<compile_context>
chip_gen: v5e
topology: v5e:2x2
jax: 0.10.0
libtpu: 0.0.40
codegen_flags: <defaults>
</compile_context>

<pallas_src>
import functools
import math

import jax
import jax.numpy as jnp
from jax.experimental import pallas as pl
from jax.experimental.pallas import tpu as pltpu

# ----------------------------------------------------------------------------
# Constants
# ----------------------------------------------------------------------------
_VMEM_LIMIT = 32 * 1024 * 1024      # 32 MiB: safe on v5e/v6e/v7x

# 84x84 net: conv(8,4)->20, conv(4,2)->9, conv(3,1)->7  => 64*7*7 = 3136
N_FLAT = 64 * 7 * 7                 # 3136
TK = 1664                           # K tile (13*128), 2 reduction steps
K_PAD = 2 * TK                      # 3328 (zero padded, lane aligned)
HID = 512                           # hidden width per branch (val / adv)

_CONV_LAYOUT = (("conv1", 8, 4), ("conv2", 4, 2), ("conv3", 3, 1))


def _cparams(dim_sems):
    return pltpu.CompilerParams(dimension_semantics=dim_sems,
                                vmem_limit_bytes=_VMEM_LIMIT)


def _round_up(x, m):
    return ((x + m - 1) // m) * m


# ----------------------------------------------------------------------------
# Conv-as-matmul kernel (im2col patches @ weight + bias, ReLU)
# ----------------------------------------------------------------------------
def _conv_matmul_kernel(x_ref, w_ref, b_ref, o_ref):
    acc = jnp.dot(x_ref[...], w_ref[...], preferred_element_type=jnp.float32)
    o_ref[...] = jnp.maximum(acc + b_ref[...], 0.0).astype(o_ref.dtype)


def _conv_tiling(m):
    """(tile_m, padded_m).  Small M -> one block (no grid-loop overhead on
    single-TC v5e/v6e); large M -> 512-row tiles on a 'parallel' axis."""
    if m <= 1024:
        tm = _round_up(m, 8)
        return tm, tm
    tm = 512
    return tm, _round_up(m, tm)


def conv_matmul_relu(x, w, b):
    M, K = x.shape
    Kw, N = w.shape
    assert K == Kw and b.shape == (1, N)
    tm, Mp = _conv_tiling(M)
    if Mp != M:
        x = jnp.pad(x, ((0, Mp - M), (0, 0)))      # zero rows: harmless in matmul
    y = pl.pallas_call(
        _conv_matmul_kernel,
        grid=(Mp // tm,),
        in_specs=[
            pl.BlockSpec((tm, K), lambda i: (i, 0)),   # patch tile (streams)
            pl.BlockSpec((K, N), lambda i: (0, 0)),    # weight (VMEM resident)
            pl.BlockSpec((1, N), lambda i: (0, 0)),    # bias (VMEM resident)
        ],
        out_specs=pl.BlockSpec((tm, N), lambda i: (i, 0)),
        out_shape=jax.ShapeDtypeStruct((Mp, N), jnp.float32),
        compiler_params=_cparams(("parallel",)),
    )(x, w, b)
    return y[:M] if Mp != M else y


# ----------------------------------------------------------------------------
# Fused dueling-head kernels.
#
# Grid = (hidden_splits, nk):
#   h ("parallel"): splits the 2H=1024 hidden columns (val half / adv half);
#                   on v7x each TensorCore streams a disjoint weight-column half.
#   k ("arbitrary"): K reduction over the padded 3328 feature dim, TK per step,
#                   accumulated into an f32 VMEM scratch.
# On the last k step: hidden = relu(acc + b1) and the block-diagonal second-layer
# matmul produce a per-half partial head row; the tiny sum + v+a-mean(a) combine
# is done as a cheap JAX epilogue.
# ----------------------------------------------------------------------------
def _head_single_kernel(feat_ref, w1_ref, b1_ref, wh_ref, o_ref, acc_ref):
    """Single weight stream: eval (mu-only) or training with precomposed weights."""
    k = pl.program_id(1)

    @pl.when(k == 0)
    def _init():
        acc_ref[...] = jnp.zeros_like(acc_ref)

    acc_ref[...] += jnp.dot(feat_ref[...].astype(jnp.bfloat16), w1_ref[...],
                            preferred_element_type=jnp.float32)

    @pl.when(k == pl.num_programs(1) - 1)
    def _fin():
        hidden = jnp.maximum(acc_ref[...] + b1_ref[...], 0.0)
        o_ref[...] = jnp.dot(hidden, wh_ref[...],
                             preferred_element_type=jnp.float32).astype(o_ref.dtype)


def _head_noisy_kernel(feat_ref, w1mu_ref, w1sig_ref, eps_in_ref, eps_out_ref,
                       b1_ref, wh_ref, o_ref, acc_ref, *, n_split):
    """Dynamic noise via rank-1 epsilon: mu + sigma streams only, eps is tiny."""
    k = pl.program_id(1)

    @pl.when(k == 0)
    def _init():
        acc_ref[...] = jnp.zeros_like(acc_ref)

    f = feat_ref[...]                                   # (B, TK) f32
    f16 = f.astype(jnp.bfloat16)
    mu = w1mu_ref[...]                                  # (TK, W) bf16
    sg = w1sig_ref[...]                                 # (TK, W) bf16
    eout = eps_out_ref[...]                             # (1, W) f32

    mean_part = jnp.dot(f16, mu, preferred_element_type=jnp.float32)

    if n_split == 1:
        ein = eps_in_ref[...]                           # (2, 1, TK): [val, adv] eps_in
        fv = (f * ein[0]).astype(jnp.bfloat16)
        fa = (f * ein[1]).astype(jnp.bfloat16)
        noisy = jnp.concatenate(
            [jnp.dot(fv, sg[:, :HID], preferred_element_type=jnp.float32),
             jnp.dot(fa, sg[:, HID:], preferred_element_type=jnp.float32)],
            axis=1)
    else:
        eh = eps_in_ref[...]                            # (1, TK): this half's eps_in
        fe = (f * eh).astype(jnp.bfloat16)
        noisy = jnp.dot(fe, sg, preferred_element_type=jnp.float32)

    acc_ref[...] += mean_part + noisy * eout

    @pl.when(k == pl.num_programs(1) - 1)
    def _fin():
        hidden = jnp.maximum(acc_ref[...] + b1_ref[...], 0.0)
        o_ref[...] = jnp.dot(hidden, wh_ref[...],
                             preferred_element_type=jnp.float32).astype(o_ref.dtype)


def fused_dueling_head(feat_pad, hp, *, training, precomposed=True, hidden_splits=1):
    B, Kp = feat_pad.shape
    assert Kp == K_PAD and Kp % TK == 0
    assert hidden_splits in (1, 2)
    nk = Kp // TK
    H2 = 2 * HID
    W = H2 // hidden_splits
    NA1 = hp["wh_mu"].shape[1]          # 1 + n_actions

    feat_spec = pl.BlockSpec((B, TK), lambda h, k: (0, k))
    w1_spec = pl.BlockSpec((TK, W), lambda h, k: (k, h))
    b1_spec = pl.BlockSpec((1, W), lambda h, k: (0, h))
    wh_spec = pl.BlockSpec((W, NA1), lambda h, k: (h, 0))
    out_spec = pl.BlockSpec((None, B, NA1), lambda h, k: (h, 0, 0))
    out_shape = jax.ShapeDtypeStruct((hidden_splits, B, NA1), jnp.float32)
    scratch = [pltpu.VMEM((B, W), jnp.float32)]
    cparams = _cparams(("parallel", "arbitrary"))

    if training:
        b1, wh, bh = hp["b1_train"], hp["wh_train"], hp["bh_train"]
    else:
        b1, wh, bh = hp["b1_mu"], hp["wh_mu"], hp["bh_mu"]

    if (not training) or precomposed:
        w1 = hp["w1_comp"] if training else hp["w1_mu"]
        parts = pl.pallas_call(
            _head_single_kernel,
            grid=(hidden_splits, nk),
            in_specs=[feat_spec, w1_spec, b1_spec, wh_spec],
            out_specs=out_spec,
            out_shape=out_shape,
            scratch_shapes=scratch,
            compiler_params=cparams,
        )(feat_pad, w1, b1, wh)
    else:
        if hidden_splits == 1:
            ein_spec = pl.BlockSpec((2, 1, TK), lambda h, k: (0, 0, k))
        else:
            ein_spec = pl.BlockSpec((None, 1, TK), lambda h, k: (h, 0, k))
        eout_spec = pl.BlockSpec((1, W), lambda h, k: (0, h))
        kernel = functools.partial(_head_noisy_kernel, n_split=hidden_splits)
        parts = pl.pallas_call(
            kernel,
            grid=(hidden_splits, nk),
            in_specs=[feat_spec, w1_spec, w1_spec, ein_spec, eout_spec,
                      b1_spec, wh_spec],
            out_specs=out_spec,
            out_shape=out_shape,
            scratch_shapes=scratch,
            compiler_params=cparams,
        )(feat_pad, hp["w1_mu"], hp["w1_sigma"], hp["eps_in"], hp["eps_out"],
          b1, wh)

    # Tiny epilogue (B x (1+A)): merge hidden halves, add head bias, dueling combine.
    head = jnp.sum(parts, axis=0) + bh
    v = head[:, 0:1]
    a = head[:, 1:]
    return v + a - jnp.mean(a, axis=1, keepdims=True)


# ----------------------------------------------------------------------------
# Plain-JAX glue: im2col patch extraction (matches PyTorch NCHW conv semantics)
# ----------------------------------------------------------------------------
def im2col(x_nhwc, k, s):
    N, H, Wd, C = x_nhwc.shape
    Ho = (H - k) // s + 1
    Wo = (Wd - k) // s + 1
    ih = (jnp.arange(Ho) * s)[:, None] + jnp.arange(k)[None, :]   # (Ho, k)
    iw = (jnp.arange(Wo) * s)[:, None] + jnp.arange(k)[None, :]   # (Wo, k)
    p = x_nhwc[:, ih]                 # (N, Ho, k, W, C)
    p = p[:, :, :, iw]                # (N, Ho, k, Wo, k, C)
    p = jnp.transpose(p, (0, 1, 3, 2, 4, 5))   # (N, Ho, Wo, kh, kw, C)
    return p.reshape(N * Ho * Wo, k * k * C), Ho, Wo


# ----------------------------------------------------------------------------
# Deterministic parameter initialization (mirrors the PyTorch __init__)
# ----------------------------------------------------------------------------
def _uniform(key, shape, bound):
    return jax.random.uniform(key, shape, jnp.float32, -bound, bound)


def _scale_noise(key, size):
    x = jax.random.normal(key, (size,), jnp.float32)
    return jnp.sign(x) * jnp.sqrt(jnp.abs(x))


def init_noisy(key, in_f, out_f, sigma_init=0.017):
    k1, k2, k3, k4 = jax.random.split(key, 4)
    mu_range = 1.0 / math.sqrt(in_f)
    w_mu = _uniform(k1, (out_f, in_f), mu_range)       # PyTorch (out, in)
    b_mu = _uniform(k2, (out_f,), mu_range)
    eps_in = _scale_noise(k3, in_f)
    eps_out = _scale_noise(k4, out_f)
    # store transposed (in, out) for the x @ w kernel layout; keep factorized eps
    return {
        "w_mu": w_mu.T,
        "w_sigma": jnp.full((in_f, out_f), sigma_init, jnp.float32),
        "eps_in": eps_in,
        "eps_out": eps_out,
        "b_mu": b_mu.reshape(1, out_f),
        "b_sigma": jnp.full((1, out_f), sigma_init, jnp.float32),
        "b_eps": eps_out.reshape(1, out_f),
    }


def init_conv(key, out_c, in_c, k):
    k1, k2 = jax.random.split(key)
    fan_in = in_c * k * k
    bound = 1.0 / math.sqrt(fan_in)
    w = _uniform(k1, (out_c, in_c, k, k), bound)       # PyTorch layout
    b = _uniform(k2, (out_c,), bound)
    # (out,in,kh,kw) -> (kh,kw,in,out) -> (kh*kw*in, out): matches im2col order
    w_mat = jnp.transpose(w, (2, 3, 1, 0)).reshape(k * k * in_c, out_c)
    return w_mat, b.reshape(1, out_c)


def build_fused_head(val1, adv1, val2, adv2, n_actions, weight_dtype=jnp.bfloat16):
    """Pack the four NoisyLinear layers into the fused-head layout.

    Done once at init / reset_noise time.  Only the two big (3328, 1024)
    tensors (mu, sigma) and their precomposed sum are stored in bf16; epsilon
    stays factorized (eps_in/eps_out) so no full eps matrix ever hits HBM.
    """
    K = val1["w_mu"].shape[0]
    assert K == N_FLAT
    pad = K_PAD - K
    H2 = 2 * HID

    def padK(m):
        return jnp.pad(m, ((0, pad), (0, 0)))

    def rank1(layer):
        return layer["eps_in"][:, None] * layer["eps_out"][None, :]

    w1_mu = jnp.concatenate([val1["w_mu"], adv1["w_mu"]], axis=1)        # (K, 2H)
    w1_sig = jnp.concatenate([val1["w_sigma"], adv1["w_sigma"]], axis=1)
    w1_eps = jnp.concatenate([rank1(val1), rank1(adv1)], axis=1)
    b1_mu = jnp.concatenate([val1["b_mu"], adv1["b_mu"]], axis=1)
    b1_tr = jnp.concatenate(
        [val1["b_mu"] + val1["b_sigma"] * val1["b_eps"],
         adv1["b_mu"] + adv1["b_sigma"] * adv1["b_eps"]], axis=1)

    def blockdiag(wv, wa):
        top = jnp.concatenate([wv, jnp.zeros((HID, n_actions), jnp.float32)], axis=1)
        bot = jnp.concatenate([jnp.zeros((HID, 1), jnp.float32), wa], axis=1)
        return jnp.concatenate([top, bot], axis=0)                       # (2H, 1+A)

    wh_mu = blockdiag(val2["w_mu"], adv2["w_mu"])
    wh_tr = blockdiag(val2["w_mu"] + val2["w_sigma"] * rank1(val2),
                      adv2["w_mu"] + adv2["w_sigma"] * rank1(adv2))
    bh_mu = jnp.concatenate([val2["b_mu"], adv2["b_mu"]], axis=1)
    bh_tr = jnp.concatenate(
        [val2["b_mu"] + val2["b_sigma"] * val2["b_eps"],
         adv2["b_mu"] + adv2["b_sigma"] * adv2["b_eps"]], axis=1)

    eps_in = jnp.stack([jnp.pad(val1["eps_in"], (0, pad)),
                        jnp.pad(adv1["eps_in"], (0, pad))],
                       axis=0).reshape(2, 1, K_PAD)
    eps_out = jnp.concatenate([val1["eps_out"], adv1["eps_out"]]).reshape(1, H2)

    return {
        "w1_mu": padK(w1_mu).astype(weight_dtype),
        "w1_sigma": padK(w1_sig).astype(weight_dtype),
        "w1_comp": padK(w1_mu + w1_sig * w1_eps).astype(weight_dtype),
        "eps_in": eps_in, "eps_out": eps_out,
        "b1_mu": b1_mu, "b1_train": b1_tr,
        "wh_mu": wh_mu, "wh_train": wh_tr,
        "bh_mu": bh_mu, "bh_train": bh_tr,
    }


def init_branch(key, in_c, out_dim, sigma_init=0.017):
    ks = jax.random.split(key, 7)
    c1w, c1b = init_conv(ks[0], 32, in_c, 8)
    c2w, c2b = init_conv(ks[1], 64, 32, 4)
    c3w, c3b = init_conv(ks[2], 64, 64, 3)
    val1 = init_noisy(ks[3], N_FLAT, HID, sigma_init)
    val2 = init_noisy(ks[4], HID, 1, sigma_init)
    adv1 = init_noisy(ks[5], N_FLAT, HID, sigma_init)
    adv2 = init_noisy(ks[6], HID, out_dim, sigma_init)
    return {
        "conv1": (c1w, c1b),
        "conv2": (c2w, c2b),
        "conv3": (c3w, c3b),
        "head": build_fused_head(val1, adv1, val2, adv2, out_dim),
    }


def init_noisy_duel_net(key, input_dim, output_dim, sigma_init=0.017):
    c, h, w = input_dim
    if h != 84 or w != 84:
        raise ValueError(f"Expecting 84x84 input, got: {h}x{w}")
    online = init_branch(key, c, output_dim, sigma_init)
    # target.load_state_dict(online.state_dict()) -> identical copy
    target = jax.tree_util.tree_map(lambda a: a, online)
    return {"online": online, "target": target}


# ----------------------------------------------------------------------------
# Forward pass
# ----------------------------------------------------------------------------
def branch_forward(x_nchw, params, *, training=True, precomposed=True,
                   hidden_splits=1):
    x = jnp.transpose(x_nchw.astype(jnp.float32), (0, 2, 3, 1))   # NCHW -> NHWC
    n = x.shape[0]
    for name, k, s in _CONV_LAYOUT:
        w, b = params[name]
        patches, ho, wo = im2col(x, k, s)
        y = conv_matmul_relu(patches, w, b)                       # Pallas
        x = y.reshape(n, ho, wo, w.shape[1])
    # PyTorch nn.Flatten on NCHW flattens in (c, h, w) order
    feat = jnp.transpose(x, (0, 3, 1, 2)).reshape(n, -1)          # (N, 3136)
    feat = jnp.pad(feat, ((0, 0), (0, K_PAD - feat.shape[1])))    # (N, 3328)
    return fused_dueling_head(feat, params["head"], training=training,
                              precomposed=precomposed, hidden_splits=hidden_splits)


def noisy_duel_net_forward(x_nchw, net_params, model="online", training=True,
                           precomposed=True, hidden_splits=1):
    branch = net_params["online"] if model == "online" else net_params["target"]
    return branch_forward(x_nchw, branch, training=training,
                          precomposed=precomposed, hidden_splits=hidden_splits)


# ----------------------------------------------------------------------------
# Plain-JAX f32 reference (same packed weights, full precision) for validation
# ----------------------------------------------------------------------------
def _reference_forward(x_nchw, branch, *, training, precomposed=True):
    hi = jax.lax.Precision.HIGHEST
    x = jnp.transpose(x_nchw.astype(jnp.float32), (0, 2, 3, 1))
    n = x.shape[0]
    for name, k, s in _CONV_LAYOUT:
        w, b = branch[name]
        patches, ho, wo = im2col(x, k, s)
        y = jnp.maximum(jnp.dot(patches, w, precision=hi) + b, 0.0)
        x = y.reshape(n, ho, wo, w.shape[1])
    feat = jnp.transpose(x, (0, 3, 1, 2)).reshape(n, -1)
    feat = jnp.pad(feat, ((0, 0), (0, K_PAD - feat.shape[1])))
    hp = branch["head"]
    if not training:
        w1 = hp["w1_mu"].astype(jnp.float32)
        b1, wh, bh = hp["b1_mu"], hp["wh_mu"], hp["bh_mu"]
    else:
        b1, wh, bh = hp["b1_train"], hp["wh_train"], hp["bh_train"]
        if precomposed:
            w1 = hp["w1_comp"].astype(jnp.float32)
        else:
            ein = hp["eps_in"][:, 0, :]                      # (2, K_PAD)
            eout = hp["eps_out"][0]                          # (2H,)
            eps_full = jnp.concatenate(
                [ein[0][:, None] * eout[None, :HID],
                 ein[1][:, None] * eout[None, HID:]], axis=1)
            w1 = hp["w1_mu"].astype(jnp.float32) + \
                hp["w1_sigma"].astype(jnp.float32) * eps_full
    hidden = jnp.maximum(jnp.dot(feat, w1, precision=hi) + b1, 0.0)
    head = jnp.dot(hidden, wh, precision=hi) + bh
    v = head[:, 0:1]
    a = head[:, 1:]
    return v + a - jnp.mean(a, axis=1, keepdims=True)


# ----------------------------------------------------------------------------
if __name__ == "__main__":
    key = jax.random.PRNGKey(0)
    pkey, xkey = jax.random.split(key)

    batch, in_c, out_dim = 2, 4, 6
    params = init_noisy_duel_net(pkey, (in_c, 84, 84), out_dim, sigma_init=0.017)
    x = jax.random.normal(xkey, (batch, in_c, 84, 84), jnp.float32)

    fwd = jax.jit(noisy_duel_net_forward,
                  static_argnames=("model", "training", "precomposed",
                                   "hidden_splits"))

    q_train = fwd(x, params, model="online", training=True)              # precomposed
    q_dyn = fwd(x, params, model="online", training=True, precomposed=False)
    q_dyn2 = fwd(x, params, model="online", training=True, precomposed=False,
                 hidden_splits=2)                                        # v7x 2-TC path
    q_tgt = fwd(x, params, model="target", training=True)
    q_eval = fwd(x, params, model="online", training=False)
    jax.block_until_ready((q_train, q_dyn, q_dyn2, q_tgt, q_eval))

    for q in (q_train, q_dyn, q_dyn2, q_tgt, q_eval):
        assert q.shape == (batch, out_dim)
        assert bool(jnp.all(jnp.isfinite(q)))

    # Validate against the plain-JAX f32 reference (same bf16-stored weights).
    ref = jax.jit(_reference_forward, static_argnames=("training", "precomposed"))
    r_train = ref(x, params["online"], training=True, precomposed=True)
    r_dyn = ref(x, params["online"], training=True, precomposed=False)
    r_eval = ref(x, params["online"], training=False)
    assert bool(jnp.allclose(q_train, r_train, atol=5e-2, rtol=5e-2))
    assert bool(jnp.allclose(q_dyn, r_dyn, atol=5e-2, rtol=5e-2))
    assert bool(jnp.allclose(q_eval, r_eval, atol=5e-2, rtol=5e-2))
    # v7x hidden-split path must agree with the unsplit path.
    assert bool(jnp.allclose(q_dyn2, q_dyn, atol=1e-3, rtol=1e-3))
    # online == target at init (state_dict copy).
    assert bool(jnp.allclose(q_train, q_tgt, atol=1e-6, rtol=1e-6))

    print("KERNEL_OK")
</pallas_src>

<mosaic_0001>
module attributes {stable_mosaic.version = 11 : i64} {
  func.func @_conv_matmul_kernel(%arg0: i32, %arg1: memref<800x256xf32, #tpu.memory_space<vmem>>, %arg2: memref<256x32xf32, #tpu.memory_space<vmem>>, %arg3: memref<1x32xf32, #tpu.memory_space<vmem>>, %arg4: memref<800x32xf32, #tpu.memory_space<vmem>>) attributes {dimension_semantics = [#tpu.dimension_semantics<parallel>], iteration_bounds = array<i64: 1>, scalar_prefetch = 0 : i64, scratch_operands = 0 : i64, tpu.core_type = #tpu.core_type<tc>, window_params = [{transform_indices = @transform_0, window_bounds = array<i64: 800, 256>}, {pipeline_mode = #tpu.pipeline_mode<synchronous>, transform_indices = @transform_1, window_bounds = array<i64: 256, 32>}, {pipeline_mode = #tpu.pipeline_mode<synchronous>, transform_indices = @transform_2, window_bounds = array<i64: 1, 32>}, {transform_indices = @transform_3, window_bounds = array<i64: 800, 32>}]} {
    %c0 = arith.constant 0 : index
    %c0_0 = arith.constant 0 : index
    %0 = vector.load %arg1[%c0, %c0_0] : memref<800x256xf32, #tpu.memory_space<vmem>>, vector<800x256xf32>
    %c0_1 = arith.constant 0 : index
    %c0_2 = arith.constant 0 : index
    %1 = vector.load %arg2[%c0_1, %c0_2] : memref<256x32xf32, #tpu.memory_space<vmem>>, vector<256x32xf32>
    %cst = arith.constant dense<0.000000e+00> : vector<800x32xf32>
    %2 = tpu.matmul %0, %1, %cst {dimension_numbers = #tpu.dot_dimension_numbers<[1], [0], [0], [1], [0, 0, 1, 1], [], []>} : vector<800x256xf32>, vector<256x32xf32>, vector<800x32xf32> -> vector<800x32xf32>
    %c0_3 = arith.constant 0 : index
    %c0_4 = arith.constant 0 : index
    %3 = vector.load %arg3[%c0_3, %c0_4] : memref<1x32xf32, #tpu.memory_space<vmem>>, vector<1x32xf32>
    %4 = vector.broadcast %3 : vector<1x32xf32> to vector<800x32xf32>
    %5 = arith.addf %2, %4 : vector<800x32xf32>
    %cst_5 = arith.constant 0.000000e+00 : f32
    %6 = vector.broadcast %cst_5 : f32 to vector<800x32xf32>
    %7 = arith.maximumf %5, %6 : vector<800x32xf32>
    %c0_6 = arith.constant 0 : index
    %c0_7 = arith.constant 0 : index
    %8 = vector.load %arg4[%c0_6, %c0_7] : memref<800x32xf32, #tpu.memory_space<vmem>>, vector<800x32xf32>
    tpu.vector_store %arg4[%c0_6, %c0_7], %7 {strides = array<i32>} : memref<800x32xf32, #tpu.memory_space<vmem>>, vector<800x32xf32>,
    return
  }
  func.func @transform_0(%arg0: i32) -> (i32, i32) {
    %c0_i32 = arith.constant 0 : i32
    %c0_i32_0 = arith.constant 0 : i32
    return %arg0, %c0_i32 : i32, i32
  }
  func.func @transform_1(%arg0: i32) -> (i32, i32) {
    %c0_i32 = arith.constant 0 : i32
    %c0_i32_0 = arith.constant 0 : i32
    %c0_i32_1 = arith.constant 0 : i32
    return %c0_i32, %c0_i32_0 : i32, i32
  }
  func.func @transform_2(%arg0: i32) -> (i32, i32) {
    %c0_i32 = arith.constant 0 : i32
    %c0_i32_0 = arith.constant 0 : i32
    %c0_i32_1 = arith.constant 0 : i32
    return %c0_i32, %c0_i32_0 : i32, i32
  }
  func.func @transform_3(%arg0: i32) -> (i32, i32) {
    %c0_i32 = arith.constant 0 : i32
    %c0_i32_0 = arith.constant 0 : i32
    return %arg0, %c0_i32 : i32, i32
  }
}

module attributes {stable_mosaic.version = 11 : i64} {
  func.func @_conv_matmul_kernel(%arg0: i32, %arg1: memref<168x512xf32, #tpu.memory_space<vmem>>, %arg2: memref<512x64xf32, #tpu.memory_space<vmem>>, %arg3: memref<1x64xf32, #tpu.memory_space<vmem>>, %arg4: memref<168x64xf32, #tpu.memory_space<vmem>>) attributes {dimension_semantics = [#tpu.dimension_semantics<parallel>], iteration_bounds = array<i64: 1>, scalar_prefetch = 0 : i64, scratch_operands = 0 : i64, tpu.core_type = #tpu.core_type<tc>, window_params = [{transform_indices = @transform_0, window_bounds = array<i64: 168, 512>}, {pipeline_mode = #tpu.pipeline_mode<synchronous>, transform_indices = @transform_1, window_bounds = array<i64: 512, 64>}, {pipeline_mode = #tpu.pipeline_mode<synchronous>, transform_indices = @transform_2, window_bounds = array<i64: 1, 64>}, {transform_indices = @transform_3, window_bounds = array<i64: 168, 64>}]} {
    %c0 = arith.constant 0 : index
    %c0_0 = arith.constant 0 : index
    %0 = vector.load %arg1[%c0, %c0_0] : memref<168x512xf32, #tpu.memory_space<vmem>>, vector<168x512xf32>
    %c0_1 = arith.constant 0 : index
    %c0_2 = arith.constant 0 : index
    %1 = vector.load %arg2[%c0_1, %c0_2] : memref<512x64xf32, #tpu.memory_space<vmem>>, vector<512x64xf32>
    %cst = arith.constant dense<0.000000e+00> : vector<168x64xf32>
    %2 = tpu.matmul %0, %1, %cst {dimension_numbers = #tpu.dot_dimension_numbers<[1], [0], [0], [1], [0, 0, 1, 1], [], []>} : vector<168x512xf32>, vector<512x64xf32>, vector<168x64xf32> -> vector<168x64xf32>
    %c0_3 = arith.constant 0 : index
    %c0_4 = arith.constant 0 : index
    %3 = vector.load %arg3[%c0_3, %c0_4] : memref<1x64xf32, #tpu.memory_space<vmem>>, vector<1x64xf32>
    %4 = vector.broadcast %3 : vector<1x64xf32> to vector<168x64xf32>
    %5 = arith.addf %2, %4 : vector<168x64xf32>
    %cst_5 = arith.constant 0.000000e+00 : f32
    %6 = vector.broadcast %cst_5 : f32 to vector<168x64xf32>
    %7 = arith.maximumf %5, %6 : vector<168x64xf32>
    %c0_6 = arith.constant 0 : index
    %c0_7 = arith.constant 0 : index
    %8 = vector.load %arg4[%c0_6, %c0_7] : memref<168x64xf32, #tpu.memory_space<vmem>>, vector<168x64xf32>
    tpu.vector_store %arg4[%c0_6, %c0_7], %7 {strides = array<i32>} : memref<168x64xf32, #tpu.memory_space<vmem>>, vector<168x64xf32>,
    return
  }
  func.func @transform_0(%arg0: i32) -> (i32, i32) {
    %c0_i32 = arith.constant 0 : i32
    %c0_i32_0 = arith.constant 0 : i32
    return %arg0, %c0_i32 : i32, i32
  }
  func.func @transform_1(%arg0: i32) -> (i32, i32) {
    %c0_i32 = arith.constant 0 : i32
    %c0_i32_0 = arith.constant 0 : i32
    %c0_i32_1 = arith.constant 0 : i32
    return %c0_i32, %c0_i32_0 : i32, i32
  }
  func.func @transform_2(%arg0: i32) -> (i32, i32) {
    %c0_i32 = arith.constant 0 : i32
    %c0_i32_0 = arith.constant 0 : i32
    %c0_i32_1 = arith.constant 0 : i32
    return %c0_i32, %c0_i32_0 : i32, i32
  }
  func.func @transform_3(%arg0: i32) -> (i32, i32) {
    %c0_i32 = arith.constant 0 : i32
    %c0_i32_0 = arith.constant 0 : i32
    return %arg0, %c0_i32 : i32, i32
  }
}

module attributes {stable_mosaic.version = 11 : i64} {
  func.func @_conv_matmul_kernel(%arg0: i32, %arg1: memref<104x576xf32, #tpu.memory_space<vmem>>, %arg2: memref<576x64xf32, #tpu.memory_space<vmem>>, %arg3: memref<1x64xf32, #tpu.memory_space<vmem>>, %arg4: memref<104x64xf32, #tpu.memory_space<vmem>>) attributes {dimension_semantics = [#tpu.dimension_semantics<parallel>], iteration_bounds = array<i64: 1>, scalar_prefetch = 0 : i64, scratch_operands = 0 : i64, tpu.core_type = #tpu.core_type<tc>, window_params = [{transform_indices = @transform_0, window_bounds = array<i64: 104, 576>}, {pipeline_mode = #tpu.pipeline_mode<synchronous>, transform_indices = @transform_1, window_bounds = array<i64: 576, 64>}, {pipeline_mode = #tpu.pipeline_mode<synchronous>, transform_indices = @transform_2, window_bounds = array<i64: 1, 64>}, {transform_indices = @transform_3, window_bounds = array<i64: 104, 64>}]} {
    %c0 = arith.constant 0 : index
    %c0_0 = arith.constant 0 : index
    %0 = vector.load %arg1[%c0, %c0_0] : memref<104x576xf32, #tpu.memory_space<vmem>>, vector<104x576xf32>
    %c0_1 = arith.constant 0 : index
    %c0_2 = arith.constant 0 : index
    %1 = vector.load %arg2[%c0_1, %c0_2] : memref<576x64xf32, #tpu.memory_space<vmem>>, vector<576x64xf32>
    %cst = arith.constant dense<0.000000e+00> : vector<104x64xf32>
    %2 = tpu.matmul %0, %1, %cst {dimension_numbers = #tpu.dot_dimension_numbers<[1], [0], [0], [1], [0, 0, 1, 1], [], []>} : vector<104x576xf32>, vector<576x64xf32>, vector<104x64xf32> -> vector<104x64xf32>
    %c0_3 = arith.constant 0 : index
    %c0_4 = arith.constant 0 : index
    %3 = vector.load %arg3[%c0_3, %c0_4] : memref<1x64xf32, #tpu.memory_space<vmem>>, vector<1x64xf32>
    %4 = vector.broadcast %3 : vector<1x64xf32> to vector<104x64xf32>
    %5 = arith.addf %2, %4 : vector<104x64xf32>
    %cst_5 = arith.constant 0.000000e+00 : f32
    %6 = vector.broadcast %cst_5 : f32 to vector<104x64xf32>
    %7 = arith.maximumf %5, %6 : vector<104x64xf32>
    %c0_6 = arith.constant 0 : index
    %c0_7 = arith.constant 0 : index
    %8 = vector.load %arg4[%c0_6, %c0_7] : memref<104x64xf32, #tpu.memory_space<vmem>>, vector<104x64xf32>
    tpu.vector_store %arg4[%c0_6, %c0_7], %7 {strides = array<i32>} : memref<104x64xf32, #tpu.memory_space<vmem>>, vector<104x64xf32>,
    return
  }
  func.func @transform_0(%arg0: i32) -> (i32, i32) {
    %c0_i32 = arith.constant 0 : i32
    %c0_i32_0 = arith.constant 0 : i32
    return %arg0, %c0_i32 : i32, i32
  }
  func.func @transform_1(%arg0: i32) -> (i32, i32) {
    %c0_i32 = arith.constant 0 : i32
    %c0_i32_0 = arith.constant 0 : i32
    %c0_i32_1 = arith.constant 0 : i32
    return %c0_i32, %c0_i32_0 : i32, i32
  }
  func.func @transform_2(%arg0: i32) -> (i32, i32) {
    %c0_i32 = arith.constant 0 : i32
    %c0_i32_0 = arith.constant 0 : i32
    %c0_i32_1 = arith.constant 0 : i32
    return %c0_i32, %c0_i32_0 : i32, i32
  }
  func.func @transform_3(%arg0: i32) -> (i32, i32) {
    %c0_i32 = arith.constant 0 : i32
    %c0_i32_0 = arith.constant 0 : i32
    return %arg0, %c0_i32 : i32, i32
  }
}

module attributes {stable_mosaic.version = 11 : i64} {
  func.func @_head_single_kernel(%arg0: i32, %arg1: i32, %arg2: memref<2x1664xf32, #tpu.memory_space<vmem>>, %arg3: memref<1664x1024xbf16, #tpu.memory_space<vmem>>, %arg4: memref<1x1024xf32, #tpu.memory_space<vmem>>, %arg5: memref<1024x7xf32, #tpu.memory_space<vmem>>, %arg6: memref<1x2x7xf32, #tpu.memory_space<vmem>>, %arg7: memref<2x1024xf32, #tpu.memory_space<vmem>>) attributes {dimension_semantics = [#tpu.dimension_semantics<parallel>, #tpu.dimension_semantics<arbitrary>], iteration_bounds = array<i64: 1, 2>, scalar_prefetch = 0 : i64, scratch_operands = 1 : i64, tpu.core_type = #tpu.core_type<tc>, window_params = [{transform_indices = @transform_0, window_bounds = array<i64: 2, 1664>}, {transform_indices = @transform_1, window_bounds = array<i64: 1664, 1024>}, {transform_indices = @transform_2, window_bounds = array<i64: 1, 1024>}, {transform_indices = @transform_3, window_bounds = array<i64: 1024, 7>}, {transform_indices = @transform_4, window_bounds = array<i64: 1, 2, 7>}]} {
    %c0_i32 = arith.constant 0 : i32
    %0 = arith.cmpi eq, %arg1, %c0_i32 : i32
    %1 = arith.extui %0 : i1 to i32
    %c0_i32_0 = arith.constant 0 : i32
    %2 = arith.cmpi ne, %1, %c0_i32_0 : i32
    scf.if %2 {
      %cst_9 = arith.constant 0.000000e+00 : f32
      %13 = vector.broadcast %cst_9 : f32 to vector<2x1024xf32>
      %c0_10 = arith.constant 0 : index
      %c0_11 = arith.constant 0 : index
      %14 = vector.load %arg7[%c0_10, %c0_11] : memref<2x1024xf32, #tpu.memory_space<vmem>>, vector<2x1024xf32>
      tpu.vector_store %arg7[%c0_10, %c0_11], %13 {strides = array<i32>} : memref<2x1024xf32, #tpu.memory_space<vmem>>, vector<2x1024xf32>,
    } else {
    }
    %c0 = arith.constant 0 : index
    %c0_1 = arith.constant 0 : index
    %3 = vector.load %arg7[%c0, %c0_1] : memref<2x1024xf32, #tpu.memory_space<vmem>>, vector<2x1024xf32>
    %c0_2 = arith.constant 0 : index
    %c0_3 = arith.constant 0 : index
    %4 = vector.load %arg2[%c0_2, %c0_3] : memref<2x1664xf32, #tpu.memory_space<vmem>>, vector<2x1664xf32>
    %5 = arith.truncf %4 : vector<2x1664xf32> to vector<2x1664xbf16>
    %c0_4 = arith.constant 0 : index
    %c0_5 = arith.constant 0 : index
    %6 = vector.load %arg3[%c0_4, %c0_5] : memref<1664x1024xbf16, #tpu.memory_space<vmem>>, vector<1664x1024xbf16>
    %cst = arith.constant dense<0.000000e+00> : vector<2x1024xf32>
    %7 = tpu.matmul %5, %6, %cst {dimension_numbers = #tpu.dot_dimension_numbers<[1], [0], [0], [1], [0, 0, 1, 1], [], []>} : vector<2x1664xbf16>, vector<1664x1024xbf16>, vector<2x1024xf32> -> vector<2x1024xf32>
    %8 = arith.addf %3, %7 : vector<2x1024xf32>
    %c0_6 = arith.constant 0 : index
    %c0_7 = arith.constant 0 : index
    %9 = vector.load %arg7[%c0_6, %c0_7] : memref<2x1024xf32, #tpu.memory_space<vmem>>, vector<2x1024xf32>
    tpu.vector_store %arg7[%c0_6, %c0_7], %8 {strides = array<i32>} : memref<2x1024xf32, #tpu.memory_space<vmem>>, vector<2x1024xf32>,
    %c1_i32 = arith.constant 1 : i32
    %10 = arith.cmpi eq, %arg1, %c1_i32 : i32
    %11 = arith.extui %10 : i1 to i32
    %c0_i32_8 = arith.constant 0 : i32
    %12 = arith.cmpi ne, %11, %c0_i32_8 : i32
    scf.if %12 {
      %c0_9 = arith.constant 0 : index
      %c0_10 = arith.constant 0 : index
      %13 = vector.load %arg7[%c0_9, %c0_10] : memref<2x1024xf32, #tpu.memory_space<vmem>>, vector<2x1024xf32>
      %c0_11 = arith.constant 0 : index
      %c0_12 = arith.constant 0 : index
      %14 = vector.load %arg4[%c0_11, %c0_12] : memref<1x1024xf32, #tpu.memory_space<vmem>>, vector<1x1024xf32>
      %15 = vector.broadcast %14 : vector<1x1024xf32> to vector<2x1024xf32>
      %16 = arith.addf %13, %15 : vector<2x1024xf32>
      %cst_13 = arith.constant 0.000000e+00 : f32
      %17 = vector.broadcast %cst_13 : f32 to vector<2x1024xf32>
      %18 = arith.maximumf %16, %17 : vector<2x1024xf32>
      %c0_14 = arith.constant 0 : index
      %c0_15 = arith.constant 0 : index
      %19 = vector.load %arg5[%c0_14, %c0_15] : memref<1024x7xf32, #tpu.memory_space<vmem>>, vector<1024x7xf32>
      %cst_16 = arith.constant dense<0.000000e+00> : vector<2x7xf32>
      %20 = tpu.matmul %18, %19, %cst_16 {dimension_numbers = #tpu.dot_dimension_numbers<[1], [0], [0], [1], [0, 0, 1, 1], [], []>} : vector<2x1024xf32>, vector<1024x7xf32>, vector<2x7xf32> -> vector<2x7xf32>
      %c0_17 = arith.constant 0 : index
      %c0_18 = arith.constant 0 : index
      %c0_19 = arith.constant 0 : index
      %21 = vector.load %arg6[%c0_17, %c0_18, %c0_19] : memref<1x2x7xf32, #tpu.memory_space<vmem>>, vector<1x2x7xf32>
      %22 = vector.shape_cast %21 : vector<1x2x7xf32> to vector<2x7xf32>
      %23 = vector.shape_cast %20 : vector<2x7xf32> to vector<1x2x7xf32>
      tpu.vector_store %arg6[%c0_17, %c0_18, %c0_19], %23 {strides = array<i32>} : memref<1x2x7xf32, #tpu.memory_space<vmem>>, vector<1x2x7xf32>,
    } else {
    }
    return
  }
  func.func @transform_0(%arg0: i32, %arg1: i32) -> (i32, i32) {
    %c0_i32 = arith.constant 0 : i32
    %c0_i32_0 = arith.constant 0 : i32
    return %c0_i32, %arg1 : i32, i32
  }
  func.func @transform_1(%arg0: i32, %arg1: i32) -> (i32, i32) {
    %c0_i32 = arith.constant 0 : i32
    return %arg1, %arg0 : i32, i32
  }
  func.func @transform_2(%arg0: i32, %arg1: i32) -> (i32, i32) {
    %c0_i32 = arith.constant 0 : i32
    %c0_i32_0 = arith.constant 0 : i32
    return %c0_i32, %arg0 : i32, i32
  }
  func.func @transform_3(%arg0: i32, %arg1: i32) -> (i32, i32) {
    %c0_i32 = arith.constant 0 : i32
    %c0_i32_0 = arith.constant 0 : i32
    return %arg0, %c0_i32 : i32, i32
  }
  func.func @transform_4(%arg0: i32, %arg1: i32) -> (i32, i32, i32) {
    %c0_i32 = arith.constant 0 : i32
    %c0_i32_0 = arith.constant 0 : i32
    %c0_i32_1 = arith.constant 0 : i32
    return %arg0, %c0_i32, %c0_i32_0 : i32, i32, i32
  }
}

</mosaic_0001>

<bundles_post_ra>
// kernel: noisy_duel_net_forward.4
= control target key start
LH: loop header
LB: loop body
LE: loop exit
PB: predicated region body
PF: predicated region fallthrough
CT: control target
= control target key end

     0   :  { %vm984_vm0 = vcmask 261120   ;;  %s2349_s1 = inlined_call_operand.vmem [shape: f32[256,32], index: 1, kind: input, shape index: {}]   ;;  %s2350_s0 = inlined_call_operand.vmem [shape: f32[800,256], index: 0, kind: input, shape index: {}]   ;;  %s2351_s2 = inlined_call_operand.vmem [shape: f32[1,32], index: 2, kind: input, shape index: {}]   ;;  %s2352_s3 = inlined_call_operand.vmem [shape: f32[800,32], index: 3, kind: output, shape index: {}]  }
   0x1   :  { %v229_v0 = vld [vmem:[%s2349_s1 + $0x78] sm:$0xff]  ;;  %v228_v1 = vld [vmem:[%s2349_s1 + $0x70] sm:$0xff]  ;;  %v227_v4 = vld [vmem:[%s2349_s1 + $0x68] sm:$0xff] }
   0x2   :  { %v245_v2 = vld [vmem:[%s2349_s1 + $0xf8] sm:$0xff]  ;;  %1089 = vmatpush.msra.mxu2 %v229_v0  ;;  %v244_v3 = vld [vmem:[%s2349_s1 + $0xf0] sm:$0xff]  ;;  %250 = vmatpush.msra.mxu0 %v229_v0  ;;  %v243_v5 = vld [vmem:[%s2349_s1 + $0xe8] sm:$0xff] }
   0x3   :  { %1105 = vmatpush.msra.mxu3 %v245_v2  ;;  %567 = vmatpush.msra.mxu1 %v245_v2  ;;  %v226_v6 = vld [vmem:[%s2349_s1 + $0x60] sm:$0xff]  ;;  %v225_v8 = vld [vmem:[%s2349_s1 + $0x58] sm:$0xff]  ;;  %v224_v10 = vld [vmem:[%s2349_s1 + $0x50] sm:$0xff] }
   0x4   :  { %1090 = vmatpush.msra.mxu2 %v228_v1  ;;  %251 = vmatpush.msra.mxu0 %v228_v1  ;;  %v242_v7 = vld [vmem:[%s2349_s1 + $0xe0] sm:$0xff]  ;;  %v241_v9 = vld [vmem:[%s2349_s1 + $0xd8] sm:$0xff]  ;;  %v240_v11 = vld [vmem:[%s2349_s1 + $0xd0] sm:$0xff] }
   0x5   :  { %1106 = vmatpush.msra.mxu3 %v244_v3  ;;  %568 = vmatpush.msra.mxu1 %v244_v3  ;;  %v223_v12 = vld [vmem:[%s2349_s1 + $0x48] sm:$0xff]  ;;  %v222_v14 = vld [vmem:[%s2349_s1 + $0x40] sm:$0xff]  ;;  %v221_v16 = vld [vmem:[%s2349_s1 + $0x38] sm:$0xff] }
   0x6   :  { %1091 = vmatpush.msra.mxu2 %v227_v4  ;;  %252 = vmatpush.msra.mxu0 %v227_v4  ;;  %v239_v13 = vld [vmem:[%s2349_s1 + $0xc8] sm:$0xff]  ;;  %v238_v15 = vld [vmem:[%s2349_s1 + $0xc0] sm:$0xff]  ;;  %v237_v17 = vld [vmem:[%s2349_s1 + $0xb8] sm:$0xff] }
   0x7   :  { %1107 = vmatpush.msra.mxu3 %v243_v5  ;;  %569 = vmatpush.msra.mxu1 %v243_v5  ;;  %v220_v18 = vld [vmem:[%s2349_s1 + $0x30] sm:$0xff]  ;;  %v219_v20 = vld [vmem:[%s2349_s1 + $0x28] sm:$0xff]  ;;  %v218_v22 = vld [vmem:[%s2349_s1 + $0x20] sm:$0xff] }
   0x8   :  { %1092 = vmatpush.msra.mxu2 %v226_v6  ;;  %253 = vmatpush.msra.mxu0 %v226_v6  ;;  %v236_v19 = vld [vmem:[%s2349_s1 + $0xb0] sm:$0xff]  ;;  %v235_v21 = vld [vmem:[%s2349_s1 + $0xa8] sm:$0xff]  ;;  %v234_v23 = vld [vmem:[%s2349_s1 + $0xa0] sm:$0xff] }
   0x9   :  { %1108 = vmatpush.msra.mxu3 %v242_v7  ;;  %570 = vmatpush.msra.mxu1 %v242_v7  ;;  %v217_v24 = vld [vmem:[%s2349_s1 + $0x18] sm:$0xff]  ;;  %v216_v26 = vld [vmem:[%s2349_s1 + $0x10] sm:$0xff]  ;;  %v215_v28 = vld [vmem:[%s2349_s1 + $0x8] sm:$0xff] }
   0xa   :  { %1093 = vmatpush.msra.mxu2 %v225_v8  ;;  %254 = vmatpush.msra.mxu0 %v225_v8  ;;  %v233_v25 = vld [vmem:[%s2349_s1 + $0x98] sm:$0xff]  ;;  %v232_v27 = vld [vmem:[%s2349_s1 + $0x90] sm:$0xff]  ;;  %v231_v29 = vld [vmem:[%s2349_s1 + $0x88] sm:$0xff] }
   0xb   :  { %1109 = vmatpush.msra.mxu3 %v241_v9  ;;  %571 = vmatpush.msra.mxu1 %v241_v9  ;;  %v214_v30 = vld [vmem:[%s2349_s1] sm:$0xff]  ;;  %v115_v33 = vld [vmem:[%s2350_s0 + $0x328] sm:$0xff]  ;;  %v116_v36 = vld [vmem:[%s2350_s0 + $0x330] sm:$0xff] }
   0xc   :  { %1094 = vmatpush.msra.mxu2 %v224_v10  ;;  %255 = vmatpush.msra.mxu0 %v224_v10  ;;  %v230_v31 = vld [vmem:[%s2349_s1 + $0x80] sm:$0xff]  ;;  %v15_v35 = vld [vmem:[%s2350_s0 + $0x8] sm:$0xff]  ;;  %v117_v37 = vld [vmem:[%s2350_s0 + $0x338] sm:$0xff] }
   0xd   :  { %1110 = vmatpush.msra.mxu3 %v240_v11  ;;  %572 = vmatpush.msra.mxu1 %v240_v11  ;;  %v114_v32 = vld [vmem:[%s2350_s0 + $0x320] sm:$0xff]  ;;  %v16_v38 = vld [vmem:[%s2350_s0 + $0x10] sm:$0xff]  ;;  %v17_v39 = vld [vmem:[%s2350_s0 + $0x18] sm:$0xff] }
   0xe   :  { %1095 = vmatpush.msra.mxu2 %v223_v12  ;;  %256 = vmatpush.msra.mxu0 %v223_v12  ;;  %v14_v34 = vld [vmem:[%s2350_s0] sm:$0xff]  ;;  %v119_v41 = vld [vmem:[%s2350_s0 + $0x348] sm:$0xff]  ;;  %v120_v44 = vld [vmem:[%s2350_s0 + $0x350] sm:$0xff] }
   0xf   :  { %1111 = vmatpush.msra.mxu3 %v239_v13  ;;  %573 = vmatpush.msra.mxu1 %v239_v13  ;;  %v118_v40 = vld [vmem:[%s2350_s0 + $0x340] sm:$0xff]  ;;  %v19_v43 = vld [vmem:[%s2350_s0 + $0x28] sm:$0xff]  ;;  %v121_v45 = vld [vmem:[%s2350_s0 + $0x358] sm:$0xff] }
  0x10   :  { %1096 = vmatpush.msra.mxu2 %v222_v14  ;;  %257 = vmatpush.msra.mxu0 %v222_v14  ;;  %v18_v42 = vld [vmem:[%s2350_s0 + $0x20] sm:$0xff]  ;;  %v20_v46 = vld [vmem:[%s2350_s0 + $0x30] sm:$0xff]  ;;  %v21_v47 = vld [vmem:[%s2350_s0 + $0x38] sm:$0xff] }
  0x11   :  { %1112 = vmatpush.msra.mxu3 %v238_v15  ;;  %574 = vmatpush.msra.mxu1 %v238_v15  ;;  %v122_v48 = vld [vmem:[%s2350_s0 + $0x360] sm:$0xff]  ;;  %v123_v49 = vld [vmem:[%s2350_s0 + $0x368] sm:$0xff]  ;;  %v124_v52 = vld [vmem:[%s2350_s0 + $0x370] sm:$0xff] }
  0x12   :  { %1097 = vmatpush.msra.mxu2 %v221_v16  ;;  %258 = vmatpush.msra.mxu0 %v221_v16  ;;  %v22_v50 = vld [vmem:[%s2350_s0 + $0x40] sm:$0xff]  ;;  %v23_v51 = vld [vmem:[%s2350_s0 + $0x48] sm:$0xff]  ;;  %v125_v53 = vld [vmem:[%s2350_s0 + $0x378] sm:$0xff] }
  0x13   :  { %1113 = vmatpush.msra.mxu3 %v237_v17  ;;  %575 = vmatpush.msra.mxu1 %v237_v17  ;;  %v24_v54 = vld [vmem:[%s2350_s0 + $0x50] sm:$0xff]  ;;  %v25_v55 = vld [vmem:[%s2350_s0 + $0x58] sm:$0xff]  ;;  %v126_v56 = vld [vmem:[%s2350_s0 + $0x380] sm:$0xff] }
  0x14   :  { %1098 = vmatpush.msra.mxu2 %v220_v18  ;;  %259 = vmatpush.msra.mxu0 %v220_v18  ;;  %v127_v57 = vld [vmem:[%s2350_s0 + $0x388] sm:$0xff]  ;;  %v26_v58 = vld [vmem:[%s2350_s0 + $0x60] sm:$0xff]  ;;  %v128_v60 = vld [vmem:[%s2350_s0 + $0x390] sm:$0xff] }
  0x15   :  { %1114 = vmatpush.msra.mxu3 %v236_v19  ;;  %576 = vmatpush.msra.mxu1 %v236_v19  ;;  %v27_v59 = vld [vmem:[%s2350_s0 + $0x68] sm:$0xff]  ;;  %v129_v61 = vld [vmem:[%s2350_s0 + $0x398] sm:$0xff]  ;;  %v28_v62 = vld [vmem:[%s2350_s0 + $0x70] sm:$0xff] }
  0x16   :  { %1099 = vmatpush.msra.mxu2 %v219_v20  ;;  %260 = vmatpush.msra.mxu0 %v219_v20  ;;  %v29_v63 = vld [vmem:[%s2350_s0 + $0x78] sm:$0xff]  ;;  %v130_v0 = vld [vmem:[%s2350_s0 + $0x3a0] sm:$0xff]  ;;  %v131_v1 = vld [vmem:[%s2350_s0 + $0x3a8] sm:$0xff] }
  0x17   :  { %1115 = vmatpush.msra.mxu3 %v235_v21  ;;  %577 = vmatpush.msra.mxu1 %v235_v21  ;;  %v30_v2 = vld [vmem:[%s2350_s0 + $0x80] sm:$0xff]  ;;  %v31_v3 = vld [vmem:[%s2350_s0 + $0x88] sm:$0xff]  ;;  %v132_v4 = vld [vmem:[%s2350_s0 + $0x3b0] sm:$0xff] }
  0x18   :  { %1100 = vmatpush.msra.mxu2 %v218_v22  ;;  %261 = vmatpush.msra.mxu0 %v218_v22  ;;  %v133_v5 = vld [vmem:[%s2350_s0 + $0x3b8] sm:$0xff]  ;;  %v32_v6 = vld [vmem:[%s2350_s0 + $0x90] sm:$0xff]  ;;  %v134_v8 = vld [vmem:[%s2350_s0 + $0x3c0] sm:$0xff] }
  0x19   :  { %1116 = vmatpush.msra.mxu3 %v234_v23  ;;  %578 = vmatpush.msra.mxu1 %v234_v23  ;;  %v33_v7 = vld [vmem:[%s2350_s0 + $0x98] sm:$0xff]  ;;  %v135_v9 = vld [vmem:[%s2350_s0 + $0x3c8] sm:$0xff]  ;;  %v34_v10 = vld [vmem:[%s2350_s0 + $0xa0] sm:$0xff] }
  0x1a   :  { %1101 = vmatpush.msra.mxu2 %v217_v24  ;;  %262 = vmatpush.msra.mxu0 %v217_v24  ;;  %v35_v11 = vld [vmem:[%s2350_s0 + $0xa8] sm:$0xff]  ;;  %v136_v12 = vld [vmem:[%s2350_s0 + $0x3d0] sm:$0xff]  ;;  %v137_v13 = vld [vmem:[%s2350_s0 + $0x3d8] sm:$0xff] }
  0x1b   :  { %1117 = vmatpush.msra.mxu3 %v233_v25  ;;  %579 = vmatpush.msra.mxu1 %v233_v25  ;;  %v36_v14 = vld [vmem:[%s2350_s0 + $0xb0] sm:$0xff]  ;;  %v37_v15 = vld [vmem:[%s2350_s0 + $0xb8] sm:$0xff]  ;;  %v138_v16 = vld [vmem:[%s2350_s0 + $0x3e0] sm:$0xff] }
  0x1c   :  { %1102 = vmatpush.msra.mxu2 %v216_v26  ;;  %263 = vmatpush.msra.mxu0 %v216_v26  ;;  %v139_v17 = vld [vmem:[%s2350_s0 + $0x3e8] sm:$0xff]  ;;  %v38_v18 = vld [vmem:[%s2350_s0 + $0xc0] sm:$0xff]  ;;  %v140_v20 = vld [vmem:[%s2350_s0 + $0x3f0] sm:$0xff] }
  0x1d   :  { %1118 = vmatpush.msra.mxu3 %v232_v27  ;;  %580 = vmatpush.msra.mxu1 %v232_v27  ;;  %v39_v19 = vld [vmem:[%s2350_s0 + $0xc8] sm:$0xff]  ;;  %v141_v21 = vld [vmem:[%s2350_s0 + $0x3f8] sm:$0xff]  ;;  %v40_v22 = vld [vmem:[%s2350_s0 + $0xd0] sm:$0xff] }
  0x1e   :  { %1103 = vmatpush.msra.mxu2 %v215_v28  ;;  %264 = vmatpush.msra.mxu0 %v215_v28  ;;  %v41_v23 = vld [vmem:[%s2350_s0 + $0xd8] sm:$0xff]  ;;  %v142_v24 = vld [vmem:[%s2350_s0 + $0x400] sm:$0xff]  ;;  %v143_v25 = vld [vmem:[%s2350_s0 + $0x408] sm:$0xff] }
  0x1f   :  { %1119 = vmatpush.msra.mxu3 %v231_v29  ;;  %581 = vmatpush.msra.mxu1 %v231_v29  ;;  %v42_v26 = vld [vmem:[%s2350_s0 + $0xe0] sm:$0xff]  ;;  %v43_v27 = vld [vmem:[%s2350_s0 + $0xe8] sm:$0xff]  ;;  %v144_v28 = vld [vmem:[%s2350_s0 + $0x410] sm:$0xff] }
  0x20   :  { %1104 = vmatpush.msra.mxu2 %v214_v30  ;;  %265 = vmatpush.msra.mxu0 %v214_v30  ;;  %v145_v29 = vld [vmem:[%s2350_s0 + $0x418] sm:$0xff]  ;;  %v44_v30 = vld [vmem:[%s2350_s0 + $0xf0] sm:$0xff] }
  0x21   :  { %1120 = vmatpush.msra.mxu3 %v230_v31  ;;  %416 = vmatmul.f32.vlgmr.msra.gmra.mxu2 %v114_v32  ;;  %v1434_v32 = vld [vmem:[%s2351_s2] ss:$0 sm:$0xff] }
  0x22   :  { %733 = vmatmul.f32.vlgmr.msra.gmra.mxu3 %v115_v33  ;;  %582 = vmatpush.msra.mxu1 %v230_v31  ;;  %v45_v31 = vld [vmem:[%s2350_s0 + $0xf8] sm:$0xff]  ;;  %v146_v33 = vld [vmem:[%s2350_s0 + $0x420] sm:$0xff] }
  0x23   :  { %266 = vmatmul.f32.vlgmr.msra.gmra.mxu0 %v14_v34  ;;  %583 = vmatmul.f32.vlgmr.msra.gmra.mxu1 %v15_v35  ;;  %v147_v34 = vld [vmem:[%s2350_s0 + $0x428] sm:$0xff] }
  0x29   :  { %419 = vmatmul.f32.gmra.mxu2 %v116_v36 }
  0x2a   :  { %736 = vmatmul.f32.gmra.mxu3 %v117_v37  ;;  %v46_v37 = vld [vmem:[%s2350_s0 + $0x100] sm:$0xff] }
  0x2b   :  { %269 = vmatmul.f32.gmra.mxu0 %v16_v38  ;;  %586 = vmatmul.f32.gmra.mxu1 %v17_v39  ;;  %v47_v38 = vld [vmem:[%s2350_s0 + $0x108] sm:$0xff] }
  0x31   :  { %422 = vmatmul.f32.gmra.mxu2 %v118_v40 }
  0x32   :  { %739 = vmatmul.f32.gmra.mxu3 %v119_v41 }
  0x33   :  { %272 = vmatmul.f32.gmra.mxu0 %v18_v42  ;;  %589 = vmatmul.f32.gmra.mxu1 %v19_v43 }
  0x39   :  { %425 = vmatmul.f32.gmra.mxu2 %v120_v44 }
  0x3a   :  { %742 = vmatmul.f32.gmra.mxu3 %v121_v45  ;;  %v148_v45 = vld [vmem:[%s2350_s0 + $0x430] sm:$0xff] }
  0x3b   :  { %275 = vmatmul.f32.gmra.mxu0 %v20_v46  ;;  %592 = vmatmul.f32.gmra.mxu1 %v21_v47  ;;  %v149_v46 = vld [vmem:[%s2350_s0 + $0x438] sm:$0xff] }
  0x41   :  { %428 = vmatmul.f32.gmra.mxu2 %v122_v48 }
  0x42   :  { %745 = vmatmul.f32.gmra.mxu3 %v123_v49 }
  0x43   :  { %278 = vmatmul.f32.gmra.mxu0 %v22_v50  ;;  %595 = vmatmul.f32.gmra.mxu1 %v23_v51  ;;  %v48_v50 = vld [vmem:[%s2350_s0 + $0x110] sm:$0xff]  ;;  %v49_v51 = vld [vmem:[%s2350_s0 + $0x118] sm:$0xff] }
  0x49   :  { %431 = vmatmul.f32.gmra.mxu2 %v124_v52 }
  0x4a   :  { %748 = vmatmul.f32.gmra.mxu3 %v125_v53 }
  0x4b   :  { %281 = vmatmul.f32.gmra.mxu0 %v24_v54  ;;  %598 = vmatmul.f32.gmra.mxu1 %v25_v55 }
  0x51   :  { %434 = vmatmul.f32.gmra.mxu2 %v126_v56 }
  0x52   :  { %751 = vmatmul.f32.gmra.mxu3 %v127_v57 }
  0x53   :  { %284 = vmatmul.f32.gmra.mxu0 %v26_v58  ;;  %601 = vmatmul.f32.gmra.mxu1 %v27_v59  ;;  %v150_v59 = vld [vmem:[%s2350_s0 + $0x440] sm:$0xff] }
  0x59   :  { %437 = vmatmul.f32.gmra.mxu2 %v128_v60  ;;  %v151_v60 = vld [vmem:[%s2350_s0 + $0x448] sm:$0xff] }
  0x5a   :  { %754 = vmatmul.f32.gmra.mxu3 %v129_v61 }
  0x5b   :  { %287 = vmatmul.f32.gmra.mxu0 %v28_v62  ;;  %604 = vmatmul.f32.gmra.mxu1 %v29_v63 }
  0x61   :  { %440 = vmatmul.f32.gmra.mxu2 %v130_v0  ;;  %v50_v0 = vld [vmem:[%s2350_s0 + $0x120] sm:$0xff] }
  0x62   :  { %757 = vmatmul.f32.gmra.mxu3 %v131_v1  ;;  %v51_v1 = vld [vmem:[%s2350_s0 + $0x128] sm:$0xff] }
  0x63   :  { %290 = vmatmul.f32.gmra.mxu0 %v30_v2  ;;  %607 = vmatmul.f32.gmra.mxu1 %v31_v3 }
  0x69   :  { %443 = vmatmul.f32.gmra.mxu2 %v132_v4 }
  0x6a   :  { %760 = vmatmul.f32.gmra.mxu3 %v133_v5 }
  0x6b   :  { %293 = vmatmul.f32.gmra.mxu0 %v32_v6  ;;  %610 = vmatmul.f32.gmra.mxu1 %v33_v7 }
  0x71   :  { %446 = vmatmul.f32.gmra.mxu2 %v134_v8 }
  0x72   :  { %763 = vmatmul.f32.gmra.mxu3 %v135_v9  ;;  %v152_v9 = vld [vmem:[%s2350_s0 + $0x450] sm:$0xff] }
  0x73   :  { %296 = vmatmul.f32.gmra.mxu0 %v34_v10  ;;  %613 = vmatmul.f32.gmra.mxu1 %v35_v11  ;;  %v153_v10 = vld [vmem:[%s2350_s0 + $0x458] sm:$0xff] }
  0x79   :  { %449 = vmatmul.f32.gmra.mxu2 %v136_v12 }
  0x7a   :  { %766 = vmatmul.f32.gmra.mxu3 %v137_v13 }
  0x7b   :  { %299 = vmatmul.f32.gmra.mxu0 %v36_v14  ;;  %616 = vmatmul.f32.gmra.mxu1 %v37_v15  ;;  %v52_v14 = vld [vmem:[%s2350_s0 + $0x130] sm:$0xff]  ;;  %v53_v15 = vld [vmem:[%s2350_s0 + $0x138] sm:$0xff] }
  0x81   :  { %452 = vmatmul.f32.gmra.mxu2 %v138_v16 }
  0x82   :  { %769 = vmatmul.f32.gmra.mxu3 %v139_v17 }
  0x83   :  { %302 = vmatmul.f32.gmra.mxu0 %v38_v18  ;;  %619 = vmatmul.f32.gmra.mxu1 %v39_v19 }
  0x89   :  { %455 = vmatmul.f32.gmra.mxu2 %v140_v20 }
  0x8a   :  { %772 = vmatmul.f32.gmra.mxu3 %v141_v21 }
  0x8b   :  { %305 = vmatmul.f32.gmra.mxu0 %v40_v22  ;;  %622 = vmatmul.f32.gmra.mxu1 %v41_v23  ;;  %v154_v23 = vld [vmem:[%s2350_s0 + $0x460] sm:$0xff] }
  0x91   :  { %458 = vmatmul.f32.gmra.mxu2 %v142_v24  ;;  %v155_v24 = vld [vmem:[%s2350_s0 + $0x468] sm:$0xff] }
  0x92   :  { %775 = vmatmul.f32.gmra.mxu3 %v143_v25 }
  0x93   :  { %308 = vmatmul.f32.gmra.mxu0 %v42_v26  ;;  %625 = vmatmul.f32.gmra.mxu1 %v43_v27 }
  0x99   :  { %461 = vmatmul.f32.gmra.mxu2 %v144_v28  ;;  %v54_v28 = vld [vmem:[%s2350_s0 + $0x140] sm:$0xff] }
  0x9a   :  { %778 = vmatmul.f32.gmra.mxu3 %v145_v29  ;;  %v55_v29 = vld [vmem:[%s2350_s0 + $0x148] sm:$0xff] }
  0x9b   :  { %311 = vmatmul.f32.gmra.mxu0 %v44_v30  ;;  %628 = vmatmul.f32.gmra.mxu1 %v45_v31 }
  0xa0   :  { %v267_v35 = vpop.f32.mrf.mxu0  ;;  %v584_v36 = vpop.f32.mrf.mxu1 }
  0xa1   :  { %464 = vmatmul.f32.gmra.mxu2 %v146_v33  ;;  %v268_v39 = vadd.f32 %v1434_v32, %v267_v35 }
  0xa2   :  { %781 = vmatmul.f32.gmra.mxu3 %v147_v34 }
  0xa3   :  { %v585_v40 = vadd.f32 %v584_v36, %v268_v39  ;;  %314 = vmatmul.f32.gmra.mxu0 %v46_v37  ;;  %631 = vmatmul.f32.gmra.mxu1 %v47_v38  ;;  %v156_v38 = vld [vmem:[%s2350_s0 + $0x470] sm:$0xff]  ;;  %v157_v39 = vld [vmem:[%s2350_s0 + $0x478] sm:$0xff] }
  0xa4   :  { %v417_v41 = vpop.f32.mrf.mxu2 }
  0xa5   :  { %v734_v42 = vpop.f32.mrf.mxu3  ;;  %v418_v43 = vadd.f32 %v1434_v32, %v417_v41  ;;  %v884_v44 = vmax.f32 %v585_v40, 0.0 }
  0xa7   :  { %985 = vst.msk [vmem:[%s2352_s3] sm:$0xff] %vm984_vm0, %v884_v44  ;;  %v735_v47 = vadd.f32 %v734_v42, %v418_v43  ;;  %v56_v43 = vld [vmem:[%s2350_s0 + $0x150] sm:$0xff]  ;;  %v57_v44 = vld [vmem:[%s2350_s0 + $0x158] sm:$0xff] }
  0xa8   :  { %v270_v48 = vpop.f32.mrf.mxu0  ;;  %v587_v49 = vpop.f32.mrf.mxu1 }
  0xa9   :  { %v934_v52 = vmax.f32 %v735_v47, 0.0  ;;  %467 = vmatmul.f32.gmra.mxu2 %v148_v45  ;;  %v271_v53 = vadd.f32 %v1434_v32, %v270_v48 }
  0xaa   :  { %784 = vmatmul.f32.gmra.mxu3 %v149_v46 }
  0xab   :  { %1035 = vst.msk [vmem:[%s2352_s3 + $0x190] sm:$0xff] %vm984_vm0, %v934_v52  ;;  %v588_v54 = vadd.f32 %v587_v49, %v271_v53  ;;  %317 = vmatmul.f32.gmra.mxu0 %v48_v50  ;;  %634 = vmatmul.f32.gmra.mxu1 %v49_v51  ;;  %v158_v52 = vld [vmem:[%s2350_s0 + $0x480] sm:$0xff]  ;;  %v159_v53 = vld [vmem:[%s2350_s0 + $0x488] sm:$0xff] }
  0xac   :  { %v420_v55 = vpop.f32.mrf.mxu2 }
  0xad   :  { %v737_v56 = vpop.f32.mrf.mxu3  ;;  %v421_v57 = vadd.f32 %v1434_v32, %v420_v55  ;;  %v885_v58 = vmax.f32 %v588_v54, 0.0 }
  0xaf   :  { %986 = vst.msk [vmem:[%s2352_s3 + $0x8] sm:$0xff] %vm984_vm0, %v885_v58  ;;  %v738_v61 = vadd.f32 %v737_v56, %v421_v57  ;;  %v58_v57 = vld [vmem:[%s2350_s0 + $0x160] sm:$0xff]  ;;  %v59_v58 = vld [vmem:[%s2350_s0 + $0x168] sm:$0xff] }
  0xb0   :  { %v273_v62 = vpop.f32.mrf.mxu0  ;;  %v590_v63 = vpop.f32.mrf.mxu1 }
  0xb1   :  { %v935_v2 = vmax.f32 %v738_v61, 0.0  ;;  %470 = vmatmul.f32.gmra.mxu2 %v150_v59  ;;  %v274_v3 = vadd.f32 %v1434_v32, %v273_v62 }
  0xb2   :  { %787 = vmatmul.f32.gmra.mxu3 %v151_v60 }
  0xb3   :  { %1036 = vst.msk [vmem:[%s2352_s3 + $0x198] sm:$0xff] %vm984_vm0, %v935_v2  ;;  %v591_v4 = vadd.f32 %v590_v63, %v274_v3  ;;  %320 = vmatmul.f32.gmra.mxu0 %v50_v0  ;;  %637 = vmatmul.f32.gmra.mxu1 %v51_v1  ;;  %v160_v2 = vld [vmem:[%s2350_s0 + $0x490] sm:$0xff]  ;;  %v161_v3 = vld [vmem:[%s2350_s0 + $0x498] sm:$0xff] }
  0xb4   :  { %v423_v5 = vpop.f32.mrf.mxu2 }
  0xb5   :  { %v740_v6 = vpop.f32.mrf.mxu3  ;;  %v424_v7 = vadd.f32 %v1434_v32, %v423_v5  ;;  %v886_v8 = vmax.f32 %v591_v4, 0.0 }
  0xb7   :  { %987 = vst.msk [vmem:[%s2352_s3 + $0x10] sm:$0xff] %vm984_vm0, %v886_v8  ;;  %v741_v11 = vadd.f32 %v740_v6, %v424_v7  ;;  %v60_v7 = vld [vmem:[%s2350_s0 + $0x170] sm:$0xff]  ;;  %v61_v8 = vld [vmem:[%s2350_s0 + $0x178] sm:$0xff] }
  0xb8   :  { %v276_v12 = vpop.f32.mrf.mxu0  ;;  %v593_v13 = vpop.f32.mrf.mxu1 }
  0xb9   :  { %v936_v16 = vmax.f32 %v741_v11, 0.0  ;;  %473 = vmatmul.f32.gmra.mxu2 %v152_v9  ;;  %v277_v17 = vadd.f32 %v1434_v32, %v276_v12 }
  0xba   :  { %790 = vmatmul.f32.gmra.mxu3 %v153_v10 }
  0xbb   :  { %1037 = vst.msk [vmem:[%s2352_s3 + $0x1a0] sm:$0xff] %vm984_vm0, %v936_v16  ;;  %v594_v18 = vadd.f32 %v593_v13, %v277_v17  ;;  %323 = vmatmul.f32.gmra.mxu0 %v52_v14  ;;  %640 = vmatmul.f32.gmra.mxu1 %v53_v15  ;;  %v162_v16 = vld [vmem:[%s2350_s0 + $0x4a0] sm:$0xff]  ;;  %v163_v17 = vld [vmem:[%s2350_s0 + $0x4a8] sm:$0xff] }
  0xbc   :  { %v426_v19 = vpop.f32.mrf.mxu2 }
  0xbd   :  { %v743_v20 = vpop.f32.mrf.mxu3  ;;  %v427_v21 = vadd.f32 %v1434_v32, %v426_v19  ;;  %v887_v22 = vmax.f32 %v594_v18, 0.0 }
  0xbf   :  { %988 = vst.msk [vmem:[%s2352_s3 + $0x18] sm:$0xff] %vm984_vm0, %v887_v22  ;;  %v744_v25 = vadd.f32 %v743_v20, %v427_v21  ;;  %v62_v21 = vld [vmem:[%s2350_s0 + $0x180] sm:$0xff]  ;;  %v63_v22 = vld [vmem:[%s2350_s0 + $0x188] sm:$0xff] }
  0xc0   :  { %v279_v26 = vpop.f32.mrf.mxu0  ;;  %v596_v27 = vpop.f32.mrf.mxu1 }
  0xc1   :  { %v937_v30 = vmax.f32 %v744_v25, 0.0  ;;  %476 = vmatmul.f32.gmra.mxu2 %v154_v23  ;;  %v280_v31 = vadd.f32 %v1434_v32, %v279_v26 }
  0xc2   :  { %793 = vmatmul.f32.gmra.mxu3 %v155_v24 }
  0xc3   :  { %1038 = vst.msk [vmem:[%s2352_s3 + $0x1a8] sm:$0xff] %vm984_vm0, %v937_v30  ;;  %v597_v33 = vadd.f32 %v596_v27, %v280_v31  ;;  %326 = vmatmul.f32.gmra.mxu0 %v54_v28  ;;  %643 = vmatmul.f32.gmra.mxu1 %v55_v29  ;;  %v164_v30 = vld [vmem:[%s2350_s0 + $0x4b0] sm:$0xff]  ;;  %v165_v31 = vld [vmem:[%s2350_s0 + $0x4b8] sm:$0xff] }
  0xc4   :  { %v429_v34 = vpop.f32.mrf.mxu2 }
  0xc5   :  { %v746_v35 = vpop.f32.mrf.mxu3  ;;  %v430_v36 = vadd.f32 %v1434_v32, %v429_v34  ;;  %v888_v37 = vmax.f32 %v597_v33, 0.0 }
  0xc7   :  { %989 = vst.msk [vmem:[%s2352_s3 + $0x20] sm:$0xff] %vm984_vm0, %v888_v37  ;;  %v747_v40 = vadd.f32 %v746_v35, %v430_v36  ;;  %v64_v36 = vld [vmem:[%s2350_s0 + $0x190] sm:$0xff]  ;;  %v65_v37 = vld [vmem:[%s2350_s0 + $0x198] sm:$0xff] }
  0xc8   :  { %v282_v41 = vpop.f32.mrf.mxu0  ;;  %v599_v42 = vpop.f32.mrf.mxu1 }
  0xc9   :  { %v938_v45 = vmax.f32 %v747_v40, 0.0  ;;  %479 = vmatmul.f32.gmra.mxu2 %v156_v38  ;;  %v283_v46 = vadd.f32 %v1434_v32, %v282_v41 }
  0xca   :  { %796 = vmatmul.f32.gmra.mxu3 %v157_v39 }
  0xcb   :  { %1039 = vst.msk [vmem:[%s2352_s3 + $0x1b0] sm:$0xff] %vm984_vm0, %v938_v45  ;;  %v600_v47 = vadd.f32 %v599_v42, %v283_v46  ;;  %329 = vmatmul.f32.gmra.mxu0 %v56_v43  ;;  %646 = vmatmul.f32.gmra.mxu1 %v57_v44  ;;  %v166_v45 = vld [vmem:[%s2350_s0 + $0x4c0] sm:$0xff]  ;;  %v167_v46 = vld [vmem:[%s2350_s0 + $0x4c8] sm:$0xff] }
  0xcc   :  { %v432_v48 = vpop.f32.mrf.mxu2 }
  0xcd   :  { %v749_v49 = vpop.f32.mrf.mxu3  ;;  %v433_v50 = vadd.f32 %v1434_v32, %v432_v48  ;;  %v889_v51 = vmax.f32 %v600_v47, 0.0 }
  0xcf   :  { %990 = vst.msk [vmem:[%s2352_s3 + $0x28] sm:$0xff] %vm984_vm0, %v889_v51  ;;  %v750_v54 = vadd.f32 %v749_v49, %v433_v50  ;;  %v66_v50 = vld [vmem:[%s2350_s0 + $0x1a0] sm:$0xff]  ;;  %v67_v51 = vld [vmem:[%s2350_s0 + $0x1a8] sm:$0xff] }
  0xd0   :  { %v285_v55 = vpop.f32.mrf.mxu0  ;;  %v602_v56 = vpop.f32.mrf.mxu1 }
  0xd1   :  { %v939_v59 = vmax.f32 %v750_v54, 0.0  ;;  %482 = vmatmul.f32.gmra.mxu2 %v158_v52  ;;  %v286_v60 = vadd.f32 %v1434_v32, %v285_v55 }
  0xd2   :  { %799 = vmatmul.f32.gmra.mxu3 %v159_v53 }
  0xd3   :  { %1040 = vst.msk [vmem:[%s2352_s3 + $0x1b8] sm:$0xff] %vm984_vm0, %v939_v59  ;;  %v603_v61 = vadd.f32 %v602_v56, %v286_v60  ;;  %332 = vmatmul.f32.gmra.mxu0 %v58_v57  ;;  %649 = vmatmul.f32.gmra.mxu1 %v59_v58  ;;  %v168_v59 = vld [vmem:[%s2350_s0 + $0x4d0] sm:$0xff]  ;;  %v169_v60 = vld [vmem:[%s2350_s0 + $0x4d8] sm:$0xff] }
  0xd4   :  { %v435_v62 = vpop.f32.mrf.mxu2 }
  0xd5   :  { %v752_v63 = vpop.f32.mrf.mxu3  ;;  %v436_v0 = vadd.f32 %v1434_v32, %v435_v62  ;;  %v890_v1 = vmax.f32 %v603_v61, 0.0 }
  0xd7   :  { %991 = vst.msk [vmem:[%s2352_s3 + $0x30] sm:$0xff] %vm984_vm0, %v890_v1  ;;  %v753_v4 = vadd.f32 %v752_v63, %v436_v0  ;;  %v68_v0 = vld [vmem:[%s2350_s0 + $0x1b0] sm:$0xff]  ;;  %v69_v1 = vld [vmem:[%s2350_s0 + $0x1b8] sm:$0xff] }
  0xd8   :  { %v288_v5 = vpop.f32.mrf.mxu0  ;;  %v605_v6 = vpop.f32.mrf.mxu1 }
  0xd9   :  { %v940_v9 = vmax.f32 %v753_v4, 0.0  ;;  %485 = vmatmul.f32.gmra.mxu2 %v160_v2  ;;  %v289_v10 = vadd.f32 %v1434_v32, %v288_v5 }
  0xda   :  { %802 = vmatmul.f32.gmra.mxu3 %v161_v3 }
  0xdb   :  { %1041 = vst.msk [vmem:[%s2352_s3 + $0x1c0] sm:$0xff] %vm984_vm0, %v940_v9  ;;  %v606_v11 = vadd.f32 %v605_v6, %v289_v10  ;;  %335 = vmatmul.f32.gmra.mxu0 %v60_v7  ;;  %652 = vmatmul.f32.gmra.mxu1 %v61_v8  ;;  %v170_v9 = vld [vmem:[%s2350_s0 + $0x4e0] sm:$0xff]  ;;  %v171_v10 = vld [vmem:[%s2350_s0 + $0x4e8] sm:$0xff] }
  0xdc   :  { %v438_v12 = vpop.f32.mrf.mxu2 }
  0xdd   :  { %v755_v13 = vpop.f32.mrf.mxu3  ;;  %v439_v14 = vadd.f32 %v1434_v32, %v438_v12  ;;  %v891_v15 = vmax.f32 %v606_v11, 0.0 }
  0xdf   :  { %992 = vst.msk [vmem:[%s2352_s3 + $0x38] sm:$0xff] %vm984_vm0, %v891_v15  ;;  %v756_v18 = vadd.f32 %v755_v13, %v439_v14  ;;  %v70_v14 = vld [vmem:[%s2350_s0 + $0x1c0] sm:$0xff]  ;;  %v71_v15 = vld [vmem:[%s2350_s0 + $0x1c8] sm:$0xff] }
  0xe0   :  { %v291_v19 = vpop.f32.mrf.mxu0  ;;  %v608_v20 = vpop.f32.mrf.mxu1 }
  0xe1   :  { %v941_v23 = vmax.f32 %v756_v18, 0.0  ;;  %488 = vmatmul.f32.gmra.mxu2 %v162_v16  ;;  %v292_v24 = vadd.f32 %v1434_v32, %v291_v19 }
  0xe2   :  { %805 = vmatmul.f32.gmra.mxu3 %v163_v17 }
  0xe3   :  { %1042 = vst.msk [vmem:[%s2352_s3 + $0x1c8] sm:$0xff] %vm984_vm0, %v941_v23  ;;  %v609_v25 = vadd.f32 %v608_v20, %v292_v24  ;;  %338 = vmatmul.f32.gmra.mxu0 %v62_v21  ;;  %655 = vmatmul.f32.gmra.mxu1 %v63_v22  ;;  %v172_v23 = vld [vmem:[%s2350_s0 + $0x4f0] sm:$0xff]  ;;  %v173_v24 = vld [vmem:[%s2350_s0 + $0x4f8] sm:$0xff] }
  0xe4   :  { %v441_v26 = vpop.f32.mrf.mxu2 }
  0xe5   :  { %v758_v27 = vpop.f32.mrf.mxu3  ;;  %v442_v28 = vadd.f32 %v1434_v32, %v441_v26  ;;  %v892_v29 = vmax.f32 %v609_v25, 0.0 }
  0xe7   :  { %993 = vst.msk [vmem:[%s2352_s3 + $0x40] sm:$0xff] %vm984_vm0, %v892_v29  ;;  %v759_v33 = vadd.f32 %v758_v27, %v442_v28  ;;  %v72_v28 = vld [vmem:[%s2350_s0 + $0x1d0] sm:$0xff]  ;;  %v73_v29 = vld [vmem:[%s2350_s0 + $0x1d8] sm:$0xff] }
  0xe8   :  { %v294_v34 = vpop.f32.mrf.mxu0  ;;  %v611_v35 = vpop.f32.mrf.mxu1 }
  0xe9   :  { %v942_v38 = vmax.f32 %v759_v33, 0.0  ;;  %491 = vmatmul.f32.gmra.mxu2 %v164_v30  ;;  %v295_v39 = vadd.f32 %v1434_v32, %v294_v34 }
  0xea   :  { %808 = vmatmul.f32.gmra.mxu3 %v165_v31 }
  0xeb   :  { %1043 = vst.msk [vmem:[%s2352_s3 + $0x1d0] sm:$0xff] %vm984_vm0, %v942_v38  ;;  %v612_v40 = vadd.f32 %v611_v35, %v295_v39  ;;  %341 = vmatmul.f32.gmra.mxu0 %v64_v36  ;;  %658 = vmatmul.f32.gmra.mxu1 %v65_v37  ;;  %v174_v38 = vld [vmem:[%s2350_s0 + $0x500] sm:$0xff]  ;;  %v175_v39 = vld [vmem:[%s2350_s0 + $0x508] sm:$0xff] }
  0xec   :  { %v444_v41 = vpop.f32.mrf.mxu2 }
  0xed   :  { %v761_v42 = vpop.f32.mrf.mxu3  ;;  %v445_v43 = vadd.f32 %v1434_v32, %v444_v41  ;;  %v893_v44 = vmax.f32 %v612_v40, 0.0 }
  0xef   :  { %994 = vst.msk [vmem:[%s2352_s3 + $0x48] sm:$0xff] %vm984_vm0, %v893_v44  ;;  %v762_v47 = vadd.f32 %v761_v42, %v445_v43  ;;  %v74_v43 = vld [vmem:[%s2350_s0 + $0x1e0] sm:$0xff]  ;;  %v75_v44 = vld [vmem:[%s2350_s0 + $0x1e8] sm:$0xff] }
  0xf0   :  { %v297_v48 = vpop.f32.mrf.mxu0  ;;  %v614_v49 = vpop.f32.mrf.mxu1 }
  0xf1   :  { %v943_v52 = vmax.f32 %v762_v47, 0.0  ;;  %494 = vmatmul.f32.gmra.mxu2 %v166_v45  ;;  %v298_v53 = vadd.f32 %v1434_v32, %v297_v48 }
  0xf2   :  { %811 = vmatmul.f32.gmra.mxu3 %v167_v46 }
  0xf3   :  { %1044 = vst.msk [vmem:[%s2352_s3 + $0x1d8] sm:$0xff] %vm984_vm0, %v943_v52  ;;  %v615_v54 = vadd.f32 %v614_v49, %v298_v53  ;;  %344 = vmatmul.f32.gmra.mxu0 %v66_v50  ;;  %661 = vmatmul.f32.gmra.mxu1 %v67_v51  ;;  %v176_v52 = vld [vmem:[%s2350_s0 + $0x510] sm:$0xff]  ;;  %v177_v53 = vld [vmem:[%s2350_s0 + $0x518] sm:$0xff] }
  0xf4   :  { %v447_v55 = vpop.f32.mrf.mxu2 }
  0xf5   :  { %v764_v56 = vpop.f32.mrf.mxu3  ;;  %v448_v57 = vadd.f32 %v1434_v32, %v447_v55  ;;  %v894_v58 = vmax.f32 %v615_v54, 0.0 }
  0xf7   :  { %995 = vst.msk [vmem:[%s2352_s3 + $0x50] sm:$0xff] %vm984_vm0, %v894_v58  ;;  %v765_v61 = vadd.f32 %v764_v56, %v448_v57  ;;  %v76_v57 = vld [vmem:[%s2350_s0 + $0x1f0] sm:$0xff]  ;;  %v77_v58 = vld [vmem:[%s2350_s0 + $0x1f8] sm:$0xff] }
  0xf8   :  { %v300_v62 = vpop.f32.mrf.mxu0  ;;  %v617_v63 = vpop.f32.mrf.mxu1 }
  0xf9   :  { %v944_v2 = vmax.f32 %v765_v61, 0.0  ;;  %497 = vmatmul.f32.gmra.mxu2 %v168_v59  ;;  %v301_v3 = vadd.f32 %v1434_v32, %v300_v62 }
  0xfa   :  { %814 = vmatmul.f32.gmra.mxu3 %v169_v60 }
  0xfb   :  { %1045 = vst.msk [vmem:[%s2352_s3 + $0x1e0] sm:$0xff] %vm984_vm0, %v944_v2  ;;  %v618_v4 = vadd.f32 %v617_v63, %v301_v3  ;;  %347 = vmatmul.f32.gmra.mxu0 %v68_v0  ;;  %664 = vmatmul.f32.gmra.mxu1 %v69_v1  ;;  %v178_v2 = vld [vmem:[%s2350_s0 + $0x520] sm:$0xff]  ;;  %v179_v3 = vld [vmem:[%s2350_s0 + $0x528] sm:$0xff] }
  0xfc   :  { %v450_v5 = vpop.f32.mrf.mxu2 }
  0xfd   :  { %v767_v6 = vpop.f32.mrf.mxu3  ;;  %v451_v7 = vadd.f32 %v1434_v32, %v450_v5  ;;  %v895_v8 = vmax.f32 %v618_v4, 0.0 }
  0xff   :  { %996 = vst.msk [vmem:[%s2352_s3 + $0x58] sm:$0xff] %vm984_vm0, %v895_v8  ;;  %v768_v11 = vadd.f32 %v767_v6, %v451_v7  ;;  %v78_v7 = vld [vmem:[%s2350_s0 + $0x200] sm:$0xff]  ;;  %v79_v8 = vld [vmem:[%s2350_s0 + $0x208] sm:$0xff] }
 0x100   :  { %v303_v12 = vpop.f32.mrf.mxu0  ;;  %v620_v13 = vpop.f32.mrf.mxu1 }
 0x101   :  { %v945_v16 = vmax.f32 %v768_v11, 0.0  ;;  %500 = vmatmul.f32.gmra.mxu2 %v170_v9  ;;  %v304_v17 = vadd.f32 %v1434_v32, %v303_v12 }
 0x102   :  { %817 = vmatmul.f32.gmra.mxu3 %v171_v10 }
 0x103   :  { %1046 = vst.msk [vmem:[%s2352_s3 + $0x1e8] sm:$0xff] %vm984_vm0, %v945_v16  ;;  %v621_v18 = vadd.f32 %v620_v13, %v304_v17  ;;  %350 = vmatmul.f32.gmra.mxu0 %v70_v14  ;;  %667 = vmatmul.f32.gmra.mxu1 %v71_v15  ;;  %v180_v16 = vld [vmem:[%s2350_s0 + $0x530] sm:$0xff]  ;;  %v181_v17 = vld [vmem:[%s2350_s0 + $0x538] sm:$0xff] }
 0x104   :  { %v453_v19 = vpop.f32.mrf.mxu2 }
 0x105   :  { %v770_v20 = vpop.f32.mrf.mxu3  ;;  %v454_v21 = vadd.f32 %v1434_v32, %v453_v19  ;;  %v896_v22 = vmax.f32 %v621_v18, 0.0 }
 0x107   :  { %997 = vst.msk [vmem:[%s2352_s3 + $0x60] sm:$0xff] %vm984_vm0, %v896_v22  ;;  %v771_v25 = vadd.f32 %v770_v20, %v454_v21  ;;  %v80_v21 = vld [vmem:[%s2350_s0 + $0x210] sm:$0xff]  ;;  %v81_v22 = vld [vmem:[%s2350_s0 + $0x218] sm:$0xff] }
 0x108   :  { %v306_v26 = vpop.f32.mrf.mxu0  ;;  %v623_v27 = vpop.f32.mrf.mxu1 }
 0x109   :  { %v946_v30 = vmax.f32 %v771_v25, 0.0  ;;  %503 = vmatmul.f32.gmra.mxu2 %v172_v23  ;;  %v307_v31 = vadd.f32 %v1434_v32, %v306_v26 }
 0x10a   :  { %820 = vmatmul.f32.gmra.mxu3 %v173_v24 }
 0x10b   :  { %1047 = vst.msk [vmem:[%s2352_s3 + $0x1f0] sm:$0xff] %vm984_vm0, %v946_v30  ;;  %v624_v33 = vadd.f32 %v623_v27, %v307_v31  ;;  %353 = vmatmul.f32.gmra.mxu0 %v72_v28  ;;  %670 = vmatmul.f32.gmra.mxu1 %v73_v29  ;;  %v182_v30 = vld [vmem:[%s2350_s0 + $0x540] sm:$0xff]  ;;  %v183_v31 = vld [vmem:[%s2350_s0 + $0x548] sm:$0xff] }
 0x10c   :  { %v456_v34 = vpop.f32.mrf.mxu2 }
 0x10d   :  { %v773_v35 = vpop.f32.mrf.mxu3  ;;  %v457_v36 = vadd.f32 %v1434_v32, %v456_v34  ;;  %v897_v37 = vmax.f32 %v624_v33, 0.0 }
 0x10f   :  { %998 = vst.msk [vmem:[%s2352_s3 + $0x68] sm:$0xff] %vm984_vm0, %v897_v37  ;;  %v774_v40 = vadd.f32 %v773_v35, %v457_v36  ;;  %v82_v36 = vld [vmem:[%s2350_s0 + $0x220] sm:$0xff]  ;;  %v83_v37 = vld [vmem:[%s2350_s0 + $0x228] sm:$0xff] }
 0x110   :  { %v309_v41 = vpop.f32.mrf.mxu0  ;;  %v626_v42 = vpop.f32.mrf.mxu1 }
 0x111   :  { %v947_v45 = vmax.f32 %v774_v40, 0.0  ;;  %506 = vmatmul.f32.gmra.mxu2 %v174_v38  ;;  %v310_v46 = vadd.f32 %v1434_v32, %v309_v41 }
 0x112   :  { %823 = vmatmul.f32.gmra.mxu3 %v175_v39 }
 0x113   :  { %1048 = vst.msk [vmem:[%s2352_s3 + $0x1f8] sm:$0xff] %vm984_vm0, %v947_v45  ;;  %v627_v47 = vadd.f32 %v626_v42, %v310_v46  ;;  %356 = vmatmul.f32.gmra.mxu0 %v74_v43  ;;  %673 = vmatmul.f32.gmra.mxu1 %v75_v44  ;;  %v184_v45 = vld [vmem:[%s2350_s0 + $0x550] sm:$0xff]  ;;  %v185_v46 = vld [vmem:[%s2350_s0 + $0x558] sm:$0xff] }
 0x114   :  { %v459_v48 = vpop.f32.mrf.mxu2 }
 0x115   :  { %v776_v49 = vpop.f32.mrf.mxu3  ;;  %v460_v50 = vadd.f32 %v1434_v32, %v459_v48  ;;  %v898_v51 = vmax.f32 %v627_v47, 0.0 }
 0x117   :  { %999 = vst.msk [vmem:[%s2352_s3 + $0x70] sm:$0xff] %vm984_vm0, %v898_v51  ;;  %v777_v54 = vadd.f32 %v776_v49, %v460_v50  ;;  %v84_v50 = vld [vmem:[%s2350_s0 + $0x230] sm:$0xff]  ;;  %v85_v51 = vld [vmem:[%s2350_s0 + $0x238] sm:$0xff] }
 0x118   :  { %v312_v55 = vpop.f32.mrf.mxu0  ;;  %v629_v56 = vpop.f32.mrf.mxu1 }
 0x119   :  { %v948_v59 = vmax.f32 %v777_v54, 0.0  ;;  %509 = vmatmul.f32.gmra.mxu2 %v176_v52  ;;  %v313_v60 = vadd.f32 %v1434_v32, %v312_v55 }
 0x11a   :  { %826 = vmatmul.f32.gmra.mxu3 %v177_v53 }
 0x11b   :  { %1049 = vst.msk [vmem:[%s2352_s3 + $0x200] sm:$0xff] %vm984_vm0, %v948_v59  ;;  %v630_v61 = vadd.f32 %v629_v56, %v313_v60  ;;  %359 = vmatmul.f32.gmra.mxu0 %v76_v57  ;;  %676 = vmatmul.f32.gmra.mxu1 %v77_v58  ;;  %v186_v59 = vld [vmem:[%s2350_s0 + $0x560] sm:$0xff]  ;;  %v187_v60 = vld [vmem:[%s2350_s0 + $0x568] sm:$0xff] }
 0x11c   :  { %v462_v62 = vpop.f32.mrf.mxu2 }
 0x11d   :  { %v779_v63 = vpop.f32.mrf.mxu3  ;;  %v463_v0 = vadd.f32 %v1434_v32, %v462_v62  ;;  %v899_v1 = vmax.f32 %v630_v61, 0.0 }
 0x11f   :  { %1000 = vst.msk [vmem:[%s2352_s3 + $0x78] sm:$0xff] %vm984_vm0, %v899_v1  ;;  %v780_v4 = vadd.f32 %v779_v63, %v463_v0  ;;  %v86_v0 = vld [vmem:[%s2350_s0 + $0x240] sm:$0xff]  ;;  %v87_v1 = vld [vmem:[%s2350_s0 + $0x248] sm:$0xff] }
 0x120   :  { %v315_v5 = vpop.f32.mrf.mxu0  ;;  %v632_v6 = vpop.f32.mrf.mxu1 }
 0x121   :  { %v949_v9 = vmax.f32 %v780_v4, 0.0  ;;  %512 = vmatmul.f32.gmra.mxu2 %v178_v2  ;;  %v316_v10 = vadd.f32 %v1434_v32, %v315_v5 }
 0x122   :  { %829 = vmatmul.f32.gmra.mxu3 %v179_v3 }
 0x123   :  { %1050 = vst.msk [vmem:[%s2352_s3 + $0x208] sm:$0xff] %vm984_vm0, %v949_v9  ;;  %v633_v11 = vadd.f32 %v632_v6, %v316_v10  ;;  %362 = vmatmul.f32.gmra.mxu0 %v78_v7  ;;  %679 = vmatmul.f32.gmra.mxu1 %v79_v8  ;;  %v188_v9 = vld [vmem:[%s2350_s0 + $0x570] sm:$0xff]  ;;  %v189_v10 = vld [vmem:[%s2350_s0 + $0x578] sm:$0xff] }
 0x124   :  { %v465_v12 = vpop.f32.mrf.mxu2 }
 0x125   :  { %v782_v13 = vpop.f32.mrf.mxu3  ;;  %v466_v14 = vadd.f32 %v1434_v32, %v465_v12  ;;  %v900_v15 = vmax.f32 %v633_v11, 0.0 }
 0x127   :  { %1001 = vst.msk [vmem:[%s2352_s3 + $0x80] sm:$0xff] %vm984_vm0, %v900_v15  ;;  %v783_v18 = vadd.f32 %v782_v13, %v466_v14  ;;  %v88_v14 = vld [vmem:[%s2350_s0 + $0x250] sm:$0xff]  ;;  %v89_v15 = vld [vmem:[%s2350_s0 + $0x258] sm:$0xff] }
 0x128   :  { %v318_v19 = vpop.f32.mrf.mxu0  ;;  %v635_v20 = vpop.f32.mrf.mxu1 }
 0x129   :  { %v950_v23 = vmax.f32 %v783_v18, 0.0  ;;  %515 = vmatmul.f32.gmra.mxu2 %v180_v16  ;;  %v319_v24 = vadd.f32 %v1434_v32, %v318_v19 }
 0x12a   :  { %832 = vmatmul.f32.gmra.mxu3 %v181_v17 }
 0x12b   :  { %1051 = vst.msk [vmem:[%s2352_s3 + $0x210] sm:$0xff] %vm984_vm0, %v950_v23  ;;  %v636_v25 = vadd.f32 %v635_v20, %v319_v24  ;;  %365 = vmatmul.f32.gmra.mxu0 %v80_v21  ;;  %682 = vmatmul.f32.gmra.mxu1 %v81_v22  ;;  %v190_v23 = vld [vmem:[%s2350_s0 + $0x580] sm:$0xff]  ;;  %v191_v24 = vld [vmem:[%s2350_s0 + $0x588] sm:$0xff] }
 0x12c   :  { %v468_v26 = vpop.f32.mrf.mxu2 }
 0x12d   :  { %v785_v27 = vpop.f32.mrf.mxu3  ;;  %v469_v28 = vadd.f32 %v1434_v32, %v468_v26  ;;  %v901_v29 = vmax.f32 %v636_v25, 0.0 }
 0x12f   :  { %1002 = vst.msk [vmem:[%s2352_s3 + $0x88] sm:$0xff] %vm984_vm0, %v901_v29  ;;  %v786_v33 = vadd.f32 %v785_v27, %v469_v28  ;;  %v90_v28 = vld [vmem:[%s2350_s0 + $0x260] sm:$0xff]  ;;  %v91_v29 = vld [vmem:[%s2350_s0 + $0x268] sm:$0xff] }
 0x130   :  { %v321_v34 = vpop.f32.mrf.mxu0  ;;  %v638_v35 = vpop.f32.mrf.mxu1 }
 0x131   :  { %v951_v38 = vmax.f32 %v786_v33, 0.0  ;;  %518 = vmatmul.f32.gmra.mxu2 %v182_v30  ;;  %v322_v39 = vadd.f32 %v1434_v32, %v321_v34 }
 0x132   :  { %835 = vmatmul.f32.gmra.mxu3 %v183_v31 }
 0x133   :  { %1052 = vst.msk [vmem:[%s2352_s3 + $0x218] sm:$0xff] %vm984_vm0, %v951_v38  ;;  %v639_v40 = vadd.f32 %v638_v35, %v322_v39  ;;  %368 = vmatmul.f32.gmra.mxu0 %v82_v36  ;;  %685 = vmatmul.f32.gmra.mxu1 %v83_v37  ;;  %v192_v38 = vld [vmem:[%s2350_s0 + $0x590] sm:$0xff]  ;;  %v193_v39 = vld [vmem:[%s2350_s0 + $0x598] sm:$0xff] }
 0x134   :  { %v471_v41 = vpop.f32.mrf.mxu2 }
 0x135   :  { %v788_v42 = vpop.f32.mrf.mxu3  ;;  %v472_v43 = vadd.f32 %v1434_v32, %v471_v41  ;;  %v902_v44 = vmax.f32 %v639_v40, 0.0 }
 0x137   :  { %1003 = vst.msk [vmem:[%s2352_s3 + $0x90] sm:$0xff] %vm984_vm0, %v902_v44  ;;  %v789_v47 = vadd.f32 %v788_v42, %v472_v43  ;;  %v92_v43 = vld [vmem:[%s2350_s0 + $0x270] sm:$0xff]  ;;  %v93_v44 = vld [vmem:[%s2350_s0 + $0x278] sm:$0xff] }
 0x138   :  { %v324_v48 = vpop.f32.mrf.mxu0  ;;  %v641_v49 = vpop.f32.mrf.mxu1 }
 0x139   :  { %v952_v52 = vmax.f32 %v789_v47, 0.0  ;;  %521 = vmatmul.f32.gmra.mxu2 %v184_v45  ;;  %v325_v53 = vadd.f32 %v1434_v32, %v324_v48 }
 0x13a   :  { %838 = vmatmul.f32.gmra.mxu3 %v185_v46 }
 0x13b   :  { %1053 = vst.msk [vmem:[%s2352_s3 + $0x220] sm:$0xff] %vm984_vm0, %v952_v52  ;;  %v642_v54 = vadd.f32 %v641_v49, %v325_v53  ;;  %371 = vmatmul.f32.gmra.mxu0 %v84_v50  ;;  %688 = vmatmul.f32.gmra.mxu1 %v85_v51  ;;  %v194_v52 = vld [vmem:[%s2350_s0 + $0x5a0] sm:$0xff]  ;;  %v195_v53 = vld [vmem:[%s2350_s0 + $0x5a8] sm:$0xff] }
 0x13c   :  { %v474_v55 = vpop.f32.mrf.mxu2 }
 0x13d   :  { %v791_v56 = vpop.f32.mrf.mxu3  ;;  %v475_v57 = vadd.f32 %v1434_v32, %v474_v55  ;;  %v903_v58 = vmax.f32 %v642_v54, 0.0 }
 0x13f   :  { %1004 = vst.msk [vmem:[%s2352_s3 + $0x98] sm:$0xff] %vm984_vm0, %v903_v58  ;;  %v792_v61 = vadd.f32 %v791_v56, %v475_v57  ;;  %v94_v57 = vld [vmem:[%s2350_s0 + $0x280] sm:$0xff]  ;;  %v95_v58 = vld [vmem:[%s2350_s0 + $0x288] sm:$0xff] }
 0x140   :  { %v327_v62 = vpop.f32.mrf.mxu0  ;;  %v644_v63 = vpop.f32.mrf.mxu1 }
 0x141   :  { %v953_v2 = vmax.f32 %v792_v61, 0.0  ;;  %524 = vmatmul.f32.gmra.mxu2 %v186_v59  ;;  %v328_v3 = vadd.f32 %v1434_v32, %v327_v62 }
 0x142   :  { %841 = vmatmul.f32.gmra.mxu3 %v187_v60 }
 0x143   :  { %1054 = vst.msk [vmem:[%s2352_s3 + $0x228] sm:$0xff] %vm984_vm0, %v953_v2  ;;  %v645_v4 = vadd.f32 %v644_v63, %v328_v3  ;;  %374 = vmatmul.f32.gmra.mxu0 %v86_v0  ;;  %691 = vmatmul.f32.gmra.mxu1 %v87_v1  ;;  %v196_v2 = vld [vmem:[%s2350_s0 + $0x5b0] sm:$0xff]  ;;  %v197_v3 = vld [vmem:[%s2350_s0 + $0x5b8] sm:$0xff] }
 0x144   :  { %v477_v5 = vpop.f32.mrf.mxu2 }
 0x145   :  { %v794_v6 = vpop.f32.mrf.mxu3  ;;  %v478_v7 = vadd.f32 %v1434_v32, %v477_v5  ;;  %v904_v8 = vmax.f32 %v645_v4, 0.0 }
 0x147   :  { %1005 = vst.msk [vmem:[%s2352_s3 + $0xa0] sm:$0xff] %vm984_vm0, %v904_v8  ;;  %v795_v11 = vadd.f32 %v794_v6, %v478_v7  ;;  %v96_v7 = vld [vmem:[%s2350_s0 + $0x290] sm:$0xff]  ;;  %v97_v8 = vld [vmem:[%s2350_s0 + $0x298] sm:$0xff] }
 0x148   :  { %v330_v12 = vpop.f32.mrf.mxu0  ;;  %v647_v13 = vpop.f32.mrf.mxu1 }
 0x149   :  { %v954_v16 = vmax.f32 %v795_v11, 0.0  ;;  %527 = vmatmul.f32.gmra.mxu2 %v188_v9  ;;  %v331_v17 = vadd.f32 %v1434_v32, %v330_v12 }
 0x14a   :  { %844 = vmatmul.f32.gmra.mxu3 %v189_v10 }
 0x14b   :  { %1055 = vst.msk [vmem:[%s2352_s3 + $0x230] sm:$0xff] %vm984_vm0, %v954_v16  ;;  %v648_v18 = vadd.f32 %v647_v13, %v331_v17  ;;  %377 = vmatmul.f32.gmra.mxu0 %v88_v14  ;;  %694 = vmatmul.f32.gmra.mxu1 %v89_v15  ;;  %v2002_v14 = vld [vmem:[%s2351_s2] ss:$0 sm:$0xff]  ;;  %v199_v17 = vld [vmem:[%s2350_s0 + $0x5c8] sm:$0xff] }
 0x14c   :  { %v480_v19 = vpop.f32.mrf.mxu2 }
 0x14d   :  { %v797_v20 = vpop.f32.mrf.mxu3  ;;  %v481_v21 = vadd.f32 %v1434_v32, %v480_v19  ;;  %v905_v22 = vmax.f32 %v648_v18, 0.0 }
 0x14f   :  { %1006 = vst.msk [vmem:[%s2352_s3 + $0xa8] sm:$0xff] %vm984_vm0, %v905_v22  ;;  %v798_v25 = vadd.f32 %v797_v20, %v481_v21  ;;  %v98_v21 = vld [vmem:[%s2350_s0 + $0x2a0] sm:$0xff]  ;;  %v99_v22 = vld [vmem:[%s2350_s0 + $0x2a8] sm:$0xff] }
 0x150   :  { %v333_v26 = vpop.f32.mrf.mxu0  ;;  %v650_v27 = vpop.f32.mrf.mxu1 }
 0x151   :  { %v955_v30 = vmax.f32 %v798_v25, 0.0  ;;  %530 = vmatmul.f32.gmra.mxu2 %v190_v23  ;;  %v334_v31 = vadd.f32 %v1434_v32, %v333_v26 }
 0x152   :  { %847 = vmatmul.f32.gmra.mxu3 %v191_v24 }
 0x153   :  { %1056 = vst.msk [vmem:[%s2352_s3 + $0x238] sm:$0xff] %vm984_vm0, %v955_v30  ;;  %v651_v33 = vadd.f32 %v650_v27, %v334_v31  ;;  %380 = vmatmul.f32.gmra.mxu0 %v90_v28  ;;  %697 = vmatmul.f32.gmra.mxu1 %v91_v29  ;;  %v200_v30 = vld [vmem:[%s2350_s0 + $0x5d0] sm:$0xff]  ;;  %v201_v31 = vld [vmem:[%s2350_s0 + $0x5d8] sm:$0xff] }
 0x154   :  { %v483_v34 = vpop.f32.mrf.mxu2 }
 0x155   :  { %v800_v35 = vpop.f32.mrf.mxu3  ;;  %v484_v36 = vadd.f32 %v1434_v32, %v483_v34  ;;  %v906_v37 = vmax.f32 %v651_v33, 0.0 }
 0x157   :  { %1007 = vst.msk [vmem:[%s2352_s3 + $0xb0] sm:$0xff] %vm984_vm0, %v906_v37  ;;  %v801_v40 = vadd.f32 %v800_v35, %v484_v36  ;;  %v100_v36 = vld [vmem:[%s2350_s0 + $0x2b0] sm:$0xff]  ;;  %v101_v37 = vld [vmem:[%s2350_s0 + $0x2b8] sm:$0xff] }
 0x158   :  { %v336_v41 = vpop.f32.mrf.mxu0  ;;  %v653_v42 = vpop.f32.mrf.mxu1 }
 0x159   :  { %v956_v45 = vmax.f32 %v801_v40, 0.0  ;;  %533 = vmatmul.f32.gmra.mxu2 %v192_v38  ;;  %v337_v46 = vadd.f32 %v1434_v32, %v336_v41 }
 0x15a   :  { %850 = vmatmul.f32.gmra.mxu3 %v193_v39 }
 0x15b   :  { %1057 = vst.msk [vmem:[%s2352_s3 + $0x240] sm:$0xff] %vm984_vm0, %v956_v45  ;;  %v654_v47 = vadd.f32 %v653_v42, %v337_v46  ;;  %383 = vmatmul.f32.gmra.mxu0 %v92_v43  ;;  %700 = vmatmul.f32.gmra.mxu1 %v93_v44  ;;  %v202_v45 = vld [vmem:[%s2350_s0 + $0x5e0] sm:$0xff]  ;;  %v203_v46 = vld [vmem:[%s2350_s0 + $0x5e8] sm:$0xff] }
 0x15c   :  { %v486_v48 = vpop.f32.mrf.mxu2 }
 0x15d   :  { %v803_v49 = vpop.f32.mrf.mxu3  ;;  %v487_v50 = vadd.f32 %v1434_v32, %v486_v48  ;;  %v907_v51 = vmax.f32 %v654_v47, 0.0 }
 0x15f   :  { %1008 = vst.msk [vmem:[%s2352_s3 + $0xb8] sm:$0xff] %vm984_vm0, %v907_v51  ;;  %v804_v54 = vadd.f32 %v803_v49, %v487_v50  ;;  %v102_v50 = vld [vmem:[%s2350_s0 + $0x2c0] sm:$0xff]  ;;  %v103_v51 = vld [vmem:[%s2350_s0 + $0x2c8] sm:$0xff] }
 0x160   :  { %v339_v55 = vpop.f32.mrf.mxu0  ;;  %v656_v56 = vpop.f32.mrf.mxu1 }
 0x161   :  { %v957_v59 = vmax.f32 %v804_v54, 0.0  ;;  %536 = vmatmul.f32.gmra.mxu2 %v194_v52  ;;  %v340_v60 = vadd.f32 %v1434_v32, %v339_v55 }
 0x162   :  { %853 = vmatmul.f32.gmra.mxu3 %v195_v53 }
 0x163   :  { %1058 = vst.msk [vmem:[%s2352_s3 + $0x248] sm:$0xff] %vm984_vm0, %v957_v59  ;;  %v657_v61 = vadd.f32 %v656_v56, %v340_v60  ;;  %386 = vmatmul.f32.gmra.mxu0 %v94_v57  ;;  %703 = vmatmul.f32.gmra.mxu1 %v95_v58  ;;  %v204_v59 = vld [vmem:[%s2350_s0 + $0x5f0] sm:$0xff]  ;;  %v205_v60 = vld [vmem:[%s2350_s0 + $0x5f8] sm:$0xff] }
 0x164   :  { %v489_v62 = vpop.f32.mrf.mxu2 }
 0x165   :  { %v806_v63 = vpop.f32.mrf.mxu3  ;;  %v490_v0 = vadd.f32 %v1434_v32, %v489_v62  ;;  %v908_v1 = vmax.f32 %v657_v61, 0.0 }
 0x167   :  { %1009 = vst.msk [vmem:[%s2352_s3 + $0xc0] sm:$0xff] %vm984_vm0, %v908_v1  ;;  %v807_v4 = vadd.f32 %v806_v63, %v490_v0  ;;  %v104_v0 = vld [vmem:[%s2350_s0 + $0x2d0] sm:$0xff]  ;;  %v105_v1 = vld [vmem:[%s2350_s0 + $0x2d8] sm:$0xff] }
 0x168   :  { %v342_v5 = vpop.f32.mrf.mxu0  ;;  %v659_v6 = vpop.f32.mrf.mxu1 }
 0x169   :  { %v958_v9 = vmax.f32 %v807_v4, 0.0  ;;  %539 = vmatmul.f32.gmra.mxu2 %v196_v2  ;;  %v343_v10 = vadd.f32 %v1434_v32, %v342_v5  ;;  %v198_v32 = vld [vmem:[%s2350_s0 + $0x5c0] sm:$0xff] }
 0x16a   :  { %856 = vmatmul.f32.gmra.mxu3 %v197_v3 }
 0x16b   :  { %1059 = vst.msk [vmem:[%s2352_s3 + $0x250] sm:$0xff] %vm984_vm0, %v958_v9  ;;  %v660_v11 = vadd.f32 %v659_v6, %v343_v10  ;;  %389 = vmatmul.f32.gmra.mxu0 %v96_v7  ;;  %706 = vmatmul.f32.gmra.mxu1 %v97_v8  ;;  %v206_v9 = vld [vmem:[%s2350_s0 + $0x600] sm:$0xff]  ;;  %v207_v10 = vld [vmem:[%s2350_s0 + $0x608] sm:$0xff] }
 0x16c   :  { %v492_v12 = vpop.f32.mrf.mxu2 }
 0x16d   :  { %v809_v13 = vpop.f32.mrf.mxu3  ;;  %v493_v15 = vadd.f32 %v2002_v14, %v492_v12  ;;  %v909_v16 = vmax.f32 %v660_v11, 0.0 }
 0x16f   :  { %1010 = vst.msk [vmem:[%s2352_s3 + $0xc8] sm:$0xff] %vm984_vm0, %v909_v16  ;;  %v810_v18 = vadd.f32 %v809_v13, %v493_v15  ;;  %v106_v15 = vld [vmem:[%s2350_s0 + $0x2e0] sm:$0xff]  ;;  %v107_v16 = vld [vmem:[%s2350_s0 + $0x2e8] sm:$0xff] }
 0x170   :  { %v345_v19 = vpop.f32.mrf.mxu0  ;;  %v662_v20 = vpop.f32.mrf.mxu1 }
 0x171   :  { %v959_v23 = vmax.f32 %v810_v18, 0.0  ;;  %542 = vmatmul.f32.gmra.mxu2 %v198_v32  ;;  %v346_v24 = vadd.f32 %v2002_v14, %v345_v19 }
 0x172   :  { %859 = vmatmul.f32.gmra.mxu3 %v199_v17 }
 0x173   :  { %1060 = vst.msk [vmem:[%s2352_s3 + $0x258] sm:$0xff] %vm984_vm0, %v959_v23  ;;  %v663_v25 = vadd.f32 %v662_v20, %v346_v24  ;;  %392 = vmatmul.f32.gmra.mxu0 %v98_v21  ;;  %709 = vmatmul.f32.gmra.mxu1 %v99_v22  ;;  %v208_v23 = vld [vmem:[%s2350_s0 + $0x610] sm:$0xff]  ;;  %v209_v24 = vld [vmem:[%s2350_s0 + $0x618] sm:$0xff] }
 0x174   :  { %v495_v26 = vpop.f32.mrf.mxu2 }
 0x175   :  { %v812_v27 = vpop.f32.mrf.mxu3  ;;  %v496_v28 = vadd.f32 %v2002_v14, %v495_v26  ;;  %v910_v29 = vmax.f32 %v663_v25, 0.0 }
 0x177   :  { %1011 = vst.msk [vmem:[%s2352_s3 + $0xd0] sm:$0xff] %vm984_vm0, %v910_v29  ;;  %v813_v33 = vadd.f32 %v812_v27, %v496_v28  ;;  %v108_v28 = vld [vmem:[%s2350_s0 + $0x2f0] sm:$0xff]  ;;  %v109_v29 = vld [vmem:[%s2350_s0 + $0x2f8] sm:$0xff] }
 0x178   :  { %v348_v34 = vpop.f32.mrf.mxu0  ;;  %v665_v35 = vpop.f32.mrf.mxu1 }
 0x179   :  { %v960_v38 = vmax.f32 %v813_v33, 0.0  ;;  %545 = vmatmul.f32.gmra.mxu2 %v200_v30  ;;  %v349_v39 = vadd.f32 %v2002_v14, %v348_v34 }
 0x17a   :  { %862 = vmatmul.f32.gmra.mxu3 %v201_v31 }
 0x17b   :  { %1061 = vst.msk [vmem:[%s2352_s3 + $0x260] sm:$0xff] %vm984_vm0, %v960_v38  ;;  %v666_v40 = vadd.f32 %v665_v35, %v349_v39  ;;  %395 = vmatmul.f32.gmra.mxu0 %v100_v36  ;;  %712 = vmatmul.f32.gmra.mxu1 %v101_v37  ;;  %v210_v38 = vld [vmem:[%s2350_s0 + $0x620] sm:$0xff]  ;;  %v211_v39 = vld [vmem:[%s2350_s0 + $0x628] sm:$0xff] }
 0x17c   :  { %v498_v41 = vpop.f32.mrf.mxu2 }
 0x17d   :  { %v815_v42 = vpop.f32.mrf.mxu3  ;;  %v499_v43 = vadd.f32 %v2002_v14, %v498_v41  ;;  %v911_v44 = vmax.f32 %v666_v40, 0.0 }
 0x17f   :  { %1012 = vst.msk [vmem:[%s2352_s3 + $0xd8] sm:$0xff] %vm984_vm0, %v911_v44  ;;  %v816_v47 = vadd.f32 %v815_v42, %v499_v43  ;;  %v110_v43 = vld [vmem:[%s2350_s0 + $0x300] sm:$0xff]  ;;  %v111_v44 = vld [vmem:[%s2350_s0 + $0x308] sm:$0xff] }
 0x180   :  { %v351_v48 = vpop.f32.mrf.mxu0  ;;  %v668_v49 = vpop.f32.mrf.mxu1 }
 0x181   :  { %v961_v52 = vmax.f32 %v816_v47, 0.0  ;;  %548 = vmatmul.f32.gmra.mxu2 %v202_v45  ;;  %v352_v53 = vadd.f32 %v2002_v14, %v351_v48 }
 0x182   :  { %865 = vmatmul.f32.gmra.mxu3 %v203_v46 }
 0x183   :  { %1062 = vst.msk [vmem:[%s2352_s3 + $0x268] sm:$0xff] %vm984_vm0, %v961_v52  ;;  %v669_v54 = vadd.f32 %v668_v49, %v352_v53  ;;  %398 = vmatmul.f32.gmra.mxu0 %v102_v50  ;;  %715 = vmatmul.f32.gmra.mxu1 %v103_v51  ;;  %v212_v52 = vld [vmem:[%s2350_s0 + $0x630] sm:$0xff]  ;;  %v213_v53 = vld [vmem:[%s2350_s0 + $0x638] sm:$0xff] }
 0x184   :  { %v501_v55 = vpop.f32.mrf.mxu2 }
 0x185   :  { %v818_v56 = vpop.f32.mrf.mxu3  ;;  %v502_v57 = vadd.f32 %v2002_v14, %v501_v55  ;;  %v912_v58 = vmax.f32 %v669_v54, 0.0 }
 0x187   :  { %1013 = vst.msk [vmem:[%s2352_s3 + $0xe0] sm:$0xff] %vm984_vm0, %v912_v58  ;;  %v819_v61 = vadd.f32 %v818_v56, %v502_v57  ;;  %v112_v57 = vld [vmem:[%s2350_s0 + $0x310] sm:$0xff]  ;;  %v113_v58 = vld [vmem:[%s2350_s0 + $0x318] sm:$0xff] }
 0x188   :  { %v354_v62 = vpop.f32.mrf.mxu0  ;;  %v671_v63 = vpop.f32.mrf.mxu1 }
 0x189   :  { %v962_v2 = vmax.f32 %v819_v61, 0.0  ;;  %551 = vmatmul.f32.gmra.mxu2 %v204_v59  ;;  %v355_v3 = vadd.f32 %v2002_v14, %v354_v62 }
 0x18a   :  { %868 = vmatmul.f32.gmra.mxu3 %v205_v60 }
 0x18b   :  { %1063 = vst.msk [vmem:[%s2352_s3 + $0x270] sm:$0xff] %vm984_vm0, %v962_v2  ;;  %v672_v4 = vadd.f32 %v671_v63, %v355_v3  ;;  %401 = vmatmul.f32.gmra.mxu0 %v104_v0  ;;  %718 = vmatmul.f32.gmra.mxu1 %v105_v1 }
 0x18c   :  { %v504_v5 = vpop.f32.mrf.mxu2 }
 0x18d   :  { %v821_v6 = vpop.f32.mrf.mxu3  ;;  %v505_v7 = vadd.f32 %v2002_v14, %v504_v5  ;;  %v913_v8 = vmax.f32 %v672_v4, 0.0 }
 0x18f   :  { %1014 = vst.msk [vmem:[%s2352_s3 + $0xe8] sm:$0xff] %vm984_vm0, %v913_v8  ;;  %v822_v11 = vadd.f32 %v821_v6, %v505_v7 }
 0x190   :  { %v357_v12 = vpop.f32.mrf.mxu0  ;;  %v674_v13 = vpop.f32.mrf.mxu1 }
 0x191   :  { %v963_v32 = vmax.f32 %v822_v11, 0.0  ;;  %554 = vmatmul.f32.gmra.mxu2 %v206_v9  ;;  %v358_v17 = vadd.f32 %v2002_v14, %v357_v12 }
 0x192   :  { %871 = vmatmul.f32.gmra.mxu3 %v207_v10 }
 0x193   :  { %1064 = vst.msk [vmem:[%s2352_s3 + $0x278] sm:$0xff] %vm984_vm0, %v963_v32  ;;  %v675_v18 = vadd.f32 %v674_v13, %v358_v17  ;;  %404 = vmatmul.f32.gmra.mxu0 %v106_v15  ;;  %721 = vmatmul.f32.gmra.mxu1 %v107_v16 }
 0x194   :  { %v507_v19 = vpop.f32.mrf.mxu2 }
 0x195   :  { %v824_v20 = vpop.f32.mrf.mxu3  ;;  %v508_v21 = vadd.f32 %v2002_v14, %v507_v19  ;;  %v914_v22 = vmax.f32 %v675_v18, 0.0 }
 0x197   :  { %1015 = vst.msk [vmem:[%s2352_s3 + $0xf0] sm:$0xff] %vm984_vm0, %v914_v22  ;;  %v825_v25 = vadd.f32 %v824_v20, %v508_v21 }
 0x198   :  { %v360_v26 = vpop.f32.mrf.mxu0  ;;  %v677_v27 = vpop.f32.mrf.mxu1 }
 0x199   :  { %v964_v30 = vmax.f32 %v825_v25, 0.0  ;;  %557 = vmatmul.f32.gmra.mxu2 %v208_v23  ;;  %v361_v31 = vadd.f32 %v2002_v14, %v360_v26 }
 0x19a   :  { %874 = vmatmul.f32.gmra.mxu3 %v209_v24 }
 0x19b   :  { %1065 = vst.msk [vmem:[%s2352_s3 + $0x280] sm:$0xff] %vm984_vm0, %v964_v30  ;;  %v678_v33 = vadd.f32 %v677_v27, %v361_v31  ;;  %407 = vmatmul.f32.gmra.mxu0 %v108_v28  ;;  %724 = vmatmul.f32.gmra.mxu1 %v109_v29 }
 0x19c   :  { %v510_v34 = vpop.f32.mrf.mxu2 }
 0x19d   :  { %v827_v35 = vpop.f32.mrf.mxu3  ;;  %v511_v36 = vadd.f32 %v2002_v14, %v510_v34  ;;  %v915_v37 = vmax.f32 %v678_v33, 0.0 }
 0x19f   :  { %1016 = vst.msk [vmem:[%s2352_s3 + $0xf8] sm:$0xff] %vm984_vm0, %v915_v37  ;;  %v828_v40 = vadd.f32 %v827_v35, %v511_v36 }
 0x1a0   :  { %v363_v41 = vpop.f32.mrf.mxu0  ;;  %v680_v42 = vpop.f32.mrf.mxu1 }
 0x1a1   :  { %v965_v45 = vmax.f32 %v828_v40, 0.0  ;;  %560 = vmatmul.f32.gmra.mxu2 %v210_v38  ;;  %v364_v46 = vadd.f32 %v2002_v14, %v363_v41 }
 0x1a2   :  { %877 = vmatmul.f32.gmra.mxu3 %v211_v39 }
 0x1a3   :  { %1066 = vst.msk [vmem:[%s2352_s3 + $0x288] sm:$0xff] %vm984_vm0, %v965_v45  ;;  %v681_v47 = vadd.f32 %v680_v42, %v364_v46  ;;  %410 = vmatmul.f32.gmra.mxu0 %v110_v43  ;;  %727 = vmatmul.f32.gmra.mxu1 %v111_v44 }
 0x1a4   :  { %v513_v48 = vpop.f32.mrf.mxu2 }
 0x1a5   :  { %v830_v49 = vpop.f32.mrf.mxu3  ;;  %v514_v50 = vadd.f32 %v2002_v14, %v513_v48  ;;  %v916_v51 = vmax.f32 %v681_v47, 0.0 }
 0x1a7   :  { %1017 = vst.msk [vmem:[%s2352_s3 + $0x100] sm:$0xff] %vm984_vm0, %v916_v51  ;;  %v831_v54 = vadd.f32 %v830_v49, %v514_v50 }
 0x1a8   :  { %v366_v55 = vpop.f32.mrf.mxu0  ;;  %v683_v56 = vpop.f32.mrf.mxu1 }
 0x1a9   :  { %v966_v59 = vmax.f32 %v831_v54, 0.0  ;;  %563 = vmatmul.f32.gmra.mxu2 %v212_v52  ;;  %v367_v60 = vadd.f32 %v2002_v14, %v366_v55 }
 0x1aa   :  { %880 = vmatmul.f32.gmra.mxu3 %v213_v53 }
 0x1ab   :  { %1067 = vst.msk [vmem:[%s2352_s3 + $0x290] sm:$0xff] %vm984_vm0, %v966_v59  ;;  %v684_v61 = vadd.f32 %v683_v56, %v367_v60  ;;  %413 = vmatmul.f32.gmra.mxu0 %v112_v57  ;;  %730 = vmatmul.f32.gmra.mxu1 %v113_v58 }
 0x1ac   :  { %v516_v62 = vpop.f32.mrf.mxu2 }
 0x1ad   :  { %v833_v63 = vpop.f32.mrf.mxu3  ;;  %v517_v0 = vadd.f32 %v2002_v14, %v516_v62  ;;  %v917_v1 = vmax.f32 %v684_v61, 0.0 }
 0x1af   :  { %1018 = vst.msk [vmem:[%s2352_s3 + $0x108] sm:$0xff] %vm984_vm0, %v917_v1  ;;  %v834_v2 = vadd.f32 %v833_v63, %v517_v0 }
 0x1b0   :  { %v369_v3 = vpop.f32.mrf.mxu0  ;;  %v686_v4 = vpop.f32.mrf.mxu1 }
 0x1b1   :  { %v967_v5 = vmax.f32 %v834_v2, 0.0  ;;  %v370_v6 = vadd.f32 %v2002_v14, %v369_v3 }
 0x1b3   :  { %1068 = vst.msk [vmem:[%s2352_s3 + $0x298] sm:$0xff] %vm984_vm0, %v967_v5  ;;  %v687_v7 = vadd.f32 %v686_v4, %v370_v6 }
 0x1b4   :  { %v519_v8 = vpop.f32.mrf.mxu2 }
 0x1b5   :  { %v836_v9 = vpop.f32.mrf.mxu3  ;;  %v520_v10 = vadd.f32 %v2002_v14, %v519_v8  ;;  %v918_v11 = vmax.f32 %v687_v7, 0.0 }
 0x1b7   :  { %1019 = vst.msk [vmem:[%s2352_s3 + $0x110] sm:$0xff] %vm984_vm0, %v918_v11  ;;  %v837_v12 = vadd.f32 %v836_v9, %v520_v10 }
 0x1b8   :  { %v372_v13 = vpop.f32.mrf.mxu0  ;;  %v689_v15 = vpop.f32.mrf.mxu1 }
 0x1b9   :  { %v968_v16 = vmax.f32 %v837_v12, 0.0  ;;  %v373_v32 = vadd.f32 %v2002_v14, %v372_v13 }
 0x1bb   :  { %1069 = vst.msk [vmem:[%s2352_s3 + $0x2a0] sm:$0xff] %vm984_vm0, %v968_v16  ;;  %v690_v17 = vadd.f32 %v689_v15, %v373_v32 }
 0x1bc   :  { %v522_v18 = vpop.f32.mrf.mxu2 }
 0x1bd   :  { %v839_v19 = vpop.f32.mrf.mxu3  ;;  %v523_v20 = vadd.f32 %v2002_v14, %v522_v18  ;;  %v919_v21 = vmax.f32 %v690_v17, 0.0 }
 0x1bf   :  { %1020 = vst.msk [vmem:[%s2352_s3 + $0x118] sm:$0xff] %vm984_vm0, %v919_v21  ;;  %v840_v22 = vadd.f32 %v839_v19, %v523_v20 }
 0x1c0   :  { %v375_v23 = vpop.f32.mrf.mxu0  ;;  %v692_v24 = vpop.f32.mrf.mxu1 }
 0x1c1   :  { %v969_v25 = vmax.f32 %v840_v22, 0.0  ;;  %v376_v26 = vadd.f32 %v2002_v14, %v375_v23 }
 0x1c3   :  { %1070 = vst.msk [vmem:[%s2352_s3 + $0x2a8] sm:$0xff] %vm984_vm0, %v969_v25  ;;  %v693_v27 = vadd.f32 %v692_v24, %v376_v26 }
 0x1c4   :  { %v525_v28 = vpop.f32.mrf.mxu2 }
 0x1c5   :  { %v842_v29 = vpop.f32.mrf.mxu3  ;;  %v526_v30 = vadd.f32 %v2002_v14, %v525_v28  ;;  %v920_v31 = vmax.f32 %v693_v27, 0.0 }
 0x1c7   :  { %1021 = vst.msk [vmem:[%s2352_s3 + $0x120] sm:$0xff] %vm984_vm0, %v920_v31  ;;  %v843_v33 = vadd.f32 %v842_v29, %v526_v30 }
 0x1c8   :  { %v378_v34 = vpop.f32.mrf.mxu0  ;;  %v695_v35 = vpop.f32.mrf.mxu1 }
 0x1c9   :  { %v970_v36 = vmax.f32 %v843_v33, 0.0  ;;  %v379_v37 = vadd.f32 %v2002_v14, %v378_v34 }
 0x1cb   :  { %1071 = vst.msk [vmem:[%s2352_s3 + $0x2b0] sm:$0xff] %vm984_vm0, %v970_v36  ;;  %v696_v38 = vadd.f32 %v695_v35, %v379_v37 }
 0x1cc   :  { %v528_v39 = vpop.f32.mrf.mxu2 }
 0x1cd   :  { %v845_v40 = vpop.f32.mrf.mxu3  ;;  %v529_v41 = vadd.f32 %v2002_v14, %v528_v39  ;;  %v921_v42 = vmax.f32 %v696_v38, 0.0 }
 0x1cf   :  { %1022 = vst.msk [vmem:[%s2352_s3 + $0x128] sm:$0xff] %vm984_vm0, %v921_v42  ;;  %v846_v43 = vadd.f32 %v845_v40, %v529_v41 }
 0x1d0   :  { %v381_v44 = vpop.f32.mrf.mxu0  ;;  %v698_v45 = vpop.f32.mrf.mxu1 }
 0x1d1   :  { %v971_v46 = vmax.f32 %v846_v43, 0.0  ;;  %v382_v47 = vadd.f32 %v2002_v14, %v381_v44 }
 0x1d3   :  { %1072 = vst.msk [vmem:[%s2352_s3 + $0x2b8] sm:$0xff] %vm984_vm0, %v971_v46  ;;  %v699_v48 = vadd.f32 %v698_v45, %v382_v47 }
 0x1d4   :  { %v531_v49 = vpop.f32.mrf.mxu2 }
 0x1d5   :  { %v848_v50 = vpop.f32.mrf.mxu3  ;;  %v532_v51 = vadd.f32 %v2002_v14, %v531_v49  ;;  %v922_v52 = vmax.f32 %v699_v48, 0.0 }
 0x1d7   :  { %1023 = vst.msk [vmem:[%s2352_s3 + $0x130] sm:$0xff] %vm984_vm0, %v922_v52  ;;  %v849_v53 = vadd.f32 %v848_v50, %v532_v51 }
 0x1d8   :  { %v384_v54 = vpop.f32.mrf.mxu0  ;;  %v701_v55 = vpop.f32.mrf.mxu1 }
 0x1d9   :  { %v972_v56 = vmax.f32 %v849_v53, 0.0  ;;  %v385_v57 = vadd.f32 %v2002_v14, %v384_v54 }
 0x1db   :  { %1073 = vst.msk [vmem:[%s2352_s3 + $0x2c0] sm:$0xff] %vm984_vm0, %v972_v56  ;;  %v702_v58 = vadd.f32 %v701_v55, %v385_v57 }
 0x1dc   :  { %v534_v59 = vpop.f32.mrf.mxu2 }
 0x1dd   :  { %v851_v60 = vpop.f32.mrf.mxu3  ;;  %v535_v61 = vadd.f32 %v2002_v14, %v534_v59  ;;  %v923_v62 = vmax.f32 %v702_v58, 0.0 }
 0x1df   :  { %1024 = vst.msk [vmem:[%s2352_s3 + $0x138] sm:$0xff] %vm984_vm0, %v923_v62  ;;  %v852_v63 = vadd.f32 %v851_v60, %v535_v61 }
 0x1e0   :  { %v387_v0 = vpop.f32.mrf.mxu0  ;;  %v704_v1 = vpop.f32.mrf.mxu1 }
 0x1e1   :  { %v973_v2 = vmax.f32 %v852_v63, 0.0  ;;  %v388_v3 = vadd.f32 %v2002_v14, %v387_v0 }
 0x1e3   :  { %1074 = vst.msk [vmem:[%s2352_s3 + $0x2c8] sm:$0xff] %vm984_vm0, %v973_v2  ;;  %v705_v4 = vadd.f32 %v704_v1, %v388_v3 }
 0x1e4   :  { %v537_v5 = vpop.f32.mrf.mxu2 }
 0x1e5   :  { %v854_v6 = vpop.f32.mrf.mxu3  ;;  %v538_v7 = vadd.f32 %v2002_v14, %v537_v5  ;;  %v924_v8 = vmax.f32 %v705_v4, 0.0 }
 0x1e7   :  { %1025 = vst.msk [vmem:[%s2352_s3 + $0x140] sm:$0xff] %vm984_vm0, %v924_v8  ;;  %v855_v9 = vadd.f32 %v854_v6, %v538_v7 }
 0x1e8   :  { %v390_v10 = vpop.f32.mrf.mxu0  ;;  %v707_v11 = vpop.f32.mrf.mxu1 }
 0x1e9   :  { %v974_v12 = vmax.f32 %v855_v9, 0.0  ;;  %v391_v13 = vadd.f32 %v2002_v14, %v390_v10 }
 0x1eb   :  { %1075 = vst.msk [vmem:[%s2352_s3 + $0x2d0] sm:$0xff] %vm984_vm0, %v974_v12  ;;  %v708_v15 = vadd.f32 %v707_v11, %v391_v13 }
 0x1ec   :  { %v540_v16 = vpop.f32.mrf.mxu2 }
 0x1ed   :  { %v857_v32 = vpop.f32.mrf.mxu3  ;;  %v541_v17 = vadd.f32 %v2002_v14, %v540_v16  ;;  %v925_v18 = vmax.f32 %v708_v15, 0.0 }
 0x1ef   :  { %1026 = vst.msk [vmem:[%s2352_s3 + $0x148] sm:$0xff] %vm984_vm0, %v925_v18  ;;  %v858_v19 = vadd.f32 %v857_v32, %v541_v17 }
 0x1f0   :  { %v393_v20 = vpop.f32.mrf.mxu0  ;;  %v710_v21 = vpop.f32.mrf.mxu1 }
 0x1f1   :  { %v975_v22 = vmax.f32 %v858_v19, 0.0  ;;  %v394_v23 = vadd.f32 %v2002_v14, %v393_v20 }
 0x1f3   :  { %1076 = vst.msk [vmem:[%s2352_s3 + $0x2d8] sm:$0xff] %vm984_vm0, %v975_v22  ;;  %v711_v24 = vadd.f32 %v710_v21, %v394_v23 }
 0x1f4   :  { %v543_v25 = vpop.f32.mrf.mxu2 }
 0x1f5   :  { %v860_v26 = vpop.f32.mrf.mxu3  ;;  %v544_v27 = vadd.f32 %v2002_v14, %v543_v25  ;;  %v926_v28 = vmax.f32 %v711_v24, 0.0 }
 0x1f7   :  { %1027 = vst.msk [vmem:[%s2352_s3 + $0x150] sm:$0xff] %vm984_vm0, %v926_v28  ;;  %v861_v29 = vadd.f32 %v860_v26, %v544_v27 }
 0x1f8   :  { %v396_v30 = vpop.f32.mrf.mxu0  ;;  %v713_v31 = vpop.f32.mrf.mxu1 }
 0x1f9   :  { %v976_v33 = vmax.f32 %v861_v29, 0.0  ;;  %v397_v34 = vadd.f32 %v2002_v14, %v396_v30 }
 0x1fb   :  { %1077 = vst.msk [vmem:[%s2352_s3 + $0x2e0] sm:$0xff] %vm984_vm0, %v976_v33  ;;  %v714_v35 = vadd.f32 %v713_v31, %v397_v34 }
 0x1fc   :  { %v546_v36 = vpop.f32.mrf.mxu2 }
 0x1fd   :  { %v863_v37 = vpop.f32.mrf.mxu3  ;;  %v547_v38 = vadd.f32 %v2002_v14, %v546_v36  ;;  %v927_v39 = vmax.f32 %v714_v35, 0.0 }
 0x1ff   :  { %1028 = vst.msk [vmem:[%s2352_s3 + $0x158] sm:$0xff] %vm984_vm0, %v927_v39  ;;  %v864_v40 = vadd.f32 %v863_v37, %v547_v38 }
 0x200   :  { %v399_v41 = vpop.f32.mrf.mxu0  ;;  %v716_v42 = vpop.f32.mrf.mxu1 }
 0x201   :  { %v977_v43 = vmax.f32 %v864_v40, 0.0  ;;  %v400_v44 = vadd.f32 %v2002_v14, %v399_v41 }
 0x203   :  { %1078 = vst.msk [vmem:[%s2352_s3 + $0x2e8] sm:$0xff] %vm984_vm0, %v977_v43  ;;  %v717_v45 = vadd.f32 %v716_v42, %v400_v44 }
 0x204   :  { %v549_v46 = vpop.f32.mrf.mxu2 }
 0x205   :  { %v866_v47 = vpop.f32.mrf.mxu3  ;;  %v550_v48 = vadd.f32 %v2002_v14, %v549_v46  ;;  %v928_v49 = vmax.f32 %v717_v45, 0.0 }
 0x207   :  { %1029 = vst.msk [vmem:[%s2352_s3 + $0x160] sm:$0xff] %vm984_vm0, %v928_v49  ;;  %v867_v50 = vadd.f32 %v866_v47, %v550_v48 }
 0x208   :  { %v402_v51 = vpop.f32.mrf.mxu0  ;;  %v719_v52 = vpop.f32.mrf.mxu1 }
 0x209   :  { %v978_v53 = vmax.f32 %v867_v50, 0.0  ;;  %v403_v54 = vadd.f32 %v2002_v14, %v402_v51 }
 0x20b   :  { %1079 = vst.msk [vmem:[%s2352_s3 + $0x2f0] sm:$0xff] %vm984_vm0, %v978_v53  ;;  %v720_v55 = vadd.f32 %v719_v52, %v403_v54 }
 0x20c   :  { %v552_v56 = vpop.f32.mrf.mxu2 }
 0x20d   :  { %v869_v57 = vpop.f32.mrf.mxu3  ;;  %v553_v58 = vadd.f32 %v2002_v14, %v552_v56  ;;  %v929_v59 = vmax.f32 %v720_v55, 0.0 }
 0x20f   :  { %1030 = vst.msk [vmem:[%s2352_s3 + $0x168] sm:$0xff] %vm984_vm0, %v929_v59  ;;  %v870_v60 = vadd.f32 %v869_v57, %v553_v58 }
 0x210   :  { %v405_v61 = vpop.f32.mrf.mxu0  ;;  %v722_v62 = vpop.f32.mrf.mxu1 }
 0x211   :  { %v979_v63 = vmax.f32 %v870_v60, 0.0  ;;  %v406_v0 = vadd.f32 %v2002_v14, %v405_v61 }
 0x213   :  { %1080 = vst.msk [vmem:[%s2352_s3 + $0x2f8] sm:$0xff] %vm984_vm0, %v979_v63  ;;  %v723_v1 = vadd.f32 %v722_v62, %v406_v0 }
 0x214   :  { %v555_v2 = vpop.f32.mrf.mxu2 }
 0x215   :  { %v872_v3 = vpop.f32.mrf.mxu3  ;;  %v556_v4 = vadd.f32 %v2002_v14, %v555_v2  ;;  %v930_v5 = vmax.f32 %v723_v1, 0.0 }
 0x217   :  { %1031 = vst.msk [vmem:[%s2352_s3 + $0x170] sm:$0xff] %vm984_vm0, %v930_v5  ;;  %v873_v6 = vadd.f32 %v872_v3, %v556_v4 }
 0x218   :  { %v408_v7 = vpop.f32.mrf.mxu0  ;;  %v725_v8 = vpop.f32.mrf.mxu1 }
 0x219   :  { %v980_v9 = vmax.f32 %v873_v6, 0.0  ;;  %v409_v10 = vadd.f32 %v2002_v14, %v408_v7 }
 0x21b   :  { %1081 = vst.msk [vmem:[%s2352_s3 + $0x300] sm:$0xff] %vm984_vm0, %v980_v9  ;;  %v726_v11 = vadd.f32 %v725_v8, %v409_v10 }
 0x21c   :  { %v558_v12 = vpop.f32.mrf.mxu2 }
 0x21d   :  { %v875_v13 = vpop.f32.mrf.mxu3  ;;  %v559_v15 = vadd.f32 %v2002_v14, %v558_v12  ;;  %v931_v16 = vmax.f32 %v726_v11, 0.0 }
 0x21f   :  { %1032 = vst.msk [vmem:[%s2352_s3 + $0x178] sm:$0xff] %vm984_vm0, %v931_v16  ;;  %v876_v32 = vadd.f32 %v875_v13, %v559_v15 }
 0x220   :  { %v411_v17 = vpop.f32.mrf.mxu0  ;;  %v728_v18 = vpop.f32.mrf.mxu1 }
 0x221   :  { %v981_v19 = vmax.f32 %v876_v32, 0.0  ;;  %v412_v20 = vadd.f32 %v2002_v14, %v411_v17 }
 0x223   :  { %1082 = vst.msk [vmem:[%s2352_s3 + $0x308] sm:$0xff] %vm984_vm0, %v981_v19  ;;  %v729_v21 = vadd.f32 %v728_v18, %v412_v20 }
 0x224   :  { %v561_v22 = vpop.f32.mrf.mxu2 }
 0x225   :  { %v878_v23 = vpop.f32.mrf.mxu3  ;;  %v562_v24 = vadd.f32 %v2002_v14, %v561_v22  ;;  %v932_v25 = vmax.f32 %v729_v21, 0.0 }
 0x227   :  { %1033 = vst.msk [vmem:[%s2352_s3 + $0x180] sm:$0xff] %vm984_vm0, %v932_v25  ;;  %v879_v26 = vadd.f32 %v878_v23, %v562_v24 }
 0x228   :  { %v414_v27 = vpop.f32.mrf.mxu0  ;;  %v731_v28 = vpop.f32.mrf.mxu1 }
 0x229   :  { %v982_v29 = vmax.f32 %v879_v26, 0.0  ;;  %v415_v30 = vadd.f32 %v2002_v14, %v414_v27 }
 0x22b   :  { %1083 = vst.msk [vmem:[%s2352_s3 + $0x310] sm:$0xff] %vm984_vm0, %v982_v29  ;;  %v732_v31 = vadd.f32 %v731_v28, %v415_v30 }
 0x22c   :  { %v564_v33 = vpop.f32.mrf.mxu2 }
 0x22d   :  { %v881_v34 = vpop.f32.mrf.mxu3  ;;  %v565_v35 = vadd.f32 %v2002_v14, %v564_v33  ;;  %v933_v36 = vmax.f32 %v732_v31, 0.0 }
 0x22f   :  { %1034 = vst.msk [vmem:[%s2352_s3 + $0x188] sm:$0xff] %vm984_vm0, %v933_v36  ;;  %v882_v37 = vadd.f32 %v881_v34, %v565_v35 }
 0x231   :  { %v983_v38 = vmax.f32 %v882_v37, 0.0 }
 0x233   :  { %1084 = vst.msk [vmem:[%s2352_s3 + $0x318] sm:$0xff] %vm984_vm0, %v983_v38 }

// kernel: noisy_duel_net_forward.5
= control target key start
LH: loop header
LB: loop body
LE: loop exit
PB: predicated region body
PF: predicated region fallthrough
CT: control target
= control target key end

     0   :  { %vm507_vm0 = vcmask 523264   ;;  %s1108_s1 = inlined_call_operand.vmem [shape: f32[512,64], index: 1, kind: input, shape index: {}]   ;;  %s1109_s0 = inlined_call_operand.vmem [shape: f32[168,512], index: 0, kind: input, shape index: {}]   ;;  %s1110_s2 = inlined_call_operand.vmem [shape: f32[1,64], index: 2, kind: input, shape index: {}]   ;;  %s1111_s3 = inlined_call_operand.vmem [shape: f32[168,64], index: 3, kind: output, shape index: {}]  }
   0x1   :  { %v145_v0 = vld [vmem:[%s1108_s1 + $0x178] sm:$0xff]  ;;  %v144_v2 = vld [vmem:[%s1108_s1 + $0x170] sm:$0xff]  ;;  %v143_v6 = vld [vmem:[%s1108_s1 + $0x168] sm:$0xff] }
   0x2   :  { %v113_v1 = vld [vmem:[%s1108_s1 + $0x78] sm:$0xff]  ;;  %326 = vmatpush.msra.mxu2 %v145_v0  ;;  %v112_v4 = vld [vmem:[%s1108_s1 + $0x70] sm:$0xff]  ;;  %v111_v8 = vld [vmem:[%s1108_s1 + $0x68] sm:$0xff] }
   0x3   :  { %166 = vmatpush.msra.mxu0 %v113_v1  ;;  %v161_v3 = vld [vmem:[%s1108_s1 + $0x1f8] sm:$0xff]  ;;  %v160_v7 = vld [vmem:[%s1108_s1 + $0x1f0] sm:$0xff]  ;;  %v159_v10 = vld [vmem:[%s1108_s1 + $0x1e8] sm:$0xff] }
   0x4   :  { %v129_v5 = vld [vmem:[%s1108_s1 + $0xf8] sm:$0xff]  ;;  %406 = vmatpush.msra.mxu3 %v161_v3  ;;  %327 = vmatpush.msra.mxu2 %v144_v2  ;;  %v128_v9 = vld [vmem:[%s1108_s1 + $0xf0] sm:$0xff]  ;;  %v142_v11 = vld [vmem:[%s1108_s1 + $0x160] sm:$0xff] }
   0x5   :  { %246 = vmatpush.msra.mxu1 %v129_v5  ;;  %167 = vmatpush.msra.mxu0 %v112_v4  ;;  %v110_v12 = vld [vmem:[%s1108_s1 + $0x60] sm:$0xff]  ;;  %v127_v13 = vld [vmem:[%s1108_s1 + $0xe8] sm:$0xff]  ;;  %v141_v16 = vld [vmem:[%s1108_s1 + $0x158] sm:$0xff] }
   0x6   :  { %407 = vmatpush.msra.mxu3 %v160_v7  ;;  %328 = vmatpush.msra.mxu2 %v143_v6  ;;  %v158_v14 = vld [vmem:[%s1108_s1 + $0x1e0] sm:$0xff]  ;;  %v109_v17 = vld [vmem:[%s1108_s1 + $0x58] sm:$0xff]  ;;  %v140_v20 = vld [vmem:[%s1108_s1 + $0x150] sm:$0xff] }
   0x7   :  { %247 = vmatpush.msra.mxu1 %v128_v9  ;;  %168 = vmatpush.msra.mxu0 %v111_v8  ;;  %v126_v15 = vld [vmem:[%s1108_s1 + $0xe0] sm:$0xff]  ;;  %v157_v18 = vld [vmem:[%s1108_s1 + $0x1d8] sm:$0xff]  ;;  %v108_v21 = vld [vmem:[%s1108_s1 + $0x50] sm:$0xff] }
   0x8   :  { %408 = vmatpush.msra.mxu3 %v159_v10  ;;  %329 = vmatpush.msra.mxu2 %v142_v11  ;;  %v125_v19 = vld [vmem:[%s1108_s1 + $0xd8] sm:$0xff]  ;;  %v156_v22 = vld [vmem:[%s1108_s1 + $0x1d0] sm:$0xff]  ;;  %v139_v24 = vld [vmem:[%s1108_s1 + $0x148] sm:$0xff] }
   0x9   :  { %248 = vmatpush.msra.mxu1 %v127_v13  ;;  %169 = vmatpush.msra.mxu0 %v110_v12  ;;  %v124_v23 = vld [vmem:[%s1108_s1 + $0xd0] sm:$0xff]  ;;  %v107_v25 = vld [vmem:[%s1108_s1 + $0x48] sm:$0xff]  ;;  %v138_v28 = vld [vmem:[%s1108_s1 + $0x140] sm:$0xff] }
   0xa   :  { %409 = vmatpush.msra.mxu3 %v158_v14  ;;  %330 = vmatpush.msra.mxu2 %v141_v16  ;;  %v155_v26 = vld [vmem:[%s1108_s1 + $0x1c8] sm:$0xff]  ;;  %v106_v29 = vld [vmem:[%s1108_s1 + $0x40] sm:$0xff]  ;;  %v137_v32 = vld [vmem:[%s1108_s1 + $0x138] sm:$0xff] }
   0xb   :  { %249 = vmatpush.msra.mxu1 %v126_v15  ;;  %170 = vmatpush.msra.mxu0 %v109_v17  ;;  %v123_v27 = vld [vmem:[%s1108_s1 + $0xc8] sm:$0xff]  ;;  %v154_v30 = vld [vmem:[%s1108_s1 + $0x1c0] sm:$0xff]  ;;  %v105_v33 = vld [vmem:[%s1108_s1 + $0x38] sm:$0xff] }
   0xc   :  { %410 = vmatpush.msra.mxu3 %v157_v18  ;;  %331 = vmatpush.msra.mxu2 %v140_v20  ;;  %v122_v31 = vld [vmem:[%s1108_s1 + $0xc0] sm:$0xff]  ;;  %v153_v34 = vld [vmem:[%s1108_s1 + $0x1b8] sm:$0xff]  ;;  %v136_v36 = vld [vmem:[%s1108_s1 + $0x130] sm:$0xff] }
   0xd   :  { %250 = vmatpush.msra.mxu1 %v125_v19  ;;  %171 = vmatpush.msra.mxu0 %v108_v21  ;;  %v121_v35 = vld [vmem:[%s1108_s1 + $0xb8] sm:$0xff]  ;;  %v104_v37 = vld [vmem:[%s1108_s1 + $0x30] sm:$0xff]  ;;  %v135_v40 = vld [vmem:[%s1108_s1 + $0x128] sm:$0xff] }
   0xe   :  { %411 = vmatpush.msra.mxu3 %v156_v22  ;;  %332 = vmatpush.msra.mxu2 %v139_v24  ;;  %v152_v38 = vld [vmem:[%s1108_s1 + $0x1b0] sm:$0xff]  ;;  %v103_v41 = vld [vmem:[%s1108_s1 + $0x28] sm:$0xff]  ;;  %v134_v44 = vld [vmem:[%s1108_s1 + $0x120] sm:$0xff] }
   0xf   :  { %251 = vmatpush.msra.mxu1 %v124_v23  ;;  %172 = vmatpush.msra.mxu0 %v107_v25  ;;  %v120_v39 = vld [vmem:[%s1108_s1 + $0xb0] sm:$0xff]  ;;  %v151_v42 = vld [vmem:[%s1108_s1 + $0x1a8] sm:$0xff]  ;;  %v102_v45 = vld [vmem:[%s1108_s1 + $0x20] sm:$0xff] }
  0x10   :  { %412 = vmatpush.msra.mxu3 %v155_v26  ;;  %333 = vmatpush.msra.mxu2 %v138_v28  ;;  %v119_v43 = vld [vmem:[%s1108_s1 + $0xa8] sm:$0xff]  ;;  %v150_v46 = vld [vmem:[%s1108_s1 + $0x1a0] sm:$0xff]  ;;  %v133_v48 = vld [vmem:[%s1108_s1 + $0x118] sm:$0xff] }
  0x11   :  { %252 = vmatpush.msra.mxu1 %v123_v27  ;;  %173 = vmatpush.msra.mxu0 %v106_v29  ;;  %v118_v47 = vld [vmem:[%s1108_s1 + $0xa0] sm:$0xff]  ;;  %v101_v49 = vld [vmem:[%s1108_s1 + $0x18] sm:$0xff]  ;;  %v132_v52 = vld [vmem:[%s1108_s1 + $0x110] sm:$0xff] }
  0x12   :  { %413 = vmatpush.msra.mxu3 %v154_v30  ;;  %334 = vmatpush.msra.mxu2 %v137_v32  ;;  %v149_v50 = vld [vmem:[%s1108_s1 + $0x198] sm:$0xff]  ;;  %v100_v53 = vld [vmem:[%s1108_s1 + $0x10] sm:$0xff]  ;;  %v131_v56 = vld [vmem:[%s1108_s1 + $0x108] sm:$0xff] }
  0x13   :  { %253 = vmatpush.msra.mxu1 %v122_v31  ;;  %174 = vmatpush.msra.mxu0 %v105_v33  ;;  %v117_v51 = vld [vmem:[%s1108_s1 + $0x98] sm:$0xff]  ;;  %v148_v54 = vld [vmem:[%s1108_s1 + $0x190] sm:$0xff]  ;;  %v99_v57 = vld [vmem:[%s1108_s1 + $0x8] sm:$0xff] }
  0x14   :  { %414 = vmatpush.msra.mxu3 %v153_v34  ;;  %335 = vmatpush.msra.mxu2 %v136_v36  ;;  %v116_v55 = vld [vmem:[%s1108_s1 + $0x90] sm:$0xff]  ;;  %v147_v58 = vld [vmem:[%s1108_s1 + $0x188] sm:$0xff]  ;;  %v130_v60 = vld [vmem:[%s1108_s1 + $0x100] sm:$0xff] }
  0x15   :  { %254 = vmatpush.msra.mxu1 %v121_v35  ;;  %175 = vmatpush.msra.mxu0 %v104_v37  ;;  %v115_v59 = vld [vmem:[%s1108_s1 + $0x88] sm:$0xff]  ;;  %v98_v61 = vld [vmem:[%s1108_s1] sm:$0xff]  ;;  %v16_v62 = vld [vmem:[%s1109_s0 + $0x10] sm:$0xff] }
  0x16   :  { %415 = vmatpush.msra.mxu3 %v152_v38  ;;  %336 = vmatpush.msra.mxu2 %v135_v40  ;;  %v146_v63 = vld [vmem:[%s1108_s1 + $0x180] sm:$0xff]  ;;  %v17_v1 = vld [vmem:[%s1109_s0 + $0x18] sm:$0xff]  ;;  %v15_v3 = vld [vmem:[%s1109_s0 + $0x8] sm:$0xff] }
  0x17   :  { %255 = vmatpush.msra.mxu1 %v120_v39  ;;  %176 = vmatpush.msra.mxu0 %v103_v41  ;;  %v14_v0 = vld [vmem:[%s1109_s0] sm:$0xff]  ;;  %v20_v4 = vld [vmem:[%s1109_s0 + $0x30] sm:$0xff]  ;;  %v21_v6 = vld [vmem:[%s1109_s0 + $0x38] sm:$0xff] }
  0x18   :  { %416 = vmatpush.msra.mxu3 %v151_v42  ;;  %337 = vmatpush.msra.mxu2 %v134_v44  ;;  %v114_v2 = vld [vmem:[%s1108_s1 + $0x80] sm:$0xff]  ;;  %v19_v7 = vld [vmem:[%s1109_s0 + $0x28] sm:$0xff]  ;;  %v24_v8 = vld [vmem:[%s1109_s0 + $0x50] sm:$0xff] }
  0x19   :  { %256 = vmatpush.msra.mxu1 %v119_v43  ;;  %177 = vmatpush.msra.mxu0 %v102_v45  ;;  %v18_v5 = vld [vmem:[%s1109_s0 + $0x20] sm:$0xff]  ;;  %v25_v10 = vld [vmem:[%s1109_s0 + $0x58] sm:$0xff]  ;;  %v23_v11 = vld [vmem:[%s1109_s0 + $0x48] sm:$0xff] }
  0x1a   :  { %417 = vmatpush.msra.mxu3 %v150_v46  ;;  %338 = vmatpush.msra.mxu2 %v133_v48  ;;  %v22_v9 = vld [vmem:[%s1109_s0 + $0x40] sm:$0xff]  ;;  %v28_v12 = vld [vmem:[%s1109_s0 + $0x70] sm:$0xff]  ;;  %v29_v14 = vld [vmem:[%s1109_s0 + $0x78] sm:$0xff] }
  0x1b   :  { %257 = vmatpush.msra.mxu1 %v118_v47  ;;  %178 = vmatpush.msra.mxu0 %v101_v49  ;;  %v26_v13 = vld [vmem:[%s1109_s0 + $0x60] sm:$0xff]  ;;  %v27_v15 = vld [vmem:[%s1109_s0 + $0x68] sm:$0xff]  ;;  %v32_v16 = vld [vmem:[%s1109_s0 + $0x90] sm:$0xff] }
  0x1c   :  { %418 = vmatpush.msra.mxu3 %v149_v50  ;;  %339 = vmatpush.msra.mxu2 %v132_v52  ;;  %v30_v17 = vld [vmem:[%s1109_s0 + $0x80] sm:$0xff]  ;;  %v33_v18 = vld [vmem:[%s1109_s0 + $0x98] sm:$0xff]  ;;  %v31_v19 = vld [vmem:[%s1109_s0 + $0x88] sm:$0xff] }
  0x1d   :  { %258 = vmatpush.msra.mxu1 %v117_v51  ;;  %179 = vmatpush.msra.mxu0 %v100_v53  ;;  %v36_v20 = vld [vmem:[%s1109_s0 + $0xb0] sm:$0xff]  ;;  %v34_v21 = vld [vmem:[%s1109_s0 + $0xa0] sm:$0xff]  ;;  %v37_v22 = vld [vmem:[%s1109_s0 + $0xb8] sm:$0xff] }
  0x1e   :  { %419 = vmatpush.msra.mxu3 %v148_v54  ;;  %340 = vmatpush.msra.mxu2 %v131_v56  ;;  %v35_v23 = vld [vmem:[%s1109_s0 + $0xa8] sm:$0xff]  ;;  %v40_v24 = vld [vmem:[%s1109_s0 + $0xd0] sm:$0xff]  ;;  %v38_v25 = vld [vmem:[%s1109_s0 + $0xc0] sm:$0xff] }
  0x1f   :  { %259 = vmatpush.msra.mxu1 %v116_v55  ;;  %180 = vmatpush.msra.mxu0 %v99_v57  ;;  %v41_v26 = vld [vmem:[%s1109_s0 + $0xd8] sm:$0xff]  ;;  %v39_v27 = vld [vmem:[%s1109_s0 + $0xc8] sm:$0xff]  ;;  %v44_v28 = vld [vmem:[%s1109_s0 + $0xf0] sm:$0xff] }
  0x20   :  { %420 = vmatpush.msra.mxu3 %v147_v58  ;;  %341 = vmatpush.msra.mxu2 %v130_v60  ;;  %v42_v29 = vld [vmem:[%s1109_s0 + $0xe0] sm:$0xff]  ;;  %v45_v30 = vld [vmem:[%s1109_s0 + $0xf8] sm:$0xff]  ;;  %v43_v31 = vld [vmem:[%s1109_s0 + $0xe8] sm:$0xff] }
  0x21   :  { %260 = vmatpush.msra.mxu1 %v115_v59  ;;  %181 = vmatpush.msra.mxu0 %v98_v61  ;;  %v48_v32 = vld [vmem:[%s1109_s0 + $0x110] sm:$0xff]  ;;  %v46_v33 = vld [vmem:[%s1109_s0 + $0x100] sm:$0xff]  ;;  %v49_v34 = vld [vmem:[%s1109_s0 + $0x118] sm:$0xff] }
  0x22   :  { %342 = vmatmul.f32.vlgmr.msra.gmra.mxu2 %v16_v62  ;;  %421 = vmatpush.msra.mxu3 %v146_v63  ;;  %v47_v35 = vld [vmem:[%s1109_s0 + $0x108] sm:$0xff]  ;;  %v52_v36 = vld [vmem:[%s1109_s0 + $0x130] sm:$0xff]  ;;  %v50_v37 = vld [vmem:[%s1109_s0 + $0x120] sm:$0xff] }
  0x23   :  { %182 = vmatmul.f32.vlgmr.msra.gmra.mxu0 %v14_v0  ;;  %422 = vmatmul.f32.vlgmr.msra.gmra.mxu3 %v17_v1  ;;  %v53_v38 = vld [vmem:[%s1109_s0 + $0x138] sm:$0xff]  ;;  %v51_v39 = vld [vmem:[%s1109_s0 + $0x128] sm:$0xff]  ;;  %v56_v40 = vld [vmem:[%s1109_s0 + $0x150] sm:$0xff] }
  0x24   :  { %261 = vmatpush.msra.mxu1 %v114_v2  ;;  %v54_v41 = vld [vmem:[%s1109_s0 + $0x140] sm:$0xff]  ;;  %v57_v42 = vld [vmem:[%s1109_s0 + $0x158] sm:$0xff]  ;;  %v55_v43 = vld [vmem:[%s1109_s0 + $0x148] sm:$0xff] }
  0x25   :  { %262 = vmatmul.f32.vlgmr.msra.gmra.mxu1 %v15_v3  ;;  %v60_v44 = vld [vmem:[%s1109_s0 + $0x170] sm:$0xff]  ;;  %v58_v45 = vld [vmem:[%s1109_s0 + $0x160] sm:$0xff]  ;;  %v61_v46 = vld [vmem:[%s1109_s0 + $0x178] sm:$0xff] }
  0x26   :  { %v59_v47 = vld [vmem:[%s1109_s0 + $0x168] sm:$0xff]  ;;  %v64_v48 = vld [vmem:[%s1109_s0 + $0x190] sm:$0xff]  ;;  %v62_v49 = vld [vmem:[%s1109_s0 + $0x180] sm:$0xff] }
  0x27   :  { %v65_v50 = vld [vmem:[%s1109_s0 + $0x198] sm:$0xff]  ;;  %v63_v51 = vld [vmem:[%s1109_s0 + $0x188] sm:$0xff]  ;;  %v68_v52 = vld [vmem:[%s1109_s0 + $0x1b0] sm:$0xff] }
  0x28   :  { %v66_v53 = vld [vmem:[%s1109_s0 + $0x1a0] sm:$0xff]  ;;  %v69_v54 = vld [vmem:[%s1109_s0 + $0x1b8] sm:$0xff]  ;;  %v67_v55 = vld [vmem:[%s1109_s0 + $0x1a8] sm:$0xff] }
  0x29   :  { %v72_v56 = vld [vmem:[%s1109_s0 + $0x1d0] sm:$0xff]  ;;  %v70_v57 = vld [vmem:[%s1109_s0 + $0x1c0] sm:$0xff]  ;;  %v73_v58 = vld [vmem:[%s1109_s0 + $0x1d8] sm:$0xff] }
  0x2a   :  { %345 = vmatmul.f32.gmra.mxu2 %v20_v4  ;;  %v71_v59 = vld [vmem:[%s1109_s0 + $0x1c8] sm:$0xff]  ;;  %v76_v60 = vld [vmem:[%s1109_s0 + $0x1f0] sm:$0xff]  ;;  %v74_v61 = vld [vmem:[%s1109_s0 + $0x1e0] sm:$0xff] }
  0x2b   :  { %185 = vmatmul.f32.gmra.mxu0 %v18_v5  ;;  %425 = vmatmul.f32.gmra.mxu3 %v21_v6  ;;  %v77_v62 = vld [vmem:[%s1109_s0 + $0x1f8] sm:$0xff]  ;;  %v75_v63 = vld [vmem:[%s1109_s0 + $0x1e8] sm:$0xff]  ;;  %v941_v0 = vld [vmem:[%s1110_s2] ss:$0 sm:$0xff] }
  0x2c   :  { %v80_v1 = vld [vmem:[%s1109_s0 + $0x210] sm:$0xff]  ;;  %v78_v3 = vld [vmem:[%s1109_s0 + $0x200] sm:$0xff]  ;;  %v81_v4 = vld [vmem:[%s1109_s0 + $0x218] sm:$0xff] }
  0x2d   :  { %265 = vmatmul.f32.gmra.mxu1 %v19_v7  ;;  %v79_v7 = vld [vmem:[%s1109_s0 + $0x208] sm:$0xff] }
  0x32   :  { %348 = vmatmul.f32.gmra.mxu2 %v24_v8 }
  0x33   :  { %188 = vmatmul.f32.gmra.mxu0 %v22_v9  ;;  %428 = vmatmul.f32.gmra.mxu3 %v25_v10 }
  0x35   :  { %268 = vmatmul.f32.gmra.mxu1 %v23_v11 }
  0x3a   :  { %351 = vmatmul.f32.gmra.mxu2 %v28_v12  ;;  %v84_v12 = vld [vmem:[%s1109_s0 + $0x230] sm:$0xff] }
  0x3b   :  { %191 = vmatmul.f32.gmra.mxu0 %v26_v13  ;;  %431 = vmatmul.f32.gmra.mxu3 %v29_v14 }
  0x3d   :  { %271 = vmatmul.f32.gmra.mxu1 %v27_v15  ;;  %v82_v15 = vld [vmem:[%s1109_s0 + $0x220] sm:$0xff] }
  0x42   :  { %354 = vmatmul.f32.gmra.mxu2 %v32_v16  ;;  %v85_v16 = vld [vmem:[%s1109_s0 + $0x238] sm:$0xff] }
  0x43   :  { %194 = vmatmul.f32.gmra.mxu0 %v30_v17  ;;  %434 = vmatmul.f32.gmra.mxu3 %v33_v18 }
  0x45   :  { %274 = vmatmul.f32.gmra.mxu1 %v31_v19 }
  0x4a   :  { %357 = vmatmul.f32.gmra.mxu2 %v36_v20  ;;  %v83_v20 = vld [vmem:[%s1109_s0 + $0x228] sm:$0xff] }
  0x4b   :  { %197 = vmatmul.f32.gmra.mxu0 %v34_v21  ;;  %437 = vmatmul.f32.gmra.mxu3 %v37_v22 }
  0x4d   :  { %277 = vmatmul.f32.gmra.mxu1 %v35_v23 }
  0x52   :  { %360 = vmatmul.f32.gmra.mxu2 %v40_v24 }
  0x53   :  { %200 = vmatmul.f32.gmra.mxu0 %v38_v25  ;;  %440 = vmatmul.f32.gmra.mxu3 %v41_v26  ;;  %v88_v25 = vld [vmem:[%s1109_s0 + $0x250] sm:$0xff] }
  0x55   :  { %280 = vmatmul.f32.gmra.mxu1 %v39_v27 }
  0x5a   :  { %363 = vmatmul.f32.gmra.mxu2 %v44_v28  ;;  %v86_v28 = vld [vmem:[%s1109_s0 + $0x240] sm:$0xff] }
  0x5b   :  { %203 = vmatmul.f32.gmra.mxu0 %v42_v29  ;;  %443 = vmatmul.f32.gmra.mxu3 %v45_v30  ;;  %v89_v29 = vld [vmem:[%s1109_s0 + $0x258] sm:$0xff] }
  0x5d   :  { %283 = vmatmul.f32.gmra.mxu1 %v43_v31 }
  0x62   :  { %366 = vmatmul.f32.gmra.mxu2 %v48_v32 }
  0x63   :  { %206 = vmatmul.f32.gmra.mxu0 %v46_v33  ;;  %446 = vmatmul.f32.gmra.mxu3 %v49_v34  ;;  %v87_v33 = vld [vmem:[%s1109_s0 + $0x248] sm:$0xff] }
  0x65   :  { %286 = vmatmul.f32.gmra.mxu1 %v47_v35 }
  0x6a   :  { %369 = vmatmul.f32.gmra.mxu2 %v52_v36 }
  0x6b   :  { %209 = vmatmul.f32.gmra.mxu0 %v50_v37  ;;  %449 = vmatmul.f32.gmra.mxu3 %v53_v38  ;;  %v92_v38 = vld [vmem:[%s1109_s0 + $0x270] sm:$0xff] }
  0x6d   :  { %289 = vmatmul.f32.gmra.mxu1 %v51_v39 }
  0x72   :  { %372 = vmatmul.f32.gmra.mxu2 %v56_v40 }
  0x73   :  { %212 = vmatmul.f32.gmra.mxu0 %v54_v41  ;;  %452 = vmatmul.f32.gmra.mxu3 %v57_v42  ;;  %v90_v41 = vld [vmem:[%s1109_s0 + $0x260] sm:$0xff]  ;;  %v93_v42 = vld [vmem:[%s1109_s0 + $0x278] sm:$0xff] }
  0x75   :  { %292 = vmatmul.f32.gmra.mxu1 %v55_v43 }
  0x7a   :  { %375 = vmatmul.f32.gmra.mxu2 %v60_v44 }
  0x7b   :  { %215 = vmatmul.f32.gmra.mxu0 %v58_v45  ;;  %455 = vmatmul.f32.gmra.mxu3 %v61_v46  ;;  %v91_v46 = vld [vmem:[%s1109_s0 + $0x268] sm:$0xff] }
  0x7d   :  { %295 = vmatmul.f32.gmra.mxu1 %v59_v47 }
  0x82   :  { %378 = vmatmul.f32.gmra.mxu2 %v64_v48 }
  0x83   :  { %218 = vmatmul.f32.gmra.mxu0 %v62_v49  ;;  %458 = vmatmul.f32.gmra.mxu3 %v65_v50 }
  0x85   :  { %298 = vmatmul.f32.gmra.mxu1 %v63_v51  ;;  %v96_v51 = vld [vmem:[%s1109_s0 + $0x290] sm:$0xff] }
  0x8a   :  { %381 = vmatmul.f32.gmra.mxu2 %v68_v52 }
  0x8b   :  { %221 = vmatmul.f32.gmra.mxu0 %v66_v53  ;;  %461 = vmatmul.f32.gmra.mxu3 %v69_v54  ;;  %v94_v54 = vld [vmem:[%s1109_s0 + $0x280] sm:$0xff] }
  0x8d   :  { %301 = vmatmul.f32.gmra.mxu1 %v67_v55  ;;  %v97_v55 = vld [vmem:[%s1109_s0 + $0x298] sm:$0xff] }
  0x92   :  { %384 = vmatmul.f32.gmra.mxu2 %v72_v56 }
  0x93   :  { %224 = vmatmul.f32.gmra.mxu0 %v70_v57  ;;  %464 = vmatmul.f32.gmra.mxu3 %v73_v58 }
  0x95   :  { %304 = vmatmul.f32.gmra.mxu1 %v71_v59  ;;  %v95_v59 = vld [vmem:[%s1109_s0 + $0x288] sm:$0xff] }
  0x9a   :  { %387 = vmatmul.f32.gmra.mxu2 %v76_v60 }
  0x9b   :  { %227 = vmatmul.f32.gmra.mxu0 %v74_v61  ;;  %467 = vmatmul.f32.gmra.mxu3 %v77_v62 }
  0x9d   :  { %307 = vmatmul.f32.gmra.mxu1 %v75_v63 }
  0xa0   :  { %v183_v2 = vpop.f32.mrf.mxu0 }
  0xa1   :  { %v184_v5 = vadd.f32 %v941_v0, %v183_v2 }
  0xa2   :  { %390 = vmatmul.f32.gmra.mxu2 %v80_v1  ;;  %v263_v6 = vpop.f32.mrf.mxu1 }
  0xa3   :  { %v264_v8 = vadd.f32 %v263_v6, %v184_v5  ;;  %230 = vmatmul.f32.gmra.mxu0 %v78_v3  ;;  %470 = vmatmul.f32.gmra.mxu3 %v81_v4 }
  0xa5   :  { %v343_v9 = vpop.f32.mrf.mxu2  ;;  %310 = vmatmul.f32.gmra.mxu1 %v79_v7 }
  0xa6   :  { %v344_v10 = vadd.f32 %v343_v9, %v264_v8  ;;  %v423_v11 = vpop.f32.mrf.mxu3 }
  0xa8   :  { %v424_v13 = vadd.f32 %v423_v11, %v344_v10  ;;  %v186_v14 = vpop.f32.mrf.mxu0 }
  0xa9   :  { %v187_v17 = vadd.f32 %v941_v0, %v186_v14 }
  0xaa   :  { %v486_v18 = vmax.f32 %v424_v13, 0.0  ;;  %393 = vmatmul.f32.gmra.mxu2 %v84_v12  ;;  %v266_v19 = vpop.f32.mrf.mxu1 }
  0xab   :  { %v267_v21 = vadd.f32 %v266_v19, %v187_v17  ;;  %233 = vmatmul.f32.gmra.mxu0 %v82_v15  ;;  %473 = vmatmul.f32.gmra.mxu3 %v85_v16 }
  0xac   :  { %508 = vst.msk [vmem:[%s1111_s3] sm:$0xff] %vm507_vm0, %v486_v18 }
  0xad   :  { %v346_v22 = vpop.f32.mrf.mxu2  ;;  %313 = vmatmul.f32.gmra.mxu1 %v83_v20 }
  0xae   :  { %v347_v23 = vadd.f32 %v346_v22, %v267_v21  ;;  %v426_v24 = vpop.f32.mrf.mxu3 }
  0xb0   :  { %v427_v26 = vadd.f32 %v426_v24, %v347_v23  ;;  %v189_v27 = vpop.f32.mrf.mxu0 }
  0xb1   :  { %v190_v30 = vadd.f32 %v941_v0, %v189_v27 }
  0xb2   :  { %v487_v31 = vmax.f32 %v427_v26, 0.0  ;;  %396 = vmatmul.f32.gmra.mxu2 %v88_v25  ;;  %v269_v32 = vpop.f32.mrf.mxu1 }
  0xb3   :  { %v270_v34 = vadd.f32 %v269_v32, %v190_v30  ;;  %236 = vmatmul.f32.gmra.mxu0 %v86_v28  ;;  %476 = vmatmul.f32.gmra.mxu3 %v89_v29 }
  0xb4   :  { %509 = vst.msk [vmem:[%s1111_s3 + $0x8] sm:$0xff] %vm507_vm0, %v487_v31 }
  0xb5   :  { %v349_v35 = vpop.f32.mrf.mxu2  ;;  %316 = vmatmul.f32.gmra.mxu1 %v87_v33 }
  0xb6   :  { %v350_v36 = vadd.f32 %v349_v35, %v270_v34  ;;  %v429_v37 = vpop.f32.mrf.mxu3 }
  0xb8   :  { %v430_v39 = vadd.f32 %v429_v37, %v350_v36  ;;  %v192_v40 = vpop.f32.mrf.mxu0 }
  0xb9   :  { %v193_v43 = vadd.f32 %v941_v0, %v192_v40 }
  0xba   :  { %v488_v44 = vmax.f32 %v430_v39, 0.0  ;;  %399 = vmatmul.f32.gmra.mxu2 %v92_v38  ;;  %v272_v45 = vpop.f32.mrf.mxu1 }
  0xbb   :  { %v273_v47 = vadd.f32 %v272_v45, %v193_v43  ;;  %239 = vmatmul.f32.gmra.mxu0 %v90_v41  ;;  %479 = vmatmul.f32.gmra.mxu3 %v93_v42 }
  0xbc   :  { %510 = vst.msk [vmem:[%s1111_s3 + $0x10] sm:$0xff] %vm507_vm0, %v488_v44 }
  0xbd   :  { %v352_v48 = vpop.f32.mrf.mxu2  ;;  %319 = vmatmul.f32.gmra.mxu1 %v91_v46 }
  0xbe   :  { %v353_v49 = vadd.f32 %v352_v48, %v273_v47  ;;  %v432_v50 = vpop.f32.mrf.mxu3 }
  0xc0   :  { %v433_v52 = vadd.f32 %v432_v50, %v353_v49  ;;  %v195_v53 = vpop.f32.mrf.mxu0 }
  0xc1   :  { %v196_v56 = vadd.f32 %v941_v0, %v195_v53 }
  0xc2   :  { %v489_v57 = vmax.f32 %v433_v52, 0.0  ;;  %402 = vmatmul.f32.gmra.mxu2 %v96_v51  ;;  %v275_v58 = vpop.f32.mrf.mxu1 }
  0xc3   :  { %v276_v60 = vadd.f32 %v275_v58, %v196_v56  ;;  %242 = vmatmul.f32.gmra.mxu0 %v94_v54  ;;  %482 = vmatmul.f32.gmra.mxu3 %v97_v55 }
  0xc4   :  { %511 = vst.msk [vmem:[%s1111_s3 + $0x18] sm:$0xff] %vm507_vm0, %v489_v57 }
  0xc5   :  { %v355_v61 = vpop.f32.mrf.mxu2  ;;  %322 = vmatmul.f32.gmra.mxu1 %v95_v59 }
  0xc6   :  { %v356_v62 = vadd.f32 %v355_v61, %v276_v60  ;;  %v435_v63 = vpop.f32.mrf.mxu3 }
  0xc8   :  { %v436_v1 = vadd.f32 %v435_v63, %v356_v62  ;;  %v198_v2 = vpop.f32.mrf.mxu0 }
  0xc9   :  { %v199_v3 = vadd.f32 %v941_v0, %v198_v2 }
  0xca   :  { %v490_v4 = vmax.f32 %v436_v1, 0.0  ;;  %v278_v5 = vpop.f32.mrf.mxu1 }
  0xcb   :  { %v279_v6 = vadd.f32 %v278_v5, %v199_v3 }
  0xcc   :  { %512 = vst.msk [vmem:[%s1111_s3 + $0x20] sm:$0xff] %vm507_vm0, %v490_v4 }
  0xcd   :  { %v358_v7 = vpop.f32.mrf.mxu2 }
  0xce   :  { %v359_v8 = vadd.f32 %v358_v7, %v279_v6  ;;  %v438_v9 = vpop.f32.mrf.mxu3 }
  0xd0   :  { %v439_v10 = vadd.f32 %v438_v9, %v359_v8  ;;  %v201_v11 = vpop.f32.mrf.mxu0 }
  0xd1   :  { %v202_v12 = vadd.f32 %v941_v0, %v201_v11 }
  0xd2   :  { %v491_v13 = vmax.f32 %v439_v10, 0.0  ;;  %v281_v14 = vpop.f32.mrf.mxu1 }
  0xd3   :  { %v282_v15 = vadd.f32 %v281_v14, %v202_v12 }
  0xd4   :  { %513 = vst.msk [vmem:[%s1111_s3 + $0x28] sm:$0xff] %vm507_vm0, %v491_v13 }
  0xd5   :  { %v361_v16 = vpop.f32.mrf.mxu2 }
  0xd6   :  { %v362_v17 = vadd.f32 %v361_v16, %v282_v15  ;;  %v441_v18 = vpop.f32.mrf.mxu3 }
  0xd8   :  { %v442_v19 = vadd.f32 %v441_v18, %v362_v17  ;;  %v204_v20 = vpop.f32.mrf.mxu0 }
  0xd9   :  { %v205_v21 = vadd.f32 %v941_v0, %v204_v20 }
  0xda   :  { %v492_v22 = vmax.f32 %v442_v19, 0.0  ;;  %v284_v23 = vpop.f32.mrf.mxu1 }
  0xdb   :  { %v285_v24 = vadd.f32 %v284_v23, %v205_v21 }
  0xdc   :  { %514 = vst.msk [vmem:[%s1111_s3 + $0x30] sm:$0xff] %vm507_vm0, %v492_v22 }
  0xdd   :  { %v364_v25 = vpop.f32.mrf.mxu2 }
  0xde   :  { %v365_v26 = vadd.f32 %v364_v25, %v285_v24  ;;  %v444_v27 = vpop.f32.mrf.mxu3 }
  0xe0   :  { %v445_v28 = vadd.f32 %v444_v27, %v365_v26  ;;  %v207_v29 = vpop.f32.mrf.mxu0 }
  0xe1   :  { %v208_v30 = vadd.f32 %v941_v0, %v207_v29 }
  0xe2   :  { %v493_v31 = vmax.f32 %v445_v28, 0.0  ;;  %v287_v32 = vpop.f32.mrf.mxu1 }
  0xe3   :  { %v288_v33 = vadd.f32 %v287_v32, %v208_v30 }
  0xe4   :  { %515 = vst.msk [vmem:[%s1111_s3 + $0x38] sm:$0xff] %vm507_vm0, %v493_v31 }
  0xe5   :  { %v367_v34 = vpop.f32.mrf.mxu2 }
  0xe6   :  { %v368_v35 = vadd.f32 %v367_v34, %v288_v33  ;;  %v447_v36 = vpop.f32.mrf.mxu3 }
  0xe8   :  { %v448_v37 = vadd.f32 %v447_v36, %v368_v35  ;;  %v210_v38 = vpop.f32.mrf.mxu0 }
  0xe9   :  { %v211_v39 = vadd.f32 %v941_v0, %v210_v38 }
  0xea   :  { %v494_v40 = vmax.f32 %v448_v37, 0.0  ;;  %v290_v41 = vpop.f32.mrf.mxu1 }
  0xeb   :  { %v291_v42 = vadd.f32 %v290_v41, %v211_v39 }
  0xec   :  { %516 = vst.msk [vmem:[%s1111_s3 + $0x40] sm:$0xff] %vm507_vm0, %v494_v40 }
  0xed   :  { %v370_v43 = vpop.f32.mrf.mxu2 }
  0xee   :  { %v371_v44 = vadd.f32 %v370_v43, %v291_v42  ;;  %v450_v45 = vpop.f32.mrf.mxu3 }
  0xf0   :  { %v451_v46 = vadd.f32 %v450_v45, %v371_v44  ;;  %v213_v47 = vpop.f32.mrf.mxu0 }
  0xf1   :  { %v214_v48 = vadd.f32 %v941_v0, %v213_v47 }
  0xf2   :  { %v495_v49 = vmax.f32 %v451_v46, 0.0  ;;  %v293_v50 = vpop.f32.mrf.mxu1 }
  0xf3   :  { %v294_v51 = vadd.f32 %v293_v50, %v214_v48 }
  0xf4   :  { %517 = vst.msk [vmem:[%s1111_s3 + $0x48] sm:$0xff] %vm507_vm0, %v495_v49 }
  0xf5   :  { %v373_v52 = vpop.f32.mrf.mxu2 }
  0xf6   :  { %v374_v53 = vadd.f32 %v373_v52, %v294_v51  ;;  %v453_v54 = vpop.f32.mrf.mxu3 }
  0xf8   :  { %v454_v55 = vadd.f32 %v453_v54, %v374_v53  ;;  %v216_v56 = vpop.f32.mrf.mxu0 }
  0xf9   :  { %v217_v57 = vadd.f32 %v941_v0, %v216_v56 }
  0xfa   :  { %v496_v58 = vmax.f32 %v454_v55, 0.0  ;;  %v296_v59 = vpop.f32.mrf.mxu1 }
  0xfb   :  { %v297_v60 = vadd.f32 %v296_v59, %v217_v57 }
  0xfc   :  { %518 = vst.msk [vmem:[%s1111_s3 + $0x50] sm:$0xff] %vm507_vm0, %v496_v58 }
  0xfd   :  { %v376_v61 = vpop.f32.mrf.mxu2 }
  0xfe   :  { %v377_v62 = vadd.f32 %v376_v61, %v297_v60  ;;  %v456_v63 = vpop.f32.mrf.mxu3 }
 0x100   :  { %v457_v1 = vadd.f32 %v456_v63, %v377_v62  ;;  %v219_v2 = vpop.f32.mrf.mxu0 }
 0x101   :  { %v220_v3 = vadd.f32 %v941_v0, %v219_v2 }
 0x102   :  { %v497_v4 = vmax.f32 %v457_v1, 0.0  ;;  %v299_v5 = vpop.f32.mrf.mxu1 }
 0x103   :  { %v300_v6 = vadd.f32 %v299_v5, %v220_v3 }
 0x104   :  { %519 = vst.msk [vmem:[%s1111_s3 + $0x58] sm:$0xff] %vm507_vm0, %v497_v4 }
 0x105   :  { %v379_v7 = vpop.f32.mrf.mxu2 }
 0x106   :  { %v380_v8 = vadd.f32 %v379_v7, %v300_v6  ;;  %v459_v9 = vpop.f32.mrf.mxu3 }
 0x108   :  { %v460_v10 = vadd.f32 %v459_v9, %v380_v8  ;;  %v222_v11 = vpop.f32.mrf.mxu0 }
 0x109   :  { %v223_v12 = vadd.f32 %v941_v0, %v222_v11 }
 0x10a   :  { %v498_v13 = vmax.f32 %v460_v10, 0.0  ;;  %v302_v14 = vpop.f32.mrf.mxu1 }
 0x10b   :  { %v303_v15 = vadd.f32 %v302_v14, %v223_v12 }
 0x10c   :  { %520 = vst.msk [vmem:[%s1111_s3 + $0x60] sm:$0xff] %vm507_vm0, %v498_v13 }
 0x10d   :  { %v382_v16 = vpop.f32.mrf.mxu2 }
 0x10e   :  { %v383_v17 = vadd.f32 %v382_v16, %v303_v15  ;;  %v462_v18 = vpop.f32.mrf.mxu3 }
 0x110   :  { %v463_v19 = vadd.f32 %v462_v18, %v383_v17  ;;  %v225_v20 = vpop.f32.mrf.mxu0 }
 0x111   :  { %v226_v21 = vadd.f32 %v941_v0, %v225_v20 }
 0x112   :  { %v499_v22 = vmax.f32 %v463_v19, 0.0  ;;  %v305_v23 = vpop.f32.mrf.mxu1 }
 0x113   :  { %v306_v24 = vadd.f32 %v305_v23, %v226_v21 }
 0x114   :  { %521 = vst.msk [vmem:[%s1111_s3 + $0x68] sm:$0xff] %vm507_vm0, %v499_v22 }
 0x115   :  { %v385_v25 = vpop.f32.mrf.mxu2 }
 0x116   :  { %v386_v26 = vadd.f32 %v385_v25, %v306_v24  ;;  %v465_v27 = vpop.f32.mrf.mxu3 }
 0x118   :  { %v466_v28 = vadd.f32 %v465_v27, %v386_v26  ;;  %v228_v29 = vpop.f32.mrf.mxu0 }
 0x119   :  { %v229_v30 = vadd.f32 %v941_v0, %v228_v29 }
 0x11a   :  { %v500_v31 = vmax.f32 %v466_v28, 0.0  ;;  %v308_v32 = vpop.f32.mrf.mxu1 }
 0x11b   :  { %v309_v33 = vadd.f32 %v308_v32, %v229_v30 }
 0x11c   :  { %522 = vst.msk [vmem:[%s1111_s3 + $0x70] sm:$0xff] %vm507_vm0, %v500_v31 }
 0x11d   :  { %v388_v34 = vpop.f32.mrf.mxu2 }
 0x11e   :  { %v389_v35 = vadd.f32 %v388_v34, %v309_v33  ;;  %v468_v36 = vpop.f32.mrf.mxu3 }
 0x120   :  { %v469_v37 = vadd.f32 %v468_v36, %v389_v35  ;;  %v231_v38 = vpop.f32.mrf.mxu0 }
 0x121   :  { %v232_v39 = vadd.f32 %v941_v0, %v231_v38 }
 0x122   :  { %v501_v40 = vmax.f32 %v469_v37, 0.0  ;;  %v311_v41 = vpop.f32.mrf.mxu1 }
 0x123   :  { %v312_v42 = vadd.f32 %v311_v41, %v232_v39 }
 0x124   :  { %523 = vst.msk [vmem:[%s1111_s3 + $0x78] sm:$0xff] %vm507_vm0, %v501_v40 }
 0x125   :  { %v391_v43 = vpop.f32.mrf.mxu2 }
 0x126   :  { %v392_v44 = vadd.f32 %v391_v43, %v312_v42  ;;  %v471_v45 = vpop.f32.mrf.mxu3 }
 0x128   :  { %v472_v46 = vadd.f32 %v471_v45, %v392_v44  ;;  %v234_v47 = vpop.f32.mrf.mxu0 }
 0x129   :  { %v235_v48 = vadd.f32 %v941_v0, %v234_v47 }
 0x12a   :  { %v502_v49 = vmax.f32 %v472_v46, 0.0  ;;  %v314_v50 = vpop.f32.mrf.mxu1 }
 0x12b   :  { %v315_v51 = vadd.f32 %v314_v50, %v235_v48 }
 0x12c   :  { %524 = vst.msk [vmem:[%s1111_s3 + $0x80] sm:$0xff] %vm507_vm0, %v502_v49 }
 0x12d   :  { %v394_v52 = vpop.f32.mrf.mxu2 }
 0x12e   :  { %v395_v53 = vadd.f32 %v394_v52, %v315_v51  ;;  %v474_v54 = vpop.f32.mrf.mxu3 }
 0x130   :  { %v475_v55 = vadd.f32 %v474_v54, %v395_v53  ;;  %v237_v56 = vpop.f32.mrf.mxu0 }
 0x131   :  { %v238_v57 = vadd.f32 %v941_v0, %v237_v56 }
 0x132   :  { %v503_v58 = vmax.f32 %v475_v55, 0.0  ;;  %v317_v59 = vpop.f32.mrf.mxu1 }
 0x133   :  { %v318_v60 = vadd.f32 %v317_v59, %v238_v57 }
 0x134   :  { %525 = vst.msk [vmem:[%s1111_s3 + $0x88] sm:$0xff] %vm507_vm0, %v503_v58 }
 0x135   :  { %v397_v61 = vpop.f32.mrf.mxu2 }
 0x136   :  { %v398_v62 = vadd.f32 %v397_v61, %v318_v60  ;;  %v477_v63 = vpop.f32.mrf.mxu3 }
 0x138   :  { %v478_v1 = vadd.f32 %v477_v63, %v398_v62  ;;  %v240_v2 = vpop.f32.mrf.mxu0 }
 0x139   :  { %v241_v3 = vadd.f32 %v941_v0, %v240_v2 }
 0x13a   :  { %v504_v4 = vmax.f32 %v478_v1, 0.0  ;;  %v320_v5 = vpop.f32.mrf.mxu1 }
 0x13b   :  { %v321_v6 = vadd.f32 %v320_v5, %v241_v3 }
 0x13c   :  { %526 = vst.msk [vmem:[%s1111_s3 + $0x90] sm:$0xff] %vm507_vm0, %v504_v4 }
 0x13d   :  { %v400_v7 = vpop.f32.mrf.mxu2 }
 0x13e   :  { %v401_v8 = vadd.f32 %v400_v7, %v321_v6  ;;  %v480_v9 = vpop.f32.mrf.mxu3 }
 0x140   :  { %v481_v10 = vadd.f32 %v480_v9, %v401_v8  ;;  %v243_v11 = vpop.f32.mrf.mxu0 }
 0x141   :  { %v244_v12 = vadd.f32 %v941_v0, %v243_v11 }
 0x142   :  { %v505_v13 = vmax.f32 %v481_v10, 0.0  ;;  %v323_v14 = vpop.f32.mrf.mxu1 }
 0x143   :  { %v324_v15 = vadd.f32 %v323_v14, %v244_v12 }
 0x144   :  { %527 = vst.msk [vmem:[%s1111_s3 + $0x98] sm:$0xff] %vm507_vm0, %v505_v13 }
 0x145   :  { %v403_v16 = vpop.f32.mrf.mxu2 }
 0x146   :  { %v404_v17 = vadd.f32 %v403_v16, %v324_v15  ;;  %v483_v18 = vpop.f32.mrf.mxu3 }
 0x148   :  { %v484_v19 = vadd.f32 %v483_v18, %v404_v17 }
 0x14a   :  { %v506_v20 = vmax.f32 %v484_v19, 0.0 }
 0x14c   :  { %528 = vst.msk [vmem:[%s1111_s3 + $0xa0] sm:$0xff] %vm507_vm0, %v506_v20 }

// kernel: noisy_duel_net_forward.6
= control target key start
LH: loop header
LB: loop body
LE: loop exit
PB: predicated region body
PF: predicated region fallthrough
CT: control target
= control target key end

     0   :  { %vm155_vm0 = vcmask 523264   ;;  %s1108_s1 = inlined_call_operand.vmem [shape: f32[576,64], index: 1, kind: input, shape index: {}]   ;;  %s1109_s0 = inlined_call_operand.vmem [shape: f32[104,576], index: 0, kind: input, shape index: {}]   ;;  %s1110_s2 = inlined_call_operand.vmem [shape: f32[1,64], index: 2, kind: input, shape index: {}]   ;;  %s1111_s3 = inlined_call_operand.vmem [shape: f32[104,64], index: 3, kind: output, shape index: {}]  }
   0x1   :  { %v94_v0 = vld [vmem:[%s1108_s1 + $0x78] sm:$0xff]  ;;  %v93_v1 = vld [vmem:[%s1108_s1 + $0x70] sm:$0xff]  ;;  %v92_v2 = vld [vmem:[%s1108_s1 + $0x68] sm:$0xff] }
   0x2   :  { %518 = vmatpush.msra.mxu1 %v94_v0  ;;  %519 = vmatpush.msra.mxu2 %v94_v0  ;;  %v91_v3 = vld [vmem:[%s1108_s1 + $0x60] sm:$0xff]  ;;  %v90_v4 = vld [vmem:[%s1108_s1 + $0x58] sm:$0xff]  ;;  %v89_v5 = vld [vmem:[%s1108_s1 + $0x50] sm:$0xff] }
   0x3   :  { %520 = vmatpush.msra.mxu3 %v94_v0  ;;  %195 = vmatpush.msra.mxu0 %v94_v0  ;;  %v88_v6 = vld [vmem:[%s1108_s1 + $0x48] sm:$0xff]  ;;  %v87_v7 = vld [vmem:[%s1108_s1 + $0x40] sm:$0xff]  ;;  %v86_v8 = vld [vmem:[%s1108_s1 + $0x38] sm:$0xff] }
   0x4   :  { %521 = vmatpush.msra.mxu1 %v93_v1  ;;  %522 = vmatpush.msra.mxu2 %v93_v1  ;;  %v85_v9 = vld [vmem:[%s1108_s1 + $0x30] sm:$0xff]  ;;  %v84_v10 = vld [vmem:[%s1108_s1 + $0x28] sm:$0xff]  ;;  %v83_v11 = vld [vmem:[%s1108_s1 + $0x20] sm:$0xff] }
   0x5   :  { %523 = vmatpush.msra.mxu3 %v93_v1  ;;  %196 = vmatpush.msra.mxu0 %v93_v1  ;;  %v82_v12 = vld [vmem:[%s1108_s1 + $0x18] sm:$0xff]  ;;  %v81_v13 = vld [vmem:[%s1108_s1 + $0x10] sm:$0xff]  ;;  %v80_v14 = vld [vmem:[%s1108_s1 + $0x8] sm:$0xff] }
   0x6   :  { %524 = vmatpush.msra.mxu1 %v92_v2  ;;  %525 = vmatpush.msra.mxu2 %v92_v2  ;;  %v79_v15 = vld [vmem:[%s1108_s1] sm:$0xff]  ;;  %v126_v18 = vld [vmem:[%s1108_s1 + $0x178] sm:$0xff]  ;;  %v125_v20 = vld [vmem:[%s1108_s1 + $0x170] sm:$0xff] }
   0x7   :  { %526 = vmatpush.msra.mxu3 %v92_v2  ;;  %197 = vmatpush.msra.mxu0 %v92_v2  ;;  %v34_v16 = vld [vmem:[%s1109_s0 + $0xa0] sm:$0xff]  ;;  %v110_v19 = vld [vmem:[%s1108_s1 + $0xf8] sm:$0xff]  ;;  %v109_v21 = vld [vmem:[%s1108_s1 + $0xf0] sm:$0xff] }
   0x8   :  { %527 = vmatpush.msra.mxu1 %v91_v3  ;;  %528 = vmatpush.msra.mxu2 %v91_v3  ;;  %v54_v17 = vld [vmem:[%s1109_s0 + $0x140] sm:$0xff]  ;;  %v142_v22 = vld [vmem:[%s1108_s1 + $0x1f8] sm:$0xff]  ;;  %v124_v24 = vld [vmem:[%s1108_s1 + $0x168] sm:$0xff] }
   0x9   :  { %529 = vmatpush.msra.mxu3 %v91_v3  ;;  %198 = vmatpush.msra.mxu0 %v91_v3  ;;  %v14_v23 = vld [vmem:[%s1109_s0] sm:$0xff]  ;;  %v108_v25 = vld [vmem:[%s1108_s1 + $0xe8] sm:$0xff]  ;;  %v141_v26 = vld [vmem:[%s1108_s1 + $0x1f0] sm:$0xff] }
   0xa   :  { %530 = vmatpush.msra.mxu1 %v90_v4  ;;  %531 = vmatpush.msra.mxu2 %v90_v4  ;;  %v150_v27 = vld [vmem:[%s1108_s1 + $0x238] sm:$0xff]  ;;  %v123_v28 = vld [vmem:[%s1108_s1 + $0x160] sm:$0xff]  ;;  %v140_v30 = vld [vmem:[%s1108_s1 + $0x1e8] sm:$0xff] }
   0xb   :  { %532 = vmatpush.msra.mxu3 %v90_v4  ;;  %199 = vmatpush.msra.mxu0 %v90_v4  ;;  %v107_v29 = vld [vmem:[%s1108_s1 + $0xe0] sm:$0xff]  ;;  %v39_v31 = vld [vmem:[%s1109_s0 + $0xc8] sm:$0xff]  ;;  %v106_v33 = vld [vmem:[%s1108_s1 + $0xd8] sm:$0xff] }
   0xc   :  { %533 = vmatpush.msra.mxu1 %v89_v5  ;;  %534 = vmatpush.msra.mxu2 %v89_v5  ;;  %v59_v32 = vld [vmem:[%s1109_s0 + $0x168] sm:$0xff]  ;;  %v122_v34 = vld [vmem:[%s1108_s1 + $0x158] sm:$0xff]  ;;  %v139_v35 = vld [vmem:[%s1108_s1 + $0x1e0] sm:$0xff] }
   0xd   :  { %535 = vmatpush.msra.mxu3 %v89_v5  ;;  %200 = vmatpush.msra.mxu0 %v89_v5  ;;  %v105_v36 = vld [vmem:[%s1108_s1 + $0xd0] sm:$0xff]  ;;  %v138_v39 = vld [vmem:[%s1108_s1 + $0x1d8] sm:$0xff]  ;;  %v104_v40 = vld [vmem:[%s1108_s1 + $0xc8] sm:$0xff] }
   0xe   :  { %536 = vmatpush.msra.mxu1 %v88_v6  ;;  %537 = vmatpush.msra.mxu2 %v88_v6  ;;  %v149_v37 = vld [vmem:[%s1108_s1 + $0x230] sm:$0xff]  ;;  %v19_v41 = vld [vmem:[%s1109_s0 + $0x28] sm:$0xff]  ;;  %v103_v44 = vld [vmem:[%s1108_s1 + $0xc0] sm:$0xff] }
   0xf   :  { %538 = vmatpush.msra.mxu3 %v88_v6  ;;  %201 = vmatpush.msra.mxu0 %v88_v6  ;;  %v121_v38 = vld [vmem:[%s1108_s1 + $0x150] sm:$0xff]  ;;  %v120_v42 = vld [vmem:[%s1108_s1 + $0x148] sm:$0xff]  ;;  %v119_v46 = vld [vmem:[%s1108_s1 + $0x140] sm:$0xff] }
  0x10   :  { %539 = vmatpush.msra.mxu1 %v87_v7  ;;  %540 = vmatpush.msra.mxu2 %v87_v7  ;;  %v137_v43 = vld [vmem:[%s1108_s1 + $0x1d0] sm:$0xff]  ;;  %v148_v45 = vld [vmem:[%s1108_s1 + $0x228] sm:$0xff]  ;;  %v118_v50 = vld [vmem:[%s1108_s1 + $0x138] sm:$0xff] }
  0x11   :  { %541 = vmatpush.msra.mxu3 %v87_v7  ;;  %202 = vmatpush.msra.mxu0 %v87_v7  ;;  %v136_v47 = vld [vmem:[%s1108_s1 + $0x1c8] sm:$0xff]  ;;  %v44_v48 = vld [vmem:[%s1109_s0 + $0xf0] sm:$0xff]  ;;  %v102_v51 = vld [vmem:[%s1108_s1 + $0xb8] sm:$0xff] }
  0x12   :  { %542 = vmatpush.msra.mxu1 %v86_v8  ;;  %543 = vmatpush.msra.mxu2 %v86_v8  ;;  %v64_v49 = vld [vmem:[%s1109_s0 + $0x190] sm:$0xff]  ;;  %v135_v52 = vld [vmem:[%s1108_s1 + $0x1c0] sm:$0xff]  ;;  %v134_v56 = vld [vmem:[%s1108_s1 + $0x1b8] sm:$0xff] }
  0x13   :  { %544 = vmatpush.msra.mxu3 %v86_v8  ;;  %203 = vmatpush.msra.mxu0 %v86_v8  ;;  %v147_v53 = vld [vmem:[%s1108_s1 + $0x220] sm:$0xff]  ;;  %v117_v54 = vld [vmem:[%s1108_s1 + $0x130] sm:$0xff]  ;;  %v116_v58 = vld [vmem:[%s1108_s1 + $0x128] sm:$0xff] }
  0x14   :  { %545 = vmatpush.msra.mxu1 %v85_v9  ;;  %546 = vmatpush.msra.mxu2 %v85_v9  ;;  %v101_v55 = vld [vmem:[%s1108_s1 + $0xb0] sm:$0xff]  ;;  %v100_v59 = vld [vmem:[%s1108_s1 + $0xa8] sm:$0xff]  ;;  %v146_v61 = vld [vmem:[%s1108_s1 + $0x218] sm:$0xff] }
  0x15   :  { %547 = vmatpush.msra.mxu3 %v85_v9  ;;  %204 = vmatpush.msra.mxu0 %v85_v9  ;;  %v24_v57 = vld [vmem:[%s1109_s0 + $0x50] sm:$0xff]  ;;  %v115_v62 = vld [vmem:[%s1108_s1 + $0x120] sm:$0xff]  ;;  %v132_v0 = vld [vmem:[%s1108_s1 + $0x1a8] sm:$0xff] }
  0x16   :  { %548 = vmatpush.msra.mxu1 %v84_v10  ;;  %549 = vmatpush.msra.mxu2 %v84_v10  ;;  %v133_v60 = vld [vmem:[%s1108_s1 + $0x1b0] sm:$0xff]  ;;  %v99_v63 = vld [vmem:[%s1108_s1 + $0xa0] sm:$0xff]  ;;  %v49_v1 = vld [vmem:[%s1109_s0 + $0x118] sm:$0xff] }
  0x17   :  { %550 = vmatpush.msra.mxu3 %v84_v10  ;;  %205 = vmatpush.msra.mxu0 %v84_v10  ;;  %v69_v2 = vld [vmem:[%s1109_s0 + $0x1b8] sm:$0xff]  ;;  %v131_v5 = vld [vmem:[%s1108_s1 + $0x1a0] sm:$0xff]  ;;  %v97_v7 = vld [vmem:[%s1108_s1 + $0x90] sm:$0xff] }
  0x18   :  { %551 = vmatpush.msra.mxu1 %v83_v11  ;;  %552 = vmatpush.msra.mxu2 %v83_v11  ;;  %v98_v3 = vld [vmem:[%s1108_s1 + $0x98] sm:$0xff]  ;;  %v74_v6 = vld [vmem:[%s1109_s0 + $0x1e0] sm:$0xff]  ;;  %v113_v8 = vld [vmem:[%s1108_s1 + $0x110] sm:$0xff] }
  0x19   :  { %553 = vmatpush.msra.mxu3 %v83_v11  ;;  %206 = vmatpush.msra.mxu0 %v83_v11  ;;  %v114_v4 = vld [vmem:[%s1108_s1 + $0x118] sm:$0xff]  ;;  %v96_v10 = vld [vmem:[%s1108_s1 + $0x88] sm:$0xff]  ;;  %v145_v11 = vld [vmem:[%s1108_s1 + $0x210] sm:$0xff] }
  0x1a   :  { %554 = vmatpush.msra.mxu1 %v82_v12  ;;  %555 = vmatpush.msra.mxu2 %v82_v12  ;;  %v130_v9 = vld [vmem:[%s1108_s1 + $0x198] sm:$0xff] }
  0x1b   :  { %556 = vmatpush.msra.mxu3 %v82_v12  ;;  %207 = vmatpush.msra.mxu0 %v82_v12  ;;  %v112_v12 = vld [vmem:[%s1108_s1 + $0x108] sm:$0xff] }
  0x1c   :  { %557 = vmatpush.msra.mxu1 %v81_v13  ;;  %558 = vmatpush.msra.mxu2 %v81_v13 }
  0x1d   :  { %559 = vmatpush.msra.mxu3 %v81_v13  ;;  %208 = vmatpush.msra.mxu0 %v81_v13  ;;  %v129_v13 = vld [vmem:[%s1108_s1 + $0x190] sm:$0xff] }
  0x1e   :  { %560 = vmatpush.msra.mxu1 %v80_v14  ;;  %561 = vmatpush.msra.mxu2 %v80_v14 }
  0x1f   :  { %562 = vmatpush.msra.mxu3 %v80_v14  ;;  %209 = vmatpush.msra.mxu0 %v80_v14  ;;  %v95_v14 = vld [vmem:[%s1108_s1 + $0x80] sm:$0xff] }
  0x20   :  { %563 = vmatpush.msra.mxu1 %v79_v15  ;;  %564 = vmatpush.msra.mxu2 %v79_v15 }
  0x21   :  { %223 = vmatmul.f32.vlgmr.msra.gmra.mxu1 %v34_v16  ;;  %235 = vmatmul.f32.vlgmr.msra.gmra.mxu2 %v54_v17  ;;  %v111_v16 = vld [vmem:[%s1108_s1 + $0x100] sm:$0xff]  ;;  %v128_v17 = vld [vmem:[%s1108_s1 + $0x188] sm:$0xff] }
  0x22   :  { %307 = vmatpush.msrb.mxu2 %v126_v18  ;;  %251 = vmatpush.msrb.mxu1 %v110_v19  ;;  %v15_v18 = vld [vmem:[%s1109_s0 + $0x8] sm:$0xff]  ;;  %v16_v19 = vld [vmem:[%s1109_s0 + $0x10] sm:$0xff] }
  0x23   :  { %565 = vmatpush.msra.mxu3 %v79_v15  ;;  %210 = vmatpush.msra.mxu0 %v79_v15  ;;  %v29_v15 = vld [vmem:[%s1109_s0 + $0x78] sm:$0xff] }
  0x24   :  { %308 = vmatpush.msrb.mxu2 %v125_v20  ;;  %252 = vmatpush.msrb.mxu1 %v109_v21  ;;  %v127_v20 = vld [vmem:[%s1108_s1 + $0x180] sm:$0xff]  ;;  %v144_v21 = vld [vmem:[%s1108_s1 + $0x208] sm:$0xff] }
  0x25   :  { %363 = vmatpush.msrb.mxu3 %v142_v22  ;;  %211 = vmatmul.f32.vlgmr.msra.gmra.mxu0 %v14_v23  ;;  %v17_v22 = vld [vmem:[%s1109_s0 + $0x18] sm:$0xff]  ;;  %v143_v23 = vld [vmem:[%s1108_s1 + $0x200] sm:$0xff] }
  0x26   :  { %309 = vmatpush.msrb.mxu2 %v124_v24  ;;  %253 = vmatpush.msrb.mxu1 %v108_v25  ;;  %v18_v24 = vld [vmem:[%s1109_s0 + $0x20] sm:$0xff]  ;;  %v20_v25 = vld [vmem:[%s1109_s0 + $0x30] sm:$0xff] }
  0x27   :  { %364 = vmatpush.msrb.mxu3 %v141_v26  ;;  %427 = vmatpush.msrb.mxu0 %v150_v27  ;;  %v21_v26 = vld [vmem:[%s1109_s0 + $0x38] sm:$0xff]  ;;  %v22_v27 = vld [vmem:[%s1109_s0 + $0x40] sm:$0xff] }
  0x28   :  { %310 = vmatpush.msrb.mxu2 %v123_v28  ;;  %254 = vmatpush.msrb.mxu1 %v107_v29  ;;  %v23_v28 = vld [vmem:[%s1109_s0 + $0x48] sm:$0xff]  ;;  %v25_v29 = vld [vmem:[%s1109_s0 + $0x58] sm:$0xff] }
  0x29   :  { %365 = vmatpush.msrb.mxu3 %v140_v30  ;;  %226 = vmatmul.f32.gmra.mxu1 %v39_v31  ;;  %v26_v30 = vld [vmem:[%s1109_s0 + $0x60] sm:$0xff]  ;;  %v27_v31 = vld [vmem:[%s1109_s0 + $0x68] sm:$0xff] }
  0x2a   :  { %238 = vmatmul.f32.gmra.mxu2 %v59_v32  ;;  %255 = vmatpush.msrb.mxu1 %v106_v33  ;;  %v28_v32 = vld [vmem:[%s1109_s0 + $0x70] sm:$0xff]  ;;  %v30_v33 = vld [vmem:[%s1109_s0 + $0x80] sm:$0xff] }
  0x2b   :  { %311 = vmatpush.msrb.mxu2 %v122_v34  ;;  %366 = vmatpush.msrb.mxu3 %v139_v35  ;;  %v31_v34 = vld [vmem:[%s1109_s0 + $0x88] sm:$0xff]  ;;  %v32_v35 = vld [vmem:[%s1109_s0 + $0x90] sm:$0xff] }
  0x2c   :  { %256 = vmatpush.msrb.mxu1 %v105_v36  ;;  %428 = vmatpush.msrb.mxu0 %v149_v37  ;;  %v33_v36 = vld [vmem:[%s1109_s0 + $0x98] sm:$0xff]  ;;  %v35_v37 = vld [vmem:[%s1109_s0 + $0xa8] sm:$0xff] }
  0x2d   :  { %312 = vmatpush.msrb.mxu2 %v121_v38  ;;  %367 = vmatpush.msrb.mxu3 %v138_v39  ;;  %v36_v38 = vld [vmem:[%s1109_s0 + $0xb0] sm:$0xff]  ;;  %v37_v39 = vld [vmem:[%s1109_s0 + $0xb8] sm:$0xff] }
  0x2e   :  { %257 = vmatpush.msrb.mxu1 %v104_v40  ;;  %214 = vmatmul.f32.gmra.mxu0 %v19_v41  ;;  %v38_v40 = vld [vmem:[%s1109_s0 + $0xc0] sm:$0xff]  ;;  %v40_v41 = vld [vmem:[%s1109_s0 + $0xd0] sm:$0xff] }
  0x2f   :  { %313 = vmatpush.msrb.mxu2 %v120_v42  ;;  %368 = vmatpush.msrb.mxu3 %v137_v43  ;;  %v41_v42 = vld [vmem:[%s1109_s0 + $0xd8] sm:$0xff]  ;;  %v42_v43 = vld [vmem:[%s1109_s0 + $0xe0] sm:$0xff] }
  0x30   :  { %258 = vmatpush.msrb.mxu1 %v103_v44  ;;  %429 = vmatpush.msrb.mxu0 %v148_v45  ;;  %v43_v44 = vld [vmem:[%s1109_s0 + $0xe8] sm:$0xff]  ;;  %v45_v45 = vld [vmem:[%s1109_s0 + $0xf8] sm:$0xff] }
  0x31   :  { %314 = vmatpush.msrb.mxu2 %v119_v46  ;;  %369 = vmatpush.msrb.mxu3 %v136_v47  ;;  %v46_v46 = vld [vmem:[%s1109_s0 + $0x100] sm:$0xff]  ;;  %v47_v47 = vld [vmem:[%s1109_s0 + $0x108] sm:$0xff] }
  0x32   :  { %229 = vmatmul.f32.gmra.mxu1 %v44_v48  ;;  %241 = vmatmul.f32.gmra.mxu2 %v64_v49  ;;  %v48_v48 = vld [vmem:[%s1109_s0 + $0x110] sm:$0xff]  ;;  %v50_v49 = vld [vmem:[%s1109_s0 + $0x120] sm:$0xff] }
  0x33   :  { %315 = vmatpush.msrb.mxu2 %v118_v50  ;;  %259 = vmatpush.msrb.mxu1 %v102_v51  ;;  %v51_v50 = vld [vmem:[%s1109_s0 + $0x128] sm:$0xff]  ;;  %v52_v51 = vld [vmem:[%s1109_s0 + $0x130] sm:$0xff] }
  0x34   :  { %370 = vmatpush.msrb.mxu3 %v135_v52  ;;  %430 = vmatpush.msrb.mxu0 %v147_v53  ;;  %v53_v52 = vld [vmem:[%s1109_s0 + $0x138] sm:$0xff]  ;;  %v55_v53 = vld [vmem:[%s1109_s0 + $0x148] sm:$0xff] }
  0x35   :  { %316 = vmatpush.msrb.mxu2 %v117_v54  ;;  %260 = vmatpush.msrb.mxu1 %v101_v55  ;;  %v56_v54 = vld [vmem:[%s1109_s0 + $0x150] sm:$0xff]  ;;  %v57_v55 = vld [vmem:[%s1109_s0 + $0x158] sm:$0xff] }
  0x36   :  { %371 = vmatpush.msrb.mxu3 %v134_v56  ;;  %217 = vmatmul.f32.gmra.mxu0 %v24_v57  ;;  %v58_v56 = vld [vmem:[%s1109_s0 + $0x160] sm:$0xff]  ;;  %v60_v57 = vld [vmem:[%s1109_s0 + $0x170] sm:$0xff] }
  0x37   :  { %317 = vmatpush.msrb.mxu2 %v116_v58  ;;  %261 = vmatpush.msrb.mxu1 %v100_v59  ;;  %v61_v58 = vld [vmem:[%s1109_s0 + $0x178] sm:$0xff]  ;;  %v62_v59 = vld [vmem:[%s1109_s0 + $0x180] sm:$0xff] }
  0x38   :  { %372 = vmatpush.msrb.mxu3 %v133_v60  ;;  %431 = vmatpush.msrb.mxu0 %v146_v61  ;;  %v63_v60 = vld [vmem:[%s1109_s0 + $0x188] sm:$0xff]  ;;  %v65_v61 = vld [vmem:[%s1109_s0 + $0x198] sm:$0xff] }
  0x39   :  { %318 = vmatpush.msrb.mxu2 %v115_v62  ;;  %262 = vmatpush.msrb.mxu1 %v99_v63  ;;  %v66_v62 = vld [vmem:[%s1109_s0 + $0x1a0] sm:$0xff]  ;;  %v67_v63 = vld [vmem:[%s1109_s0 + $0x1a8] sm:$0xff] }
  0x3a   :  { %373 = vmatpush.msrb.mxu3 %v132_v0  ;;  %232 = vmatmul.f32.gmra.mxu1 %v49_v1  ;;  %v68_v0 = vld [vmem:[%s1109_s0 + $0x1b0] sm:$0xff]  ;;  %v70_v1 = vld [vmem:[%s1109_s0 + $0x1c0] sm:$0xff] }
  0x3b   :  { %244 = vmatmul.f32.gmra.mxu2 %v69_v2  ;;  %263 = vmatpush.msrb.mxu1 %v98_v3  ;;  %v71_v2 = vld [vmem:[%s1109_s0 + $0x1c8] sm:$0xff]  ;;  %v72_v3 = vld [vmem:[%s1109_s0 + $0x1d0] sm:$0xff] }
  0x3c   :  { %319 = vmatpush.msrb.mxu2 %v114_v4  ;;  %374 = vmatpush.msrb.mxu3 %v131_v5  ;;  %v73_v5 = vld [vmem:[%s1109_s0 + $0x1d8] sm:$0xff] }
  0x3d   :  { %247 = vmatmul.f32.vlgmr.msra.gmra.mxu3 %v74_v6  ;;  %264 = vmatpush.msrb.mxu1 %v97_v7  ;;  %v75_v6 = vld [vmem:[%s1109_s0 + $0x1e8] sm:$0xff]  ;;  %v76_v7 = vld [vmem:[%s1109_s0 + $0x1f0] sm:$0xff] }
  0x3e   :  { %320 = vmatpush.msrb.mxu2 %v113_v8  ;;  %375 = vmatpush.msrb.mxu3 %v130_v9  ;;  %v77_v8 = vld [vmem:[%s1109_s0 + $0x1f8] sm:$0xff] }
  0x3f   :  { %265 = vmatpush.msrb.mxu1 %v96_v10  ;;  %432 = vmatpush.msrb.mxu0 %v145_v11  ;;  %v1012_v10 = vld [vmem:[%s1110_s2] ss:$0 sm:$0xff] }
  0x40   :  { %321 = vmatpush.msrb.mxu2 %v112_v12  ;;  %376 = vmatpush.msrb.mxu3 %v129_v13 }
  0x41   :  { %266 = vmatpush.msrb.mxu1 %v95_v14  ;;  %220 = vmatmul.f32.gmra.mxu0 %v29_v15  ;;  %v78_v14 = vld [vmem:[%s1109_s0 + $0x200] sm:$0xff] }
  0x42   :  { %322 = vmatpush.msrb.mxu2 %v111_v16  ;;  %377 = vmatpush.msrb.mxu3 %v128_v17 }
  0x43   :  { %267 = vmatmul.f32.vlgmr.msrb.gmra.mxu1 %v15_v18  ;;  %323 = vmatmul.f32.vlgmr.msrb.gmra.mxu2 %v16_v19 }
  0x44   :  { %378 = vmatpush.msrb.mxu3 %v127_v20  ;;  %433 = vmatpush.msrb.mxu0 %v144_v21 }
  0x45   :  { %379 = vmatmul.f32.vlgmr.msrb.gmra.mxu3 %v17_v22 }
  0x46   :  { %434 = vmatpush.msrb.mxu0 %v143_v23 }
  0x49   :  { %505 = vmatmul.msk.f32.vlgmr.msrb.gmra.mxu0 %vm155_vm0, %v18_v24 }
  0x4b   :  { %270 = vmatmul.f32.gmra.mxu1 %v20_v25  ;;  %326 = vmatmul.f32.gmra.mxu2 %v21_v26 }
  0x4d   :  { %382 = vmatmul.f32.gmra.mxu3 %v22_v27 }
  0x51   :  { %506 = vmatmul.msk.f32.gmra.mxu0 %vm155_vm0, %v23_v28 }
  0x53   :  { %273 = vmatmul.f32.gmra.mxu1 %v25_v29  ;;  %329 = vmatmul.f32.gmra.mxu2 %v26_v30 }
  0x55   :  { %385 = vmatmul.f32.gmra.mxu3 %v27_v31 }
  0x59   :  { %507 = vmatmul.msk.f32.gmra.mxu0 %vm155_vm0, %v28_v32 }
  0x5b   :  { %276 = vmatmul.f32.gmra.mxu1 %v30_v33  ;;  %332 = vmatmul.f32.gmra.mxu2 %v31_v34 }
  0x5d   :  { %388 = vmatmul.f32.gmra.mxu3 %v32_v35 }
  0x61   :  { %508 = vmatmul.msk.f32.gmra.mxu0 %vm155_vm0, %v33_v36 }
  0x63   :  { %279 = vmatmul.f32.gmra.mxu1 %v35_v37  ;;  %335 = vmatmul.f32.gmra.mxu2 %v36_v38 }
  0x65   :  { %391 = vmatmul.f32.gmra.mxu3 %v37_v39 }
  0x69   :  { %509 = vmatmul.msk.f32.gmra.mxu0 %vm155_vm0, %v38_v40 }
  0x6b   :  { %282 = vmatmul.f32.gmra.mxu1 %v40_v41  ;;  %338 = vmatmul.f32.gmra.mxu2 %v41_v42 }
  0x6d   :  { %394 = vmatmul.f32.gmra.mxu3 %v42_v43 }
  0x71   :  { %510 = vmatmul.msk.f32.gmra.mxu0 %vm155_vm0, %v43_v44 }
  0x73   :  { %285 = vmatmul.f32.gmra.mxu1 %v45_v45  ;;  %341 = vmatmul.f32.gmra.mxu2 %v46_v46 }
  0x75   :  { %397 = vmatmul.f32.gmra.mxu3 %v47_v47 }
  0x79   :  { %511 = vmatmul.msk.f32.gmra.mxu0 %vm155_vm0, %v48_v48 }
  0x7b   :  { %288 = vmatmul.f32.gmra.mxu1 %v50_v49  ;;  %344 = vmatmul.f32.gmra.mxu2 %v51_v50 }
  0x7d   :  { %400 = vmatmul.f32.gmra.mxu3 %v52_v51 }
  0x81   :  { %512 = vmatmul.msk.f32.gmra.mxu0 %vm155_vm0, %v53_v52 }
  0x83   :  { %291 = vmatmul.f32.gmra.mxu1 %v55_v53  ;;  %347 = vmatmul.f32.gmra.mxu2 %v56_v54 }
  0x85   :  { %403 = vmatmul.f32.gmra.mxu3 %v57_v55 }
  0x89   :  { %513 = vmatmul.msk.f32.gmra.mxu0 %vm155_vm0, %v58_v56 }
  0x8b   :  { %294 = vmatmul.f32.gmra.mxu1 %v60_v57  ;;  %350 = vmatmul.f32.gmra.mxu2 %v61_v58 }
  0x8d   :  { %406 = vmatmul.f32.gmra.mxu3 %v62_v59 }
  0x91   :  { %514 = vmatmul.msk.f32.gmra.mxu0 %vm155_vm0, %v63_v60 }
  0x93   :  { %297 = vmatmul.f32.gmra.mxu1 %v65_v61  ;;  %353 = vmatmul.f32.gmra.mxu2 %v66_v62 }
  0x95   :  { %409 = vmatmul.f32.gmra.mxu3 %v67_v63 }
  0x99   :  { %515 = vmatmul.msk.f32.gmra.mxu0 %vm155_vm0, %v68_v0 }
  0x9b   :  { %300 = vmatmul.f32.gmra.mxu1 %v70_v1  ;;  %356 = vmatmul.f32.gmra.mxu2 %v71_v2 }
  0x9d   :  { %412 = vmatmul.f32.gmra.mxu3 %v72_v3 }
  0x9e   :  { %v994_v4 = vpop.f32.mrf.mxu1 }
  0x9f   :  { %v225_v3 = vadd.f32 %v1012_v10, %v994_v4 }
  0xa1   :  { %516 = vmatmul.msk.f32.gmra.mxu0 %vm155_vm0, %v73_v5 }
  0xa2   :  { %v212_v9 = vpop.f32.mrf.mxu0 }
  0xa3   :  { %303 = vmatmul.f32.gmra.mxu1 %v75_v6  ;;  %359 = vmatmul.f32.gmra.mxu2 %v76_v7  ;;  %v213_v29 = vadd.f32 %v1012_v10, %v212_v9 }
  0xa4   :  { %v236_v11 = vpop.f32.mrf.mxu2 }
  0xa5   :  { %415 = vmatmul.f32.gmra.mxu3 %v77_v8  ;;  %v1015_v12 = vadd.f32 %v1012_v10, %v236_v11 }
  0xa6   :  { %v1017_v13 = vpop.f32.mrf.mxu1 }
  0xa9   :  { %517 = vmatmul.msk.f32.gmra.mxu0 %vm155_vm0, %v78_v14 }
  0xab   :  { %v215_v15 = vpop.f32.mrf.mxu0 }
  0xac   :  { %v216_v37 = vadd.f32 %v1012_v10, %v215_v15 }
  0xad   :  { %v239_v16 = vpop.f32.mrf.mxu2 }
  0xae   :  { %v1024_v17 = vadd.f32 %v1012_v10, %v239_v16 }
  0xaf   :  { %v1026_v18 = vpop.f32.mrf.mxu1 }
  0xb3   :  { %v218_v19 = vpop.f32.mrf.mxu0 }
  0xb4   :  { %v219_v47 = vadd.f32 %v1012_v10, %v218_v19  ;;  %v228_v19 = vadd.f32 %v1012_v10, %v1017_v13 }
  0xb5   :  { %v242_v20 = vpop.f32.mrf.mxu2 }
  0xb6   :  { %v1029_v21 = vadd.f32 %v1012_v10, %v242_v20 }
  0xb7   :  { %v1031_v22 = vpop.f32.mrf.mxu1 }
  0xbe   :  { %v245_v23 = vpop.f32.mrf.mxu2  ;;  %v221_v24 = vpop.f32.mrf.mxu0 }
  0xbf   :  { %v1034_v25 = vadd.f32 %v1012_v10, %v245_v23  ;;  %v222_v57 = vadd.f32 %v1012_v10, %v221_v24 }
  0xc0   :  { %v248_v26 = vpop.f32.mrf.mxu3  ;;  %v268_v27 = vpop.f32.mrf.mxu1 }
  0xc1   :  { %v1037_v28 = vadd.f32 %v1012_v10, %v248_v26  ;;  %v269_v30 = vadd.f32 %v268_v27, %v213_v29 }
  0xc6   :  { %v324_v31 = vpop.f32.mrf.mxu2  ;;  %v436_v32 = vpop.f32.mrf.mxu0 }
  0xc7   :  { %v325_v33 = vadd.f32 %v324_v31, %v269_v30 }
  0xc8   :  { %v271_v34 = vpop.f32.mrf.mxu1  ;;  %v380_v35 = vpop.f32.mrf.mxu3 }
  0xc9   :  { %v381_v36 = vadd.f32 %v380_v35, %v325_v33  ;;  %v272_v39 = vadd.f32 %v271_v34, %v216_v37 }
  0xcb   :  { %v437_v38 = vadd.f32 %v436_v32, %v381_v36  ;;  %v231_v32 = vadd.f32 %v1012_v10, %v1026_v18 }
  0xcd   :  { %v475_v40 = vmax.f32 %v437_v38, 0.0 }
  0xce   :  { %v327_v41 = vpop.f32.mrf.mxu2  ;;  %v439_v42 = vpop.f32.mrf.mxu0 }
  0xcf   :  { %488 = vst.msk [vmem:[%s1111_s3] sm:$0xff] %vm155_vm0, %v475_v40  ;;  %v328_v43 = vadd.f32 %v327_v41, %v272_v39  ;;  %v234_v41 = vadd.f32 %v1012_v10, %v1031_v22 }
  0xd0   :  { %v274_v44 = vpop.f32.mrf.mxu1  ;;  %v383_v45 = vpop.f32.mrf.mxu3 }
  0xd1   :  { %v384_v46 = vadd.f32 %v383_v45, %v328_v43  ;;  %v275_v49 = vadd.f32 %v274_v44, %v219_v47 }
  0xd3   :  { %v440_v48 = vadd.f32 %v439_v42, %v384_v46 }
  0xd5   :  { %v476_v50 = vmax.f32 %v440_v48, 0.0 }
  0xd6   :  { %v330_v51 = vpop.f32.mrf.mxu2  ;;  %v442_v52 = vpop.f32.mrf.mxu0 }
  0xd7   :  { %489 = vst.msk [vmem:[%s1111_s3 + $0x8] sm:$0xff] %vm155_vm0, %v476_v50  ;;  %v331_v53 = vadd.f32 %v330_v51, %v275_v49 }
  0xd8   :  { %v277_v54 = vpop.f32.mrf.mxu1  ;;  %v386_v55 = vpop.f32.mrf.mxu3 }
  0xd9   :  { %v387_v56 = vadd.f32 %v386_v55, %v331_v53  ;;  %v278_v59 = vadd.f32 %v277_v54, %v222_v57 }
  0xdb   :  { %v443_v58 = vadd.f32 %v442_v52, %v387_v56 }
  0xdd   :  { %v477_v60 = vmax.f32 %v443_v58, 0.0 }
  0xde   :  { %v333_v61 = vpop.f32.mrf.mxu2  ;;  %v445_v62 = vpop.f32.mrf.mxu0 }
  0xdf   :  { %490 = vst.msk [vmem:[%s1111_s3 + $0x10] sm:$0xff] %vm155_vm0, %v477_v60  ;;  %v334_v63 = vadd.f32 %v333_v61, %v278_v59 }
  0xe0   :  { %v280_v0 = vpop.f32.mrf.mxu1  ;;  %v389_v1 = vpop.f32.mrf.mxu3 }
  0xe1   :  { %v390_v2 = vadd.f32 %v389_v1, %v334_v63  ;;  %v281_v6 = vadd.f32 %v280_v0, %v225_v3 }
  0xe3   :  { %v446_v5 = vadd.f32 %v445_v62, %v390_v2 }
  0xe5   :  { %v478_v7 = vmax.f32 %v446_v5, 0.0 }
  0xe6   :  { %v336_v8 = vpop.f32.mrf.mxu2  ;;  %v448_v9 = vpop.f32.mrf.mxu0 }
  0xe7   :  { %491 = vst.msk [vmem:[%s1111_s3 + $0x18] sm:$0xff] %vm155_vm0, %v478_v7  ;;  %v337_v11 = vadd.f32 %v336_v8, %v281_v6 }
  0xe8   :  { %v283_v14 = vpop.f32.mrf.mxu1  ;;  %v392_v15 = vpop.f32.mrf.mxu3 }
  0xe9   :  { %v393_v16 = vadd.f32 %v392_v15, %v337_v11  ;;  %v284_v23 = vadd.f32 %v283_v14, %v228_v19 }
  0xeb   :  { %v449_v20 = vadd.f32 %v448_v9, %v393_v16 }
  0xed   :  { %v479_v4 = vmax.f32 %v449_v20, 0.0 }
  0xee   :  { %v339_v24 = vpop.f32.mrf.mxu2  ;;  %v451_v26 = vpop.f32.mrf.mxu0 }
  0xef   :  { %492 = vst.msk [vmem:[%s1111_s3 + $0x20] sm:$0xff] %vm155_vm0, %v479_v4  ;;  %v340_v27 = vadd.f32 %v339_v24, %v284_v23 }
  0xf0   :  { %v286_v29 = vpop.f32.mrf.mxu1  ;;  %v395_v30 = vpop.f32.mrf.mxu3 }
  0xf1   :  { %v396_v31 = vadd.f32 %v395_v30, %v340_v27  ;;  %v287_v34 = vadd.f32 %v286_v29, %v231_v32 }
  0xf3   :  { %v452_v33 = vadd.f32 %v451_v26, %v396_v31 }
  0xf5   :  { %v480_v13 = vmax.f32 %v452_v33, 0.0 }
  0xf6   :  { %v342_v35 = vpop.f32.mrf.mxu2  ;;  %v454_v36 = vpop.f32.mrf.mxu0 }
  0xf7   :  { %493 = vst.msk [vmem:[%s1111_s3 + $0x28] sm:$0xff] %vm155_vm0, %v480_v13  ;;  %v343_v37 = vadd.f32 %v342_v35, %v287_v34 }
  0xf8   :  { %v289_v38 = vpop.f32.mrf.mxu1  ;;  %v398_v39 = vpop.f32.mrf.mxu3 }
  0xf9   :  { %v399_v40 = vadd.f32 %v398_v39, %v343_v37  ;;  %v290_v43 = vadd.f32 %v289_v38, %v234_v41 }
  0xfb   :  { %v455_v42 = vadd.f32 %v454_v36, %v399_v40 }
  0xfd   :  { %v481_v18 = vmax.f32 %v455_v42, 0.0 }
  0xfe   :  { %v345_v44 = vpop.f32.mrf.mxu2  ;;  %v457_v45 = vpop.f32.mrf.mxu0 }
  0xff   :  { %494 = vst.msk [vmem:[%s1111_s3 + $0x30] sm:$0xff] %vm155_vm0, %v481_v18  ;;  %v346_v46 = vadd.f32 %v345_v44, %v290_v43 }
 0x100   :  { %v292_v47 = vpop.f32.mrf.mxu1  ;;  %v401_v48 = vpop.f32.mrf.mxu3 }
 0x101   :  { %v402_v49 = vadd.f32 %v401_v48, %v346_v46  ;;  %v293_v51 = vadd.f32 %v292_v47, %v1015_v12 }
 0x103   :  { %v458_v50 = vadd.f32 %v457_v45, %v402_v49 }
 0x105   :  { %v482_v52 = vmax.f32 %v458_v50, 0.0 }
 0x106   :  { %v348_v53 = vpop.f32.mrf.mxu2  ;;  %v460_v10 = vpop.f32.mrf.mxu0 }
 0x107   :  { %495 = vst.msk [vmem:[%s1111_s3 + $0x38] sm:$0xff] %vm155_vm0, %v482_v52  ;;  %v349_v22 = vadd.f32 %v348_v53, %v293_v51 }
 0x108   :  { %v295_v54 = vpop.f32.mrf.mxu1  ;;  %v404_v55 = vpop.f32.mrf.mxu3 }
 0x109   :  { %v405_v56 = vadd.f32 %v404_v55, %v349_v22  ;;  %v296_v58 = vadd.f32 %v295_v54, %v1024_v17 }
 0x10b   :  { %v461_v57 = vadd.f32 %v460_v10, %v405_v56 }
 0x10d   :  { %v483_v59 = vmax.f32 %v461_v57, 0.0 }
 0x10e   :  { %v351_v60 = vpop.f32.mrf.mxu2  ;;  %v463_v61 = vpop.f32.mrf.mxu0 }
 0x10f   :  { %496 = vst.msk [vmem:[%s1111_s3 + $0x40] sm:$0xff] %vm155_vm0, %v483_v59  ;;  %v352_v12 = vadd.f32 %v351_v60, %v296_v58 }
 0x110   :  { %v298_v62 = vpop.f32.mrf.mxu1  ;;  %v407_v63 = vpop.f32.mrf.mxu3 }
 0x111   :  { %v408_v0 = vadd.f32 %v407_v63, %v352_v12  ;;  %v299_v2 = vadd.f32 %v298_v62, %v1029_v21 }
 0x113   :  { %v464_v1 = vadd.f32 %v463_v61, %v408_v0 }
 0x115   :  { %v484_v3 = vmax.f32 %v464_v1, 0.0 }
 0x116   :  { %v354_v5 = vpop.f32.mrf.mxu2  ;;  %v466_v6 = vpop.f32.mrf.mxu0 }
 0x117   :  { %497 = vst.msk [vmem:[%s1111_s3 + $0x48] sm:$0xff] %vm155_vm0, %v484_v3  ;;  %v355_v17 = vadd.f32 %v354_v5, %v299_v2 }
 0x118   :  { %v301_v7 = vpop.f32.mrf.mxu1  ;;  %v410_v8 = vpop.f32.mrf.mxu3 }
 0x119   :  { %v411_v9 = vadd.f32 %v410_v8, %v355_v17  ;;  %v302_v14 = vadd.f32 %v301_v7, %v1034_v25 }
 0x11b   :  { %v467_v11 = vadd.f32 %v466_v6, %v411_v9 }
 0x11d   :  { %v485_v15 = vmax.f32 %v467_v11, 0.0 }
 0x11e   :  { %v357_v16 = vpop.f32.mrf.mxu2  ;;  %v469_v19 = vpop.f32.mrf.mxu0 }
 0x11f   :  { %498 = vst.msk [vmem:[%s1111_s3 + $0x50] sm:$0xff] %vm155_vm0, %v485_v15  ;;  %v358_v21 = vadd.f32 %v357_v16, %v302_v14 }
 0x120   :  { %v413_v20 = vpop.f32.mrf.mxu3  ;;  %v304_v4 = vpop.f32.mrf.mxu1 }
 0x121   :  { %v414_v23 = vadd.f32 %v413_v20, %v358_v21  ;;  %v305_v26 = vadd.f32 %v304_v4, %v1037_v28 }
 0x123   :  { %v470_v24 = vadd.f32 %v469_v19, %v414_v23 }
 0x125   :  { %v486_v27 = vmax.f32 %v470_v24, 0.0 }
 0x126   :  { %v360_v29 = vpop.f32.mrf.mxu2  ;;  %v472_v31 = vpop.f32.mrf.mxu0 }
 0x127   :  { %499 = vst.msk [vmem:[%s1111_s3 + $0x58] sm:$0xff] %vm155_vm0, %v486_v27  ;;  %v361_v25 = vadd.f32 %v360_v29, %v305_v26 }
 0x128   :  { %v416_v30 = vpop.f32.mrf.mxu3 }
 0x129   :  { %v417_v32 = vadd.f32 %v416_v30, %v361_v25 }
 0x12b   :  { %v473_v33 = vadd.f32 %v472_v31, %v417_v32 }
 0x12d   :  { %v487_v34 = vmax.f32 %v473_v33, 0.0 }
 0x12f   :  { %500 = vst.msk [vmem:[%s1111_s3 + $0x60] sm:$0xff] %vm155_vm0, %v487_v34 }

// kernel: noisy_duel_net_forward.7
= control target key start
LH: loop header
LB: loop body
LE: loop exit
PB: predicated region body
PF: predicated region fallthrough
CT: control target
= control target key end

     0   :  { %s11424_s15 = smov 0   ;;  %s11426_s16 = smov 0   ;;  %s13754_s0 = inlined_call_operand.vmem [shape: f32[2,3328], index: 0, kind: input, shape index: {}]   ;;  %s13755_s1 = inlined_call_operand.vmem [shape: bf16[3328,1024], index: 1, kind: input, shape index: {}]   ;;  %s13756_s2 = inlined_call_operand.vmem [shape: f32[1,1024], index: 2, kind: input, shape index: {}]   ;;  %s13757_s3 = inlined_call_operand.vmem [shape: f32[1024,7], index: 3, kind: input, shape index: {}]   ;;  %s13758_s4 = inlined_call_operand.vmem [shape: f32[1,2,7], index: 4, kind: output, shape index: {}]  }
   0x1   :  { %s11428_s17 = smov 0  }
   0x2 LB: > { %s23_s18 = sadd.s32 1, %s11392_s16  ;;  %p7179_p0 = scmp.ge.s32.totalorder %s11396_s17, 1  ;;  %s11396_s17 = sphi %s11428_s17, %s14_s17   ;;  %s11392_s16 = sphi %s11426_s16, %s13760_s16   ;;  %s11388_s15 = sphi %s11424_s15, %s13759_s15  }
   0x3   : > { %p24_p1 = scmp.ge.s32.totalorder %s23_s18, 2  ;;  %p215_p2 = scmp.lt.s32.totalorder %s11396_s17, 3 }
   0x5   : > { %s13762_s18 = smov (%p24_p1, %s23_s18), 0  ;;  %p216_p3 = pnand %p7179_p0, %p215_p2 }
   0x6   : > { %s259_s19 = smul.u32 (!%p216_p3), 13, %s11388_s15  ;;  %p7183_p6 = scmp.ne.s32.totalorder (!%p216_p3), %s11388_s15, 0 }
   0x7   : > { %219 = sbr.rel (%p216_p3) target bundleno = 1738 (0x6ca), region = 36 }
   0x8   : > { %s265_s20 = smul.u32 (!%p216_p3), 208, %s11388_s15  ;;  %p260_p4 = scmp.lt.s32.totalorder (!%p216_p3), %s259_s19, 25 }
   0xa   : > { %p267_p5 = scmp.lt.s32.totalorder (!%p216_p3), %s265_s20, 415 }
   0xc   : > { %s13764_s19 = smov (!%p260_p4, %s259_s19), 25  ;;  %s13766_s20 = smov (!%p267_p5, %s265_s20), 415 }
   0xd   : > { %s7180_s21 = sshll.u32 %s13764_s19, 1  ;;  %s10516_s25 = sshll.u32 %s13766_s20, 5 }
   0xe   : > { %s11449_s24 = scalar_lea.vmem %s13754_s0, %s7180_s21  ;;  %s11454_s28 = scalar_lea.vmem %s13755_s1, %s10516_s25 }
   0xf   : > { %295 = sbr.rel (%p7183_p6) target bundleno = 23 (0x17), region = 40 }
  0x14   : > { %v11398_v0 = vmov 0.0  }
  0x15   : > { %296 = vst [vmem:[#allocation2] sm:$0xff] %v11398_v0 }
  0x16   : > { %297 = vst [vmem:[#allocation2 + $0x8] sm:$0xff] %v11398_v0 }
  0x17 PF: > { %v7410_v1 = vld [vmem:[%s11454_s28 + $0x1c0] sm:$0xf]  ;;  %vm6710_vm0 = vcmask 1041408   ;;  %vm6712_vm1 = vcmask 1045508   ;;  %vm6714_vm2 = vcmask 1043456   ;;  %p10512_p7 = scmp.ne.s32.totalorder %s11388_s15, 1 }
  0x18   : > { %v10577_v2 = vld [vmem:[%s11454_s28 + $0x1dc] sm:$0xf0] }
  0x19   : > { %v7666_v3 = vld [vmem:[%s11454_s28 + $0x3c0] sm:$0xf]  ;;  %v7411_v4 = vor.u32 %v10577_v2, %v7410_v1 }
  0x1a   : > { %v10641_v5 = vld [vmem:[%s11454_s28 + $0x3dc] sm:$0xf0] }
  0x1b   : > { %v7922_v6 = vld [vmem:[%s11454_s28 + $0x5c0] sm:$0xf]  ;;  %v7667_v8 = vor.u32 %v10641_v5, %v7666_v3  ;;  %5344 = vmatpush.bf16.msra.mxu0 %v7411_v4 }
  0x1c   : > { %v10705_v7 = vld [vmem:[%s11454_s28 + $0x5dc] sm:$0xf0] }
  0x1d   : > { %v7923_v9 = vor.u32 %v10705_v7, %v7922_v6  ;;  %v8178_v10 = vld [vmem:[%s11454_s28 + $0x7c0] sm:$0xf]  ;;  %5357 = vmatpush.bf16.msra.mxu1 %v7667_v8 }
  0x1e   : > { %v10769_v11 = vld [vmem:[%s11454_s28 + $0x7dc] sm:$0xf0] }
  0x1f   : > { %v7378_v12 = vld [vmem:[%s11454_s28 + $0x180] sm:$0xf]  ;;  %v8179_v13 = vor.u32 %v10769_v11, %v8178_v10  ;;  %5370 = vmatpush.bf16.msra.mxu2 %v7923_v9 }
  0x20   : > { %v10569_v14 = vld [vmem:[%s11454_s28 + $0x19c] sm:$0xf0] }
  0x21   : > { %v7634_v15 = vld [vmem:[%s11454_s28 + $0x380] sm:$0xf]  ;;  %v7379_v17 = vor.u32 %v10569_v14, %v7378_v12  ;;  %5383 = vmatpush.bf16.msra.mxu3 %v8179_v13 }
  0x22   : > { %v10633_v16 = vld [vmem:[%s11454_s28 + $0x39c] sm:$0xf0] }
  0x23   : > { %v7635_v18 = vor.u32 %v10633_v16, %v7634_v15  ;;  %v7890_v19 = vld [vmem:[%s11454_s28 + $0x580] sm:$0xf]  ;;  %5345 = vmatpush.bf16.msra.mxu0 %v7379_v17 }
  0x24   : > { %v10697_v20 = vld [vmem:[%s11454_s28 + $0x59c] sm:$0xf0] }
  0x25   : > { %v8146_v21 = vld [vmem:[%s11454_s28 + $0x780] sm:$0xf]  ;;  %v7891_v22 = vor.u32 %v10697_v20, %v7890_v19  ;;  %5358 = vmatpush.bf16.msra.mxu1 %v7635_v18 }
  0x26   : > { %v10761_v23 = vld [vmem:[%s11454_s28 + $0x79c] sm:$0xf0] }
  0x27   : > { %v7346_v24 = vld [vmem:[%s11454_s28 + $0x140] sm:$0xf]  ;;  %v8147_v26 = vor.u32 %v10761_v23, %v8146_v21  ;;  %5371 = vmatpush.bf16.msra.mxu2 %v7891_v22 }
  0x28   : > { %v10561_v25 = vld [vmem:[%s11454_s28 + $0x15c] sm:$0xf0] }
  0x29   : > { %v7602_v27 = vld [vmem:[%s11454_s28 + $0x340] sm:$0xf]  ;;  %v7347_v30 = vor.u32 %v10561_v25, %v7346_v24  ;;  %5384 = vmatpush.bf16.msra.mxu3 %v8147_v26 }
  0x2a   : > { %v10625_v28 = vld [vmem:[%s11454_s28 + $0x35c] sm:$0xf0] }
  0x2b   : > { %v7858_v29 = vld [vmem:[%s11454_s28 + $0x540] sm:$0xf]  ;;  %v7603_v34 = vor.u32 %v10625_v28, %v7602_v27  ;;  %5346 = vmatpush.bf16.msra.mxu0 %v7347_v30 }
  0x2c   : > { %v10689_v31 = vld [vmem:[%s11454_s28 + $0x55c] sm:$0xf0] }
  0x2d   : > { %v8114_v32 = vld [vmem:[%s11454_s28 + $0x740] sm:$0xf]  ;;  %v7859_v35 = vor.u32 %v10689_v31, %v7858_v29  ;;  %5359 = vmatpush.bf16.msra.mxu1 %v7603_v34 }
  0x2e   : > { %v10753_v33 = vld [vmem:[%s11454_s28 + $0x75c] sm:$0xf0] }
  0x2f   : > { %v7314_v36 = vld [vmem:[%s11454_s28 + $0x100] sm:$0xf]  ;;  %v8115_v39 = vor.u32 %v10753_v33, %v8114_v32  ;;  %5372 = vmatpush.bf16.msra.mxu2 %v7859_v35 }
  0x30   : > { %v10553_v37 = vld [vmem:[%s11454_s28 + $0x11c] sm:$0xf0] }
  0x31   : > { %v7570_v38 = vld [vmem:[%s11454_s28 + $0x300] sm:$0xf]  ;;  %v7315_v45 = vor.u32 %v10553_v37, %v7314_v36  ;;  %5385 = vmatpush.bf16.msra.mxu3 %v8115_v39 }
  0x32   : > { %v10617_v40 = vld [vmem:[%s11454_s28 + $0x31c] sm:$0xf0] }
  0x33   : > { %v7826_v41 = vld [vmem:[%s11454_s28 + $0x500] sm:$0xf]  ;;  %v7571_v46 = vor.u32 %v10617_v40, %v7570_v38  ;;  %5347 = vmatpush.bf16.msra.mxu0 %v7315_v45 }
  0x34   : > { %v10681_v42 = vld [vmem:[%s11454_s28 + $0x51c] sm:$0xf0] }
  0x35   : > { %v8082_v43 = vld [vmem:[%s11454_s28 + $0x700] sm:$0xf]  ;;  %v7827_v47 = vor.u32 %v10681_v42, %v7826_v41  ;;  %5360 = vmatpush.bf16.msra.mxu1 %v7571_v46 }
  0x36   : > { %v10745_v44 = vld [vmem:[%s11454_s28 + $0x71c] sm:$0xf0] }
  0x37   : > { %v7282_v48 = vld [vmem:[%s11454_s28 + $0xc0] sm:$0xf]  ;;  %v8083_v51 = vor.u32 %v10745_v44, %v8082_v43  ;;  %5373 = vmatpush.bf16.msra.mxu2 %v7827_v47 }
  0x38   : > { %v10545_v49 = vld [vmem:[%s11454_s28 + $0xdc] sm:$0xf0] }
  0x39   : > { %v7538_v50 = vld [vmem:[%s11454_s28 + $0x2c0] sm:$0xf]  ;;  %v7283_v57 = vor.u32 %v10545_v49, %v7282_v48  ;;  %5386 = vmatpush.bf16.msra.mxu3 %v8083_v51 }
  0x3a   : > { %v10609_v52 = vld [vmem:[%s11454_s28 + $0x2dc] sm:$0xf0] }
  0x3b   : > { %v7794_v53 = vld [vmem:[%s11454_s28 + $0x4c0] sm:$0xf]  ;;  %v7539_v58 = vor.u32 %v10609_v52, %v7538_v50  ;;  %5348 = vmatpush.bf16.msra.mxu0 %v7283_v57 }
  0x3c   : > { %v10673_v54 = vld [vmem:[%s11454_s28 + $0x4dc] sm:$0xf0] }
  0x3d   : > { %v8050_v55 = vld [vmem:[%s11454_s28 + $0x6c0] sm:$0xf]  ;;  %v7795_v59 = vor.u32 %v10673_v54, %v7794_v53  ;;  %5361 = vmatpush.bf16.msra.mxu1 %v7539_v58 }
  0x3e   : > { %v10737_v56 = vld [vmem:[%s11454_s28 + $0x6dc] sm:$0xf0] }
  0x3f   : > { %v7250_v60 = vld [vmem:[%s11454_s28 + $0x80] sm:$0xf]  ;;  %v8051_v63 = vor.u32 %v10737_v56, %v8050_v55  ;;  %5374 = vmatpush.bf16.msra.mxu2 %v7795_v59 }
  0x40   : > { %v10537_v61 = vld [vmem:[%s11454_s28 + $0x9c] sm:$0xf0] }
  0x41   : > { %v7506_v62 = vld [vmem:[%s11454_s28 + $0x280] sm:$0xf]  ;;  %v7251_v5 = vor.u32 %v10537_v61, %v7250_v60  ;;  %5387 = vmatpush.bf16.msra.mxu3 %v8051_v63 }
  0x42   : > { %v10601_v0 = vld [vmem:[%s11454_s28 + $0x29c] sm:$0xf0] }
  0x43   : > { %v7762_v1 = vld [vmem:[%s11454_s28 + $0x480] sm:$0xf]  ;;  %v7507_v6 = vor.u32 %v10601_v0, %v7506_v62  ;;  %5349 = vmatpush.bf16.msra.mxu0 %v7251_v5 }
  0x44   : > { %v10665_v2 = vld [vmem:[%s11454_s28 + $0x49c] sm:$0xf0] }
  0x45   : > { %v8018_v3 = vld [vmem:[%s11454_s28 + $0x680] sm:$0xf]  ;;  %v7763_v7 = vor.u32 %v10665_v2, %v7762_v1  ;;  %5362 = vmatpush.bf16.msra.mxu1 %v7507_v6 }
  0x46   : > { %v10729_v4 = vld [vmem:[%s11454_s28 + $0x69c] sm:$0xf0] }
  0x47   : > { %v7218_v8 = vld [vmem:[%s11454_s28 + $0x40] sm:$0xf]  ;;  %v8019_v11 = vor.u32 %v10729_v4, %v8018_v3  ;;  %5375 = vmatpush.bf16.msra.mxu2 %v7763_v7 }
  0x48   : > { %v10529_v9 = vld [vmem:[%s11454_s28 + $0x5c] sm:$0xf0] }
  0x49   : > { %v7474_v10 = vld [vmem:[%s11454_s28 + $0x240] sm:$0xf]  ;;  %v7219_v17 = vor.u32 %v10529_v9, %v7218_v8  ;;  %5388 = vmatpush.bf16.msra.mxu3 %v8019_v11 }
  0x4a   : > { %v10593_v12 = vld [vmem:[%s11454_s28 + $0x25c] sm:$0xf0] }
  0x4b   : > { %v7730_v13 = vld [vmem:[%s11454_s28 + $0x440] sm:$0xf]  ;;  %v7475_v20 = vor.u32 %v10593_v12, %v7474_v10  ;;  %5350 = vmatpush.bf16.msra.mxu0 %v7219_v17 }
  0x4c   : > { %v10657_v14 = vld [vmem:[%s11454_s28 + $0x45c] sm:$0xf0] }
  0x4d   : > { %v7986_v15 = vld [vmem:[%s11454_s28 + $0x640] sm:$0xf]  ;;  %v7731_v21 = vor.u32 %v10657_v14, %v7730_v13  ;;  %5363 = vmatpush.bf16.msra.mxu1 %v7475_v20 }
  0x4e   : > { %v10721_v16 = vld [vmem:[%s11454_s28 + $0x65c] sm:$0xf0] }
  0x4f   : > { %v7186_v18 = vld [vmem:[%s11454_s28] sm:$0xf]  ;;  %v7987_v25 = vor.u32 %v10721_v16, %v7986_v15  ;;  %5376 = vmatpush.bf16.msra.mxu2 %v7731_v21  ;;  %v302_v21 = vld [vmem:[%s11449_s24 + $0x10] sm:$0xff] }
  0x50   : > { %v10521_v19 = vld [vmem:[%s11454_s28 + $0x1c] sm:$0xf0] }
  0x51   : > { %v7442_v22 = vld [vmem:[%s11454_s28 + $0x200] sm:$0xf]  ;;  %v7187_v32 = vor.u32 %v10521_v19, %v7186_v18  ;;  %5389 = vmatpush.bf16.msra.mxu3 %v7987_v25 }
  0x52   : > { %v10585_v23 = vld [vmem:[%s11454_s28 + $0x21c] sm:$0xf0] }
  0x53   : > { %v7698_v24 = vld [vmem:[%s11454_s28 + $0x400] sm:$0xf]  ;;  %v7443_v36 = vor.u32 %v10585_v23, %v7442_v22  ;;  %5351 = vmatpush.bf16.msra.mxu0 %v7187_v32 }
  0x54   : > { %v10649_v26 = vld [vmem:[%s11454_s28 + $0x41c] sm:$0xf0] }
  0x55   : > { %v7954_v27 = vld [vmem:[%s11454_s28 + $0x600] sm:$0xf]  ;;  %v7699_v37 = vor.u32 %v10649_v26, %v7698_v24  ;;  %5364 = vmatpush.bf16.msra.mxu1 %v7443_v36 }
  0x56   : > { %v10713_v28 = vld [vmem:[%s11454_s28 + $0x61c] sm:$0xf0] }
  0x57   : > { %v8434_v29 = vld [vmem:[%s11454_s28 + $0x9c0] sm:$0xf]  ;;  %v7955_v40 = vor.u32 %v10713_v28, %v7954_v27  ;;  %5377 = vmatpush.bf16.msra.mxu2 %v7699_v37 }
  0x58   : > { %v10833_v30 = vld [vmem:[%s11454_s28 + $0x9dc] sm:$0xf0] }
  0x59   : > { %v8690_v31 = vld [vmem:[%s11454_s28 + $0xbc0] sm:$0xf]  ;;  %v8435_v41 = vor.u32 %v10833_v30, %v8434_v29  ;;  %5390 = vmatpush.bf16.msra.mxu3 %v7955_v40 }
  0x5a   : > { %v10897_v33 = vld [vmem:[%s11454_s28 + $0xbdc] sm:$0xf0] }
  0x5b   : > { %v8946_v34 = vld [vmem:[%s11454_s28 + $0xdc0] sm:$0xf]  ;;  %v8691_v42 = vor.u32 %v10897_v33, %v8690_v31  ;;  %5396 = vmatpush.bf16.msrb.mxu0 %v8435_v41 }
  0x5c   : > { %v10961_v35 = vld [vmem:[%s11454_s28 + $0xddc] sm:$0xf0] }
  0x5d   : > { %v9202_v38 = vld [vmem:[%s11454_s28 + $0xfc0] sm:$0xf]  ;;  %v8947_v43 = vor.u32 %v10961_v35, %v8946_v34  ;;  %5409 = vmatpush.bf16.msrb.mxu1 %v8691_v42 }
  0x5e   : > { %v11025_v39 = vld [vmem:[%s11454_s28 + $0xfdc] sm:$0xf0] }
  0x5f   : > { %v8402_v44 = vld [vmem:[%s11454_s28 + $0x980] sm:$0xf]  ;;  %v9203_v47 = vor.u32 %v11025_v39, %v9202_v38  ;;  %5422 = vmatpush.bf16.msrb.mxu2 %v8947_v43 }
  0x60   : > { %v10825_v45 = vld [vmem:[%s11454_s28 + $0x99c] sm:$0xf0] }
  0x61   : > { %v8658_v46 = vld [vmem:[%s11454_s28 + $0xb80] sm:$0xf]  ;;  %v8403_v53 = vor.u32 %v10825_v45, %v8402_v44  ;;  %5435 = vmatpush.bf16.msrb.mxu3 %v9203_v47 }
  0x62   : > { %v10889_v48 = vld [vmem:[%s11454_s28 + $0xb9c] sm:$0xf0] }
  0x63   : > { %v8914_v49 = vld [vmem:[%s11454_s28 + $0xd80] sm:$0xf]  ;;  %v8659_v56 = vor.u32 %v10889_v48, %v8658_v46  ;;  %5397 = vmatpush.bf16.msrb.mxu0 %v8403_v53 }
  0x64   : > { %v10953_v50 = vld [vmem:[%s11454_s28 + $0xd9c] sm:$0xf0] }
  0x65   : > { %v9170_v51 = vld [vmem:[%s11454_s28 + $0xf80] sm:$0xf]  ;;  %v8915_v57 = vor.u32 %v10953_v50, %v8914_v49  ;;  %5410 = vmatpush.bf16.msrb.mxu1 %v8659_v56 }
  0x66   : > { %v11017_v52 = vld [vmem:[%s11454_s28 + $0xf9c] sm:$0xf0] }
  0x67   : > { %v8370_v54 = vld [vmem:[%s11454_s28 + $0x940] sm:$0xf]  ;;  %v9171_v61 = vor.u32 %v11017_v52, %v9170_v51  ;;  %5423 = vmatpush.bf16.msrb.mxu2 %v8915_v57 }
  0x68   : > { %v10817_v55 = vld [vmem:[%s11454_s28 + $0x95c] sm:$0xf0] }
  0x69   : > { %v8626_v58 = vld [vmem:[%s11454_s28 + $0xb40] sm:$0xf]  ;;  %v8371_v2 = vor.u32 %v10817_v55, %v8370_v54  ;;  %5436 = vmatpush.bf16.msrb.mxu3 %v9171_v61 }
  0x6a   : > { %v10881_v59 = vld [vmem:[%s11454_s28 + $0xb5c] sm:$0xf0] }
  0x6b   : > { %v300_v60 = vld [vmem:[%s11449_s24] sm:$0xff]  ;;  %v8627_v4 = vor.u32 %v10881_v59, %v8626_v58  ;;  %5398 = vmatpush.bf16.msrb.mxu0 %v8371_v2  ;;  %v301_v58 = vld [vmem:[%s11449_s24 + $0x8] sm:$0xff] }
  0x6c   : > { %v8882_v62 = vld [vmem:[%s11454_s28 + $0xd40] sm:$0xf]  ;;  %308 = vst [vmem:[#allocation1] ss:$4 sm:$0xff] %v300_v60 }
  0x6d   : > { %v10945_v63 = vld [vmem:[%s11454_s28 + $0xd5c] sm:$0xf0]  ;;  %5411 = vmatpush.bf16.msrb.mxu1 %v8627_v4  ;;  %310 = vst [vmem:[#allocation1 + $0x20] ss:$4 sm:$0xff] %v301_v58 }
  0x6e   : > { %v9138_v0 = vld [vmem:[%s11454_s28 + $0xf40] sm:$0xf]  ;;  %v8883_v5 = vor.u32 %v10945_v63, %v8882_v62 }
  0x6f   : > { %v11009_v1 = vld [vmem:[%s11454_s28 + $0xf5c] sm:$0xf0] }
  0x70   : > { %v8338_v3 = vld [vmem:[%s11454_s28 + $0x900] sm:$0xf]  ;;  %v9139_v9 = vor.u32 %v11009_v1, %v9138_v0  ;;  %5424 = vmatpush.bf16.msrb.mxu2 %v8883_v5 }
  0x71   : > { %v10809_v6 = vld [vmem:[%s11454_s28 + $0x91c] sm:$0xf0] }
  0x72   : > { %v8594_v7 = vld [vmem:[%s11454_s28 + $0xb00] sm:$0xf]  ;;  %v8339_v16 = vor.u32 %v10809_v6, %v8338_v3  ;;  %5437 = vmatpush.bf16.msrb.mxu3 %v9139_v9 }
  0x73   : > { %v10873_v8 = vld [vmem:[%s11454_s28 + $0xb1c] sm:$0xf0]  ;;  %v313_v24 = vld.sshfl [vmem:[#allocation1 + $0x10] sm:$0xff pattern:$0x73625140] }
  0x74   : > { %v8850_v10 = vld [vmem:[%s11454_s28 + $0xd00] sm:$0xf]  ;;  %v8595_v22 = vor.u32 %v10873_v8, %v8594_v7  ;;  %v11561_v27 = vpack.c.bf16 %v313_v24, %v313_v24  ;;  %v314_v29 = vld.sshfl [vmem:[#allocation1 + $0x18] sm:$0xff pattern:$0x73625140]  ;;  %5399 = vmatpush.bf16.msrb.mxu0 %v8339_v16 }
  0x75   : > { %v10937_v11 = vld [vmem:[%s11454_s28 + $0xd1c] sm:$0xf0]  ;;  %v312_v30 = vld.sshfl [vmem:[#allocation1 + $0x8] sm:$0xff pattern:$0x73625140]  ;;  %v11567_v33 = vpack.c.bf16 %v314_v29, %v314_v29 }
  0x76   : > { %v9106_v12 = vld [vmem:[%s11454_s28 + $0xf00] sm:$0xf]  ;;  %v8851_v23 = vor.u32 %v10937_v11, %v8850_v10  ;;  %v11569_v34 = vpack.c.bf16 %v312_v30, %v312_v30  ;;  %5378 = vmatmul.bf16.vlgmr.msra.gmra.mxu2 %v11561_v27  ;;  %5412 = vmatpush.bf16.msrb.mxu1 %v8595_v22 }
  0x77   : > { %v11001_v13 = vld [vmem:[%s11454_s28 + $0xf1c] sm:$0xf0]  ;;  %5391 = vmatmul.bf16.vlgmr.msra.gmra.mxu3 %v11567_v33 }
  0x78   : > { %v8306_v14 = vld [vmem:[%s11454_s28 + $0x8c0] sm:$0xf]  ;;  %v9107_v26 = vor.u32 %v11001_v13, %v9106_v12  ;;  %5425 = vmatpush.bf16.msrb.mxu2 %v8851_v23  ;;  %5365 = vmatmul.bf16.vlgmr.msra.gmra.mxu1 %v11569_v34 }
  0x79   : > { %v10801_v15 = vld [vmem:[%s11454_s28 + $0x8dc] sm:$0xf0] }
  0x7a   : > { %v8562_v17 = vld [vmem:[%s11454_s28 + $0xac0] sm:$0xf]  ;;  %v8307_v35 = vor.u32 %v10801_v15, %v8306_v14  ;;  %5438 = vmatpush.bf16.msrb.mxu3 %v9107_v26  ;;  %v317_v26 = vld.sshfl [vmem:[#allocation1 + $0x30] sm:$0xff pattern:$0x73625140] }
  0x7b   : > { %v10865_v18 = vld [vmem:[%s11454_s28 + $0xadc] sm:$0xf0] }
  0x7c   : > { %v8818_v19 = vld [vmem:[%s11454_s28 + $0xcc0] sm:$0xf]  ;;  %v8563_v36 = vor.u32 %v10865_v18, %v8562_v17  ;;  %5400 = vmatpush.bf16.msrb.mxu0 %v8307_v35  ;;  %v316_v35 = vld.sshfl [vmem:[#allocation1 + $0x28] sm:$0xff pattern:$0x73625140] }
  0x7d   : > { %v10929_v20 = vld [vmem:[%s11454_s28 + $0xcdc] sm:$0xf0] }
  0x7e   : > { %v311_v25 = vld.sshfl [vmem:[#allocation1] sm:$0xff pattern:$0x73625140]  ;;  %v8819_v37 = vor.u32 %v10929_v20, %v8818_v19  ;;  %5413 = vmatpush.bf16.msrb.mxu1 %v8563_v36 }
  0x7f   : > { %v11563_v28 = vpack.c.bf16 %v311_v25, %v311_v25  ;;  %v9074_v31 = vld [vmem:[%s11454_s28 + $0xec0] sm:$0xf]  ;;  %319 = vst [vmem:[#allocation1] ss:$4 sm:$0xff] %v302_v21  ;;  %v303_v21 = vld [vmem:[%s11449_s24 + $0x18] sm:$0x3] }
  0x80   : > { %v10993_v32 = vld [vmem:[%s11454_s28 + $0xedc] sm:$0xf0]  ;;  %5426 = vmatpush.bf16.msrb.mxu2 %v8819_v37 }
  0x81   : > { %v8274_v38 = vld [vmem:[%s11454_s28 + $0x880] sm:$0xf]  ;;  %v9075_v41 = vor.u32 %v10993_v32, %v9074_v31  ;;  %5352 = vmatmul.bf16.vlgmr.msra.gmra.mxu0 %v11563_v28  ;;  %v318_v32 = vld.sshfl [vmem:[#allocation1 + $0x38] sm:$0xff pattern:$0x73625140] }
  0x82   : > { %v10793_v39 = vld [vmem:[%s11454_s28 + $0x89c] sm:$0xf0] }
  0x83   : > { %v8530_v40 = vld [vmem:[%s11454_s28 + $0xa80] sm:$0xf]  ;;  %v8275_v47 = vor.u32 %v10793_v39, %v8274_v38  ;;  %5439 = vmatpush.bf16.msrb.mxu3 %v9075_v41  ;;  %v11615_v39 = vpack.c.bf16 %v317_v26, %v317_v26 }
  0x84   : > { %v10857_v42 = vld [vmem:[%s11454_s28 + $0xa9c] sm:$0xf0] }
  0x85   : > { %v8786_v43 = vld [vmem:[%s11454_s28 + $0xc80] sm:$0xf]  ;;  %v8531_v50 = vor.u32 %v10857_v42, %v8530_v40  ;;  %5401 = vmatpush.bf16.msrb.mxu0 %v8275_v47 }
  0x86   : > { %v10921_v44 = vld [vmem:[%s11454_s28 + $0xc9c] sm:$0xf0] }
  0x87   : > { %v9042_v45 = vld [vmem:[%s11454_s28 + $0xe80] sm:$0xf]  ;;  %v8787_v51 = vor.u32 %v10921_v44, %v8786_v43  ;;  %5414 = vmatpush.bf16.msrb.mxu1 %v8531_v50  ;;  %v11621_v43 = vpack.c.bf16 %v318_v32, %v318_v32 }
  0x88   : > { %v10985_v46 = vld [vmem:[%s11454_s28 + $0xe9c] sm:$0xf0] }
  0x89   : > { %v8242_v48 = vld [vmem:[%s11454_s28 + $0x840] sm:$0xf]  ;;  %v9043_v55 = vor.u32 %v10985_v46, %v9042_v45  ;;  %5427 = vmatpush.bf16.msrb.mxu2 %v8787_v51  ;;  %v11623_v45 = vpack.c.bf16 %v316_v35, %v316_v35 }
  0x8a   : > { %v10785_v49 = vld [vmem:[%s11454_s28 + $0x85c] sm:$0xf0] }
  0x8b   : > { %v8498_v52 = vld [vmem:[%s11454_s28 + $0xa40] sm:$0xf]  ;;  %v8243_v61 = vor.u32 %v10785_v49, %v8242_v48  ;;  %5440 = vmatpush.bf16.msrb.mxu3 %v9043_v55 }
  0x8c   : > { %v10849_v53 = vld [vmem:[%s11454_s28 + $0xa5c] sm:$0xf0] }
  0x8d   : > { %v8754_v54 = vld [vmem:[%s11454_s28 + $0xc40] sm:$0xf]  ;;  %v8499_v1 = vor.u32 %v10849_v53, %v8498_v52  ;;  %5402 = vmatpush.bf16.msrb.mxu0 %v8243_v61 }
  0x8e   : > { %v10913_v56 = vld [vmem:[%s11454_s28 + $0xc5c] sm:$0xf0] }
  0x8f   : > { %v9010_v57 = vld [vmem:[%s11454_s28 + $0xe40] sm:$0xf]  ;;  %v8755_v2 = vor.u32 %v10913_v56, %v8754_v54  ;;  %5415 = vmatpush.bf16.msrb.mxu1 %v8499_v1 }
  0x90   : > { %v10977_v59 = vld [vmem:[%s11454_s28 + $0xe5c] sm:$0xf0] }
  0x91   : > { %v8210_v60 = vld [vmem:[%s11454_s28 + $0x800] sm:$0xf]  ;;  %v9011_v6 = vor.u32 %v10977_v59, %v9010_v57  ;;  %5428 = vmatpush.bf16.msrb.mxu2 %v8755_v2 }
  0x92   : > { %v10777_v62 = vld [vmem:[%s11454_s28 + $0x81c] sm:$0xf0] }
  0x93   : > { %v8466_v63 = vld [vmem:[%s11454_s28 + $0xa00] sm:$0xf]  ;;  %v8211_v13 = vor.u32 %v10777_v62, %v8210_v60  ;;  %5441 = vmatpush.bf16.msrb.mxu3 %v9011_v6 }
  0x94   : > { %v10841_v0 = vld [vmem:[%s11454_s28 + $0xa1c] sm:$0xf0] }
  0x95   : > { %v8722_v3 = vld [vmem:[%s11454_s28 + $0xc00] sm:$0xf]  ;;  %v8467_v17 = vor.u32 %v10841_v0, %v8466_v63  ;;  %5403 = vmatpush.bf16.msrb.mxu0 %v8211_v13 }
  0x96   : > { %v10905_v4 = vld [vmem:[%s11454_s28 + $0xc1c] sm:$0xf0] }
  0x97   : > { %v8978_v5 = vld [vmem:[%s11454_s28 + $0xe00] sm:$0xf]  ;;  %v8723_v18 = vor.u32 %v10905_v4, %v8722_v3  ;;  %5416 = vmatpush.bf16.msrb.mxu1 %v8467_v17 }
  0x98   : > { %v10969_v7 = vld [vmem:[%s11454_s28 + $0xe1c] sm:$0xf0] }
  0x99   : > { %v9458_v8 = vld [vmem:[%s11454_s28 + $0x11c0] sm:$0xf]  ;;  %v8979_v22 = vor.u32 %v10969_v7, %v8978_v5  ;;  %5429 = vmatpush.bf16.msrb.mxu2 %v8723_v18 }
  0x9a   : > { %v11089_v9 = vld [vmem:[%s11454_s28 + $0x11dc] sm:$0xf0]  ;;  %5417 = vmatmul.bf16.vlgmr.msrb.gmra.mxu1 %v11623_v45 }
  0x9b   : > { %v9714_v10 = vld [vmem:[%s11454_s28 + $0x13c0] sm:$0xf]  ;;  %v9459_v23 = vor.u32 %v11089_v9, %v9458_v8  ;;  %5442 = vmatpush.bf16.msrb.mxu3 %v8979_v22 }
  0x9c   : > { %v11153_v11 = vld [vmem:[%s11454_s28 + $0x13dc] sm:$0xf0]  ;;  %5430 = vmatmul.bf16.vlgmr.msrb.gmra.mxu2 %v11615_v39 }
  0x9d   : > { %v9970_v12 = vld [vmem:[%s11454_s28 + $0x15c0] sm:$0xf]  ;;  %v9715_v30 = vor.u32 %v11153_v11, %v9714_v10  ;;  %5448 = vmatpush.bf16.msra.mxu0 %v9459_v23 }
  0x9e   : > { %v11217_v14 = vld [vmem:[%s11454_s28 + $0x15dc] sm:$0xf0]  ;;  %5443 = vmatmul.bf16.vlgmr.msrb.gmra.mxu3 %v11621_v43 }
  0x9f   : > { %v10226_v15 = vld [vmem:[%s11454_s28 + $0x17c0] sm:$0xf]  ;;  %v9971_v31 = vor.u32 %v11217_v14, %v9970_v12  ;;  %5461 = vmatpush.bf16.msra.mxu1 %v9715_v30 }
  0xa0   : > { %v11281_v16 = vld [vmem:[%s11454_s28 + $0x17dc] sm:$0xf0] }
  0xa1   : > { %v9426_v19 = vld [vmem:[%s11454_s28 + $0x1180] sm:$0xf]  ;;  %v10227_v36 = vor.u32 %v11281_v16, %v10226_v15  ;;  %5474 = vmatpush.bf16.msra.mxu2 %v9971_v31 }
  0xa2   : > { %v11081_v20 = vld [vmem:[%s11454_s28 + $0x119c] sm:$0xf0] }
  0xa3   : > { %v9682_v24 = vld [vmem:[%s11454_s28 + $0x1380] sm:$0xf]  ;;  %v9427_v44 = vor.u32 %v11081_v20, %v9426_v19  ;;  %5487 = vmatpush.bf16.msra.mxu3 %v10227_v36 }
  0xa4   : > { %v11145_v25 = vld [vmem:[%s11454_s28 + $0x139c] sm:$0xf0] }
  0xa5   : > { %v315_v29 = vld.sshfl [vmem:[#allocation1 + $0x20] sm:$0xff pattern:$0x73625140]  ;;  %v9683_v46 = vor.u32 %v11145_v25, %v9682_v24  ;;  %5449 = vmatpush.bf16.msra.mxu0 %v9427_v44 }
  0xa6   : > { %v9938_v37 = vld [vmem:[%s11454_s28 + $0x1580] sm:$0xf]  ;;  %320 = vst [vmem:[#allocation1 + $0x20] ss:$4 sm:$0xff] %v303_v21  ;;  %v11619_v42 = vpack.c.bf16 %v315_v29, %v315_v29 }
  0xa7   : > { %v11209_v38 = vld [vmem:[%s11454_s28 + $0x159c] sm:$0xf0]  ;;  %5462 = vmatpush.bf16.msra.mxu1 %v9683_v46 }
  0xa8   : > { %v10194_v40 = vld [vmem:[%s11454_s28 + $0x1780] sm:$0xf]  ;;  %v9939_v47 = vor.u32 %v11209_v38, %v9938_v37  ;;  %5404 = vmatmul.bf16.vlgmr.msrb.gmra.mxu0 %v11619_v42 }
  0xa9   : > { %v11273_v41 = vld [vmem:[%s11454_s28 + $0x179c] sm:$0xf0] }
  0xaa   : > { %v9394_v48 = vld [vmem:[%s11454_s28 + $0x1140] sm:$0xf]  ;;  %v10195_v51 = vor.u32 %v11273_v41, %v10194_v40  ;;  %5475 = vmatpush.bf16.msra.mxu2 %v9939_v47 }
  0xab   : > { %v11073_v49 = vld [vmem:[%s11454_s28 + $0x115c] sm:$0xf0] }
  0xac   : > { %v9650_v50 = vld [vmem:[%s11454_s28 + $0x1340] sm:$0xf]  ;;  %v9395_v57 = vor.u32 %v11073_v49, %v9394_v48  ;;  %5488 = vmatpush.bf16.msra.mxu3 %v10195_v51 }
  0xad   : > { %v11137_v52 = vld [vmem:[%s11454_s28 + $0x135c] sm:$0xf0] }
  0xae   : > { %v9906_v53 = vld [vmem:[%s11454_s28 + $0x1540] sm:$0xf]  ;;  %v9651_v58 = vor.u32 %v11137_v52, %v9650_v50  ;;  %5450 = vmatpush.bf16.msra.mxu0 %v9395_v57 }
  0xaf   : > { %v11201_v54 = vld [vmem:[%s11454_s28 + $0x155c] sm:$0xf0] }
  0xb0   : > { %v10162_v55 = vld [vmem:[%s11454_s28 + $0x1740] sm:$0xf]  ;;  %v9907_v59 = vor.u32 %v11201_v54, %v9906_v53  ;;  %5463 = vmatpush.bf16.msra.mxu1 %v9651_v58 }
  0xb1   : > { %v11265_v56 = vld [vmem:[%s11454_s28 + $0x175c] sm:$0xf0] }
  0xb2   : > { %v9362_v60 = vld [vmem:[%s11454_s28 + $0x1100] sm:$0xf]  ;;  %v10163_v63 = vor.u32 %v11265_v56, %v10162_v55  ;;  %5476 = vmatpush.bf16.msra.mxu2 %v9907_v59 }
  0xb3   : > { %v11065_v61 = vld [vmem:[%s11454_s28 + $0x111c] sm:$0xf0] }
  0xb4   : > { %v9618_v62 = vld [vmem:[%s11454_s28 + $0x1300] sm:$0xf]  ;;  %v9363_v5 = vor.u32 %v11065_v61, %v9362_v60  ;;  %5489 = vmatpush.bf16.msra.mxu3 %v10163_v63  ;;  %v10573_v63 = vld [vmem:[%s11454_s28 + $0x1c4] sm:$0xf] }
  0xb5   : > { %v11129_v0 = vld [vmem:[%s11454_s28 + $0x131c] sm:$0xf0] }
  0xb6   : > { %v9874_v1 = vld [vmem:[%s11454_s28 + $0x1500] sm:$0xf]  ;;  %v9619_v6 = vor.u32 %v11129_v0, %v9618_v62  ;;  %5451 = vmatpush.bf16.msra.mxu0 %v9363_v5  ;;  %v7412_v0 = vld [vmem:[%s11454_s28 + $0x1e0] sm:$0xf0] }
  0xb7   : > { %v11193_v2 = vld [vmem:[%s11454_s28 + $0x151c] sm:$0xf0]  ;;  %v7924_v5 = vld [vmem:[%s11454_s28 + $0x5e0] sm:$0xf0] }
  0xb8   : > { %v10130_v3 = vld [vmem:[%s11454_s28 + $0x1700] sm:$0xf]  ;;  %v9875_v7 = vor.u32 %v11193_v2, %v9874_v1  ;;  %5464 = vmatpush.bf16.msra.mxu1 %v9619_v6  ;;  %v10637_v1 = vld [vmem:[%s11454_s28 + $0x3c4] sm:$0xf] }
  0xb9   : > { %v11257_v4 = vld [vmem:[%s11454_s28 + $0x171c] sm:$0xf0] }
  0xba   : > { %v9330_v8 = vld [vmem:[%s11454_s28 + $0x10c0] sm:$0xf]  ;;  %v10131_v11 = vor.u32 %v11257_v4, %v10130_v3  ;;  %5477 = vmatpush.bf16.msra.mxu2 %v9875_v7  ;;  %v7668_v3 = vld [vmem:[%s11454_s28 + $0x3e0] sm:$0xf0] }
  0xbb   : > { %v11057_v9 = vld [vmem:[%s11454_s28 + $0x10dc] sm:$0xf0]  ;;  %v10701_v4 = vld [vmem:[%s11454_s28 + $0x5c4] sm:$0xf] }
  0xbc   : > { %v9586_v10 = vld [vmem:[%s11454_s28 + $0x12c0] sm:$0xf]  ;;  %v9331_v17 = vor.u32 %v11057_v9, %v9330_v8  ;;  %5490 = vmatpush.bf16.msra.mxu3 %v10131_v11  ;;  %v323_v9 = vld.sshfl [vmem:[#allocation1 + $0x10] sm:$0xff pattern:$0x73625140] }
  0xbd   : > { %v11121_v12 = vld [vmem:[%s11454_s28 + $0x12dc] sm:$0xf0] }
  0xbe   : > { %v9842_v13 = vld [vmem:[%s11454_s28 + $0x14c0] sm:$0xf]  ;;  %v9587_v18 = vor.u32 %v11121_v12, %v9586_v10  ;;  %5452 = vmatpush.bf16.msra.mxu0 %v9331_v17  ;;  %v322_v12 = vld.sshfl [vmem:[#allocation1 + $0x8] sm:$0xff pattern:$0x73625140] }
  0xbf   : > { %v11185_v14 = vld [vmem:[%s11454_s28 + $0x14dc] sm:$0xf0] }
  0xc0   : > { %v10098_v15 = vld [vmem:[%s11454_s28 + $0x16c0] sm:$0xf]  ;;  %v9843_v19 = vor.u32 %v11185_v14, %v9842_v13  ;;  %5465 = vmatpush.bf16.msra.mxu1 %v9587_v18  ;;  %v324_v13 = vld.sshfl [vmem:[#allocation1 + $0x18] sm:$0xff pattern:$0x73625140]  ;;  %v7415_v14 = vor.u32 %v10573_v63, %v7412_v0 }
  0xc1   : > { %v11249_v16 = vld [vmem:[%s11454_s28 + $0x16dc] sm:$0xf0]  ;;  %v10565_v18 = vld [vmem:[%s11454_s28 + $0x184] sm:$0xf] }
  0xc2   : > { %v9298_v20 = vld [vmem:[%s11454_s28 + $0x1080] sm:$0xf]  ;;  %v10099_v23 = vor.u32 %v11249_v16, %v10098_v15  ;;  %5478 = vmatpush.bf16.msra.mxu2 %v9843_v19  ;;  %v7671_v15 = vor.u32 %v10637_v1, %v7668_v3  ;;  %v7927_v19 = vor.u32 %v10701_v4, %v7924_v5  ;;  %v7284_v4 = vld [vmem:[%s11454_s28 + $0xe0] sm:$0xf0] }
  0xc3   : > { %v11049_v21 = vld [vmem:[%s11454_s28 + $0x109c] sm:$0xf0]  ;;  %v10605_v5 = vld [vmem:[%s11454_s28 + $0x2c4] sm:$0xf] }
  0xc4   : > { %v9554_v22 = vld [vmem:[%s11454_s28 + $0x1280] sm:$0xf]  ;;  %v9299_v31 = vor.u32 %v11049_v21, %v9298_v20  ;;  %5491 = vmatpush.bf16.msra.mxu3 %v10099_v23  ;;  %v7380_v21 = vld [vmem:[%s11454_s28 + $0x1a0] sm:$0xf0] }
  0xc5   : > { %v11113_v24 = vld [vmem:[%s11454_s28 + $0x129c] sm:$0xf0]  ;;  %v7636_v23 = vld [vmem:[%s11454_s28 + $0x3a0] sm:$0xf0] }
  0xc6   : > { %v9810_v25 = vld [vmem:[%s11454_s28 + $0x1480] sm:$0xf]  ;;  %v9555_v32 = vor.u32 %v11113_v24, %v9554_v22  ;;  %5453 = vmatpush.bf16.msra.mxu0 %v9299_v31  ;;  %v10629_v22 = vld [vmem:[%s11454_s28 + $0x384] sm:$0xf]  ;;  %v11693_v24 = vpack.c.bf16 %v323_v9, %v323_v9 }
  0xc7   : > { %v11177_v26 = vld [vmem:[%s11454_s28 + $0x149c] sm:$0xf0] }
  0xc8   : > { %v10066_v29 = vld [vmem:[%s11454_s28 + $0x1680] sm:$0xf]  ;;  %v9811_v35 = vor.u32 %v11177_v26, %v9810_v25  ;;  %5466 = vmatpush.bf16.msra.mxu1 %v9555_v32  ;;  %v11695_v25 = vpack.c.bf16 %v322_v12, %v322_v12  ;;  %v10693_v26 = vld [vmem:[%s11454_s28 + $0x584] sm:$0xf]  ;;  %v7383_v32 = vor.u32 %v10565_v18, %v7380_v21 }
  0xc9   : > { %v11241_v30 = vld [vmem:[%s11454_s28 + $0x169c] sm:$0xf0]  ;;  %v7508_v18 = vld [vmem:[%s11454_s28 + $0x2a0] sm:$0xf0] }
  0xca   : > { %v9266_v36 = vld [vmem:[%s11454_s28 + $0x1040] sm:$0xf]  ;;  %v10067_v40 = vor.u32 %v11241_v30, %v10066_v29  ;;  %5479 = vmatpush.bf16.msra.mxu2 %v9811_v35  ;;  %v7892_v29 = vld [vmem:[%s11454_s28 + $0x5a0] sm:$0xf0]  ;;  %v11699_v30 = vpack.c.bf16 %v324_v13, %v324_v13  ;;  %v7639_v35 = vor.u32 %v10629_v22, %v7636_v23 }
  0xcb   : > { %v11041_v37 = vld [vmem:[%s11454_s28 + $0x105c] sm:$0xf0]  ;;  %v7764_v21 = vld [vmem:[%s11454_s28 + $0x4a0] sm:$0xf0] }
  0xcc   : > { %v9522_v38 = vld [vmem:[%s11454_s28 + $0x1240] sm:$0xf]  ;;  %v9267_v50 = vor.u32 %v11041_v37, %v9266_v36  ;;  %5492 = vmatpush.bf16.msra.mxu3 %v10067_v40  ;;  %v7895_v40 = vor.u32 %v10693_v26, %v7892_v29 }
  0xcd   : > { %v11105_v41 = vld [vmem:[%s11454_s28 + $0x125c] sm:$0xf0] }
  0xce   : > { %v9778_v44 = vld [vmem:[%s11454_s28 + $0x1440] sm:$0xf]  ;;  %v9523_v54 = vor.u32 %v11105_v41, %v9522_v38  ;;  %5454 = vmatpush.bf16.msra.mxu0 %v9267_v50  ;;  %v10557_v38 = vld [vmem:[%s11454_s28 + $0x144] sm:$0xf] }
  0xcf   : > { %v11169_v46 = vld [vmem:[%s11454_s28 + $0x145c] sm:$0xf0]  ;;  %v7348_v41 = vld [vmem:[%s11454_s28 + $0x160] sm:$0xf0] }
  0xd0   : > { %v10034_v47 = vld [vmem:[%s11454_s28 + $0x1640] sm:$0xf]  ;;  %v9779_v55 = vor.u32 %v11169_v46, %v9778_v44  ;;  %5467 = vmatpush.bf16.msra.mxu1 %v9523_v54  ;;  %v10621_v44 = vld [vmem:[%s11454_s28 + $0x344] sm:$0xf]  ;;  %v7351_v50 = vor.u32 %v10557_v38, %v7348_v41 }
  0xd1   : > { %v11233_v48 = vld [vmem:[%s11454_s28 + $0x165c] sm:$0xf0]  ;;  %v7604_v46 = vld [vmem:[%s11454_s28 + $0x360] sm:$0xf0] }
  0xd2   : > { %v9234_v49 = vld [vmem:[%s11454_s28 + $0x1000] sm:$0xf]  ;;  %v10035_v59 = vor.u32 %v11233_v48, %v10034_v47  ;;  %5480 = vmatpush.bf16.msra.mxu2 %v9779_v55  ;;  %v10685_v47 = vld [vmem:[%s11454_s28 + $0x544] sm:$0xf] }
  0xd3   : > { %v11033_v51 = vld [vmem:[%s11454_s28 + $0x101c] sm:$0xf0]  ;;  %v7860_v48 = vld [vmem:[%s11454_s28 + $0x560] sm:$0xf0] }
  0xd4   : > { %v9490_v52 = vld [vmem:[%s11454_s28 + $0x1200] sm:$0xf]  ;;  %v9235_v2 = vor.u32 %v11033_v51, %v9234_v49  ;;  %5493 = vmatpush.bf16.msra.mxu3 %v10035_v59  ;;  %v7607_v51 = vor.u32 %v10621_v44, %v7604_v46  ;;  %v10549_v54 = vld [vmem:[%s11454_s28 + $0x104] sm:$0xf]  ;;  %v7863_v55 = vor.u32 %v10685_v47, %v7860_v48 }
  0xd5   : > { %v11097_v53 = vld [vmem:[%s11454_s28 + $0x121c] sm:$0xf0]  ;;  %v10677_v59 = vld [vmem:[%s11454_s28 + $0x504] sm:$0xf] }
  0xd6   : > { %v9746_v56 = vld [vmem:[%s11454_s28 + $0x1400] sm:$0xf]  ;;  %v9491_v6 = vor.u32 %v11097_v53, %v9490_v52  ;;  %5455 = vmatpush.bf16.msra.mxu0 %v9235_v2  ;;  %v10541_v2 = vld [vmem:[%s11454_s28 + $0xc4] sm:$0xf] }
  0xd7   : > { %v11161_v57 = vld [vmem:[%s11454_s28 + $0x141c] sm:$0xf0]  ;;  %v7476_v38 = vld [vmem:[%s11454_s28 + $0x260] sm:$0xf0] }
  0xd8   : > { %v10002_v58 = vld [vmem:[%s11454_s28 + $0x1600] sm:$0xf]  ;;  %v9747_v7 = vor.u32 %v11161_v57, %v9746_v56  ;;  %5468 = vmatpush.bf16.msra.mxu1 %v9491_v6  ;;  %v7316_v56 = vld [vmem:[%s11454_s28 + $0x120] sm:$0xf0] }
  0xd9   : > { %v11225_v60 = vld [vmem:[%s11454_s28 + $0x161c] sm:$0xf0]  ;;  %v10613_v57 = vld [vmem:[%s11454_s28 + $0x304] sm:$0xf] }
  0xda   : > { %v10482_v61 = vld [vmem:[%s11454_s28 + $0x19c0] sm:$0xf]  ;;  %v10003_v10 = vor.u32 %v11225_v60, %v10002_v58  ;;  %5481 = vmatpush.bf16.msra.mxu2 %v9747_v7  ;;  %v7572_v58 = vld [vmem:[%s11454_s28 + $0x320] sm:$0xf0] }
  0xdb   : > { %v11345_v62 = vld [vmem:[%s11454_s28 + $0x19dc] sm:$0xf0]  ;;  %5469 = vmatmul.bf16.vlgmr.msra.gmra.mxu1 %v11695_v25  ;;  %v7828_v60 = vld [vmem:[%s11454_s28 + $0x520] sm:$0xf0]  ;;  %v7575_v63 = vor.u32 %v10613_v57, %v7572_v58 }
  0xdc   : > { %v321_v8 = vld.sshfl [vmem:[#allocation1] sm:$0xff pattern:$0x73625140]  ;;  %v10483_v11 = vor.u32 %v11345_v62, %v10482_v61  ;;  %5494 = vmatpush.bf16.msra.mxu3 %v10003_v10  ;;  %5513 = vmatpush.bf16.msrb.mxu1 %v7415_v14  ;;  %v7319_v62 = vor.u32 %v10549_v54, %v7316_v56  ;;  %v7831_v3 = vor.u32 %v10677_v59, %v7828_v60 }
  0xdd   : > { %v10450_v16 = vld [vmem:[%s11454_s28 + $0x1980] sm:$0xf]  ;;  %v11688_v20 = vpack.c.bf16 %v321_v8, %v321_v8  ;;  %5482 = vmatmul.bf16.vlgmr.msra.gmra.mxu2 %v11693_v24  ;;  %v7540_v6 = vld [vmem:[%s11454_s28 + $0x2e0] sm:$0xf0]  ;;  %v7287_v10 = vor.u32 %v10541_v2, %v7284_v4 }
  0xde   : > { %v11337_v17 = vld [vmem:[%s11454_s28 + $0x199c] sm:$0xf0]  ;;  %5500 = vmatpush.bf16.msrb.mxu0 %v10483_v11  ;;  %5526 = vmatpush.bf16.msrb.mxu2 %v7671_v15  ;;  %v10669_v7 = vld [vmem:[%s11454_s28 + $0x4c4] sm:$0xf]  ;;  %v7543_v11 = vor.u32 %v10605_v5, %v7540_v6 }
  0xdf   : > { %v10451_v31 = vor.u32 %v11337_v17, %v10450_v16  ;;  %v10418_v36 = vld [vmem:[%s11454_s28 + $0x1940] sm:$0xf]  ;;  %5456 = vmatmul.bf16.vlgmr.msra.gmra.mxu0 %v11688_v20  ;;  %5495 = vmatmul.bf16.vlgmr.msra.gmra.mxu3 %v11699_v30  ;;  %v7796_v8 = vld [vmem:[%s11454_s28 + $0x4e0] sm:$0xf0] }
  0xe0   : > { %v11329_v37 = vld [vmem:[%s11454_s28 + $0x195c] sm:$0xf0]  ;;  %5539 = vmatpush.bf16.msrb.mxu3 %v7927_v19  ;;  %5514 = vmatpush.bf16.msrb.mxu1 %v7383_v32  ;;  %v10533_v14 = vld [vmem:[%s11454_s28 + $0x84] sm:$0xf]  ;;  %v7799_v15 = vor.u32 %v10669_v7, %v7796_v8 }
  0xe1   : > { %v10419_v49 = vor.u32 %v11329_v37, %v10418_v36  ;;  %v10386_v52 = vld [vmem:[%s11454_s28 + $0x1900] sm:$0xf]  ;;  %v7252_v16 = vld [vmem:[%s11454_s28 + $0xa0] sm:$0xf0] }
  0xe2   : > { %5501 = vmatpush.bf16.msrb.mxu0 %v10451_v31  ;;  %5527 = vmatpush.bf16.msrb.mxu2 %v7639_v35  ;;  %v11321_v53 = vld [vmem:[%s11454_s28 + $0x191c] sm:$0xf0]  ;;  %v10597_v17 = vld [vmem:[%s11454_s28 + $0x284] sm:$0xf]  ;;  %v7255_v23 = vor.u32 %v10533_v14, %v7252_v16 }
  0xe3   : > { %v10387_v61 = vor.u32 %v11321_v53, %v10386_v52  ;;  %v10354_v0 = vld [vmem:[%s11454_s28 + $0x18c0] sm:$0xf]  ;;  %v10661_v19 = vld [vmem:[%s11454_s28 + $0x484] sm:$0xf]  ;;  %v7511_v26 = vor.u32 %v10597_v17, %v7508_v18 }
  0xe4   : > { %5540 = vmatpush.bf16.msrb.mxu3 %v7895_v40  ;;  %5515 = vmatpush.bf16.msrb.mxu1 %v7351_v50  ;;  %v11313_v1 = vld [vmem:[%s11454_s28 + $0x18dc] sm:$0xf0]  ;;  %v10525_v32 = vld [vmem:[%s11454_s28 + $0x44] sm:$0xf]  ;;  %v7767_v35 = vor.u32 %v10661_v19, %v7764_v21 }
  0xe5   : > { %v10355_v9 = vor.u32 %v11313_v1, %v10354_v0  ;;  %v10322_v12 = vld [vmem:[%s11454_s28 + $0x1880] sm:$0xf]  ;;  %v7220_v36 = vld [vmem:[%s11454_s28 + $0x60] sm:$0xf0] }
  0xe6   : > { %5502 = vmatpush.bf16.msrb.mxu0 %v10419_v49  ;;  %5528 = vmatpush.bf16.msrb.mxu2 %v7607_v51  ;;  %v11305_v13 = vld [vmem:[%s11454_s28 + $0x189c] sm:$0xf0]  ;;  %v10589_v37 = vld [vmem:[%s11454_s28 + $0x244] sm:$0xf]  ;;  %v7223_v49 = vor.u32 %v10525_v32, %v7220_v36 }
  0xe7   : > { %v10323_v22 = vor.u32 %v11305_v13, %v10322_v12  ;;  %v10290_v29 = vld [vmem:[%s11454_s28 + $0x1840] sm:$0xf]  ;;  %v10653_v40 = vld [vmem:[%s11454_s28 + $0x444] sm:$0xf]  ;;  %v7479_v50 = vor.u32 %v10589_v37, %v7476_v38 }
  0xe8   : > { %5541 = vmatpush.bf16.msrb.mxu3 %v7863_v55  ;;  %5516 = vmatpush.bf16.msrb.mxu1 %v7319_v62  ;;  %v11297_v31 = vld [vmem:[%s11454_s28 + $0x185c] sm:$0xf0]  ;;  %v7732_v41 = vld [vmem:[%s11454_s28 + $0x460] sm:$0xf0] }
  0xe9   : > { %v10291_v44 = vor.u32 %v11297_v31, %v10290_v29  ;;  %v10258_v46 = vld [vmem:[%s11454_s28 + $0x1800] sm:$0xf]  ;;  %v10517_v48 = vld [vmem:[%s11454_s28 + $0x4] sm:$0xf]  ;;  %v7735_v54 = vor.u32 %v10653_v40, %v7732_v41 }
  0xea   : > { %5503 = vmatpush.bf16.msrb.mxu0 %v10387_v61  ;;  %5529 = vmatpush.bf16.msrb.mxu2 %v7575_v63  ;;  %v11289_v47 = vld [vmem:[%s11454_s28 + $0x181c] sm:$0xf0]  ;;  %v7188_v51 = vld [vmem:[%s11454_s28 + $0x20] sm:$0xf0] }
  0xeb   : > { %v10581_v52 = vld [vmem:[%s11454_s28 + $0x204] sm:$0xf]  ;;  %v10259_v61 = vor.u32 %v11289_v47, %v10258_v46  ;;  %v7191_v1 = vor.u32 %v10517_v48, %v7188_v51 }
  0xec   : > { %5542 = vmatpush.bf16.msrb.mxu3 %v7831_v3  ;;  %5517 = vmatpush.bf16.msrb.mxu1 %v7287_v10  ;;  %v7444_v53 = vld [vmem:[%s11454_s28 + $0x220] sm:$0xf0] }
  0xed   : > { %v10645_v55 = vld [vmem:[%s11454_s28 + $0x404] sm:$0xf]  ;;  %v7447_v2 = vor.u32 %v10581_v52, %v7444_v53 }
  0xee   : > { %5504 = vmatpush.bf16.msrb.mxu0 %v10355_v9  ;;  %5530 = vmatpush.bf16.msrb.mxu2 %v7543_v11  ;;  %v7700_v56 = vld [vmem:[%s11454_s28 + $0x420] sm:$0xf0] }
  0xef   : > { %v10765_v57 = vld [vmem:[%s11454_s28 + $0x7c4] sm:$0xf]  ;;  %v7703_v5 = vor.u32 %v10645_v55, %v7700_v56 }
  0xf0   : > { %5543 = vmatpush.bf16.msrb.mxu3 %v7799_v15  ;;  %5518 = vmatpush.bf16.msrb.mxu1 %v7255_v23  ;;  %v8180_v58 = vld [vmem:[%s11454_s28 + $0x7e0] sm:$0xf0] }
  0xf1   : > { %v10829_v59 = vld [vmem:[%s11454_s28 + $0x9c4] sm:$0xf]  ;;  %v8183_v6 = vor.u32 %v10765_v57, %v8180_v58 }
  0xf2   : > { %5505 = vmatpush.bf16.msrb.mxu0 %v10323_v22  ;;  %5531 = vmatpush.bf16.msrb.mxu2 %v7511_v26  ;;  %v8436_v60 = vld [vmem:[%s11454_s28 + $0x9e0] sm:$0xf0] }
  0xf3   : > { %v10893_v62 = vld [vmem:[%s11454_s28 + $0xbc4] sm:$0xf]  ;;  %v8439_v7 = vor.u32 %v10829_v59, %v8436_v60 }
  0xf4   : > { %5544 = vmatpush.bf16.msrb.mxu3 %v7767_v35  ;;  %v8692_v63 = vld [vmem:[%s11454_s28 + $0xbe0] sm:$0xf0]  ;;  %5519 = vmatpush.bf16.msrb.mxu1 %v7223_v49 }
  0xf5   : > { %v10957_v0 = vld [vmem:[%s11454_s28 + $0xdc4] sm:$0xf]  ;;  %v8695_v8 = vor.u32 %v10893_v62, %v8692_v63 }
  0xf6   : > { %5506 = vmatpush.bf16.msrb.mxu0 %v10291_v44  ;;  %5532 = vmatpush.bf16.msrb.mxu2 %v7479_v50  ;;  %v8948_v3 = vld [vmem:[%s11454_s28 + $0xde0] sm:$0xf0] }
  0xf7   : > { %v325_v4 = vld.sshfl [vmem:[#allocation1 + $0x20] sm:$0xff pattern:$0x73625140]  ;;  %v8951_v12 = vor.u32 %v10957_v0, %v8948_v3 }
  0xf8   : > { %5545 = vmatpush.bf16.msrb.mxu3 %v7735_v54  ;;  %v10757_v9 = vld [vmem:[%s11454_s28 + $0x784] sm:$0xf]  ;;  %v11764_v13 = vpack.c.bf16 %v325_v4, %v325_v4  ;;  %5520 = vmatpush.bf16.msrb.mxu1 %v7191_v1 }
  0xf9   : > { %v8148_v10 = vld [vmem:[%s11454_s28 + $0x7a0] sm:$0xf0] }
  0xfa   : > { %v10821_v11 = vld [vmem:[%s11454_s28 + $0x984] sm:$0xf]  ;;  %5507 = vmatpush.bf16.msrb.mxu0 %v10259_v61  ;;  %5533 = vmatpush.bf16.msrb.mxu2 %v7447_v2  ;;  %v8151_v19 = vor.u32 %v10757_v9, %v8148_v10 }
  0xfb   : > { %v8404_v14 = vld [vmem:[%s11454_s28 + $0x9a0] sm:$0xf0]  ;;  %5521 = vmatmul.bf16.vlgmr.msrb.gmra.mxu1 %v11563_v28 }
  0xfc   : > { %v10885_v15 = vld [vmem:[%s11454_s28 + $0xb84] sm:$0xf]  ;;  %5546 = vmatpush.bf16.msrb.mxu3 %v7703_v5  ;;  %5565 = vmatpush.bf16.msra.mxu1 %v8439_v7  ;;  %v8407_v21 = vor.u32 %v10821_v11, %v8404_v14 }
  0xfd   : > { %v8660_v16 = vld [vmem:[%s11454_s28 + $0xba0] sm:$0xf0]  ;;  %5508 = vmatmul.bf16.vlgmr.msrb.gmra.mxu0 %v11764_v13  ;;  %5534 = vmatmul.bf16.vlgmr.msrb.gmra.mxu2 %v11569_v34 }
  0xfe   : > { %v10949_v17 = vld [vmem:[%s11454_s28 + $0xd84] sm:$0xf]  ;;  %5552 = vmatpush.bf16.msra.mxu0 %v8183_v6  ;;  %5578 = vmatpush.bf16.msra.mxu2 %v8695_v8  ;;  %v8663_v22 = vor.u32 %v10885_v15, %v8660_v16 }
  0xff   : > { %v8916_v18 = vld [vmem:[%s11454_s28 + $0xda0] sm:$0xf0]  ;;  %5547 = vmatmul.bf16.vlgmr.msrb.gmra.mxu3 %v11561_v27 }
 0x100   : > { %v10749_v23 = vld [vmem:[%s11454_s28 + $0x744] sm:$0xf]  ;;  %5591 = vmatpush.bf16.msra.mxu3 %v8951_v12  ;;  %v8919_v31 = vor.u32 %v10949_v17, %v8916_v18  ;;  %5566 = vmatpush.bf16.msra.mxu1 %v8407_v21 }
 0x101   : > { %v8116_v26 = vld [vmem:[%s11454_s28 + $0x760] sm:$0xf0] }
 0x102   : > { %v10813_v29 = vld [vmem:[%s11454_s28 + $0x944] sm:$0xf]  ;;  %5553 = vmatpush.bf16.msra.mxu0 %v8151_v19  ;;  %v8119_v40 = vor.u32 %v10749_v23, %v8116_v26  ;;  %5579 = vmatpush.bf16.msra.mxu2 %v8663_v22 }
 0x103   : > { %v8372_v32 = vld [vmem:[%s11454_s28 + $0x960] sm:$0xf0] }
 0x104   : > { %v10877_v35 = vld [vmem:[%s11454_s28 + $0xb44] sm:$0xf]  ;;  %v8375_v41 = vor.u32 %v10813_v29, %v8372_v32  ;;  %5592 = vmatpush.bf16.msra.mxu3 %v8919_v31 }
 0x105   : > { %v8628_v36 = vld [vmem:[%s11454_s28 + $0xb60] sm:$0xf0] }
 0x106   : > { %v10941_v37 = vld [vmem:[%s11454_s28 + $0xd44] sm:$0xf]  ;;  %v8631_v44 = vor.u32 %v10877_v35, %v8628_v36  ;;  %5554 = vmatpush.bf16.msra.mxu0 %v8119_v40  ;;  %5567 = vmatpush.bf16.msra.mxu1 %v8375_v41 }
 0x107   : > { %v8884_v38 = vld [vmem:[%s11454_s28 + $0xd60] sm:$0xf0] }
 0x108   : > { %v10741_v46 = vld [vmem:[%s11454_s28 + $0x704] sm:$0xf]  ;;  %v8887_v49 = vor.u32 %v10941_v37, %v8884_v38  ;;  %5580 = vmatpush.bf16.msra.mxu2 %v8631_v44 }
 0x109   : > { %v8084_v47 = vld [vmem:[%s11454_s28 + $0x720] sm:$0xf0] }
 0x10a   : > { %v10805_v48 = vld [vmem:[%s11454_s28 + $0x904] sm:$0xf]  ;;  %v8087_v55 = vor.u32 %v10741_v46, %v8084_v47  ;;  %5593 = vmatpush.bf16.msra.mxu3 %v8887_v49 }
 0x10b   : > { %v8340_v50 = vld [vmem:[%s11454_s28 + $0x920] sm:$0xf0] }
 0x10c   : > { %v10869_v51 = vld [vmem:[%s11454_s28 + $0xb04] sm:$0xf]  ;;  %v8343_v56 = vor.u32 %v10805_v48, %v8340_v50  ;;  %5555 = vmatpush.bf16.msra.mxu0 %v8087_v55 }
 0x10d   : > { %v8596_v52 = vld [vmem:[%s11454_s28 + $0xb20] sm:$0xf0] }
 0x10e   : > { %v10933_v53 = vld [vmem:[%s11454_s28 + $0xd04] sm:$0xf]  ;;  %v8599_v57 = vor.u32 %v10869_v51, %v8596_v52  ;;  %5568 = vmatpush.bf16.msra.mxu1 %v8343_v56 }
 0x10f   : > { %v8852_v54 = vld [vmem:[%s11454_s28 + $0xd20] sm:$0xf0] }
 0x110   : > { %v10733_v58 = vld [vmem:[%s11454_s28 + $0x6c4] sm:$0xf]  ;;  %v8855_v61 = vor.u32 %v10933_v53, %v8852_v54  ;;  %5581 = vmatpush.bf16.msra.mxu2 %v8599_v57 }
 0x111   : > { %v8052_v59 = vld [vmem:[%s11454_s28 + $0x6e0] sm:$0xf0] }
 0x112   : > { %v10797_v60 = vld [vmem:[%s11454_s28 + $0x8c4] sm:$0xf]  ;;  %v8055_v3 = vor.u32 %v10733_v58, %v8052_v59  ;;  %5594 = vmatpush.bf16.msra.mxu3 %v8855_v61 }
 0x113   : > { %v8308_v62 = vld [vmem:[%s11454_s28 + $0x8e0] sm:$0xf0] }
 0x114   : > { %v10861_v63 = vld [vmem:[%s11454_s28 + $0xac4] sm:$0xf]  ;;  %v8311_v4 = vor.u32 %v10797_v60, %v8308_v62  ;;  %5556 = vmatpush.bf16.msra.mxu0 %v8055_v3 }
 0x115   : > { %v8564_v0 = vld [vmem:[%s11454_s28 + $0xae0] sm:$0xf0] }
 0x116   : > { %v10925_v1 = vld [vmem:[%s11454_s28 + $0xcc4] sm:$0xf]  ;;  %v8567_v5 = vor.u32 %v10861_v63, %v8564_v0  ;;  %5569 = vmatpush.bf16.msra.mxu1 %v8311_v4 }
 0x117   : > { %v8820_v2 = vld [vmem:[%s11454_s28 + $0xce0] sm:$0xf0] }
 0x118   : > { %v10725_v6 = vld [vmem:[%s11454_s28 + $0x684] sm:$0xf]  ;;  %v8823_v9 = vor.u32 %v10925_v1, %v8820_v2  ;;  %5582 = vmatpush.bf16.msra.mxu2 %v8567_v5 }
 0x119   : > { %v8020_v7 = vld [vmem:[%s11454_s28 + $0x6a0] sm:$0xf0] }
 0x11a   : > { %v10789_v8 = vld [vmem:[%s11454_s28 + $0x884] sm:$0xf]  ;;  %v8023_v16 = vor.u32 %v10725_v6, %v8020_v7  ;;  %5595 = vmatpush.bf16.msra.mxu3 %v8823_v9 }
 0x11b   : > { %v8276_v10 = vld [vmem:[%s11454_s28 + $0x8a0] sm:$0xf0] }
 0x11c   : > { %v10853_v11 = vld [vmem:[%s11454_s28 + $0xa84] sm:$0xf]  ;;  %v8279_v17 = vor.u32 %v10789_v8, %v8276_v10  ;;  %5557 = vmatpush.bf16.msra.mxu0 %v8023_v16 }
 0x11d   : > { %v8532_v12 = vld [vmem:[%s11454_s28 + $0xaa0] sm:$0xf0] }
 0x11e   : > { %v10917_v14 = vld [vmem:[%s11454_s28 + $0xc84] sm:$0xf]  ;;  %v8535_v18 = vor.u32 %v10853_v11, %v8532_v12  ;;  %5570 = vmatpush.bf16.msra.mxu1 %v8279_v17 }
 0x11f   : > { %v8788_v15 = vld [vmem:[%s11454_s28 + $0xca0] sm:$0xf0] }
 0x120   : > { %v10717_v19 = vld [vmem:[%s11454_s28 + $0x644] sm:$0xf]  ;;  %v8791_v23 = vor.u32 %v10917_v14, %v8788_v15  ;;  %5583 = vmatpush.bf16.msra.mxu2 %v8535_v18 }
 0x121   : > { %v7988_v21 = vld [vmem:[%s11454_s28 + $0x660] sm:$0xf0] }
 0x122   : > { %v10781_v22 = vld [vmem:[%s11454_s28 + $0x844] sm:$0xf]  ;;  %v7991_v36 = vor.u32 %v10717_v19, %v7988_v21  ;;  %5596 = vmatpush.bf16.msra.mxu3 %v8791_v23 }
 0x123   : > { %v8244_v26 = vld [vmem:[%s11454_s28 + $0x860] sm:$0xf0] }
 0x124   : > { %v10845_v29 = vld [vmem:[%s11454_s28 + $0xa44] sm:$0xf]  ;;  %v8247_v40 = vor.u32 %v10781_v22, %v8244_v26  ;;  %5558 = vmatpush.bf16.msra.mxu0 %v7991_v36 }
 0x125   : > { %v8500_v31 = vld [vmem:[%s11454_s28 + $0xa60] sm:$0xf0] }
 0x126   : > { %v10909_v32 = vld [vmem:[%s11454_s28 + $0xc44] sm:$0xf]  ;;  %v8503_v41 = vor.u32 %v10845_v29, %v8500_v31  ;;  %5571 = vmatpush.bf16.msra.mxu1 %v8247_v40 }
 0x127   : > { %v8756_v35 = vld [vmem:[%s11454_s28 + $0xc60] sm:$0xf0] }
 0x128   : > { %v10709_v37 = vld [vmem:[%s11454_s28 + $0x604] sm:$0xf]  ;;  %v8759_v48 = vor.u32 %v10909_v32, %v8756_v35  ;;  %5584 = vmatpush.bf16.msra.mxu2 %v8503_v41 }
 0x129   : > { %v7956_v38 = vld [vmem:[%s11454_s28 + $0x620] sm:$0xf0] }
 0x12a   : > { %v10773_v44 = vld [vmem:[%s11454_s28 + $0x804] sm:$0xf]  ;;  %v7959_v55 = vor.u32 %v10709_v37, %v7956_v38  ;;  %5597 = vmatpush.bf16.msra.mxu3 %v8759_v48 }
 0x12b   : > { %v8212_v46 = vld [vmem:[%s11454_s28 + $0x820] sm:$0xf0] }
 0x12c   : > { %v10837_v47 = vld [vmem:[%s11454_s28 + $0xa04] sm:$0xf]  ;;  %v8215_v59 = vor.u32 %v10773_v44, %v8212_v46  ;;  %5559 = vmatpush.bf16.msra.mxu0 %v7959_v55 }
 0x12d   : > { %v8468_v49 = vld [vmem:[%s11454_s28 + $0xa20] sm:$0xf0] }
 0x12e   : > { %v10901_v50 = vld [vmem:[%s11454_s28 + $0xc04] sm:$0xf]  ;;  %v8471_v60 = vor.u32 %v10837_v47, %v8468_v49  ;;  %5572 = vmatpush.bf16.msra.mxu1 %v8215_v59 }
 0x12f   : > { %v8724_v51 = vld [vmem:[%s11454_s28 + $0xc20] sm:$0xf0]  ;;  %5560 = vmatmul.bf16.vlgmr.msra.gmra.mxu0 %v11567_v33 }
 0x130   : > { %v11021_v52 = vld [vmem:[%s11454_s28 + $0xfc4] sm:$0xf]  ;;  %v8727_v63 = vor.u32 %v10901_v50, %v8724_v51  ;;  %5585 = vmatpush.bf16.msra.mxu2 %v8471_v60 }
 0x131   : > { %v9204_v53 = vld [vmem:[%s11454_s28 + $0xfe0] sm:$0xf0]  ;;  %5573 = vmatmul.bf16.vlgmr.msra.gmra.mxu1 %v11619_v42 }
 0x132   : > { %v11085_v54 = vld [vmem:[%s11454_s28 + $0x11c4] sm:$0xf]  ;;  %v9207_v0 = vor.u32 %v11021_v52, %v9204_v53  ;;  %5598 = vmatpush.bf16.msra.mxu3 %v8727_v63 }
 0x133   : > { %v9460_v56 = vld [vmem:[%s11454_s28 + $0x11e0] sm:$0xf0]  ;;  %5586 = vmatmul.bf16.vlgmr.msra.gmra.mxu2 %v11623_v45 }
 0x134   : > { %v11149_v57 = vld [vmem:[%s11454_s28 + $0x13c4] sm:$0xf]  ;;  %v9463_v1 = vor.u32 %v11085_v54, %v9460_v56  ;;  %5604 = vmatpush.bf16.msrb.mxu0 %v9207_v0 }
 0x135   : > { %v9716_v58 = vld [vmem:[%s11454_s28 + $0x13e0] sm:$0xf0]  ;;  %5599 = vmatmul.bf16.vlgmr.msra.gmra.mxu3 %v11615_v39 }
 0x136   : > { %v11213_v61 = vld [vmem:[%s11454_s28 + $0x15c4] sm:$0xf]  ;;  %v9719_v2 = vor.u32 %v11149_v57, %v9716_v58  ;;  %5617 = vmatpush.bf16.msrb.mxu1 %v9463_v1 }
 0x137   : > { %v9972_v62 = vld [vmem:[%s11454_s28 + $0x15e0] sm:$0xf0] }
 0x138   : > { %v11013_v3 = vld [vmem:[%s11454_s28 + $0xf84] sm:$0xf]  ;;  %v9975_v6 = vor.u32 %v11213_v61, %v9972_v62  ;;  %5630 = vmatpush.bf16.msrb.mxu2 %v9719_v2 }
 0x139   : > { %v9172_v4 = vld [vmem:[%s11454_s28 + $0xfa0] sm:$0xf0] }
 0x13a   : > { %v11077_v5 = vld [vmem:[%s11454_s28 + $0x1184] sm:$0xf]  ;;  %v9175_v12 = vor.u32 %v11013_v3, %v9172_v4  ;;  %5643 = vmatpush.bf16.msrb.mxu3 %v9975_v6 }
 0x13b   : > { %v9428_v7 = vld [vmem:[%s11454_s28 + $0x11a0] sm:$0xf0] }
 0x13c   : > { %v11141_v8 = vld [vmem:[%s11454_s28 + $0x1384] sm:$0xf]  ;;  %v9431_v14 = vor.u32 %v11077_v5, %v9428_v7  ;;  %5605 = vmatpush.bf16.msrb.mxu0 %v9175_v12 }
 0x13d   : > { %v9684_v9 = vld [vmem:[%s11454_s28 + $0x13a0] sm:$0xf0] }
 0x13e   : > { %v11205_v10 = vld [vmem:[%s11454_s28 + $0x1584] sm:$0xf]  ;;  %v9687_v15 = vor.u32 %v11141_v8, %v9684_v9  ;;  %5618 = vmatpush.bf16.msrb.mxu1 %v9431_v14 }
 0x13f   : > { %v9940_v11 = vld [vmem:[%s11454_s28 + $0x15a0] sm:$0xf0] }
 0x140   : > { %v11005_v16 = vld [vmem:[%s11454_s28 + $0xf44] sm:$0xf]  ;;  %v9943_v19 = vor.u32 %v11205_v10, %v9940_v11  ;;  %5631 = vmatpush.bf16.msrb.mxu2 %v9687_v15 }
 0x141   : > { %v9140_v17 = vld [vmem:[%s11454_s28 + $0xf60] sm:$0xf0] }
 0x142   : > { %v11069_v18 = vld [vmem:[%s11454_s28 + $0x1144] sm:$0xf]  ;;  %v9143_v31 = vor.u32 %v11005_v16, %v9140_v17  ;;  %5644 = vmatpush.bf16.msrb.mxu3 %v9943_v19 }
 0x143   : > { %v9396_v21 = vld [vmem:[%s11454_s28 + $0x1160] sm:$0xf0] }
 0x144   : > { %v11133_v22 = vld [vmem:[%s11454_s28 + $0x1344] sm:$0xf]  ;;  %v9399_v32 = vor.u32 %v11069_v18, %v9396_v21  ;;  %5606 = vmatpush.bf16.msrb.mxu0 %v9143_v31 }
 0x145   : > { %v9652_v23 = vld [vmem:[%s11454_s28 + $0x1360] sm:$0xf0] }
 0x146   : > { %v11197_v26 = vld [vmem:[%s11454_s28 + $0x1544] sm:$0xf]  ;;  %v9655_v35 = vor.u32 %v11133_v22, %v9652_v23  ;;  %5619 = vmatpush.bf16.msrb.mxu1 %v9399_v32  ;;  %v5353_v23 = vpop.f32.mrf.mxu0  ;;  %v5366_v32 = vpop.f32.mrf.mxu1 }
 0x147   : > { %v9908_v29 = vld [vmem:[%s11454_s28 + $0x1560] sm:$0xf0] }
 0x148   : > { %v10997_v36 = vld [vmem:[%s11454_s28 + $0xf04] sm:$0xf]  ;;  %v9911_v40 = vor.u32 %v11197_v26, %v9908_v29  ;;  %5632 = vmatpush.bf16.msrb.mxu2 %v9655_v35 }
 0x149   : > { %v9108_v37 = vld [vmem:[%s11454_s28 + $0xf20] sm:$0xf0] }
 0x14a   : > { %v11061_v38 = vld [vmem:[%s11454_s28 + $0x1104] sm:$0xf]  ;;  %v9111_v49 = vor.u32 %v10997_v36, %v9108_v37  ;;  %5645 = vmatpush.bf16.msrb.mxu3 %v9911_v40 }
 0x14b   : > { %v9364_v41 = vld [vmem:[%s11454_s28 + $0x1120] sm:$0xf0] }
 0x14c   : > { %v11125_v44 = vld [vmem:[%s11454_s28 + $0x1304] sm:$0xf]  ;;  %v9367_v50 = vor.u32 %v11061_v38, %v9364_v41  ;;  %5607 = vmatpush.bf16.msrb.mxu0 %v9111_v49  ;;  %v5367_v41 = vadd.f32 %v5366_v32, %v5353_v23  ;;  %v10562_v32 = vld [vmem:[%s11454_s28 + $0x164] sm:$0xf0] }
 0x14d   : > { %v9620_v46 = vld [vmem:[%s11454_s28 + $0x1320] sm:$0xf0] }
 0x14e   : > { %v11189_v47 = vld [vmem:[%s11454_s28 + $0x1504] sm:$0xf]  ;;  %v9623_v51 = vor.u32 %v11125_v44, %v9620_v46  ;;  %5620 = vmatpush.bf16.msrb.mxu1 %v9367_v50 }
 0x14f   : > { %v9876_v48 = vld [vmem:[%s11454_s28 + $0x1520] sm:$0xf0] }
 0x150   : > { %v10989_v52 = vld [vmem:[%s11454_s28 + $0xec4] sm:$0xf]  ;;  %v9879_v55 = vor.u32 %v11189_v47, %v9876_v48  ;;  %5633 = vmatpush.bf16.msrb.mxu2 %v9623_v51 }
 0x151   : > { %v9076_v53 = vld [vmem:[%s11454_s28 + $0xee0] sm:$0xf0] }
 0x152   : > { %v11053_v54 = vld [vmem:[%s11454_s28 + $0x10c4] sm:$0xf]  ;;  %v9079_v61 = vor.u32 %v10989_v52, %v9076_v53  ;;  %5646 = vmatpush.bf16.msrb.mxu3 %v9879_v55  ;;  %v5379_v52 = vpop.f32.mrf.mxu2  ;;  %v7418_v55 = vld [vmem:[%s11454_s28 + $0x1c8] sm:$0xf] }
 0x153   : > { %v9332_v56 = vld [vmem:[%s11454_s28 + $0x10e0] sm:$0xf0] }
 0x154   : > { %v11117_v57 = vld [vmem:[%s11454_s28 + $0x12c4] sm:$0xf]  ;;  %v9335_v62 = vor.u32 %v11053_v54, %v9332_v56  ;;  %5608 = vmatpush.bf16.msrb.mxu0 %v9079_v61  ;;  %v10578_v56 = vld [vmem:[%s11454_s28 + $0x1e4] sm:$0xf0] }
 0x155   : > { %v9588_v58 = vld [vmem:[%s11454_s28 + $0x12e0] sm:$0xf0]  ;;  %v10642_v61 = vld [vmem:[%s11454_s28 + $0x3e4] sm:$0xf0] }
 0x156   : > { %v11181_v59 = vld [vmem:[%s11454_s28 + $0x14c4] sm:$0xf]  ;;  %v9591_v63 = vor.u32 %v11117_v57, %v9588_v58  ;;  %5621 = vmatpush.bf16.msrb.mxu1 %v9335_v62  ;;  %v5380_v57 = vadd.f32 %v5379_v52, %v5367_v41  ;;  %v7578_v52 = vld [vmem:[%s11454_s28 + $0x308] sm:$0xf] }
 0x157   : > { %v9844_v60 = vld [vmem:[%s11454_s28 + $0x14e0] sm:$0xf0] }
 0x158   : > { %v10981_v0 = vld [vmem:[%s11454_s28 + $0xe84] sm:$0xf]  ;;  %v9847_v3 = vor.u32 %v11181_v59, %v9844_v60  ;;  %5634 = vmatpush.bf16.msrb.mxu2 %v9591_v63  ;;  %v7674_v60 = vld [vmem:[%s11454_s28 + $0x3c8] sm:$0xf] }
 0x159   : > { %v9044_v1 = vld [vmem:[%s11454_s28 + $0xea0] sm:$0xf0] }
 0x15a   : > { %v11045_v2 = vld [vmem:[%s11454_s28 + $0x1084] sm:$0xf]  ;;  %v9047_v9 = vor.u32 %v10981_v0, %v9044_v1  ;;  %5647 = vmatpush.bf16.msrb.mxu3 %v9847_v3  ;;  %v5392_v0 = vpop.f32.mrf.mxu3  ;;  %v5381_v23 = vpop.f32.mrf.mxu2 }
 0x15b   : > { %v9300_v4 = vld [vmem:[%s11454_s28 + $0x10a0] sm:$0xf0] }
 0x15c   : > { %v11109_v5 = vld [vmem:[%s11454_s28 + $0x1284] sm:$0xf]  ;;  %v9303_v10 = vor.u32 %v11045_v2, %v9300_v4  ;;  %5609 = vmatpush.bf16.msrb.mxu0 %v9047_v9  ;;  %v7419_v2 = vor.u32 %v10578_v56, %v7418_v55 }
 0x15d   : > { %v9556_v6 = vld [vmem:[%s11454_s28 + $0x12a0] sm:$0xf0] }
 0x15e   : > { %v11173_v7 = vld [vmem:[%s11454_s28 + $0x1484] sm:$0xf]  ;;  %v9559_v11 = vor.u32 %v11109_v5, %v9556_v6  ;;  %5622 = vmatpush.bf16.msrb.mxu1 %v9303_v10  ;;  %v5393_v6 = vadd.f32 %v5392_v0, %v5380_v57  ;;  %v7386_v10 = vld [vmem:[%s11454_s28 + $0x188] sm:$0xf] }
 0x15f   : > { %v9812_v8 = vld [vmem:[%s11454_s28 + $0x14a0] sm:$0xf0] }
 0x160   : > { %v10973_v12 = vld [vmem:[%s11454_s28 + $0xe44] sm:$0xf]  ;;  %v9815_v16 = vor.u32 %v11173_v7, %v9812_v8  ;;  %5635 = vmatpush.bf16.msrb.mxu2 %v9559_v11  ;;  %v5355_v7 = vpop.f32.mrf.mxu0  ;;  %v7675_v8 = vor.u32 %v10642_v61, %v7674_v60  ;;  %v10570_v11 = vld [vmem:[%s11454_s28 + $0x1a4] sm:$0xf0] }
 0x161   : > { %v9012_v14 = vld [vmem:[%s11454_s28 + $0xe60] sm:$0xf0] }
 0x162   : > { %v11037_v15 = vld [vmem:[%s11454_s28 + $0x1044] sm:$0xf]  ;;  %v9015_v26 = vor.u32 %v10973_v12, %v9012_v14  ;;  %5648 = vmatpush.bf16.msrb.mxu3 %v9815_v16  ;;  %v5368_v12 = vpop.f32.mrf.mxu1  ;;  %v7642_v14 = vld [vmem:[%s11454_s28 + $0x388] sm:$0xf] }
 0x163   : > { %v9268_v17 = vld [vmem:[%s11454_s28 + $0x1060] sm:$0xf0]  ;;  %v5431_v12 = vpop.f32.mrf.mxu2 }
 0x164   : > { %v11101_v18 = vld [vmem:[%s11454_s28 + $0x1244] sm:$0xf]  ;;  %v9271_v35 = vor.u32 %v11037_v15, %v9268_v17  ;;  %5610 = vmatpush.bf16.msrb.mxu0 %v9015_v26  ;;  %v10634_v15 = vld [vmem:[%s11454_s28 + $0x3a4] sm:$0xf0] }
 0x165   : > { %v9524_v19 = vld [vmem:[%s11454_s28 + $0x1260] sm:$0xf0]  ;;  %v7643_v26 = vor.u32 %v10634_v15, %v7642_v14 }
 0x166   : > { %v11165_v21 = vld [vmem:[%s11454_s28 + $0x1444] sm:$0xf]  ;;  %v9527_v36 = vor.u32 %v11101_v18, %v9524_v19  ;;  %5623 = vmatpush.bf16.msrb.mxu1 %v9271_v35  ;;  %v7387_v18 = vor.u32 %v10570_v11, %v7386_v10  ;;  %v7610_v35 = vld [vmem:[%s11454_s28 + $0x348] sm:$0xf] }
 0x167   : > { %v9780_v22 = vld [vmem:[%s11454_s28 + $0x1460] sm:$0xf0] }
 0x168   : > { %v10965_v29 = vld [vmem:[%s11454_s28 + $0xe04] sm:$0xf]  ;;  %v9783_v44 = vor.u32 %v11165_v21, %v9780_v22  ;;  %5636 = vmatpush.bf16.msrb.mxu2 %v9527_v36  ;;  %v10626_v36 = vld [vmem:[%s11454_s28 + $0x364] sm:$0xf0]  ;;  %v5405_v55 = vpop.f32.mrf.mxu0 }
 0x169   : > { %v8980_v31 = vld [vmem:[%s11454_s28 + $0xe20] sm:$0xf0]  ;;  %v5406_v61 = vadd.f32 %v5405_v55, %v5393_v6 }
 0x16a   : > { %v11029_v37 = vld [vmem:[%s11454_s28 + $0x1004] sm:$0xf]  ;;  %v8983_v53 = vor.u32 %v10965_v29, %v8980_v31  ;;  %5649 = vmatpush.bf16.msrb.mxu3 %v9783_v44  ;;  %v7354_v31 = vld [vmem:[%s11454_s28 + $0x148] sm:$0xf] }
 0x16b   : > { %v9236_v38 = vld [vmem:[%s11454_s28 + $0x1020] sm:$0xf0]  ;;  %v7355_v41 = vor.u32 %v10562_v32, %v7354_v31 }
 0x16c   : > { %v11093_v40 = vld [vmem:[%s11454_s28 + $0x1204] sm:$0xf]  ;;  %v9239_v58 = vor.u32 %v11029_v37, %v9236_v38  ;;  %5611 = vmatpush.bf16.msrb.mxu0 %v8983_v53  ;;  %v5394_v38 = vpop.f32.mrf.mxu3  ;;  %v10618_v53 = vld [vmem:[%s11454_s28 + $0x324] sm:$0xf0] }
 0x16d   : > { %v9492_v46 = vld [vmem:[%s11454_s28 + $0x1220] sm:$0xf0] }
 0x16e   : > { %v11157_v47 = vld [vmem:[%s11454_s28 + $0x1404] sm:$0xf]  ;;  %v9495_v59 = vor.u32 %v11093_v40, %v9492_v46  ;;  %5624 = vmatpush.bf16.msrb.mxu1 %v9239_v58 }
 0x16f   : > { %v9748_v48 = vld [vmem:[%s11454_s28 + $0x1420] sm:$0xf0]  ;;  %5612 = vmatmul.bf16.vlgmr.msrb.gmra.mxu0 %v11621_v43 }
 0x170   : > { %v11277_v49 = vld [vmem:[%s11454_s28 + $0x17c4] sm:$0xf]  ;;  %v9751_v62 = vor.u32 %v11157_v47, %v9748_v48  ;;  %5637 = vmatpush.bf16.msrb.mxu2 %v9495_v59  ;;  %v7611_v48 = vor.u32 %v10626_v36, %v7610_v35 }
 0x171   : > { %v10228_v50 = vld [vmem:[%s11454_s28 + $0x17e0] sm:$0xf0]  ;;  %5625 = vmatmul.bf16.vlgmr.msrb.gmra.mxu1 %v11688_v20 }
 0x172   : > { %v11341_v51 = vld [vmem:[%s11454_s28 + $0x19c4] sm:$0xf]  ;;  %v10231_v63 = vor.u32 %v11277_v49, %v10228_v50  ;;  %5650 = vmatpush.bf16.msrb.mxu3 %v9751_v62  ;;  %v7322_v50 = vld [vmem:[%s11454_s28 + $0x108] sm:$0xf]  ;;  %v5418_v62 = vpop.f32.mrf.mxu1 }
 0x173   : > { %v10484_v54 = vld [vmem:[%s11454_s28 + $0x19e0] sm:$0xf0]  ;;  %5638 = vmatmul.bf16.vlgmr.msrb.gmra.mxu2 %v11695_v25 }
 0x174   : > { %v10487_v1 = vor.u32 %v11341_v51, %v10484_v54  ;;  %v11269_v3 = vld [vmem:[%s11454_s28 + $0x1784] sm:$0xf]  ;;  %5656 = vmatpush.bf16.msra.mxu0 %v10231_v63  ;;  %5682 = vmatpush.bf16.msra.mxu2 %v7419_v2  ;;  %v10554_v51 = vld [vmem:[%s11454_s28 + $0x124] sm:$0xf0]  ;;  %v7579_v63 = vor.u32 %v10618_v53, %v7578_v52 }
 0x175   : > { %v10196_v4 = vld [vmem:[%s11454_s28 + $0x17a0] sm:$0xf0]  ;;  %5651 = vmatmul.bf16.vlgmr.msrb.gmra.mxu3 %v11693_v24  ;;  %v7323_v57 = vor.u32 %v10554_v51, %v7322_v50  ;;  %v10546_v2 = vld [vmem:[%s11454_s28 + $0xe4] sm:$0xf0] }
 0x176   : > { %v11333_v5 = vld [vmem:[%s11454_s28 + $0x1984] sm:$0xf]  ;;  %v10199_v16 = vor.u32 %v11269_v3, %v10196_v4  ;;  %5669 = vmatpush.bf16.msra.mxu1 %v10487_v1  ;;  %5695 = vmatpush.bf16.msra.mxu3 %v7675_v8  ;;  %v7290_v1 = vld [vmem:[%s11454_s28 + $0xc8] sm:$0xf] }
 0x177   : > { %v10452_v9 = vld [vmem:[%s11454_s28 + $0x19a0] sm:$0xf0]  ;;  %v7546_v3 = vld [vmem:[%s11454_s28 + $0x2c8] sm:$0xf]  ;;  %v7291_v8 = vor.u32 %v10546_v2, %v7290_v1 }
 0x178   : > { %v10455_v17 = vor.u32 %v11333_v5, %v10452_v9  ;;  %v11261_v19 = vld [vmem:[%s11454_s28 + $0x1744] sm:$0xf]  ;;  %5657 = vmatpush.bf16.msra.mxu0 %v10199_v16  ;;  %5683 = vmatpush.bf16.msra.mxu2 %v7387_v18  ;;  %v10610_v4 = vld [vmem:[%s11454_s28 + $0x2e4] sm:$0xf0]  ;;  %v5419_v5 = vadd.f32 %v5418_v62, %v5406_v61 }
 0x179   : > { %v10164_v21 = vld [vmem:[%s11454_s28 + $0x1760] sm:$0xf0]  ;;  %v7547_v14 = vor.u32 %v10610_v4, %v7546_v3  ;;  %v7258_v16 = vld [vmem:[%s11454_s28 + $0x88] sm:$0xf] }
 0x17a   : > { %v11325_v22 = vld [vmem:[%s11454_s28 + $0x1944] sm:$0xf]  ;;  %v10167_v37 = vor.u32 %v11261_v19, %v10164_v21  ;;  %5670 = vmatpush.bf16.msra.mxu1 %v10455_v17  ;;  %5696 = vmatpush.bf16.msra.mxu3 %v7643_v26  ;;  %v10538_v17 = vld [vmem:[%s11454_s28 + $0xa4] sm:$0xf0]  ;;  %v5432_v18 = vadd.f32 %v5431_v12, %v5419_v5  ;;  %v5444_v19 = vpop.f32.mrf.mxu3  ;;  %v5420_v38 = vpop.f32.mrf.mxu1 }
 0x17b   : > { %v10420_v29 = vld [vmem:[%s11454_s28 + $0x1960] sm:$0xf0]  ;;  %v7514_v21 = vld [vmem:[%s11454_s28 + $0x288] sm:$0xf]  ;;  %v7259_v32 = vor.u32 %v10538_v17, %v7258_v16 }
 0x17c   : > { %v10423_v40 = vor.u32 %v11325_v22, %v10420_v29  ;;  %v11253_v44 = vld [vmem:[%s11454_s28 + $0x1704] sm:$0xf]  ;;  %5658 = vmatpush.bf16.msra.mxu0 %v10167_v37  ;;  %5684 = vmatpush.bf16.msra.mxu2 %v7355_v41  ;;  %v10602_v22 = vld [vmem:[%s11454_s28 + $0x2a4] sm:$0xf0]  ;;  %v11943_v26 = vadd.f32 %v5444_v19, %v5432_v18  ;;  %v5407_v29 = vpop.f32.mrf.mxu0 }
 0x17d   : > { %v10132_v46 = vld [vmem:[%s11454_s28 + $0x1720] sm:$0xf0]  ;;  %v10586_v61 = vld [vmem:[%s11454_s28 + $0x224] sm:$0xf0] }
 0x17e   : > { %v11317_v47 = vld [vmem:[%s11454_s28 + $0x1904] sm:$0xf]  ;;  %v10135_v54 = vor.u32 %v11253_v44, %v10132_v46  ;;  %5671 = vmatpush.bf16.msra.mxu1 %v10423_v40  ;;  %5697 = vmatpush.bf16.msra.mxu3 %v7611_v48  ;;  %v7515_v40 = vor.u32 %v10602_v22, %v7514_v21  ;;  %v7226_v44 = vld [vmem:[%s11454_s28 + $0x48] sm:$0xf] }
 0x17f   : > { %v10388_v49 = vld [vmem:[%s11454_s28 + $0x1920] sm:$0xf0]  ;;  %v10530_v46 = vld [vmem:[%s11454_s28 + $0x64] sm:$0xf0] }
 0x180   : > { %v10391_v56 = vor.u32 %v11317_v47, %v10388_v49  ;;  %v11245_v58 = vld [vmem:[%s11454_s28 + $0x16c4] sm:$0xf]  ;;  %5659 = vmatpush.bf16.msra.mxu0 %v10135_v54  ;;  %5685 = vmatpush.bf16.msra.mxu2 %v7323_v57  ;;  %v7482_v47 = vld [vmem:[%s11454_s28 + $0x248] sm:$0xf]  ;;  %v7227_v53 = vor.u32 %v10530_v46, %v7226_v44  ;;  %v5433_v57 = vpop.f32.mrf.mxu2 }
 0x181   : > { %v10100_v59 = vld [vmem:[%s11454_s28 + $0x16e0] sm:$0xf0]  ;;  %v10594_v48 = vld [vmem:[%s11454_s28 + $0x264] sm:$0xf0] }
 0x182   : > { %v11309_v60 = vld [vmem:[%s11454_s28 + $0x18c4] sm:$0xf]  ;;  %v10103_v7 = vor.u32 %v11245_v58, %v10100_v59  ;;  %5672 = vmatpush.bf16.msra.mxu1 %v10391_v56  ;;  %5698 = vmatpush.bf16.msra.mxu3 %v7579_v63  ;;  %v7194_v56 = vld [vmem:[%s11454_s28 + $0x8] sm:$0xf]  ;;  %v7483_v58 = vor.u32 %v10594_v48, %v7482_v47  ;;  %v5446_v62 = vpop.f32.mrf.mxu3 }
 0x183   : > { %v10356_v0 = vld [vmem:[%s11454_s28 + $0x18e0] sm:$0xf0]  ;;  %v10522_v59 = vld [vmem:[%s11454_s28 + $0x24] sm:$0xf0] }
 0x184   : > { %v10359_v6 = vor.u32 %v11309_v60, %v10356_v0  ;;  %v11237_v9 = vld [vmem:[%s11454_s28 + $0x1684] sm:$0xf]  ;;  %5660 = vmatpush.bf16.msra.mxu0 %v10103_v7  ;;  %5686 = vmatpush.bf16.msra.mxu2 %v7291_v8  ;;  %v7450_v60 = vld [vmem:[%s11454_s28 + $0x208] sm:$0xf] }
 0x185   : > { %v10068_v10 = vld [vmem:[%s11454_s28 + $0x16a0] sm:$0xf0]  ;;  %v7930_v63 = vld [vmem:[%s11454_s28 + $0x5c8] sm:$0xf] }
 0x186   : > { %v11301_v11 = vld [vmem:[%s11454_s28 + $0x1884] sm:$0xf]  ;;  %v10071_v23 = vor.u32 %v11237_v9, %v10068_v10  ;;  %5673 = vmatpush.bf16.msra.mxu1 %v10359_v6  ;;  %5699 = vmatpush.bf16.msra.mxu3 %v7547_v14  ;;  %v10706_v0 = vld [vmem:[%s11454_s28 + $0x5e4] sm:$0xf0]  ;;  %v7195_v6 = vor.u32 %v10522_v59, %v7194_v56  ;;  %v7451_v10 = vor.u32 %v10586_v61, %v7450_v60  ;;  %v5457_v59 = vpop.f32.mrf.mxu0 }
 0x187   : > { %v10324_v15 = vld [vmem:[%s11454_s28 + $0x18a0] sm:$0xf0]  ;;  %v8186_v1 = vld [vmem:[%s11454_s28 + $0x7c8] sm:$0xf]  ;;  %v5458_v62 = vadd.f32 %v5457_v59, %v11943_v26 }
 0x188   : > { %v10327_v31 = vor.u32 %v11301_v11, %v10324_v15  ;;  %v11229_v35 = vld [vmem:[%s11454_s28 + $0x1644] sm:$0xf]  ;;  %5661 = vmatpush.bf16.msra.mxu0 %v10071_v23  ;;  %5687 = vmatpush.bf16.msra.mxu2 %v7259_v32  ;;  %v10770_v3 = vld [vmem:[%s11454_s28 + $0x7e4] sm:$0xf0]  ;;  %v7931_v11 = vor.u32 %v10706_v0, %v7930_v63  ;;  %v5470_v0 = vpop.f32.mrf.mxu1 }
 0x189   : > { %v10036_v36 = vld [vmem:[%s11454_s28 + $0x1660] sm:$0xf0]  ;;  %v8442_v4 = vld [vmem:[%s11454_s28 + $0x9c8] sm:$0xf]  ;;  %v8187_v12 = vor.u32 %v10770_v3, %v8186_v1 }
 0x18a   : > { %v11293_v37 = vld [vmem:[%s11454_s28 + $0x1844] sm:$0xf]  ;;  %v10039_v49 = vor.u32 %v11229_v35, %v10036_v36  ;;  %5674 = vmatpush.bf16.msra.mxu1 %v10327_v31  ;;  %5700 = vmatpush.bf16.msra.mxu3 %v7515_v40  ;;  %v10834_v5 = vld [vmem:[%s11454_s28 + $0x9e4] sm:$0xf0] }
 0x18b   : > { %v10292_v41 = vld [vmem:[%s11454_s28 + $0x1860] sm:$0xf0]  ;;  %v8698_v8 = vld [vmem:[%s11454_s28 + $0xbc8] sm:$0xf]  ;;  %v8443_v14 = vor.u32 %v10834_v5, %v8442_v4 }
 0x18c   : > { %v11221_v50 = vld [vmem:[%s11454_s28 + $0x1604] sm:$0xf]  ;;  %v10295_v52 = vor.u32 %v11293_v37, %v10292_v41  ;;  %5662 = vmatpush.bf16.msra.mxu0 %v10039_v49  ;;  %5688 = vmatpush.bf16.msra.mxu2 %v7227_v53  ;;  %v10898_v9 = vld [vmem:[%s11454_s28 + $0xbe4] sm:$0xf0] }
 0x18d   : > { %v10004_v51 = vld [vmem:[%s11454_s28 + $0x1620] sm:$0xf0]  ;;  %v7898_v15 = vld [vmem:[%s11454_s28 + $0x588] sm:$0xf]  ;;  %v8699_v18 = vor.u32 %v10898_v9, %v8698_v8 }
 0x18e   : > { %v11285_v54 = vld [vmem:[%s11454_s28 + $0x1804] sm:$0xf]  ;;  %v10007_v2 = vor.u32 %v11221_v50, %v10004_v51  ;;  %5675 = vmatpush.bf16.msra.mxu1 %v10295_v52  ;;  %5701 = vmatpush.bf16.msra.mxu3 %v7483_v58  ;;  %v10698_v16 = vld [vmem:[%s11454_s28 + $0x5a4] sm:$0xf0] }
 0x18f   : > { %v10260_v55 = vld [vmem:[%s11454_s28 + $0x1820] sm:$0xf0]  ;;  %v8154_v17 = vld [vmem:[%s11454_s28 + $0x788] sm:$0xf]  ;;  %v7899_v31 = vor.u32 %v10698_v16, %v7898_v15 }
 0x190   : > { %v10263_v7 = vor.u32 %v11285_v54, %v10260_v55  ;;  %5663 = vmatpush.bf16.msra.mxu0 %v10007_v2  ;;  %v10762_v19 = vld [vmem:[%s11454_s28 + $0x7a4] sm:$0xf0]  ;;  %5689 = vmatpush.bf16.msra.mxu2 %v7195_v6  ;;  %v5471_v6 = vadd.f32 %v5470_v0, %v5458_v62 }
 0x191   : > { %v8410_v21 = vld [vmem:[%s11454_s28 + $0x988] sm:$0xf]  ;;  %v8155_v32 = vor.u32 %v10762_v19, %v8154_v17 }
 0x192   : > { %v10826_v22 = vld [vmem:[%s11454_s28 + $0x9a4] sm:$0xf0]  ;;  %5676 = vmatpush.bf16.msra.mxu1 %v10263_v7  ;;  %5702 = vmatpush.bf16.msra.mxu3 %v7451_v10 }
 0x193   : > { %v8666_v23 = vld [vmem:[%s11454_s28 + $0xb88] sm:$0xf]  ;;  %v8411_v35 = vor.u32 %v10826_v22, %v8410_v21  ;;  %5664 = vmatmul.bf16.vlgmr.msra.gmra.mxu0 %v11699_v30  ;;  %5690 = vmatmul.bf16.vlgmr.msra.gmra.mxu2 %v11563_v28  ;;  %v5483_v21 = vpop.f32.mrf.mxu2 }
 0x194   : > { %v10890_v29 = vld [vmem:[%s11454_s28 + $0xba4] sm:$0xf0]  ;;  %5708 = vmatpush.bf16.msrb.mxu0 %v7931_v11  ;;  %5734 = vmatpush.bf16.msrb.mxu2 %v8443_v14 }
 0x195   : > { %v7866_v36 = vld [vmem:[%s11454_s28 + $0x548] sm:$0xf]  ;;  %v8667_v40 = vor.u32 %v10890_v29, %v8666_v23  ;;  %5677 = vmatmul.bf16.vlgmr.msra.gmra.mxu1 %v11764_v13  ;;  %5703 = vmatmul.bf16.vlgmr.msra.gmra.mxu3 %v11569_v34 }
 0x196   : > { %5721 = vmatpush.bf16.msrb.mxu1 %v8187_v12  ;;  %v10690_v37 = vld [vmem:[%s11454_s28 + $0x564] sm:$0xf0]  ;;  %5747 = vmatpush.bf16.msrb.mxu3 %v8699_v18 }
 0x197   : > { %v8122_v38 = vld [vmem:[%s11454_s28 + $0x748] sm:$0xf]  ;;  %v7867_v49 = vor.u32 %v10690_v37, %v7866_v36  ;;  %v5459_v37 = vpop.f32.mrf.mxu0 }
 0x198   : > { %v10754_v41 = vld [vmem:[%s11454_s28 + $0x764] sm:$0xf0]  ;;  %5709 = vmatpush.bf16.msrb.mxu0 %v7899_v31  ;;  %5735 = vmatpush.bf16.msrb.mxu2 %v8411_v35  ;;  %v5484_v31 = vadd.f32 %v5483_v21, %v5471_v6 }
 0x199   : > { %v8378_v44 = vld [vmem:[%s11454_s28 + $0x948] sm:$0xf]  ;;  %v8123_v50 = vor.u32 %v10754_v41, %v8122_v38 }
 0x19a   : > { %v10818_v46 = vld [vmem:[%s11454_s28 + $0x964] sm:$0xf0]  ;;  %5722 = vmatpush.bf16.msrb.mxu1 %v8155_v32  ;;  %5748 = vmatpush.bf16.msrb.mxu3 %v8667_v40  ;;  %v5496_v32 = vpop.f32.mrf.mxu3  ;;  %v5472_v40 = vpop.f32.mrf.mxu1 }
 0x19b   : > { %v8634_v47 = vld [vmem:[%s11454_s28 + $0xb48] sm:$0xf]  ;;  %v8379_v51 = vor.u32 %v10818_v46, %v8378_v44  ;;  %v12014_v41 = vadd.f32 %v5496_v32, %v5484_v31 }
 0x19c   : > { %v10882_v48 = vld [vmem:[%s11454_s28 + $0xb64] sm:$0xf0]  ;;  %5710 = vmatpush.bf16.msrb.mxu0 %v7867_v49 }
 0x19d   : > { %v7834_v52 = vld [vmem:[%s11454_s28 + $0x508] sm:$0xf]  ;;  %v8635_v55 = vor.u32 %v10882_v48, %v8634_v47  ;;  %5736 = vmatpush.bf16.msrb.mxu2 %v8379_v51 }
 0x19e   : > { %v10682_v53 = vld [vmem:[%s11454_s28 + $0x524] sm:$0xf0]  ;;  %5723 = vmatpush.bf16.msrb.mxu1 %v8123_v50 }
 0x19f   : > { %v8090_v54 = vld [vmem:[%s11454_s28 + $0x708] sm:$0xf]  ;;  %v7835_v63 = vor.u32 %v10682_v53, %v7834_v52  ;;  %5749 = vmatpush.bf16.msrb.mxu3 %v8635_v55 }
 0x1a0   : > { %v10746_v56 = vld [vmem:[%s11454_s28 + $0x724] sm:$0xf0] }
 0x1a1   : > { %v8346_v57 = vld [vmem:[%s11454_s28 + $0x908] sm:$0xf]  ;;  %v8091_v1 = vor.u32 %v10746_v56, %v8090_v54  ;;  %5711 = vmatpush.bf16.msrb.mxu0 %v7835_v63 }
 0x1a2   : > { %v10810_v58 = vld [vmem:[%s11454_s28 + $0x924] sm:$0xf0] }
 0x1a3   : > { %v8602_v60 = vld [vmem:[%s11454_s28 + $0xb08] sm:$0xf]  ;;  %v8347_v2 = vor.u32 %v10810_v58, %v8346_v57  ;;  %5724 = vmatpush.bf16.msrb.mxu1 %v8091_v1 }
 0x1a4   : > { %v10874_v61 = vld [vmem:[%s11454_s28 + $0xb24] sm:$0xf0] }
 0x1a5   : > { %v7802_v3 = vld [vmem:[%s11454_s28 + $0x4c8] sm:$0xf]  ;;  %v8603_v7 = vor.u32 %v10874_v61, %v8602_v60  ;;  %5737 = vmatpush.bf16.msrb.mxu2 %v8347_v2 }
 0x1a6   : > { %v10674_v4 = vld [vmem:[%s11454_s28 + $0x4e4] sm:$0xf0] }
 0x1a7   : > { %v8058_v5 = vld [vmem:[%s11454_s28 + $0x6c8] sm:$0xf]  ;;  %v7803_v12 = vor.u32 %v10674_v4, %v7802_v3  ;;  %5750 = vmatpush.bf16.msrb.mxu3 %v8603_v7  ;;  %v5485_v4 = vpop.f32.mrf.mxu2 }
 0x1a8   : > { %v10738_v8 = vld [vmem:[%s11454_s28 + $0x6e4] sm:$0xf0] }
 0x1a9   : > { %v8314_v9 = vld [vmem:[%s11454_s28 + $0x8c8] sm:$0xf]  ;;  %v8059_v14 = vor.u32 %v10738_v8, %v8058_v5  ;;  %5712 = vmatpush.bf16.msrb.mxu0 %v7803_v12  ;;  %v5498_v8 = vpop.f32.mrf.mxu3 }
 0x1aa   : > { %v10802_v26 = vld [vmem:[%s11454_s28 + $0x8e4] sm:$0xf0] }
 0x1ab   : > { %v8570_v10 = vld [vmem:[%s11454_s28 + $0xac8] sm:$0xf]  ;;  %v8315_v15 = vor.u32 %v10802_v26, %v8314_v9  ;;  %5725 = vmatpush.bf16.msrb.mxu1 %v8059_v14 }
 0x1ac   : > { %v10866_v11 = vld [vmem:[%s11454_s28 + $0xae4] sm:$0xf0] }
 0x1ad   : > { %v7770_v16 = vld [vmem:[%s11454_s28 + $0x488] sm:$0xf]  ;;  %v8571_v19 = vor.u32 %v10866_v11, %v8570_v10  ;;  %5738 = vmatpush.bf16.msrb.mxu2 %v8315_v15 }
 0x1ae   : > { %v10666_v17 = vld [vmem:[%s11454_s28 + $0x4a4] sm:$0xf0] }
 0x1af   : > { %v8026_v18 = vld [vmem:[%s11454_s28 + $0x688] sm:$0xf]  ;;  %v7771_v38 = vor.u32 %v10666_v17, %v7770_v16  ;;  %5751 = vmatpush.bf16.msrb.mxu3 %v8571_v19 }
 0x1b0   : > { %v10730_v22 = vld [vmem:[%s11454_s28 + $0x6a4] sm:$0xf0] }
 0x1b1   : > { %v8282_v23 = vld [vmem:[%s11454_s28 + $0x888] sm:$0xf]  ;;  %v8027_v44 = vor.u32 %v10730_v22, %v8026_v18  ;;  %5713 = vmatpush.bf16.msrb.mxu0 %v7771_v38 }
 0x1b2   : > { %v10794_v29 = vld [vmem:[%s11454_s28 + $0x8a4] sm:$0xf0] }
 0x1b3   : > { %v8538_v35 = vld [vmem:[%s11454_s28 + $0xa88] sm:$0xf]  ;;  %v8283_v46 = vor.u32 %v10794_v29, %v8282_v23  ;;  %5726 = vmatpush.bf16.msrb.mxu1 %v8027_v44 }
 0x1b4   : > { %v10858_v36 = vld [vmem:[%s11454_s28 + $0xaa4] sm:$0xf0] }
 0x1b5   : > { %v7738_v47 = vld [vmem:[%s11454_s28 + $0x448] sm:$0xf]  ;;  %v8539_v50 = vor.u32 %v10858_v36, %v8538_v35  ;;  %5739 = vmatpush.bf16.msrb.mxu2 %v8283_v46 }
 0x1b6   : > { %v10658_v48 = vld [vmem:[%s11454_s28 + $0x464] sm:$0xf0] }
 0x1b7   : > { %v7994_v49 = vld [vmem:[%s11454_s28 + $0x648] sm:$0xf]  ;;  %v7739_v56 = vor.u32 %v10658_v48, %v7738_v47  ;;  %5752 = vmatpush.bf16.msrb.mxu3 %v8539_v50 }
 0x1b8   : > { %v10722_v51 = vld [vmem:[%s11454_s28 + $0x664] sm:$0xf0] }
 0x1b9   : > { %v8250_v52 = vld [vmem:[%s11454_s28 + $0x848] sm:$0xf]  ;;  %v7995_v59 = vor.u32 %v10722_v51, %v7994_v49  ;;  %5714 = vmatpush.bf16.msrb.mxu0 %v7739_v56 }
 0x1ba   : > { %v10786_v53 = vld [vmem:[%s11454_s28 + $0x864] sm:$0xf0] }
 0x1bb   : > { %v8506_v54 = vld [vmem:[%s11454_s28 + $0xa48] sm:$0xf]  ;;  %v8251_v60 = vor.u32 %v10786_v53, %v8250_v52  ;;  %5727 = vmatpush.bf16.msrb.mxu1 %v7995_v59 }
 0x1bc   : > { %v10850_v55 = vld [vmem:[%s11454_s28 + $0xa64] sm:$0xf0] }
 0x1bd   : > { %v7706_v57 = vld [vmem:[%s11454_s28 + $0x408] sm:$0xf]  ;;  %v8507_v0 = vor.u32 %v10850_v55, %v8506_v54  ;;  %5740 = vmatpush.bf16.msrb.mxu2 %v8251_v60 }
 0x1be   : > { %v10650_v58 = vld [vmem:[%s11454_s28 + $0x424] sm:$0xf0] }
 0x1bf   : > { %v7962_v61 = vld [vmem:[%s11454_s28 + $0x608] sm:$0xf]  ;;  %v7707_v9 = vor.u32 %v10650_v58, %v7706_v57  ;;  %5753 = vmatpush.bf16.msrb.mxu3 %v8507_v0 }
 0x1c0   : > { %v10714_v62 = vld [vmem:[%s11454_s28 + $0x624] sm:$0xf0] }
 0x1c1   : > { %v8218_v63 = vld [vmem:[%s11454_s28 + $0x808] sm:$0xf]  ;;  %v7963_v12 = vor.u32 %v10714_v62, %v7962_v61  ;;  %5715 = vmatpush.bf16.msrb.mxu0 %v7707_v9 }
 0x1c2   : > { %v10778_v1 = vld [vmem:[%s11454_s28 + $0x824] sm:$0xf0] }
 0x1c3   : > { %v8474_v2 = vld [vmem:[%s11454_s28 + $0xa08] sm:$0xf]  ;;  %v8219_v14 = vor.u32 %v10778_v1, %v8218_v63  ;;  %5728 = vmatpush.bf16.msrb.mxu1 %v7963_v12 }
 0x1c4   : > { %v10842_v3 = vld [vmem:[%s11454_s28 + $0xa24] sm:$0xf0]  ;;  %5716 = vmatmul.bf16.vlgmr.msrb.gmra.mxu0 %v11561_v27 }
 0x1c5   : > { %v8954_v5 = vld [vmem:[%s11454_s28 + $0xdc8] sm:$0xf]  ;;  %v8475_v17 = vor.u32 %v10842_v3, %v8474_v2  ;;  %5741 = vmatpush.bf16.msrb.mxu2 %v8219_v14  ;;  %v5509_v2 = vpop.f32.mrf.mxu0 }
 0x1c6   : > { %v10962_v7 = vld [vmem:[%s11454_s28 + $0xde4] sm:$0xf0]  ;;  %5729 = vmatmul.bf16.vlgmr.msrb.gmra.mxu1 %v11567_v33 }
 0x1c7   : > { %v9210_v6 = vld [vmem:[%s11454_s28 + $0xfc8] sm:$0xf]  ;;  %v8955_v18 = vor.u32 %v10962_v7, %v8954_v5  ;;  %5754 = vmatpush.bf16.msrb.mxu3 %v8475_v17  ;;  %v12069_v5 = vadd.f32 %v5509_v2, %v12014_v41 }
 0x1c8   : > { %v11026_v26 = vld [vmem:[%s11454_s28 + $0xfe4] sm:$0xf0]  ;;  %5742 = vmatmul.bf16.vlgmr.msrb.gmra.mxu2 %v11619_v42 }
 0x1c9   : > { %v9466_v10 = vld [vmem:[%s11454_s28 + $0x11c8] sm:$0xf]  ;;  %v9211_v19 = vor.u32 %v11026_v26, %v9210_v6  ;;  %5760 = vmatpush.bf16.msra.mxu0 %v8955_v18 }
 0x1ca   : > { %v11090_v11 = vld [vmem:[%s11454_s28 + $0x11e4] sm:$0xf0]  ;;  %5755 = vmatmul.bf16.vlgmr.msrb.gmra.mxu3 %v11623_v45 }
 0x1cb   : > { %v9722_v15 = vld [vmem:[%s11454_s28 + $0x13c8] sm:$0xf]  ;;  %v9467_v21 = vor.u32 %v11090_v11, %v9466_v10  ;;  %5773 = vmatpush.bf16.msra.mxu1 %v9211_v19  ;;  %v5522_v11 = vpop.f32.mrf.mxu1 }
 0x1cc   : > { %v11154_v16 = vld [vmem:[%s11454_s28 + $0x13e4] sm:$0xf0] }
 0x1cd   : > { %v8922_v22 = vld [vmem:[%s11454_s28 + $0xd88] sm:$0xf]  ;;  %v9723_v31 = vor.u32 %v11154_v16, %v9722_v15  ;;  %5786 = vmatpush.bf16.msra.mxu2 %v9467_v21 }
 0x1ce   : > { %v10954_v23 = vld [vmem:[%s11454_s28 + $0xda4] sm:$0xf0] }
 0x1cf   : > { %v9178_v29 = vld [vmem:[%s11454_s28 + $0xf88] sm:$0xf]  ;;  %v8923_v40 = vor.u32 %v10954_v23, %v8922_v22  ;;  %5799 = vmatpush.bf16.msra.mxu3 %v9723_v31 }
 0x1d0   : > { %v11018_v32 = vld [vmem:[%s11454_s28 + $0xfa4] sm:$0xf0] }
 0x1d1   : > { %v9434_v35 = vld [vmem:[%s11454_s28 + $0x1188] sm:$0xf]  ;;  %v9179_v44 = vor.u32 %v11018_v32, %v9178_v29  ;;  %5761 = vmatpush.bf16.msra.mxu0 %v8923_v40 }
 0x1d2   : > { %v11082_v36 = vld [vmem:[%s11454_s28 + $0x11a4] sm:$0xf0] }
 0x1d3   : > { %v9690_v37 = vld [vmem:[%s11454_s28 + $0x1388] sm:$0xf]  ;;  %v9435_v46 = vor.u32 %v11082_v36, %v9434_v35  ;;  %5774 = vmatpush.bf16.msra.mxu1 %v9179_v44 }
 0x1d4   : > { %v11146_v38 = vld [vmem:[%s11454_s28 + $0x13a4] sm:$0xf0] }
 0x1d5   : > { %v8890_v47 = vld [vmem:[%s11454_s28 + $0xd48] sm:$0xf]  ;;  %v9691_v50 = vor.u32 %v11146_v38, %v9690_v37  ;;  %5787 = vmatpush.bf16.msra.mxu2 %v9435_v46  ;;  %v5535_v37 = vpop.f32.mrf.mxu2  ;;  %v5548_v38 = vpop.f32.mrf.mxu3 }
 0x1d6   : > { %v10946_v48 = vld [vmem:[%s11454_s28 + $0xd64] sm:$0xf0]  ;;  %v5536_v46 = vadd.f32 %v5535_v37, %v5522_v11 }
 0x1d7   : > { %v9146_v49 = vld [vmem:[%s11454_s28 + $0xf48] sm:$0xf]  ;;  %v8891_v56 = vor.u32 %v10946_v48, %v8890_v47  ;;  %5800 = vmatpush.bf16.msra.mxu3 %v9691_v50  ;;  %v5511_v47 = vpop.f32.mrf.mxu0 }
 0x1d8   : > { %v11010_v51 = vld [vmem:[%s11454_s28 + $0xf64] sm:$0xf0] }
 0x1d9   : > { %v9402_v52 = vld [vmem:[%s11454_s28 + $0x1148] sm:$0xf]  ;;  %v9147_v57 = vor.u32 %v11010_v51, %v9146_v49  ;;  %5762 = vmatpush.bf16.msra.mxu0 %v8891_v56 }
 0x1da   : > { %v11074_v53 = vld [vmem:[%s11454_s28 + $0x1164] sm:$0xf0] }
 0x1db   : > { %v9658_v54 = vld [vmem:[%s11454_s28 + $0x1348] sm:$0xf]  ;;  %v9403_v58 = vor.u32 %v11074_v53, %v9402_v52  ;;  %5775 = vmatpush.bf16.msra.mxu1 %v9147_v57 }
 0x1dc   : > { %v11138_v55 = vld [vmem:[%s11454_s28 + $0x1364] sm:$0xf0] }
 0x1dd   : > { %v8858_v59 = vld [vmem:[%s11454_s28 + $0xd08] sm:$0xf]  ;;  %v9659_v62 = vor.u32 %v11138_v55, %v9658_v54  ;;  %5788 = vmatpush.bf16.msra.mxu2 %v9403_v58  ;;  %v12090_v54 = vadd.f32 %v5548_v38, %v5536_v46  ;;  %v5524_v55 = vpop.f32.mrf.mxu1  ;;  %v5550_v11 = vpop.f32.mrf.mxu3 }
 0x1de   : > { %v10938_v60 = vld [vmem:[%s11454_s28 + $0xd24] sm:$0xf0] }
 0x1df   : > { %v9114_v61 = vld [vmem:[%s11454_s28 + $0xf08] sm:$0xf]  ;;  %v8859_v7 = vor.u32 %v10938_v60, %v8858_v59  ;;  %5801 = vmatpush.bf16.msra.mxu3 %v9659_v62 }
 0x1e0   : > { %v11002_v63 = vld [vmem:[%s11454_s28 + $0xf24] sm:$0xf0] }
 0x1e1   : > { %v9370_v0 = vld [vmem:[%s11454_s28 + $0x1108] sm:$0xf]  ;;  %v9115_v6 = vor.u32 %v11002_v63, %v9114_v61  ;;  %5763 = vmatpush.bf16.msra.mxu0 %v8859_v7 }
 0x1e2   : > { %v11066_v1 = vld [vmem:[%s11454_s28 + $0x1124] sm:$0xf0] }
 0x1e3   : > { %v9626_v3 = vld [vmem:[%s11454_s28 + $0x1308] sm:$0xf]  ;;  %v9371_v8 = vor.u32 %v11066_v1, %v9370_v0  ;;  %5776 = vmatpush.bf16.msra.mxu1 %v9115_v6 }
 0x1e4   : > { %v11130_v4 = vld [vmem:[%s11454_s28 + $0x1324] sm:$0xf0] }
 0x1e5   : > { %v8826_v9 = vld [vmem:[%s11454_s28 + $0xcc8] sm:$0xf]  ;;  %v9627_v12 = vor.u32 %v11130_v4, %v9626_v3  ;;  %5789 = vmatpush.bf16.msra.mxu2 %v9371_v8 }
 0x1e6   : > { %v10930_v26 = vld [vmem:[%s11454_s28 + $0xce4] sm:$0xf0] }
 0x1e7   : > { %v9082_v10 = vld [vmem:[%s11454_s28 + $0xec8] sm:$0xf]  ;;  %v8827_v18 = vor.u32 %v10930_v26, %v8826_v9  ;;  %5802 = vmatpush.bf16.msra.mxu3 %v9627_v12 }
 0x1e8   : > { %v10994_v14 = vld [vmem:[%s11454_s28 + $0xee4] sm:$0xf0] }
 0x1e9   : > { %v9338_v15 = vld [vmem:[%s11454_s28 + $0x10c8] sm:$0xf]  ;;  %v9083_v19 = vor.u32 %v10994_v14, %v9082_v10  ;;  %5764 = vmatpush.bf16.msra.mxu0 %v8827_v18  ;;  %v5537_v10 = vpop.f32.mrf.mxu2 }
 0x1ea   : > { %v11058_v41 = vld [vmem:[%s11454_s28 + $0x10e4] sm:$0xf0]  ;;  %v7324_v10 = vld [vmem:[%s11454_s28 + $0x128] sm:$0xf0] }
 0x1eb   : > { %v9594_v16 = vld [vmem:[%s11454_s28 + $0x12c8] sm:$0xf]  ;;  %v9339_v21 = vor.u32 %v11058_v41, %v9338_v15  ;;  %5777 = vmatpush.bf16.msra.mxu1 %v9083_v19 }
 0x1ec   : > { %v11122_v17 = vld [vmem:[%s11454_s28 + $0x12e4] sm:$0xf0] }
 0x1ed   : > { %v8794_v22 = vld [vmem:[%s11454_s28 + $0xc88] sm:$0xf]  ;;  %v9595_v31 = vor.u32 %v11122_v17, %v9594_v16  ;;  %5790 = vmatpush.bf16.msra.mxu2 %v9339_v21 }
 0x1ee   : > { %v10922_v23 = vld [vmem:[%s11454_s28 + $0xca4] sm:$0xf0] }
 0x1ef   : > { %v9050_v29 = vld [vmem:[%s11454_s28 + $0xe88] sm:$0xf]  ;;  %v8795_v48 = vor.u32 %v10922_v23, %v8794_v22  ;;  %5803 = vmatpush.bf16.msra.mxu3 %v9595_v31  ;;  %v10574_v22 = vld [vmem:[%s11454_s28 + $0x1cc] sm:$0xf] }
 0x1f0   : > { %v10986_v32 = vld [vmem:[%s11454_s28 + $0xea4] sm:$0xf0]  ;;  %v7420_v23 = vld [vmem:[%s11454_s28 + $0x1e8] sm:$0xf0] }
 0x1f1   : > { %v9306_v35 = vld [vmem:[%s11454_s28 + $0x1088] sm:$0xf]  ;;  %v9051_v49 = vor.u32 %v10986_v32, %v9050_v29  ;;  %5765 = vmatpush.bf16.msra.mxu0 %v8795_v48  ;;  %v10566_v48 = vld [vmem:[%s11454_s28 + $0x18c] sm:$0xf] }
 0x1f2   : > { %v11050_v36 = vld [vmem:[%s11454_s28 + $0x10a4] sm:$0xf0] }
 0x1f3   : > { %v9562_v40 = vld [vmem:[%s11454_s28 + $0x1288] sm:$0xf]  ;;  %v9307_v50 = vor.u32 %v11050_v36, %v9306_v35  ;;  %5778 = vmatpush.bf16.msra.mxu1 %v9051_v49  ;;  %v7388_v49 = vld [vmem:[%s11454_s28 + $0x1a8] sm:$0xf0] }
 0x1f4   : > { %v11114_v44 = vld [vmem:[%s11454_s28 + $0x12a4] sm:$0xf0] }
 0x1f5   : > { %v8762_v51 = vld [vmem:[%s11454_s28 + $0xc48] sm:$0xf]  ;;  %v9563_v56 = vor.u32 %v11114_v44, %v9562_v40  ;;  %5791 = vmatpush.bf16.msra.mxu2 %v9307_v50  ;;  %v7423_v40 = vor.u32 %v10574_v22, %v7420_v23 }
 0x1f6   : > { %v10914_v52 = vld [vmem:[%s11454_s28 + $0xc64] sm:$0xf0] }
 0x1f7   : > { %v9018_v53 = vld [vmem:[%s11454_s28 + $0xe48] sm:$0xf]  ;;  %v8763_v62 = vor.u32 %v10914_v52, %v8762_v51  ;;  %5804 = vmatpush.bf16.msra.mxu3 %v9563_v56 }
 0x1f8   : > { %v10978_v57 = vld [vmem:[%s11454_s28 + $0xe64] sm:$0xf0] }
 0x1f9   : > { %v9274_v58 = vld [vmem:[%s11454_s28 + $0x1048] sm:$0xf]  ;;  %v9019_v1 = vor.u32 %v10978_v57, %v9018_v53  ;;  %5766 = vmatpush.bf16.msra.mxu0 %v8763_v62  ;;  %v7391_v57 = vor.u32 %v10566_v48, %v7388_v49  ;;  %v7356_v62 = vld [vmem:[%s11454_s28 + $0x168] sm:$0xf0] }
 0x1fa   : > { %v11042_v59 = vld [vmem:[%s11454_s28 + $0x1064] sm:$0xf0] }
 0x1fb   : > { %v9530_v60 = vld [vmem:[%s11454_s28 + $0x1248] sm:$0xf]  ;;  %v9275_v2 = vor.u32 %v11042_v59, %v9274_v58  ;;  %5779 = vmatpush.bf16.msra.mxu1 %v9019_v1 }
 0x1fc   : > { %v11106_v61 = vld [vmem:[%s11454_s28 + $0x1264] sm:$0xf0] }
 0x1fd   : > { %v8730_v63 = vld [vmem:[%s11454_s28 + $0xc08] sm:$0xf]  ;;  %v9531_v6 = vor.u32 %v11106_v61, %v9530_v60  ;;  %5792 = vmatpush.bf16.msra.mxu2 %v9275_v2  ;;  %v10558_v61 = vld [vmem:[%s11454_s28 + $0x14c] sm:$0xf] }
 0x1fe   : > { %v10906_v0 = vld [vmem:[%s11454_s28 + $0xc24] sm:$0xf0] }
 0x1ff   : > { %v8986_v3 = vld [vmem:[%s11454_s28 + $0xe08] sm:$0xf]  ;;  %v8731_v41 = vor.u32 %v10906_v0, %v8730_v63  ;;  %5805 = vmatpush.bf16.msra.mxu3 %v9531_v6 }
 0x200   : > { %v10970_v4 = vld [vmem:[%s11454_s28 + $0xe24] sm:$0xf0] }
 0x201   : > { %v9242_v7 = vld [vmem:[%s11454_s28 + $0x1008] sm:$0xf]  ;;  %v8987_v19 = vor.u32 %v10970_v4, %v8986_v3  ;;  %5767 = vmatpush.bf16.msra.mxu0 %v8731_v41 }
 0x202   : > { %v11034_v8 = vld [vmem:[%s11454_s28 + $0x1024] sm:$0xf0] }
 0x203   : > { %v9498_v9 = vld [vmem:[%s11454_s28 + $0x1208] sm:$0xf]  ;;  %v9243_v21 = vor.u32 %v11034_v8, %v9242_v7  ;;  %5780 = vmatpush.bf16.msra.mxu1 %v8987_v19  ;;  %v7359_v7 = vor.u32 %v10558_v61, %v7356_v62  ;;  %v5574_v19 = vpop.f32.mrf.mxu1 }
 0x204   : > { %v11098_v26 = vld [vmem:[%s11454_s28 + $0x1224] sm:$0xf0]  ;;  %5768 = vmatmul.bf16.vlgmr.msra.gmra.mxu0 %v11615_v39 }
 0x205   : > { %v9978_v12 = vld [vmem:[%s11454_s28 + $0x15c8] sm:$0xf]  ;;  %v9499_v29 = vor.u32 %v11098_v26, %v9498_v9  ;;  %5793 = vmatpush.bf16.msra.mxu2 %v9243_v21  ;;  %v10550_v26 = vld [vmem:[%s11454_s28 + $0x10c] sm:$0xf] }
 0x206   : > { %v11218_v14 = vld [vmem:[%s11454_s28 + $0x15e4] sm:$0xf0]  ;;  %5781 = vmatmul.bf16.vlgmr.msra.gmra.mxu1 %v11621_v43  ;;  %v7327_v21 = vor.u32 %v10550_v26, %v7324_v10 }
 0x207   : > { %v10234_v15 = vld [vmem:[%s11454_s28 + $0x17c8] sm:$0xf]  ;;  %v9979_v31 = vor.u32 %v11218_v14, %v9978_v12  ;;  %5806 = vmatpush.bf16.msra.mxu3 %v9499_v29  ;;  %v5561_v12 = vpop.f32.mrf.mxu0 }
 0x208   : > { %v11282_v16 = vld [vmem:[%s11454_s28 + $0x17e4] sm:$0xf0]  ;;  %5794 = vmatmul.bf16.vlgmr.msra.gmra.mxu2 %v11688_v20 }
 0x209   : > { %v10490_v17 = vld [vmem:[%s11454_s28 + $0x19c8] sm:$0xf]  ;;  %v10235_v32 = vor.u32 %v11282_v16, %v10234_v15  ;;  %5812 = vmatpush.bf16.msrb.mxu0 %v9979_v31  ;;  %v10542_v31 = vld [vmem:[%s11454_s28 + $0xcc] sm:$0xf] }
 0x20a   : > { %v11346_v18 = vld [vmem:[%s11454_s28 + $0x19e4] sm:$0xf0]  ;;  %5807 = vmatmul.bf16.vlgmr.msra.gmra.mxu3 %v11695_v25 }
 0x20b   : > { %v10491_v35 = vor.u32 %v11346_v18, %v10490_v17  ;;  %v9946_v36 = vld [vmem:[%s11454_s28 + $0x1588] sm:$0xf]  ;;  %5825 = vmatpush.bf16.msrb.mxu1 %v10235_v32  ;;  %5851 = vmatpush.bf16.msrb.mxu3 %v7423_v40  ;;  %v5562_v18 = vadd.f32 %v5561_v12, %v12090_v54  ;;  %v7292_v32 = vld [vmem:[%s11454_s28 + $0xe8] sm:$0xf0] }
 0x20c   : > { %v11210_v37 = vld [vmem:[%s11454_s28 + $0x15a4] sm:$0xf0] }
 0x20d   : > { %v10202_v38 = vld [vmem:[%s11454_s28 + $0x1788] sm:$0xf]  ;;  %v9947_v50 = vor.u32 %v11210_v37, %v9946_v36  ;;  %5838 = vmatpush.bf16.msrb.mxu2 %v10491_v35  ;;  %v5575_v35 = vadd.f32 %v5574_v19, %v5562_v18  ;;  %v10518_v18 = vld [vmem:[%s11454_s28 + $0xc] sm:$0xf] }
 0x20e   : > { %v11274_v44 = vld [vmem:[%s11454_s28 + $0x17a4] sm:$0xf0]  ;;  %v7196_v19 = vld [vmem:[%s11454_s28 + $0x28] sm:$0xf0] }
 0x20f   : > { %v10458_v46 = vld [vmem:[%s11454_s28 + $0x1988] sm:$0xf]  ;;  %v10203_v51 = vor.u32 %v11274_v44, %v10202_v38  ;;  %5813 = vmatpush.bf16.msrb.mxu0 %v9947_v50  ;;  %5852 = vmatpush.bf16.msrb.mxu3 %v7391_v57 }
 0x210   : > { %v11338_v47 = vld [vmem:[%s11454_s28 + $0x19a4] sm:$0xf0] }
 0x211   : > { %v10459_v52 = vor.u32 %v11338_v47, %v10458_v46  ;;  %v9914_v53 = vld [vmem:[%s11454_s28 + $0x1548] sm:$0xf]  ;;  %5826 = vmatpush.bf16.msrb.mxu1 %v10203_v51  ;;  %v5587_v46 = vpop.f32.mrf.mxu2  ;;  %v7295_v47 = vor.u32 %v10542_v31, %v7292_v32  ;;  %v7932_v32 = vld [vmem:[%s11454_s28 + $0x5e8] sm:$0xf0] }
 0x212   : > { %v11202_v55 = vld [vmem:[%s11454_s28 + $0x1564] sm:$0xf0]  ;;  %v5588_v51 = vadd.f32 %v5587_v46, %v5575_v35  ;;  %v10766_v35 = vld [vmem:[%s11454_s28 + $0x7cc] sm:$0xf] }
 0x213   : > { %v10170_v56 = vld [vmem:[%s11454_s28 + $0x1748] sm:$0xf]  ;;  %v9915_v63 = vor.u32 %v11202_v55, %v9914_v53  ;;  %5839 = vmatpush.bf16.msrb.mxu2 %v10459_v52  ;;  %5853 = vmatpush.bf16.msrb.mxu3 %v7359_v7  ;;  %v5600_v52 = vpop.f32.mrf.mxu3  ;;  %v10534_v53 = vld [vmem:[%s11454_s28 + $0x8c] sm:$0xf] }
 0x214   : > { %v11266_v58 = vld [vmem:[%s11454_s28 + $0x1764] sm:$0xf0]  ;;  %v7260_v55 = vld [vmem:[%s11454_s28 + $0xa8] sm:$0xf0]  ;;  %v12158_v57 = vadd.f32 %v5600_v52, %v5588_v51 }
 0x215   : > { %v10426_v59 = vld [vmem:[%s11454_s28 + $0x1948] sm:$0xf]  ;;  %v10171_v0 = vor.u32 %v11266_v58, %v10170_v56  ;;  %5814 = vmatpush.bf16.msrb.mxu0 %v9915_v63  ;;  %v5563_v58 = vpop.f32.mrf.mxu0  ;;  %v10526_v7 = vld [vmem:[%s11454_s28 + $0x4c] sm:$0xf] }
 0x216   : > { %v11330_v60 = vld [vmem:[%s11454_s28 + $0x1964] sm:$0xf0]  ;;  %v10694_v51 = vld [vmem:[%s11454_s28 + $0x58c] sm:$0xf] }
 0x217   : > { %v10427_v1 = vor.u32 %v11330_v60, %v10426_v59  ;;  %v9882_v2 = vld [vmem:[%s11454_s28 + $0x1508] sm:$0xf]  ;;  %5827 = vmatpush.bf16.msrb.mxu1 %v10171_v0  ;;  %5854 = vmatpush.bf16.msrb.mxu3 %v7327_v21  ;;  %v5576_v0 = vpop.f32.mrf.mxu1  ;;  %v10822_v58 = vld [vmem:[%s11454_s28 + $0x98c] sm:$0xf] }
 0x218   : > { %v11194_v3 = vld [vmem:[%s11454_s28 + $0x1524] sm:$0xf0]  ;;  %v7612_v0 = vld [vmem:[%s11454_s28 + $0x368] sm:$0xf0] }
 0x219   : > { %v10138_v4 = vld [vmem:[%s11454_s28 + $0x1708] sm:$0xf]  ;;  %v9883_v11 = vor.u32 %v11194_v3, %v9882_v2  ;;  %5840 = vmatpush.bf16.msrb.mxu2 %v10427_v1  ;;  %v7263_v1 = vor.u32 %v10534_v53, %v7260_v55  ;;  %v7900_v53 = vld [vmem:[%s11454_s28 + $0x5a8] sm:$0xf0] }
 0x21a   : > { %v11258_v6 = vld [vmem:[%s11454_s28 + $0x1724] sm:$0xf0]  ;;  %v10758_v55 = vld [vmem:[%s11454_s28 + $0x78c] sm:$0xf] }
 0x21b   : > { %v10394_v8 = vld [vmem:[%s11454_s28 + $0x1908] sm:$0xf]  ;;  %v10139_v14 = vor.u32 %v11258_v6, %v10138_v4  ;;  %5815 = vmatpush.bf16.msrb.mxu0 %v9883_v11  ;;  %5855 = vmatpush.bf16.msrb.mxu3 %v7295_v47  ;;  %v7228_v6 = vld [vmem:[%s11454_s28 + $0x68] sm:$0xf0]  ;;  %v5602_v21 = vpop.f32.mrf.mxu3 }
 0x21c   : > { %v11322_v9 = vld [vmem:[%s11454_s28 + $0x1924] sm:$0xf0]  ;;  %v8348_v21 = vld [vmem:[%s11454_s28 + $0x928] sm:$0xf0] }
 0x21d   : > { %v10395_v15 = vor.u32 %v11322_v9, %v10394_v8  ;;  %v9850_v41 = vld [vmem:[%s11454_s28 + $0x14c8] sm:$0xf]  ;;  %5828 = vmatpush.bf16.msrb.mxu1 %v10139_v14 }
 0x21e   : > { %v11186_v16 = vld [vmem:[%s11454_s28 + $0x14e4] sm:$0xf0] }
 0x21f   : > { %v10106_v17 = vld [vmem:[%s11454_s28 + $0x16c8] sm:$0xf]  ;;  %v9851_v36 = vor.u32 %v11186_v16, %v9850_v41  ;;  %5841 = vmatpush.bf16.msrb.mxu2 %v10395_v15  ;;  %v5589_v41 = vpop.f32.mrf.mxu2  ;;  %5856 = vmatpush.bf16.msrb.mxu3 %v7263_v1  ;;  %v7231_v16 = vor.u32 %v10526_v7, %v7228_v6  ;;  %v10686_v1 = vld [vmem:[%s11454_s28 + $0x54c] sm:$0xf] }
 0x220   : > { %v11250_v22 = vld [vmem:[%s11454_s28 + $0x16e4] sm:$0xf0]  ;;  %v8124_v7 = vld [vmem:[%s11454_s28 + $0x768] sm:$0xf0] }
 0x221   : > { %v10362_v23 = vld [vmem:[%s11454_s28 + $0x18c8] sm:$0xf]  ;;  %v10107_v54 = vor.u32 %v11250_v22, %v10106_v17  ;;  %5816 = vmatpush.bf16.msrb.mxu0 %v9851_v36  ;;  %v10638_v22 = vld [vmem:[%s11454_s28 + $0x3cc] sm:$0xf] }
 0x222   : > { %v11314_v29 = vld [vmem:[%s11454_s28 + $0x18e4] sm:$0xf0]  ;;  %v8188_v36 = vld [vmem:[%s11454_s28 + $0x7e8] sm:$0xf0] }
 0x223   : > { %v10363_v37 = vor.u32 %v11314_v29, %v10362_v23  ;;  %v9818_v38 = vld [vmem:[%s11454_s28 + $0x1488] sm:$0xf]  ;;  %5829 = vmatpush.bf16.msrb.mxu1 %v10107_v54  ;;  %v7676_v23 = vld [vmem:[%s11454_s28 + $0x3e8] sm:$0xf0]  ;;  %5857 = vmatpush.bf16.msrb.mxu3 %v7231_v16 }
 0x224   : > { %v11178_v40 = vld [vmem:[%s11454_s28 + $0x14a4] sm:$0xf0]  ;;  %v10702_v29 = vld [vmem:[%s11454_s28 + $0x5cc] sm:$0xf]  ;;  %v7679_v46 = vor.u32 %v10638_v22, %v7676_v23 }
 0x225   : > { %v10074_v44 = vld [vmem:[%s11454_s28 + $0x1688] sm:$0xf]  ;;  %v9819_v56 = vor.u32 %v11178_v40, %v9818_v38  ;;  %5842 = vmatpush.bf16.msrb.mxu2 %v10363_v37  ;;  %v10830_v38 = vld [vmem:[%s11454_s28 + $0x9cc] sm:$0xf]  ;;  %v7935_v47 = vor.u32 %v10702_v29, %v7932_v32  ;;  %v5626_v29 = vpop.f32.mrf.mxu1 }
 0x226   : > { %v11242_v48 = vld [vmem:[%s11454_s28 + $0x16a4] sm:$0xf0]  ;;  %v8444_v40 = vld [vmem:[%s11454_s28 + $0x9e8] sm:$0xf0] }
 0x227   : > { %v10330_v49 = vld [vmem:[%s11454_s28 + $0x1888] sm:$0xf]  ;;  %v10075_v59 = vor.u32 %v11242_v48, %v10074_v44  ;;  %5817 = vmatpush.bf16.msrb.mxu0 %v9819_v56  ;;  %v7199_v44 = vor.u32 %v10518_v18, %v7196_v19  ;;  %v8191_v48 = vor.u32 %v10766_v35, %v8188_v36  ;;  %v8447_v52 = vor.u32 %v10830_v38, %v8444_v40  ;;  %v8156_v56 = vld [vmem:[%s11454_s28 + $0x7a8] sm:$0xf0]  ;;  %v5613_v18 = vpop.f32.mrf.mxu0 }
 0x228   : > { %v11306_v50 = vld [vmem:[%s11454_s28 + $0x18a4] sm:$0xf0]  ;;  %v10814_v6 = vld [vmem:[%s11454_s28 + $0x94c] sm:$0xf]  ;;  %v5614_v22 = vadd.f32 %v5613_v18, %v12158_v57 }
 0x229   : > { %v10331_v60 = vor.u32 %v11306_v50, %v10330_v49  ;;  %v9786_v61 = vld [vmem:[%s11454_s28 + $0x1448] sm:$0xf]  ;;  %5830 = vmatpush.bf16.msrb.mxu1 %v10075_v59  ;;  %v10630_v49 = vld [vmem:[%s11454_s28 + $0x38c] sm:$0xf]  ;;  %5858 = vmatpush.bf16.msrb.mxu3 %v7199_v44 }
 0x22a   : > { %v11170_v62 = vld [vmem:[%s11454_s28 + $0x1464] sm:$0xf0]  ;;  %v7644_v50 = vld [vmem:[%s11454_s28 + $0x3a8] sm:$0xf0]  ;;  %v5627_v38 = vadd.f32 %v5626_v29, %v5614_v22 }
 0x22b   : > { %v10042_v63 = vld [vmem:[%s11454_s28 + $0x1648] sm:$0xf]  ;;  %v9787_v8 = vor.u32 %v11170_v62, %v9786_v61  ;;  %5843 = vmatpush.bf16.msrb.mxu2 %v10331_v60  ;;  %v8412_v59 = vld [vmem:[%s11454_s28 + $0x9a8] sm:$0xf0]  ;;  %v7647_v60 = vor.u32 %v10630_v49, %v7644_v50  ;;  %v7903_v61 = vor.u32 %v10694_v51, %v7900_v53  ;;  %v8159_v62 = vor.u32 %v10758_v55, %v8156_v56  ;;  %v5639_v56 = vpop.f32.mrf.mxu2 }
 0x22c   : > { %v11234_v2 = vld [vmem:[%s11454_s28 + $0x1664] sm:$0xf0]  ;;  %5859 = vmatmul.bf16.vlgmr.msrb.gmra.mxu3 %v11563_v28  ;;  %v7836_v41 = vld [vmem:[%s11454_s28 + $0x528] sm:$0xf0] }
 0x22d   : > { %v10298_v3 = vld [vmem:[%s11454_s28 + $0x1848] sm:$0xf]  ;;  %v10043_v10 = vor.u32 %v11234_v2, %v10042_v63  ;;  %5818 = vmatpush.bf16.msrb.mxu0 %v9787_v8  ;;  %v10622_v63 = vld [vmem:[%s11454_s28 + $0x34c] sm:$0xf]  ;;  %5903 = vmatpush.bf16.msra.mxu3 %v8447_v52  ;;  %v8415_v2 = vor.u32 %v10822_v58, %v8412_v59 }
 0x22e   : > { %v11298_v4 = vld [vmem:[%s11454_s28 + $0x1864] sm:$0xf0]  ;;  %v8380_v8 = vld [vmem:[%s11454_s28 + $0x968] sm:$0xf0] }
 0x22f   : > { %v9754_v9 = vld [vmem:[%s11454_s28 + $0x1408] sm:$0xf]  ;;  %v10299_v11 = vor.u32 %v11298_v4, %v10298_v3  ;;  %5831 = vmatpush.bf16.msrb.mxu1 %v10043_v10  ;;  %v7868_v3 = vld [vmem:[%s11454_s28 + $0x568] sm:$0xf0] }
 0x230   : > { %v11162_v26 = vld [vmem:[%s11454_s28 + $0x1424] sm:$0xf0]  ;;  %v10750_v4 = vld [vmem:[%s11454_s28 + $0x74c] sm:$0xf] }
 0x231   : > { %v10010_v12 = vld [vmem:[%s11454_s28 + $0x1608] sm:$0xf]  ;;  %v9755_v31 = vor.u32 %v11162_v26, %v9754_v9  ;;  %5844 = vmatpush.bf16.msrb.mxu2 %v10299_v11  ;;  %v7615_v9 = vor.u32 %v10622_v63, %v7612_v0  ;;  %v7871_v26 = vor.u32 %v10686_v1, %v7868_v3  ;;  %v8127_v10 = vor.u32 %v10750_v4, %v8124_v7  ;;  %v10614_v11 = vld [vmem:[%s11454_s28 + $0x30c] sm:$0xf]  ;;  %v5615_v1 = vpop.f32.mrf.mxu0  ;;  %v5628_v3 = vpop.f32.mrf.mxu1 }
 0x232   : > { %v11226_v14 = vld [vmem:[%s11454_s28 + $0x1624] sm:$0xf0]  ;;  %5904 = vmatpush.bf16.msra.mxu3 %v8415_v2  ;;  %v10742_v16 = vld [vmem:[%s11454_s28 + $0x70c] sm:$0xf] }
 0x233   : > { %v10266_v15 = vld [vmem:[%s11454_s28 + $0x1808] sm:$0xf]  ;;  %v10011_v54 = vor.u32 %v11226_v14, %v10010_v12  ;;  %5819 = vmatpush.bf16.msrb.mxu0 %v9755_v31  ;;  %v7580_v12 = vld [vmem:[%s11454_s28 + $0x328] sm:$0xf0] }
 0x234   : > { %v11290_v17 = vld [vmem:[%s11454_s28 + $0x1824] sm:$0xf0]  ;;  %v10678_v14 = vld [vmem:[%s11454_s28 + $0x50c] sm:$0xf]  ;;  %v7583_v23 = vor.u32 %v10614_v11, %v7580_v12 }
 0x235   : > { %v10267_v37 = vor.u32 %v11290_v17, %v10266_v15  ;;  %5832 = vmatpush.bf16.msrb.mxu1 %v10011_v54  ;;  %v8383_v15 = vor.u32 %v10814_v6, %v8380_v8  ;;  %v8092_v17 = vld [vmem:[%s11454_s28 + $0x728] sm:$0xf0]  ;;  %v7839_v31 = vor.u32 %v10678_v14, %v7836_v41 }
 0x236   : > { %5820 = vmatmul.bf16.vlgmr.msrb.gmra.mxu0 %v11693_v24  ;;  %v10806_v19 = vld [vmem:[%s11454_s28 + $0x90c] sm:$0xf]  ;;  %v8095_v32 = vor.u32 %v10742_v16, %v8092_v17 }
 0x237   : > { %5845 = vmatpush.bf16.msrb.mxu2 %v10267_v37  ;;  %5864 = vmatpush.bf16.msra.mxu0 %v7679_v46  ;;  %v10606_v35 = vld [vmem:[%s11454_s28 + $0x2cc] sm:$0xf]  ;;  %v8351_v37 = vor.u32 %v10806_v19, %v8348_v21 }
 0x238   : > { %5833 = vmatmul.bf16.vlgmr.msrb.gmra.mxu1 %v11699_v30  ;;  %v7548_v36 = vld [vmem:[%s11454_s28 + $0x2e8] sm:$0xf0]  ;;  %5905 = vmatpush.bf16.msra.mxu3 %v8383_v15 }
 0x239   : > { %5877 = vmatpush.bf16.msra.mxu1 %v7935_v47  ;;  %v10670_v54 = vld [vmem:[%s11454_s28 + $0x4cc] sm:$0xf] }
 0x23a   : > { %5846 = vmatmul.bf16.vlgmr.msrb.gmra.mxu2 %v11764_v13  ;;  %v7804_v40 = vld [vmem:[%s11454_s28 + $0x4e8] sm:$0xf0] }
 0x23b   : > { %5890 = vmatpush.bf16.msra.mxu2 %v8191_v48  ;;  %5865 = vmatpush.bf16.msra.mxu0 %v7647_v60  ;;  %v10734_v44 = vld [vmem:[%s11454_s28 + $0x6cc] sm:$0xf]  ;;  %v7551_v48 = vor.u32 %v10606_v35, %v7548_v36  ;;  %v7807_v49 = vor.u32 %v10670_v54, %v7804_v40  ;;  %v5641_v54 = vpop.f32.mrf.mxu2 }
 0x23c   : > { %v8060_v57 = vld [vmem:[%s11454_s28 + $0x6e8] sm:$0xf0]  ;;  %5906 = vmatpush.bf16.msra.mxu3 %v8351_v37 }
 0x23d   : > { %5878 = vmatpush.bf16.msra.mxu1 %v7903_v61  ;;  %v10798_v46 = vld [vmem:[%s11454_s28 + $0x8cc] sm:$0xf]  ;;  %v8063_v50 = vor.u32 %v10734_v44, %v8060_v57  ;;  %v5640_v61 = vadd.f32 %v5639_v56, %v5627_v38 }
 0x23e   : > { %v8316_v47 = vld [vmem:[%s11454_s28 + $0x8e8] sm:$0xf0] }
 0x23f   : > { %5891 = vmatpush.bf16.msra.mxu2 %v8159_v62  ;;  %5866 = vmatpush.bf16.msra.mxu0 %v7615_v9  ;;  %v10598_v51 = vld [vmem:[%s11454_s28 + $0x28c] sm:$0xf]  ;;  %v8319_v55 = vor.u32 %v10798_v46, %v8316_v47  ;;  %v5652_v62 = vpop.f32.mrf.mxu3 }
 0x240   : > { %v7516_v52 = vld [vmem:[%s11454_s28 + $0x2a8] sm:$0xf0]  ;;  %v12229_v4 = vadd.f32 %v5652_v62, %v5640_v61 }
 0x241   : > { %5879 = vmatpush.bf16.msra.mxu1 %v7871_v26  ;;  %v10662_v53 = vld [vmem:[%s11454_s28 + $0x48c] sm:$0xf]  ;;  %v7519_v2 = vor.u32 %v10598_v51, %v7516_v52  ;;  %5907 = vmatpush.bf16.msra.mxu3 %v8319_v55 }
 0x242   : > { %v7772_v58 = vld [vmem:[%s11454_s28 + $0x4a8] sm:$0xf0] }
 0x243   : > { %5892 = vmatpush.bf16.msra.mxu2 %v8127_v10  ;;  %5867 = vmatpush.bf16.msra.mxu0 %v7583_v23  ;;  %v10726_v59 = vld [vmem:[%s11454_s28 + $0x68c] sm:$0xf]  ;;  %v7775_v7 = vor.u32 %v10662_v53, %v7772_v58 }
 0x244   : > { %v8028_v60 = vld [vmem:[%s11454_s28 + $0x6a8] sm:$0xf0] }
 0x245   : > { %5880 = vmatpush.bf16.msra.mxu1 %v7839_v31  ;;  %v10790_v63 = vld [vmem:[%s11454_s28 + $0x88c] sm:$0xf]  ;;  %v8031_v6 = vor.u32 %v10726_v59, %v8028_v60 }
 0x246   : > { %v8284_v0 = vld [vmem:[%s11454_s28 + $0x8a8] sm:$0xf0] }
 0x247   : > { %5893 = vmatpush.bf16.msra.mxu2 %v8095_v32  ;;  %5868 = vmatpush.bf16.msra.mxu0 %v7551_v48  ;;  %v10590_v8 = vld [vmem:[%s11454_s28 + $0x24c] sm:$0xf]  ;;  %v8287_v10 = vor.u32 %v10790_v63, %v8284_v0  ;;  %v5654_v44 = vpop.f32.mrf.mxu3 }
 0x248   : > { %v7484_v9 = vld [vmem:[%s11454_s28 + $0x268] sm:$0xf0]  ;;  %v5678_v44 = vpop.f32.mrf.mxu1 }
 0x249   : > { %5881 = vmatpush.bf16.msra.mxu1 %v7807_v49  ;;  %v10654_v26 = vld [vmem:[%s11454_s28 + $0x44c] sm:$0xf]  ;;  %v7487_v16 = vor.u32 %v10590_v8, %v7484_v9  ;;  %5908 = vmatpush.bf16.msra.mxu3 %v8287_v10 }
 0x24a   : > { %v7740_v11 = vld [vmem:[%s11454_s28 + $0x468] sm:$0xf0] }
 0x24b   : > { %5894 = vmatpush.bf16.msra.mxu2 %v8063_v50  ;;  %v10718_v12 = vld [vmem:[%s11454_s28 + $0x64c] sm:$0xf]  ;;  %5869 = vmatpush.bf16.msra.mxu0 %v7519_v2  ;;  %v7743_v19 = vor.u32 %v10654_v26, %v7740_v11 }
 0x24c   : > { %v7996_v14 = vld [vmem:[%s11454_s28 + $0x668] sm:$0xf0] }
 0x24d   : > { %v10782_v15 = vld [vmem:[%s11454_s28 + $0x84c] sm:$0xf]  ;;  %5882 = vmatpush.bf16.msra.mxu1 %v7775_v7  ;;  %v7999_v21 = vor.u32 %v10718_v12, %v7996_v14 }
 0x24e   : > { %v8252_v41 = vld [vmem:[%s11454_s28 + $0x868] sm:$0xf0] }
 0x24f   : > { %v10582_v17 = vld [vmem:[%s11454_s28 + $0x20c] sm:$0xf]  ;;  %5895 = vmatpush.bf16.msra.mxu2 %v8031_v6  ;;  %v8255_v31 = vor.u32 %v10782_v15, %v8252_v41  ;;  %5870 = vmatpush.bf16.msra.mxu0 %v7487_v16 }
 0x250   : > { %v7452_v18 = vld [vmem:[%s11454_s28 + $0x228] sm:$0xf0] }
 0x251   : > { %v10646_v22 = vld [vmem:[%s11454_s28 + $0x40c] sm:$0xf]  ;;  %v7455_v57 = vor.u32 %v10582_v17, %v7452_v18  ;;  %5883 = vmatpush.bf16.msra.mxu1 %v7743_v19  ;;  %5909 = vmatpush.bf16.msra.mxu3 %v8255_v31 }
 0x252   : > { %v7708_v23 = vld [vmem:[%s11454_s28 + $0x428] sm:$0xf0] }
 0x253   : > { %v10710_v29 = vld [vmem:[%s11454_s28 + $0x60c] sm:$0xf]  ;;  %5896 = vmatpush.bf16.msra.mxu2 %v7999_v21  ;;  %v7711_v49 = vor.u32 %v10646_v22, %v7708_v23  ;;  %5871 = vmatpush.bf16.msra.mxu0 %v7455_v57 }
 0x254   : > { %v7964_v32 = vld [vmem:[%s11454_s28 + $0x628] sm:$0xf0] }
 0x255   : > { %v10774_v35 = vld [vmem:[%s11454_s28 + $0x80c] sm:$0xf]  ;;  %v7967_v50 = vor.u32 %v10710_v29, %v7964_v32  ;;  %5884 = vmatpush.bf16.msra.mxu1 %v7711_v49 }
 0x256   : > { %v8220_v36 = vld [vmem:[%s11454_s28 + $0x828] sm:$0xf0]  ;;  %5872 = vmatmul.bf16.vlgmr.msra.gmra.mxu0 %v11569_v34 }
 0x257   : > { %v10894_v37 = vld [vmem:[%s11454_s28 + $0xbcc] sm:$0xf]  ;;  %v8223_v53 = vor.u32 %v10774_v35, %v8220_v36  ;;  %5897 = vmatpush.bf16.msra.mxu2 %v7967_v50  ;;  %v5665_v36 = vpop.f32.mrf.mxu0 }
 0x258   : > { %v8700_v38 = vld [vmem:[%s11454_s28 + $0xbe8] sm:$0xf0]  ;;  %5885 = vmatmul.bf16.vlgmr.msra.gmra.mxu1 %v11561_v27 }
 0x259   : > { %v10958_v40 = vld [vmem:[%s11454_s28 + $0xdcc] sm:$0xf]  ;;  %v8703_v55 = vor.u32 %v10894_v37, %v8700_v38  ;;  %5910 = vmatpush.bf16.msra.mxu3 %v8223_v53  ;;  %v5666_v38 = vadd.f32 %v5665_v36, %v12229_v4 }
 0x25a   : > { %v8956_v46 = vld [vmem:[%s11454_s28 + $0xde8] sm:$0xf0]  ;;  %5898 = vmatmul.bf16.vlgmr.msra.gmra.mxu2 %v11567_v33 }
 0x25b   : > { %v11022_v47 = vld [vmem:[%s11454_s28 + $0xfcc] sm:$0xf]  ;;  %v8959_v56 = vor.u32 %v10958_v40, %v8956_v46  ;;  %5916 = vmatpush.bf16.msrb.mxu0 %v8703_v55 }
 0x25c   : > { %v9212_v48 = vld [vmem:[%s11454_s28 + $0xfe8] sm:$0xf0]  ;;  %5911 = vmatmul.bf16.vlgmr.msra.gmra.mxu3 %v11619_v42 }
 0x25d   : > { %v11086_v51 = vld [vmem:[%s11454_s28 + $0x11cc] sm:$0xf]  ;;  %v9215_v58 = vor.u32 %v11022_v47, %v9212_v48  ;;  %5929 = vmatpush.bf16.msrb.mxu1 %v8959_v56 }
 0x25e   : > { %v9468_v52 = vld [vmem:[%s11454_s28 + $0x11e8] sm:$0xf0] }
 0x25f   : > { %v10886_v59 = vld [vmem:[%s11454_s28 + $0xb8c] sm:$0xf]  ;;  %v9471_v62 = vor.u32 %v11086_v51, %v9468_v52  ;;  %5942 = vmatpush.bf16.msrb.mxu2 %v9215_v58  ;;  %v5679_v51 = vadd.f32 %v5678_v44, %v5666_v38 }
 0x260   : > { %v8668_v60 = vld [vmem:[%s11454_s28 + $0xba8] sm:$0xf0] }
 0x261   : > { %v10950_v61 = vld [vmem:[%s11454_s28 + $0xd8c] sm:$0xf]  ;;  %v8671_v7 = vor.u32 %v10886_v59, %v8668_v60  ;;  %5955 = vmatpush.bf16.msrb.mxu3 %v9471_v62  ;;  %v6704_v58 = vrot.slane %v5679_v51, 6 }
 0x262   : > { %v8924_v63 = vld [vmem:[%s11454_s28 + $0xda8] sm:$0xf0] }
 0x263   : > { %v11014_v0 = vld [vmem:[%s11454_s28 + $0xf8c] sm:$0xf]  ;;  %v8927_v6 = vor.u32 %v10950_v61, %v8924_v63  ;;  %5917 = vmatpush.bf16.msrb.mxu0 %v8671_v7 }
 0x264   : > { %v9180_v1 = vld [vmem:[%s11454_s28 + $0xfa8] sm:$0xf0] }
 0x265   : > { %v11078_v2 = vld [vmem:[%s11454_s28 + $0x118c] sm:$0xf]  ;;  %v9183_v8 = vor.u32 %v11014_v0, %v9180_v1  ;;  %5930 = vmatpush.bf16.msrb.mxu1 %v8927_v6  ;;  %v12297_v1 = vsel %vm6710_vm0, %v12069_v5, %v6704_v58 }
 0x266   : > { %v9436_v3 = vld [vmem:[%s11454_s28 + $0x11a8] sm:$0xf0] }
 0x267   : > { %v10878_v9 = vld [vmem:[%s11454_s28 + $0xb4c] sm:$0xf]  ;;  %v9439_v11 = vor.u32 %v11078_v2, %v9436_v3  ;;  %5943 = vmatpush.bf16.msrb.mxu2 %v9183_v8  ;;  %v5691_v8 = vpop.f32.mrf.mxu2 }
 0x268   : > { %v8636_v26 = vld [vmem:[%s11454_s28 + $0xb68] sm:$0xf0] }
 0x269   : > { %v10942_v10 = vld [vmem:[%s11454_s28 + $0xd4c] sm:$0xf]  ;;  %v8639_v17 = vor.u32 %v10878_v9, %v8636_v26  ;;  %5956 = vmatpush.bf16.msrb.mxu3 %v9439_v11  ;;  %v5667_v11 = vpop.f32.mrf.mxu0 }
 0x26a   : > { %v8892_v12 = vld [vmem:[%s11454_s28 + $0xd68] sm:$0xf0] }
 0x26b   : > { %v11006_v14 = vld [vmem:[%s11454_s28 + $0xf4c] sm:$0xf]  ;;  %v8895_v18 = vor.u32 %v10942_v10, %v8892_v12  ;;  %5918 = vmatpush.bf16.msrb.mxu0 %v8639_v17  ;;  %v5704_v10 = vpop.f32.mrf.mxu3 }
 0x26c   : > { %v9148_v15 = vld [vmem:[%s11454_s28 + $0xf68] sm:$0xf0]  ;;  %v12304_v5 = vadd.f32 %v5704_v10, %v5691_v8 }
 0x26d   : > { %v11070_v41 = vld [vmem:[%s11454_s28 + $0x114c] sm:$0xf]  ;;  %v9151_v19 = vor.u32 %v11006_v14, %v9148_v15  ;;  %5931 = vmatpush.bf16.msrb.mxu1 %v8895_v18  ;;  %v5680_v14 = vpop.f32.mrf.mxu1 }
 0x26e   : > { %v9404_v16 = vld [vmem:[%s11454_s28 + $0x1168] sm:$0xf0] }
 0x26f   : > { %v10870_v21 = vld [vmem:[%s11454_s28 + $0xb0c] sm:$0xf]  ;;  %v9407_v29 = vor.u32 %v11070_v41, %v9404_v16  ;;  %5944 = vmatpush.bf16.msrb.mxu2 %v9151_v19 }
 0x270   : > { %v8604_v22 = vld [vmem:[%s11454_s28 + $0xb28] sm:$0xf0] }
 0x271   : > { %v10934_v23 = vld [vmem:[%s11454_s28 + $0xd0c] sm:$0xf]  ;;  %v8607_v40 = vor.u32 %v10870_v21, %v8604_v22  ;;  %5957 = vmatpush.bf16.msrb.mxu3 %v9407_v29 }
 0x272   : > { %v8860_v31 = vld [vmem:[%s11454_s28 + $0xd28] sm:$0xf0] }
 0x273   : > { %v10998_v32 = vld [vmem:[%s11454_s28 + $0xf0c] sm:$0xf]  ;;  %v8863_v57 = vor.u32 %v10934_v23, %v8860_v31  ;;  %5919 = vmatpush.bf16.msrb.mxu0 %v8607_v40 }
 0x274   : > { %v9116_v35 = vld [vmem:[%s11454_s28 + $0xf28] sm:$0xf0] }
 0x275   : > { %v11062_v54 = vld [vmem:[%s11454_s28 + $0x110c] sm:$0xf]  ;;  %v9119_v46 = vor.u32 %v10998_v32, %v9116_v35  ;;  %5932 = vmatpush.bf16.msrb.mxu1 %v8863_v57 }
 0x276   : > { %v9372_v37 = vld [vmem:[%s11454_s28 + $0x1128] sm:$0xf0] }
 0x277   : > { %v10862_v47 = vld [vmem:[%s11454_s28 + $0xacc] sm:$0xf]  ;;  %v9375_v50 = vor.u32 %v11062_v54, %v9372_v37  ;;  %5945 = vmatpush.bf16.msrb.mxu2 %v9119_v46 }
 0x278   : > { %v8572_v48 = vld [vmem:[%s11454_s28 + $0xae8] sm:$0xf0] }
 0x279   : > { %v10926_v49 = vld [vmem:[%s11454_s28 + $0xccc] sm:$0xf]  ;;  %v8575_v59 = vor.u32 %v10862_v47, %v8572_v48  ;;  %5958 = vmatpush.bf16.msrb.mxu3 %v9375_v50 }
 0x27a   : > { %v8828_v52 = vld [vmem:[%s11454_s28 + $0xce8] sm:$0xf0] }
 0x27b   : > { %v10990_v53 = vld [vmem:[%s11454_s28 + $0xecc] sm:$0xf]  ;;  %v8831_v60 = vor.u32 %v10926_v49, %v8828_v52  ;;  %5920 = vmatpush.bf16.msrb.mxu0 %v8575_v59  ;;  %v5693_v49 = vpop.f32.mrf.mxu2 }
 0x27c   : > { %v9084_v4 = vld [vmem:[%s11454_s28 + $0xee8] sm:$0xf0] }
 0x27d   : > { %v11054_v55 = vld [vmem:[%s11454_s28 + $0x10cc] sm:$0xf]  ;;  %v9087_v61 = vor.u32 %v10990_v53, %v9084_v4  ;;  %5933 = vmatpush.bf16.msrb.mxu1 %v8831_v60  ;;  %v5706_v53 = vpop.f32.mrf.mxu3 }
 0x27e   : > { %v9340_v56 = vld [vmem:[%s11454_s28 + $0x10e8] sm:$0xf0] }
 0x27f   : > { %v10854_v62 = vld [vmem:[%s11454_s28 + $0xa8c] sm:$0xf]  ;;  %v9343_v2 = vor.u32 %v11054_v55, %v9340_v56  ;;  %5946 = vmatpush.bf16.msrb.mxu2 %v9087_v61 }
 0x280   : > { %v8540_v63 = vld [vmem:[%s11454_s28 + $0xaa8] sm:$0xf0] }
 0x281   : > { %v10918_v0 = vld [vmem:[%s11454_s28 + $0xc8c] sm:$0xf]  ;;  %v8543_v12 = vor.u32 %v10854_v62, %v8540_v63  ;;  %5959 = vmatpush.bf16.msrb.mxu3 %v9343_v2 }
 0x282   : > { %v8796_v3 = vld [vmem:[%s11454_s28 + $0xca8] sm:$0xf0] }
 0x283   : > { %v10982_v7 = vld [vmem:[%s11454_s28 + $0xe8c] sm:$0xf]  ;;  %v8799_v15 = vor.u32 %v10918_v0, %v8796_v3  ;;  %5921 = vmatpush.bf16.msrb.mxu0 %v8543_v12 }
 0x284   : > { %v9052_v6 = vld [vmem:[%s11454_s28 + $0xea8] sm:$0xf0] }
 0x285   : > { %v11046_v9 = vld [vmem:[%s11454_s28 + $0x108c] sm:$0xf]  ;;  %v9055_v41 = vor.u32 %v10982_v7, %v9052_v6  ;;  %5934 = vmatpush.bf16.msrb.mxu1 %v8799_v15 }
 0x286   : > { %v9308_v26 = vld [vmem:[%s11454_s28 + $0x10a8] sm:$0xf0] }
 0x287   : > { %v10846_v16 = vld [vmem:[%s11454_s28 + $0xa4c] sm:$0xf]  ;;  %v9311_v19 = vor.u32 %v11046_v9, %v9308_v26  ;;  %5947 = vmatpush.bf16.msrb.mxu2 %v9055_v41 }
 0x288   : > { %v8508_v17 = vld [vmem:[%s11454_s28 + $0xa68] sm:$0xf0] }
 0x289   : > { %v10910_v18 = vld [vmem:[%s11454_s28 + $0xc4c] sm:$0xf]  ;;  %v8511_v32 = vor.u32 %v10846_v16, %v8508_v17  ;;  %5960 = vmatpush.bf16.msrb.mxu3 %v9311_v19 }
 0x28a   : > { %v8764_v21 = vld [vmem:[%s11454_s28 + $0xc68] sm:$0xf0] }
 0x28b   : > { %v10974_v22 = vld [vmem:[%s11454_s28 + $0xe4c] sm:$0xf]  ;;  %v8767_v54 = vor.u32 %v10910_v18, %v8764_v21  ;;  %5922 = vmatpush.bf16.msrb.mxu0 %v8511_v32 }
 0x28c   : > { %v9020_v23 = vld [vmem:[%s11454_s28 + $0xe68] sm:$0xf0] }
 0x28d   : > { %v11038_v29 = vld [vmem:[%s11454_s28 + $0x104c] sm:$0xf]  ;;  %v9023_v37 = vor.u32 %v10974_v22, %v9020_v23  ;;  %5935 = vmatpush.bf16.msrb.mxu1 %v8767_v54 }
 0x28e   : > { %v9276_v31 = vld [vmem:[%s11454_s28 + $0x1068] sm:$0xf0] }
 0x28f   : > { %v10838_v35 = vld [vmem:[%s11454_s28 + $0xa0c] sm:$0xf]  ;;  %v9279_v57 = vor.u32 %v11038_v29, %v9276_v31  ;;  %5948 = vmatpush.bf16.msrb.mxu2 %v9023_v37 }
 0x290   : > { %v8476_v36 = vld [vmem:[%s11454_s28 + $0xa28] sm:$0xf0] }
 0x291   : > { %v10902_v38 = vld [vmem:[%s11454_s28 + $0xc0c] sm:$0xf]  ;;  %v8479_v4 = vor.u32 %v10838_v35, %v8476_v36  ;;  %5961 = vmatpush.bf16.msrb.mxu3 %v9279_v57 }
 0x292   : > { %v8732_v40 = vld [vmem:[%s11454_s28 + $0xc28] sm:$0xf0] }
 0x293   : > { %v10966_v44 = vld [vmem:[%s11454_s28 + $0xe0c] sm:$0xf]  ;;  %v8735_v59 = vor.u32 %v10902_v38, %v8732_v40  ;;  %5923 = vmatpush.bf16.msrb.mxu0 %v8479_v4 }
 0x294   : > { %v8988_v46 = vld [vmem:[%s11454_s28 + $0xe28] sm:$0xf0] }
 0x295   : > { %v11030_v47 = vld [vmem:[%s11454_s28 + $0x100c] sm:$0xf]  ;;  %v8991_v60 = vor.u32 %v10966_v44, %v8988_v46  ;;  %5936 = vmatpush.bf16.msrb.mxu1 %v8735_v59  ;;  %v5730_v59 = vpop.f32.mrf.mxu1 }
 0x296   : > { %v9244_v48 = vld [vmem:[%s11454_s28 + $0x1028] sm:$0xf0]  ;;  %5924 = vmatmul.bf16.vlgmr.msrb.gmra.mxu0 %v11623_v45 }
 0x297   : > { %v11150_v50 = vld [vmem:[%s11454_s28 + $0x13cc] sm:$0xf]  ;;  %v9247_v63 = vor.u32 %v11030_v47, %v9244_v48  ;;  %5949 = vmatpush.bf16.msrb.mxu2 %v8991_v60 }
 0x298   : > { %v9724_v51 = vld [vmem:[%s11454_s28 + $0x13e8] sm:$0xf0]  ;;  %5937 = vmatmul.bf16.vlgmr.msrb.gmra.mxu1 %v11615_v39 }
 0x299   : > { %v11214_v52 = vld [vmem:[%s11454_s28 + $0x15cc] sm:$0xf]  ;;  %v9727_v0 = vor.u32 %v11150_v50, %v9724_v51  ;;  %5962 = vmatpush.bf16.msrb.mxu3 %v9247_v63  ;;  %v5717_v51 = vpop.f32.mrf.mxu0 }
 0x29a   : > { %v9980_v55 = vld [vmem:[%s11454_s28 + $0x15e8] sm:$0xf0]  ;;  %5950 = vmatmul.bf16.vlgmr.msrb.gmra.mxu2 %v11621_v43 }
 0x29b   : > { %v11278_v56 = vld [vmem:[%s11454_s28 + $0x17cc] sm:$0xf]  ;;  %v9983_v2 = vor.u32 %v11214_v52, %v9980_v55  ;;  %5968 = vmatpush.bf16.msra.mxu0 %v9727_v0 }
 0x29c   : > { %v10236_v58 = vld [vmem:[%s11454_s28 + $0x17e8] sm:$0xf0]  ;;  %5963 = vmatmul.bf16.vlgmr.msrb.gmra.mxu3 %v11688_v20 }
 0x29d   : > { %v11342_v61 = vld [vmem:[%s11454_s28 + $0x19cc] sm:$0xf]  ;;  %v10239_v3 = vor.u32 %v11278_v56, %v10236_v58  ;;  %5981 = vmatpush.bf16.msra.mxu1 %v9983_v2  ;;  %v5718_v58 = vadd.f32 %v5717_v51, %v12304_v5 }
 0x29e   : > { %v10492_v62 = vld [vmem:[%s11454_s28 + $0x19e8] sm:$0xf0] }
 0x29f   : > { %v11142_v7 = vld [vmem:[%s11454_s28 + $0x138c] sm:$0xf]  ;;  %v10495_v9 = vor.u32 %v11342_v61, %v10492_v62  ;;  %5994 = vmatpush.bf16.msra.mxu2 %v10239_v3  ;;  %v5731_v3 = vadd.f32 %v5730_v59, %v5718_v58 }
 0x2a0   : > { %v9692_v6 = vld [vmem:[%s11454_s28 + $0x13a8] sm:$0xf0] }
 0x2a1   : > { %v11206_v8 = vld [vmem:[%s11454_s28 + $0x158c] sm:$0xf]  ;;  %v9695_v15 = vor.u32 %v11142_v7, %v9692_v6  ;;  %6007 = vmatpush.bf16.msra.mxu3 %v10495_v9 }
 0x2a2   : > { %v9948_v26 = vld [vmem:[%s11454_s28 + $0x15a8] sm:$0xf0] }
 0x2a3   : > { %v11270_v10 = vld [vmem:[%s11454_s28 + $0x178c] sm:$0xf]  ;;  %v9951_v41 = vor.u32 %v11206_v8, %v9948_v26  ;;  %5969 = vmatpush.bf16.msra.mxu0 %v9695_v15 }
 0x2a4   : > { %v10204_v11 = vld [vmem:[%s11454_s28 + $0x17a8] sm:$0xf0] }
 0x2a5   : > { %v11334_v12 = vld [vmem:[%s11454_s28 + $0x198c] sm:$0xf]  ;;  %v10207_v16 = vor.u32 %v11270_v10, %v10204_v11  ;;  %5982 = vmatpush.bf16.msra.mxu1 %v9951_v41  ;;  %v5743_v10 = vpop.f32.mrf.mxu2 }
 0x2a6   : > { %v10460_v14 = vld [vmem:[%s11454_s28 + $0x19a8] sm:$0xf0]  ;;  %v5744_v41 = vadd.f32 %v5743_v10, %v5731_v3  ;;  %v7938_v3 = vld [vmem:[%s11454_s28 + $0x5d0] sm:$0xf] }
 0x2a7   : > { %v11134_v17 = vld [vmem:[%s11454_s28 + $0x134c] sm:$0xf]  ;;  %v10463_v21 = vor.u32 %v11334_v12, %v10460_v14  ;;  %5995 = vmatpush.bf16.msra.mxu2 %v10207_v16  ;;  %v5756_v16 = vpop.f32.mrf.mxu3 }
 0x2a8   : > { %v9660_v18 = vld [vmem:[%s11454_s28 + $0x1368] sm:$0xf0] }
 0x2a9   : > { %v11198_v19 = vld [vmem:[%s11454_s28 + $0x154c] sm:$0xf]  ;;  %v9663_v35 = vor.u32 %v11134_v17, %v9660_v18  ;;  %6008 = vmatpush.bf16.msra.mxu3 %v10463_v21  ;;  %v12375_v21 = vadd.f32 %v5756_v16, %v5744_v41  ;;  %v7650_v41 = vld [vmem:[%s11454_s28 + $0x390] sm:$0xf] }
 0x2aa   : > { %v9916_v22 = vld [vmem:[%s11454_s28 + $0x1568] sm:$0xf0] }
 0x2ab   : > { %v11262_v23 = vld [vmem:[%s11454_s28 + $0x174c] sm:$0xf]  ;;  %v9919_v36 = vor.u32 %v11198_v19, %v9916_v22  ;;  %5970 = vmatpush.bf16.msra.mxu0 %v9663_v35  ;;  %v5719_v22 = vpop.f32.mrf.mxu0 }
 0x2ac   : > { %v10172_v29 = vld [vmem:[%s11454_s28 + $0x1768] sm:$0xf0]  ;;  %v8162_v22 = vld [vmem:[%s11454_s28 + $0x790] sm:$0xf] }
 0x2ad   : > { %v11326_v31 = vld [vmem:[%s11454_s28 + $0x194c] sm:$0xf]  ;;  %v10175_v54 = vor.u32 %v11262_v23, %v10172_v29  ;;  %5983 = vmatpush.bf16.msra.mxu1 %v9919_v36  ;;  %v5732_v36 = vpop.f32.mrf.mxu1 }
 0x2ae   : > { %v10428_v32 = vld [vmem:[%s11454_s28 + $0x1968] sm:$0xf0]  ;;  %v10563_v36 = vld [vmem:[%s11454_s28 + $0x16c] sm:$0xf0] }
 0x2af   : > { %v11126_v37 = vld [vmem:[%s11454_s28 + $0x130c] sm:$0xf]  ;;  %v10431_v44 = vor.u32 %v11326_v31, %v10428_v32  ;;  %5996 = vmatpush.bf16.msra.mxu2 %v10175_v54 }
 0x2b0   : > { %v9628_v38 = vld [vmem:[%s11454_s28 + $0x1328] sm:$0xf0] }
 0x2b1   : > { %v11190_v40 = vld [vmem:[%s11454_s28 + $0x150c] sm:$0xf]  ;;  %v9631_v50 = vor.u32 %v11126_v37, %v9628_v38  ;;  %6009 = vmatpush.bf16.msra.mxu3 %v10431_v44 }
 0x2b2   : > { %v9884_v57 = vld [vmem:[%s11454_s28 + $0x1528] sm:$0xf0] }
 0x2b3   : > { %v11254_v46 = vld [vmem:[%s11454_s28 + $0x170c] sm:$0xf]  ;;  %v9887_v52 = vor.u32 %v11190_v40, %v9884_v57  ;;  %5971 = vmatpush.bf16.msra.mxu0 %v9631_v50 }
 0x2b4   : > { %v10140_v47 = vld [vmem:[%s11454_s28 + $0x1728] sm:$0xf0] }
 0x2b5   : > { %v11318_v48 = vld [vmem:[%s11454_s28 + $0x190c] sm:$0xf]  ;;  %v10143_v53 = vor.u32 %v11254_v46, %v10140_v47  ;;  %5984 = vmatpush.bf16.msra.mxu1 %v9887_v52 }
 0x2b6   : > { %v10396_v49 = vld [vmem:[%s11454_s28 + $0x1928] sm:$0xf0] }
 0x2b7   : > { %v11118_v4 = vld [vmem:[%s11454_s28 + $0x12cc] sm:$0xf]  ;;  %v10399_v60 = vor.u32 %v11318_v48, %v10396_v49  ;;  %5997 = vmatpush.bf16.msra.mxu2 %v10143_v53 }
 0x2b8   : > { %v9596_v55 = vld [vmem:[%s11454_s28 + $0x12e8] sm:$0xf0] }
 0x2b9   : > { %v11182_v56 = vld [vmem:[%s11454_s28 + $0x14cc] sm:$0xf]  ;;  %v9599_v7 = vor.u32 %v11118_v4, %v9596_v55  ;;  %6010 = vmatpush.bf16.msra.mxu3 %v10399_v60  ;;  %v5745_v4 = vpop.f32.mrf.mxu2  ;;  %v5758_v60 = vpop.f32.mrf.mxu3 }
 0x2ba   : > { %v9852_v61 = vld [vmem:[%s11454_s28 + $0x14e8] sm:$0xf0]  ;;  %v10619_v4 = vld [vmem:[%s11454_s28 + $0x32c] sm:$0xf0] }
 0x2bb   : > { %v11246_v62 = vld [vmem:[%s11454_s28 + $0x16cc] sm:$0xf]  ;;  %v9855_v5 = vor.u32 %v11182_v56, %v9852_v61  ;;  %5972 = vmatpush.bf16.msra.mxu0 %v9599_v7  ;;  %v7426_v61 = vld [vmem:[%s11454_s28 + $0x1d0] sm:$0xf] }
 0x2bc   : > { %v10108_v63 = vld [vmem:[%s11454_s28 + $0x16e8] sm:$0xf0]  ;;  %v10707_v7 = vld [vmem:[%s11454_s28 + $0x5ec] sm:$0xf0] }
 0x2bd   : > { %v11310_v0 = vld [vmem:[%s11454_s28 + $0x18cc] sm:$0xf]  ;;  %v10111_v6 = vor.u32 %v11246_v62, %v10108_v63  ;;  %5985 = vmatpush.bf16.msra.mxu1 %v9855_v5  ;;  %v10579_v62 = vld [vmem:[%s11454_s28 + $0x1ec] sm:$0xf0] }
 0x2be   : > { %v10364_v2 = vld [vmem:[%s11454_s28 + $0x18e8] sm:$0xf0]  ;;  %v7682_v63 = vld [vmem:[%s11454_s28 + $0x3d0] sm:$0xf]  ;;  %v7427_v10 = vor.u32 %v10579_v62, %v7426_v61 }
 0x2bf   : > { %v11110_v8 = vld [vmem:[%s11454_s28 + $0x128c] sm:$0xf]  ;;  %v10367_v11 = vor.u32 %v11310_v0, %v10364_v2  ;;  %5998 = vmatpush.bf16.msra.mxu2 %v10111_v6  ;;  %v10643_v2 = vld [vmem:[%s11454_s28 + $0x3ec] sm:$0xf0] }
 0x2c0   : > { %v9564_v9 = vld [vmem:[%s11454_s28 + $0x12a8] sm:$0xf0]  ;;  %v10747_v60 = vld [vmem:[%s11454_s28 + $0x72c] sm:$0xf0] }
 0x2c1   : > { %v11174_v26 = vld [vmem:[%s11454_s28 + $0x148c] sm:$0xf]  ;;  %v9567_v19 = vor.u32 %v11110_v8, %v9564_v9  ;;  %6011 = vmatpush.bf16.msra.mxu3 %v10367_v11  ;;  %v8194_v8 = vld [vmem:[%s11454_s28 + $0x7d0] sm:$0xf]  ;;  %v7683_v11 = vor.u32 %v10643_v2, %v7682_v63  ;;  %v5782_v63 = vpop.f32.mrf.mxu1 }
 0x2c2   : > { %v9820_v12 = vld [vmem:[%s11454_s28 + $0x14a8] sm:$0xf0]  ;;  %v10771_v9 = vld [vmem:[%s11454_s28 + $0x7ec] sm:$0xf0] }
 0x2c3   : > { %v11238_v14 = vld [vmem:[%s11454_s28 + $0x168c] sm:$0xf]  ;;  %v9823_v23 = vor.u32 %v11174_v26, %v9820_v12  ;;  %5973 = vmatpush.bf16.msra.mxu0 %v9567_v19  ;;  %v7939_v12 = vor.u32 %v10707_v7, %v7938_v3  ;;  %v8195_v16 = vor.u32 %v10771_v9, %v8194_v8  ;;  %v10699_v19 = vld [vmem:[%s11454_s28 + $0x5ac] sm:$0xf0] }
 0x2c4   : > { %v10076_v15 = vld [vmem:[%s11454_s28 + $0x16a8] sm:$0xf0]  ;;  %v7298_v3 = vld [vmem:[%s11454_s28 + $0xd0] sm:$0xf] }
 0x2c5   : > { %v11302_v17 = vld [vmem:[%s11454_s28 + $0x188c] sm:$0xf]  ;;  %v10079_v29 = vor.u32 %v11238_v14, %v10076_v15  ;;  %5986 = vmatpush.bf16.msra.mxu1 %v9823_v23  ;;  %v7394_v14 = vld [vmem:[%s11454_s28 + $0x190] sm:$0xf] }
 0x2c6   : > { %v10332_v18 = vld [vmem:[%s11454_s28 + $0x18a8] sm:$0xf0]  ;;  %v10571_v15 = vld [vmem:[%s11454_s28 + $0x1ac] sm:$0xf0] }
 0x2c7   : > { %v11102_v31 = vld [vmem:[%s11454_s28 + $0x124c] sm:$0xf]  ;;  %v10335_v54 = vor.u32 %v11302_v17, %v10332_v18  ;;  %5999 = vmatpush.bf16.msra.mxu2 %v10079_v29  ;;  %v10635_v17 = vld [vmem:[%s11454_s28 + $0x3ac] sm:$0xf0]  ;;  %v7395_v29 = vor.u32 %v10571_v15, %v7394_v14 }
 0x2c8   : > { %v9532_v32 = vld [vmem:[%s11454_s28 + $0x1268] sm:$0xf0]  ;;  %v7906_v18 = vld [vmem:[%s11454_s28 + $0x590] sm:$0xf] }
 0x2c9   : > { %v11166_v35 = vld [vmem:[%s11454_s28 + $0x144c] sm:$0xf]  ;;  %v9535_v46 = vor.u32 %v11102_v31, %v9532_v32  ;;  %6012 = vmatpush.bf16.msra.mxu3 %v10335_v54  ;;  %v10763_v23 = vld [vmem:[%s11454_s28 + $0x7ac] sm:$0xf0]  ;;  %v7651_v31 = vor.u32 %v10635_v17, %v7650_v41  ;;  %v7907_v32 = vor.u32 %v10699_v19, %v7906_v18  ;;  %v5795_v19 = vpop.f32.mrf.mxu2 }
 0x2ca   : > { %v9788_v37 = vld [vmem:[%s11454_s28 + $0x1468] sm:$0xf0]  ;;  %v7618_v54 = vld [vmem:[%s11454_s28 + $0x350] sm:$0xf] }
 0x2cb   : > { %v11230_v38 = vld [vmem:[%s11454_s28 + $0x164c] sm:$0xf]  ;;  %v9791_v49 = vor.u32 %v11166_v35, %v9788_v37  ;;  %5974 = vmatpush.bf16.msra.mxu0 %v9535_v46  ;;  %v7362_v35 = vld [vmem:[%s11454_s28 + $0x150] sm:$0xf]  ;;  %v8163_v37 = vor.u32 %v10763_v23, %v8162_v22 }
 0x2cc   : > { %v10044_v40 = vld [vmem:[%s11454_s28 + $0x1668] sm:$0xf0]  ;;  %v10755_v46 = vld [vmem:[%s11454_s28 + $0x76c] sm:$0xf0] }
 0x2cd   : > { %v11294_v44 = vld [vmem:[%s11454_s28 + $0x184c] sm:$0xf]  ;;  %v10047_v50 = vor.u32 %v11230_v38, %v10044_v40  ;;  %5987 = vmatpush.bf16.msra.mxu1 %v9791_v49  ;;  %v10627_v38 = vld [vmem:[%s11454_s28 + $0x36c] sm:$0xf0] }
 0x2ce   : > { %v10300_v57 = vld [vmem:[%s11454_s28 + $0x1868] sm:$0xf0]  ;;  %v7874_v40 = vld [vmem:[%s11454_s28 + $0x550] sm:$0xf] }
 0x2cf   : > { %v11094_v47 = vld [vmem:[%s11454_s28 + $0x120c] sm:$0xf]  ;;  %v10303_v55 = vor.u32 %v11294_v44, %v10300_v57  ;;  %6000 = vmatpush.bf16.msra.mxu2 %v10047_v50  ;;  %v10691_v44 = vld [vmem:[%s11454_s28 + $0x56c] sm:$0xf0] }
 0x2d0   : > { %v9500_v48 = vld [vmem:[%s11454_s28 + $0x1228] sm:$0xf0]  ;;  %v8130_v57 = vld [vmem:[%s11454_s28 + $0x750] sm:$0xf]  ;;  %v7875_v49 = vor.u32 %v10691_v44, %v7874_v40 }
 0x2d1   : > { %v11158_v51 = vld [vmem:[%s11454_s28 + $0x140c] sm:$0xf]  ;;  %v9503_v0 = vor.u32 %v11094_v47, %v9500_v48  ;;  %6013 = vmatpush.bf16.msra.mxu3 %v10303_v55  ;;  %v7363_v47 = vor.u32 %v10563_v36, %v7362_v35  ;;  %v7619_v48 = vor.u32 %v10627_v38, %v7618_v54  ;;  %v7330_v50 = vld [vmem:[%s11454_s28 + $0x110] sm:$0xf]  ;;  %v5784_v38 = vpop.f32.mrf.mxu1 }
 0x2d2   : > { %v9756_v52 = vld [vmem:[%s11454_s28 + $0x1428] sm:$0xf0]  ;;  %v7842_v55 = vld [vmem:[%s11454_s28 + $0x510] sm:$0xf] }
 0x2d3   : > { %v11222_v53 = vld [vmem:[%s11454_s28 + $0x160c] sm:$0xf]  ;;  %v9759_v5 = vor.u32 %v11158_v51, %v9756_v52  ;;  %5975 = vmatpush.bf16.msra.mxu0 %v9503_v0  ;;  %v10555_v51 = vld [vmem:[%s11454_s28 + $0x12c] sm:$0xf0] }
 0x2d4   : > { %v10012_v56 = vld [vmem:[%s11454_s28 + $0x1628] sm:$0xf0]  ;;  %v7586_v52 = vld [vmem:[%s11454_s28 + $0x310] sm:$0xf]  ;;  %v7331_v62 = vor.u32 %v10555_v51, %v7330_v50 }
 0x2d5   : > { %v11286_v58 = vld [vmem:[%s11454_s28 + $0x180c] sm:$0xf]  ;;  %v10015_v6 = vor.u32 %v11222_v53, %v10012_v56  ;;  %5988 = vmatpush.bf16.msra.mxu1 %v9759_v5  ;;  %v8131_v53 = vor.u32 %v10755_v46, %v8130_v57  ;;  %v10683_v56 = vld [vmem:[%s11454_s28 + $0x52c] sm:$0xf0]  ;;  %v7587_v0 = vor.u32 %v10619_v4, %v7586_v52 }
 0x2d6   : > { %v10268_v59 = vld [vmem:[%s11454_s28 + $0x1828] sm:$0xf0]  ;;  %5976 = vmatmul.bf16.vlgmr.msra.gmra.mxu0 %v11695_v25  ;;  %v7843_v2 = vor.u32 %v10683_v56, %v7842_v55  ;;  %v10547_v7 = vld [vmem:[%s11454_s28 + $0xec] sm:$0xf0] }
 0x2d7   : > { %v10271_v26 = vor.u32 %v11286_v58, %v10268_v59  ;;  %6001 = vmatpush.bf16.msra.mxu2 %v10015_v6  ;;  %6020 = vmatpush.bf16.msrb.mxu0 %v7427_v10  ;;  %v5769_v58 = vpop.f32.mrf.mxu0  ;;  %v8098_v59 = vld [vmem:[%s11454_s28 + $0x710] sm:$0xf] }
 0x2d8   : > { %5989 = vmatmul.bf16.vlgmr.msra.gmra.mxu1 %v11693_v24  ;;  %v5770_v61 = vadd.f32 %v5769_v58, %v12375_v21  ;;  %v7554_v5 = vld [vmem:[%s11454_s28 + $0x2d0] sm:$0xf]  ;;  %v8099_v6 = vor.u32 %v10747_v60, %v8098_v59 }
 0x2d9   : > { %6014 = vmatpush.bf16.msra.mxu3 %v10271_v26  ;;  %6033 = vmatpush.bf16.msrb.mxu1 %v7683_v11  ;;  %v10611_v9 = vld [vmem:[%s11454_s28 + $0x2ec] sm:$0xf0] }
 0x2da   : > { %6002 = vmatmul.bf16.vlgmr.msra.gmra.mxu2 %v11699_v30  ;;  %v5783_v8 = vadd.f32 %v5782_v63, %v5770_v61  ;;  %v7810_v26 = vld [vmem:[%s11454_s28 + $0x4d0] sm:$0xf]  ;;  %v7555_v14 = vor.u32 %v10611_v9, %v7554_v5  ;;  %v5797_v5 = vpop.f32.mrf.mxu2 }
 0x2db   : > { %6046 = vmatpush.bf16.msrb.mxu2 %v7939_v12  ;;  %6021 = vmatpush.bf16.msrb.mxu0 %v7395_v29  ;;  %v10675_v21 = vld [vmem:[%s11454_s28 + $0x4ec] sm:$0xf0]  ;;  %v7299_v12 = vor.u32 %v10547_v7, %v7298_v3 }
 0x2dc   : > { %6015 = vmatmul.bf16.vlgmr.msra.gmra.mxu3 %v11764_v13  ;;  %v8066_v10 = vld [vmem:[%s11454_s28 + $0x6d0] sm:$0xf]  ;;  %v7811_v15 = vor.u32 %v10675_v21, %v7810_v26 }
 0x2dd   : > { %6059 = vmatpush.bf16.msrb.mxu3 %v8195_v16  ;;  %6034 = vmatpush.bf16.msrb.mxu1 %v7651_v31  ;;  %v10739_v11 = vld [vmem:[%s11454_s28 + $0x6ec] sm:$0xf0]  ;;  %v5796_v31 = vadd.f32 %v5795_v19, %v5783_v8 }
 0x2de   : > { %v7266_v41 = vld [vmem:[%s11454_s28 + $0x90] sm:$0xf]  ;;  %v8067_v18 = vor.u32 %v10739_v11, %v8066_v10 }
 0x2df   : > { %6047 = vmatpush.bf16.msrb.mxu2 %v7907_v32  ;;  %6022 = vmatpush.bf16.msrb.mxu0 %v7363_v47  ;;  %v10539_v16 = vld [vmem:[%s11454_s28 + $0xac] sm:$0xf0]  ;;  %v5808_v32 = vpop.f32.mrf.mxu3  ;;  %v5771_v54 = vpop.f32.mrf.mxu0 }
 0x2e0   : > { %v7522_v17 = vld [vmem:[%s11454_s28 + $0x290] sm:$0xf]  ;;  %v12446_v40 = vadd.f32 %v5808_v32, %v5796_v31 }
 0x2e1   : > { %6060 = vmatpush.bf16.msrb.mxu3 %v8163_v37  ;;  %6035 = vmatpush.bf16.msrb.mxu1 %v7619_v48  ;;  %v10603_v22 = vld [vmem:[%s11454_s28 + $0x2ac] sm:$0xf0]  ;;  %v7267_v37 = vor.u32 %v10539_v16, %v7266_v41 }
 0x2e2   : > { %v7778_v23 = vld [vmem:[%s11454_s28 + $0x490] sm:$0xf]  ;;  %v7523_v44 = vor.u32 %v10603_v22, %v7522_v17 }
 0x2e3   : > { %6048 = vmatpush.bf16.msrb.mxu2 %v7875_v49  ;;  %6023 = vmatpush.bf16.msrb.mxu0 %v7331_v62  ;;  %v10667_v29 = vld [vmem:[%s11454_s28 + $0x4ac] sm:$0xf0] }
 0x2e4   : > { %v8034_v35 = vld [vmem:[%s11454_s28 + $0x690] sm:$0xf]  ;;  %v7779_v57 = vor.u32 %v10667_v29, %v7778_v23 }
 0x2e5   : > { %6061 = vmatpush.bf16.msrb.mxu3 %v8131_v53  ;;  %6036 = vmatpush.bf16.msrb.mxu1 %v7587_v0  ;;  %v10731_v36 = vld [vmem:[%s11454_s28 + $0x6ac] sm:$0xf0] }
 0x2e6   : > { %v7234_v46 = vld [vmem:[%s11454_s28 + $0x50] sm:$0xf]  ;;  %v8035_v49 = vor.u32 %v10731_v36, %v8034_v35 }
 0x2e7   : > { %6049 = vmatpush.bf16.msrb.mxu2 %v7843_v2  ;;  %6024 = vmatpush.bf16.msrb.mxu0 %v7299_v12  ;;  %v10531_v47 = vld [vmem:[%s11454_s28 + $0x6c] sm:$0xf0]  ;;  %v5810_v26 = vpop.f32.mrf.mxu3 }
 0x2e8   : > { %v7490_v48 = vld [vmem:[%s11454_s28 + $0x250] sm:$0xf]  ;;  %v7235_v55 = vor.u32 %v10531_v47, %v7234_v46  ;;  %v5834_v26 = vpop.f32.mrf.mxu1 }
 0x2e9   : > { %6062 = vmatpush.bf16.msrb.mxu3 %v8099_v6  ;;  %6037 = vmatpush.bf16.msrb.mxu1 %v7555_v14  ;;  %v10595_v50 = vld [vmem:[%s11454_s28 + $0x26c] sm:$0xf0] }
 0x2ea   : > { %v7746_v51 = vld [vmem:[%s11454_s28 + $0x450] sm:$0xf]  ;;  %v7491_v59 = vor.u32 %v10595_v50, %v7490_v48 }
 0x2eb   : > { %6050 = vmatpush.bf16.msrb.mxu2 %v7811_v15  ;;  %v10659_v52 = vld [vmem:[%s11454_s28 + $0x46c] sm:$0xf0]  ;;  %6025 = vmatpush.bf16.msrb.mxu0 %v7267_v37 }
 0x2ec   : > { %v8002_v53 = vld [vmem:[%s11454_s28 + $0x650] sm:$0xf]  ;;  %v7747_v60 = vor.u32 %v10659_v52, %v7746_v51 }
 0x2ed   : > { %6063 = vmatpush.bf16.msrb.mxu3 %v8067_v18  ;;  %v10723_v4 = vld [vmem:[%s11454_s28 + $0x66c] sm:$0xf0]  ;;  %6038 = vmatpush.bf16.msrb.mxu1 %v7523_v44 }
 0x2ee   : > { %v7202_v56 = vld [vmem:[%s11454_s28 + $0x10] sm:$0xf]  ;;  %v8003_v0 = vor.u32 %v10723_v4, %v8002_v53 }
 0x2ef   : > { %v10523_v58 = vld [vmem:[%s11454_s28 + $0x2c] sm:$0xf0]  ;;  %6051 = vmatpush.bf16.msrb.mxu2 %v7779_v57  ;;  %6026 = vmatpush.bf16.msrb.mxu0 %v7235_v55 }
 0x2f0   : > { %v7458_v61 = vld [vmem:[%s11454_s28 + $0x210] sm:$0xf]  ;;  %v7203_v21 = vor.u32 %v10523_v58, %v7202_v56 }
 0x2f1   : > { %v10587_v62 = vld [vmem:[%s11454_s28 + $0x22c] sm:$0xf0]  ;;  %6064 = vmatpush.bf16.msrb.mxu3 %v8035_v49  ;;  %6039 = vmatpush.bf16.msrb.mxu1 %v7491_v59 }
 0x2f2   : > { %v7714_v63 = vld [vmem:[%s11454_s28 + $0x410] sm:$0xf]  ;;  %v7459_v14 = vor.u32 %v10587_v62, %v7458_v61 }
 0x2f3   : > { %v10651_v2 = vld [vmem:[%s11454_s28 + $0x42c] sm:$0xf0]  ;;  %6052 = vmatpush.bf16.msrb.mxu2 %v7747_v60  ;;  %6027 = vmatpush.bf16.msrb.mxu0 %v7203_v21 }
 0x2f4   : > { %v7970_v3 = vld [vmem:[%s11454_s28 + $0x610] sm:$0xf]  ;;  %v7715_v15 = vor.u32 %v10651_v2, %v7714_v63 }
 0x2f5   : > { %v10715_v7 = vld [vmem:[%s11454_s28 + $0x62c] sm:$0xf0]  ;;  %6065 = vmatpush.bf16.msrb.mxu3 %v8003_v0  ;;  %6040 = vmatpush.bf16.msrb.mxu1 %v7459_v14 }
 0x2f6   : > { %v8450_v6 = vld [vmem:[%s11454_s28 + $0x9d0] sm:$0xf]  ;;  %v7971_v17 = vor.u32 %v10715_v7, %v7970_v3  ;;  %6028 = vmatmul.bf16.vlgmr.msrb.gmra.mxu0 %v11563_v28  ;;  %v5821_v7 = vpop.f32.mrf.mxu0 }
 0x2f7   : > { %v10835_v8 = vld [vmem:[%s11454_s28 + $0x9ec] sm:$0xf0]  ;;  %6053 = vmatpush.bf16.msrb.mxu2 %v7715_v15 }
 0x2f8   : > { %v8706_v9 = vld [vmem:[%s11454_s28 + $0xbd0] sm:$0xf]  ;;  %v8451_v18 = vor.u32 %v10835_v8, %v8450_v6  ;;  %6041 = vmatmul.bf16.vlgmr.msrb.gmra.mxu1 %v11569_v34  ;;  %v5822_v8 = vadd.f32 %v5821_v7, %v12446_v40 }
 0x2f9   : > { %v10899_v10 = vld [vmem:[%s11454_s28 + $0xbec] sm:$0xf0]  ;;  %6066 = vmatpush.bf16.msrb.mxu3 %v7971_v17 }
 0x2fa   : > { %v8962_v11 = vld [vmem:[%s11454_s28 + $0xdd0] sm:$0xf]  ;;  %v8707_v19 = vor.u32 %v10899_v10, %v8706_v9  ;;  %6072 = vmatpush.bf16.msra.mxu0 %v8451_v18  ;;  %6054 = vmatmul.bf16.vlgmr.msrb.gmra.mxu2 %v11561_v27 }
 0x2fb   : > { %v10963_v12 = vld [vmem:[%s11454_s28 + $0xdec] sm:$0xf0] }
 0x2fc   : > { %v9218_v41 = vld [vmem:[%s11454_s28 + $0xfd0] sm:$0xf]  ;;  %v8963_v22 = vor.u32 %v10963_v12, %v8962_v11  ;;  %6085 = vmatpush.bf16.msra.mxu1 %v8707_v19  ;;  %6067 = vmatmul.bf16.vlgmr.msrb.gmra.mxu3 %v11567_v33 }
 0x2fd   : > { %v11027_v16 = vld [vmem:[%s11454_s28 + $0xfec] sm:$0xf0] }
 0x2fe   : > { %v8418_v23 = vld [vmem:[%s11454_s28 + $0x990] sm:$0xf]  ;;  %v9219_v32 = vor.u32 %v11027_v16, %v9218_v41  ;;  %6098 = vmatpush.bf16.msra.mxu2 %v8963_v22  ;;  %v5835_v41 = vadd.f32 %v5834_v26, %v5822_v8 }
 0x2ff   : > { %v10827_v29 = vld [vmem:[%s11454_s28 + $0x9ac] sm:$0xf0] }
 0x300   : > { %v8674_v31 = vld [vmem:[%s11454_s28 + $0xb90] sm:$0xf]  ;;  %v8419_v44 = vor.u32 %v10827_v29, %v8418_v23  ;;  %6111 = vmatpush.bf16.msra.mxu3 %v9219_v32 }
 0x301   : > { %v10891_v35 = vld [vmem:[%s11454_s28 + $0xbac] sm:$0xf0] }
 0x302   : > { %v8930_v36 = vld [vmem:[%s11454_s28 + $0xd90] sm:$0xf]  ;;  %v8675_v57 = vor.u32 %v10891_v35, %v8674_v31  ;;  %6073 = vmatpush.bf16.msra.mxu0 %v8419_v44 }
 0x303   : > { %v10955_v54 = vld [vmem:[%s11454_s28 + $0xdac] sm:$0xf0] }
 0x304   : > { %v9186_v37 = vld [vmem:[%s11454_s28 + $0xf90] sm:$0xf]  ;;  %v8931_v46 = vor.u32 %v10955_v54, %v8930_v36  ;;  %6086 = vmatpush.bf16.msra.mxu1 %v8675_v57  ;;  %v5847_v54 = vpop.f32.mrf.mxu2 }
 0x305   : > { %v11019_v38 = vld [vmem:[%s11454_s28 + $0xfac] sm:$0xf0]  ;;  %v12515_v57 = vadd.f32 %v5847_v54, %v5835_v41 }
 0x306   : > { %v8386_v47 = vld [vmem:[%s11454_s28 + $0x950] sm:$0xf]  ;;  %v9187_v50 = vor.u32 %v11019_v38, %v9186_v37  ;;  %6099 = vmatpush.bf16.msra.mxu2 %v8931_v46 }
 0x307   : > { %v10819_v48 = vld [vmem:[%s11454_s28 + $0x96c] sm:$0xf0] }
 0x308   : > { %v8642_v49 = vld [vmem:[%s11454_s28 + $0xb50] sm:$0xf]  ;;  %v8387_v56 = vor.u32 %v10819_v48, %v8386_v47  ;;  %6112 = vmatpush.bf16.msra.mxu3 %v9187_v50  ;;  %v12519_v48 = vpop.f32.mrf.mxu3 }
 0x309   : > { %v10883_v51 = vld [vmem:[%s11454_s28 + $0xb6c] sm:$0xf0] }
 0x30a   : > { %v8898_v52 = vld [vmem:[%s11454_s28 + $0xd50] sm:$0xf]  ;;  %v8643_v58 = vor.u32 %v10883_v51, %v8642_v49  ;;  %6074 = vmatpush.bf16.msra.mxu0 %v8387_v56  ;;  %v5823_v49 = vpop.f32.mrf.mxu0  ;;  %v5836_v51 = vpop.f32.mrf.mxu1 }
 0x30b   : > { %v10947_v53 = vld [vmem:[%s11454_s28 + $0xd6c] sm:$0xf0] }
 0x30c   : > { %v9154_v4 = vld [vmem:[%s11454_s28 + $0xf50] sm:$0xf]  ;;  %v8899_v59 = vor.u32 %v10947_v53, %v8898_v52  ;;  %6087 = vmatpush.bf16.msra.mxu1 %v8643_v58 }
 0x30d   : > { %v11011_v55 = vld [vmem:[%s11454_s28 + $0xf6c] sm:$0xf0] }
 0x30e   : > { %v8354_v60 = vld [vmem:[%s11454_s28 + $0x910] sm:$0xf]  ;;  %v9155_v63 = vor.u32 %v11011_v55, %v9154_v4  ;;  %6100 = vmatpush.bf16.msra.mxu2 %v8899_v59 }
 0x30f   : > { %v10811_v61 = vld [vmem:[%s11454_s28 + $0x92c] sm:$0xf0] }
 0x310   : > { %v8610_v62 = vld [vmem:[%s11454_s28 + $0xb10] sm:$0xf]  ;;  %v8355_v9 = vor.u32 %v10811_v61, %v8354_v60  ;;  %6113 = vmatpush.bf16.msra.mxu3 %v9155_v63 }
 0x311   : > { %v10875_v0 = vld [vmem:[%s11454_s28 + $0xb2c] sm:$0xf0] }
 0x312   : > { %v8866_v2 = vld [vmem:[%s11454_s28 + $0xd10] sm:$0xf]  ;;  %v8611_v21 = vor.u32 %v10875_v0, %v8610_v62  ;;  %6075 = vmatpush.bf16.msra.mxu0 %v8355_v9 }
 0x313   : > { %v10939_v3 = vld [vmem:[%s11454_s28 + $0xd2c] sm:$0xf0] }
 0x314   : > { %v9122_v5 = vld [vmem:[%s11454_s28 + $0xf10] sm:$0xf]  ;;  %v8867_v10 = vor.u32 %v10939_v3, %v8866_v2  ;;  %6088 = vmatpush.bf16.msra.mxu1 %v8611_v21 }
 0x315   : > { %v11003_v6 = vld [vmem:[%s11454_s28 + $0xf2c] sm:$0xf0] }
 0x316   : > { %v8322_v11 = vld [vmem:[%s11454_s28 + $0x8d0] sm:$0xf]  ;;  %v9123_v15 = vor.u32 %v11003_v6, %v9122_v5  ;;  %6101 = vmatpush.bf16.msra.mxu2 %v8867_v10 }
 0x317   : > { %v10803_v12 = vld [vmem:[%s11454_s28 + $0x8ec] sm:$0xf0] }
 0x318   : > { %v8578_v14 = vld [vmem:[%s11454_s28 + $0xad0] sm:$0xf]  ;;  %v8323_v22 = vor.u32 %v10803_v12, %v8322_v11  ;;  %6114 = vmatpush.bf16.msra.mxu3 %v9123_v15  ;;  %v5849_v12 = vpop.f32.mrf.mxu2 }
 0x319   : > { %v10867_v16 = vld [vmem:[%s11454_s28 + $0xaec] sm:$0xf0] }
 0x31a   : > { %v8834_v17 = vld [vmem:[%s11454_s28 + $0xcd0] sm:$0xf]  ;;  %v8579_v23 = vor.u32 %v10867_v16, %v8578_v14  ;;  %6076 = vmatpush.bf16.msra.mxu0 %v8323_v22  ;;  %v5862_v16 = vpop.f32.mrf.mxu3 }
 0x31b   : > { %v10931_v40 = vld [vmem:[%s11454_s28 + $0xcec] sm:$0xf0] }
 0x31c   : > { %v9090_v18 = vld [vmem:[%s11454_s28 + $0xed0] sm:$0xf]  ;;  %v8835_v29 = vor.u32 %v10931_v40, %v8834_v17  ;;  %6089 = vmatpush.bf16.msra.mxu1 %v8579_v23 }
 0x31d   : > { %v10995_v19 = vld [vmem:[%s11454_s28 + $0xeec] sm:$0xf0] }
 0x31e   : > { %v8290_v31 = vld [vmem:[%s11454_s28 + $0x890] sm:$0xf]  ;;  %v9091_v36 = vor.u32 %v10995_v19, %v9090_v18  ;;  %6102 = vmatpush.bf16.msra.mxu2 %v8835_v29 }
 0x31f   : > { %v10795_v32 = vld [vmem:[%s11454_s28 + $0x8ac] sm:$0xf0] }
 0x320   : > { %v8546_v35 = vld [vmem:[%s11454_s28 + $0xa90] sm:$0xf]  ;;  %v8291_v50 = vor.u32 %v10795_v32, %v8290_v31  ;;  %6115 = vmatpush.bf16.msra.mxu3 %v9091_v36 }
 0x321   : > { %v10859_v37 = vld [vmem:[%s11454_s28 + $0xaac] sm:$0xf0] }
 0x322   : > { %v8802_v38 = vld [vmem:[%s11454_s28 + $0xc90] sm:$0xf]  ;;  %v8547_v52 = vor.u32 %v10859_v37, %v8546_v35  ;;  %6077 = vmatpush.bf16.msra.mxu0 %v8291_v50 }
 0x323   : > { %v10923_v44 = vld [vmem:[%s11454_s28 + $0xcac] sm:$0xf0] }
 0x324   : > { %v9058_v46 = vld [vmem:[%s11454_s28 + $0xe90] sm:$0xf]  ;;  %v8803_v53 = vor.u32 %v10923_v44, %v8802_v38  ;;  %6090 = vmatpush.bf16.msra.mxu1 %v8547_v52 }
 0x325   : > { %v10987_v47 = vld [vmem:[%s11454_s28 + $0xeac] sm:$0xf0] }
 0x326   : > { %v8258_v4 = vld [vmem:[%s11454_s28 + $0x850] sm:$0xf]  ;;  %v9059_v58 = vor.u32 %v10987_v47, %v9058_v46  ;;  %6103 = vmatpush.bf16.msra.mxu2 %v8803_v53 }
 0x327   : > { %v10787_v55 = vld [vmem:[%s11454_s28 + $0x86c] sm:$0xf0] }
 0x328   : > { %v8514_v56 = vld [vmem:[%s11454_s28 + $0xa50] sm:$0xf]  ;;  %v8259_v0 = vor.u32 %v10787_v55, %v8258_v4  ;;  %6116 = vmatpush.bf16.msra.mxu3 %v9059_v58 }
 0x329   : > { %v10851_v59 = vld [vmem:[%s11454_s28 + $0xa6c] sm:$0xf0] }
 0x32a   : > { %v8770_v60 = vld [vmem:[%s11454_s28 + $0xc50] sm:$0xf]  ;;  %v8515_v7 = vor.u32 %v10851_v59, %v8514_v56  ;;  %6078 = vmatpush.bf16.msra.mxu0 %v8259_v0 }
 0x32b   : > { %v10915_v61 = vld [vmem:[%s11454_s28 + $0xc6c] sm:$0xf0] }
 0x32c   : > { %v9026_v62 = vld [vmem:[%s11454_s28 + $0xe50] sm:$0xf]  ;;  %v8771_v5 = vor.u32 %v10915_v61, %v8770_v60  ;;  %6091 = vmatpush.bf16.msra.mxu1 %v8515_v7 }
 0x32d   : > { %v10979_v63 = vld [vmem:[%s11454_s28 + $0xe6c] sm:$0xf0] }
 0x32e   : > { %v8226_v2 = vld [vmem:[%s11454_s28 + $0x810] sm:$0xf]  ;;  %v9027_v26 = vor.u32 %v10979_v63, %v9026_v62  ;;  %6104 = vmatpush.bf16.msra.mxu2 %v8771_v5 }
 0x32f   : > { %v10779_v3 = vld [vmem:[%s11454_s28 + $0x82c] sm:$0xf0] }
 0x330   : > { %v8482_v6 = vld [vmem:[%s11454_s28 + $0xa10] sm:$0xf]  ;;  %v8227_v17 = vor.u32 %v10779_v3, %v8226_v2  ;;  %6117 = vmatpush.bf16.msra.mxu3 %v9027_v26 }
 0x331   : > { %v10843_v8 = vld [vmem:[%s11454_s28 + $0xa2c] sm:$0xf0] }
 0x332   : > { %v8738_v9 = vld [vmem:[%s11454_s28 + $0xc10] sm:$0xf]  ;;  %v8483_v22 = vor.u32 %v10843_v8, %v8482_v6  ;;  %6079 = vmatpush.bf16.msra.mxu0 %v8227_v17 }
 0x333   : > { %v10907_v21 = vld [vmem:[%s11454_s28 + $0xc2c] sm:$0xf0] }
 0x334   : > { %v8994_v10 = vld [vmem:[%s11454_s28 + $0xe10] sm:$0xf]  ;;  %v8739_v23 = vor.u32 %v10907_v21, %v8738_v9  ;;  %6092 = vmatpush.bf16.msra.mxu1 %v8483_v22  ;;  %v12578_v22 = vpop.f32.mrf.mxu1 }
 0x335   : > { %v10971_v11 = vld [vmem:[%s11454_s28 + $0xe2c] sm:$0xf0]  ;;  %6080 = vmatmul.bf16.vlgmr.msra.gmra.mxu0 %v11619_v42 }
 0x336   : > { %v9474_v14 = vld [vmem:[%s11454_s28 + $0x11d0] sm:$0xf]  ;;  %v8995_v32 = vor.u32 %v10971_v11, %v8994_v10  ;;  %6105 = vmatpush.bf16.msra.mxu2 %v8739_v23 }
 0x337   : > { %v11091_v15 = vld [vmem:[%s11454_s28 + $0x11ec] sm:$0xf0]  ;;  %6093 = vmatmul.bf16.vlgmr.msra.gmra.mxu1 %v11623_v45 }
 0x338   : > { %v9730_v41 = vld [vmem:[%s11454_s28 + $0x13d0] sm:$0xf]  ;;  %v9475_v35 = vor.u32 %v11091_v15, %v9474_v14  ;;  %6118 = vmatpush.bf16.msra.mxu3 %v8995_v32 }
 0x339   : > { %v11155_v40 = vld [vmem:[%s11454_s28 + $0x13ec] sm:$0xf0]  ;;  %6106 = vmatmul.bf16.vlgmr.msra.gmra.mxu2 %v11615_v39 }
 0x33a   : > { %v9986_v18 = vld [vmem:[%s11454_s28 + $0x15d0] sm:$0xf]  ;;  %v9731_v36 = vor.u32 %v11155_v40, %v9730_v41  ;;  %6124 = vmatpush.bf16.msrb.mxu0 %v9475_v35  ;;  %v12573_v41 = vpop.f32.mrf.mxu0 }
 0x33b   : > { %v11219_v19 = vld [vmem:[%s11454_s28 + $0x15ec] sm:$0xf0]  ;;  %6119 = vmatmul.bf16.vlgmr.msra.gmra.mxu3 %v11621_v43 }
 0x33c   : > { %v10242_v29 = vld [vmem:[%s11454_s28 + $0x17d0] sm:$0xf]  ;;  %v9987_v54 = vor.u32 %v11219_v19, %v9986_v18  ;;  %6137 = vmatpush.bf16.msrb.mxu1 %v9731_v36 }
 0x33d   : > { %v11283_v31 = vld [vmem:[%s11454_s28 + $0x17ec] sm:$0xf0] }
 0x33e   : > { %v9442_v37 = vld [vmem:[%s11454_s28 + $0x1190] sm:$0xf]  ;;  %v10243_v46 = vor.u32 %v11283_v31, %v10242_v29  ;;  %6150 = vmatpush.bf16.msrb.mxu2 %v9987_v54 }
 0x33f   : > { %v11083_v38 = vld [vmem:[%s11454_s28 + $0x11ac] sm:$0xf0] }
 0x340   : > { %v9698_v44 = vld [vmem:[%s11454_s28 + $0x1390] sm:$0xf]  ;;  %v9443_v53 = vor.u32 %v11083_v38, %v9442_v37  ;;  %6163 = vmatpush.bf16.msrb.mxu3 %v10243_v46 }
 0x341   : > { %v11147_v47 = vld [vmem:[%s11454_s28 + $0x13ac] sm:$0xf0] }
 0x342   : > { %v9954_v49 = vld [vmem:[%s11454_s28 + $0x1590] sm:$0xf]  ;;  %v9699_v4 = vor.u32 %v11147_v47, %v9698_v44  ;;  %6125 = vmatpush.bf16.msrb.mxu0 %v9443_v53 }
 0x343   : > { %v11211_v50 = vld [vmem:[%s11454_s28 + $0x15ac] sm:$0xf0] }
 0x344   : > { %v10210_v51 = vld [vmem:[%s11454_s28 + $0x1790] sm:$0xf]  ;;  %v9955_v55 = vor.u32 %v11211_v50, %v9954_v49  ;;  %6138 = vmatpush.bf16.msrb.mxu1 %v9699_v4  ;;  %v12588_v49 = vpop.f32.mrf.mxu2  ;;  %v12593_v4 = vpop.f32.mrf.mxu3 }
 0x345   : > { %v11275_v52 = vld [vmem:[%s11454_s28 + $0x17ac] sm:$0xf0] }
 0x346   : > { %v9410_v56 = vld [vmem:[%s11454_s28 + $0x1150] sm:$0xf]  ;;  %v10211_v60 = vor.u32 %v11275_v52, %v10210_v51  ;;  %6151 = vmatpush.bf16.msrb.mxu2 %v9955_v55 }
 0x347   : > { %v11075_v58 = vld [vmem:[%s11454_s28 + $0x116c] sm:$0xf0] }
 0x348   : > { %v9666_v59 = vld [vmem:[%s11454_s28 + $0x1350] sm:$0xf]  ;;  %v9411_v3 = vor.u32 %v11075_v58, %v9410_v56  ;;  %6164 = vmatpush.bf16.msrb.mxu3 %v10211_v60 }
 0x349   : > { %v11139_v61 = vld [vmem:[%s11454_s28 + $0x136c] sm:$0xf0] }
 0x34a   : > { %v9922_v62 = vld [vmem:[%s11454_s28 + $0x1550] sm:$0xf]  ;;  %v9667_v7 = vor.u32 %v11139_v61, %v9666_v59  ;;  %6126 = vmatpush.bf16.msrb.mxu0 %v9411_v3  ;;  %v5875_v59 = vpop.f32.mrf.mxu0 }
 0x34b   : > { %v11203_v63 = vld [vmem:[%s11454_s28 + $0x156c] sm:$0xf0]  ;;  %v10567_v59 = vld [vmem:[%s11454_s28 + $0x194] sm:$0xf] }
 0x34c   : > { %v10178_v0 = vld [vmem:[%s11454_s28 + $0x1750] sm:$0xf]  ;;  %v9923_v5 = vor.u32 %v11203_v63, %v9922_v62  ;;  %6139 = vmatpush.bf16.msrb.mxu1 %v9667_v7 }
 0x34d   : > { %v11267_v2 = vld [vmem:[%s11454_s28 + $0x176c] sm:$0xf0] }
 0x34e   : > { %v9378_v6 = vld [vmem:[%s11454_s28 + $0x1110] sm:$0xf]  ;;  %v10179_v26 = vor.u32 %v11267_v2, %v10178_v0  ;;  %6152 = vmatpush.bf16.msrb.mxu2 %v9923_v5  ;;  %v5888_v2 = vpop.f32.mrf.mxu1 }
 0x34f   : > { %v11067_v8 = vld [vmem:[%s11454_s28 + $0x112c] sm:$0xf0]  ;;  %v7908_v2 = vld [vmem:[%s11454_s28 + $0x5b0] sm:$0xf0] }
 0x350   : > { %v9634_v9 = vld [vmem:[%s11454_s28 + $0x1310] sm:$0xf]  ;;  %v9379_v15 = vor.u32 %v11067_v8, %v9378_v6  ;;  %6165 = vmatpush.bf16.msrb.mxu3 %v10179_v26 }
 0x351   : > { %v11131_v21 = vld [vmem:[%s11454_s28 + $0x132c] sm:$0xf0] }
 0x352   : > { %v9890_v10 = vld [vmem:[%s11454_s28 + $0x1510] sm:$0xf]  ;;  %v9635_v16 = vor.u32 %v11131_v21, %v9634_v9  ;;  %6127 = vmatpush.bf16.msrb.mxu0 %v9379_v15 }
 0x353   : > { %v11195_v11 = vld [vmem:[%s11454_s28 + $0x152c] sm:$0xf0] }
 0x354   : > { %v10146_v12 = vld [vmem:[%s11454_s28 + $0x1710] sm:$0xf]  ;;  %v9891_v17 = vor.u32 %v11195_v11, %v9890_v10  ;;  %6140 = vmatpush.bf16.msrb.mxu1 %v9635_v16 }
 0x355   : > { %v11259_v14 = vld [vmem:[%s11454_s28 + $0x172c] sm:$0xf0] }
 0x356   : > { %v9346_v40 = vld [vmem:[%s11454_s28 + $0x10d0] sm:$0xf]  ;;  %v10147_v23 = vor.u32 %v11259_v14, %v10146_v12  ;;  %6153 = vmatpush.bf16.msrb.mxu2 %v9891_v17  ;;  %v5901_v17 = vpop.f32.mrf.mxu2 }
 0x357   : > { %v11059_v18 = vld [vmem:[%s11454_s28 + $0x10ec] sm:$0xf0] }
 0x358   : > { %v9602_v19 = vld [vmem:[%s11454_s28 + $0x12d0] sm:$0xf]  ;;  %v9347_v54 = vor.u32 %v11059_v18, %v9346_v40  ;;  %6166 = vmatpush.bf16.msrb.mxu3 %v10147_v23 }
 0x359   : > { %v11123_v29 = vld [vmem:[%s11454_s28 + $0x12ec] sm:$0xf0] }
 0x35a   : > { %v9858_v31 = vld [vmem:[%s11454_s28 + $0x14d0] sm:$0xf]  ;;  %v9603_v37 = vor.u32 %v11123_v29, %v9602_v19  ;;  %6128 = vmatpush.bf16.msrb.mxu0 %v9347_v54  ;;  %v5914_v29 = vpop.f32.mrf.mxu3  ;;  %v7428_v54 = vld [vmem:[%s11454_s28 + $0x1f0] sm:$0xf0] }
 0x35b   : > { %v11187_v32 = vld [vmem:[%s11454_s28 + $0x14ec] sm:$0xf0]  ;;  %v7332_v29 = vld [vmem:[%s11454_s28 + $0x130] sm:$0xf0] }
 0x35c   : > { %v10114_v35 = vld [vmem:[%s11454_s28 + $0x16d0] sm:$0xf]  ;;  %v9859_v38 = vor.u32 %v11187_v32, %v9858_v31  ;;  %6141 = vmatpush.bf16.msrb.mxu1 %v9603_v37  ;;  %v10639_v37 = vld [vmem:[%s11454_s28 + $0x3d4] sm:$0xf] }
 0x35d   : > { %v11251_v36 = vld [vmem:[%s11454_s28 + $0x16ec] sm:$0xf0] }
 0x35e   : > { %v9314_v44 = vld [vmem:[%s11454_s28 + $0x1090] sm:$0xf]  ;;  %v10115_v50 = vor.u32 %v11251_v36, %v10114_v35  ;;  %6154 = vmatpush.bf16.msrb.mxu2 %v9859_v38  ;;  %v10575_v35 = vld [vmem:[%s11454_s28 + $0x1d4] sm:$0xf] }
 0x35f   : > { %v11051_v46 = vld [vmem:[%s11454_s28 + $0x10ac] sm:$0xf0]  ;;  %v7684_v38 = vld [vmem:[%s11454_s28 + $0x3f0] sm:$0xf0] }
 0x360   : > { %v9570_v47 = vld [vmem:[%s11454_s28 + $0x1290] sm:$0xf]  ;;  %v9315_v58 = vor.u32 %v11051_v46, %v9314_v44  ;;  %6167 = vmatpush.bf16.msrb.mxu3 %v10115_v50  ;;  %v7940_v50 = vld [vmem:[%s11454_s28 + $0x5f0] sm:$0xf0] }
 0x361   : > { %v11115_v51 = vld [vmem:[%s11454_s28 + $0x12ac] sm:$0xf0] }
 0x362   : > { %v9826_v52 = vld [vmem:[%s11454_s28 + $0x1490] sm:$0xf]  ;;  %v9571_v60 = vor.u32 %v11115_v51, %v9570_v47  ;;  %6129 = vmatpush.bf16.msrb.mxu0 %v9315_v58  ;;  %v10703_v47 = vld [vmem:[%s11454_s28 + $0x5d4] sm:$0xf] }
 0x363   : > { %v11179_v53 = vld [vmem:[%s11454_s28 + $0x14ac] sm:$0xf0] }
 0x364   : > { %v10082_v55 = vld [vmem:[%s11454_s28 + $0x1690] sm:$0xf]  ;;  %v9827_v61 = vor.u32 %v11179_v53, %v9826_v52  ;;  %6142 = vmatpush.bf16.msrb.mxu1 %v9571_v60  ;;  %v7431_v53 = vor.u32 %v10575_v35, %v7428_v54  ;;  %v7943_v60 = vor.u32 %v10703_v47, %v7940_v50  ;;  %v12647_v35 = vpop.f32.mrf.mxu0  ;;  %v7844_v54 = vld [vmem:[%s11454_s28 + $0x530] sm:$0xf0] }
 0x365   : > { %v11243_v56 = vld [vmem:[%s11454_s28 + $0x16ac] sm:$0xf0] }
 0x366   : > { %v9282_v62 = vld [vmem:[%s11454_s28 + $0x1050] sm:$0xf]  ;;  %v10083_v3 = vor.u32 %v11243_v56, %v10082_v55  ;;  %6155 = vmatpush.bf16.msrb.mxu2 %v9827_v61  ;;  %v7687_v55 = vor.u32 %v10639_v37, %v7684_v38  ;;  %v7396_v61 = vld [vmem:[%s11454_s28 + $0x1b0] sm:$0xf0]  ;;  %v12651_v38 = vpop.f32.mrf.mxu1 }
 0x367   : > { %v11043_v63 = vld [vmem:[%s11454_s28 + $0x106c] sm:$0xf0] }
 0x368   : > { %v9538_v0 = vld [vmem:[%s11454_s28 + $0x1250] sm:$0xf]  ;;  %v9283_v26 = vor.u32 %v11043_v63, %v9282_v62  ;;  %6168 = vmatpush.bf16.msrb.mxu3 %v10083_v3  ;;  %v10631_v62 = vld [vmem:[%s11454_s28 + $0x394] sm:$0xf] }
 0x369   : > { %v11107_v7 = vld [vmem:[%s11454_s28 + $0x126c] sm:$0xf0]  ;;  %v7652_v63 = vld [vmem:[%s11454_s28 + $0x3b0] sm:$0xf0] }
 0x36a   : > { %v9794_v5 = vld [vmem:[%s11454_s28 + $0x1450] sm:$0xf]  ;;  %v9539_v11 = vor.u32 %v11107_v7, %v9538_v0  ;;  %6130 = vmatpush.bf16.msrb.mxu0 %v9283_v26  ;;  %v10695_v0 = vld [vmem:[%s11454_s28 + $0x594] sm:$0xf]  ;;  %v7399_v7 = vor.u32 %v10567_v59, %v7396_v61  ;;  %v5874_v61 = vadd.f32 %v12573_v41, %v12519_v48 }
 0x36b   : > { %v11171_v6 = vld [vmem:[%s11454_s28 + $0x146c] sm:$0xf0]  ;;  %v7911_v26 = vor.u32 %v10695_v0, %v7908_v2  ;;  %v7812_v59 = vld [vmem:[%s11454_s28 + $0x4f0] sm:$0xf0] }
 0x36c   : > { %v10050_v8 = vld [vmem:[%s11454_s28 + $0x1650] sm:$0xf]  ;;  %v9795_v12 = vor.u32 %v11171_v6, %v9794_v5  ;;  %6143 = vmatpush.bf16.msrb.mxu1 %v9539_v11  ;;  %v7655_v5 = vor.u32 %v10631_v62, %v7652_v63  ;;  %v7620_v11 = vld [vmem:[%s11454_s28 + $0x370] sm:$0xf0] }
 0x36d   : > { %v11235_v9 = vld [vmem:[%s11454_s28 + $0x166c] sm:$0xf0]  ;;  %v10663_v48 = vld [vmem:[%s11454_s28 + $0x494] sm:$0xf] }
 0x36e   : > { %v9250_v21 = vld [vmem:[%s11454_s28 + $0x1010] sm:$0xf]  ;;  %v10051_v40 = vor.u32 %v11235_v9, %v10050_v8  ;;  %6156 = vmatpush.bf16.msrb.mxu2 %v9795_v12  ;;  %v10559_v9 = vld [vmem:[%s11454_s28 + $0x154] sm:$0xf] }
 0x36f   : > { %v11035_v10 = vld [vmem:[%s11454_s28 + $0x102c] sm:$0xf0]  ;;  %v10687_v12 = vld [vmem:[%s11454_s28 + $0x554] sm:$0xf] }
 0x370   : > { %v9506_v14 = vld [vmem:[%s11454_s28 + $0x1210] sm:$0xf]  ;;  %v9251_v36 = vor.u32 %v11035_v10, %v9250_v21  ;;  %6169 = vmatpush.bf16.msrb.mxu3 %v10051_v40  ;;  %v7364_v21 = vld [vmem:[%s11454_s28 + $0x170] sm:$0xf0] }
 0x371   : > { %v11099_v15 = vld [vmem:[%s11454_s28 + $0x122c] sm:$0xf0]  ;;  %v10623_v10 = vld [vmem:[%s11454_s28 + $0x354] sm:$0xf] }
 0x372   : > { %v9762_v16 = vld [vmem:[%s11454_s28 + $0x1410] sm:$0xf]  ;;  %v9507_v44 = vor.u32 %v11099_v15, %v9506_v14  ;;  %6131 = vmatpush.bf16.msrb.mxu0 %v9251_v36  ;;  %v7876_v14 = vld [vmem:[%s11454_s28 + $0x570] sm:$0xf0]  ;;  %v7623_v17 = vor.u32 %v10623_v10, %v7620_v11  ;;  %v5940_v11 = vpop.f32.mrf.mxu1 }
 0x373   : > { %v11163_v18 = vld [vmem:[%s11454_s28 + $0x142c] sm:$0xf0]  ;;  %v10679_v36 = vld [vmem:[%s11454_s28 + $0x514] sm:$0xf] }
 0x374   : > { %v10018_v19 = vld [vmem:[%s11454_s28 + $0x1610] sm:$0xf]  ;;  %v9763_v46 = vor.u32 %v11163_v18, %v9762_v16  ;;  %6144 = vmatpush.bf16.msrb.mxu1 %v9507_v44  ;;  %v7367_v16 = vor.u32 %v10559_v9, %v7364_v21  ;;  %v7524_v9 = vld [vmem:[%s11454_s28 + $0x2b0] sm:$0xf0]  ;;  %v5927_v21 = vpop.f32.mrf.mxu0 }
 0x375   : > { %v11227_v23 = vld [vmem:[%s11454_s28 + $0x162c] sm:$0xf0]  ;;  %6132 = vmatmul.bf16.vlgmr.msrb.gmra.mxu0 %v11688_v20  ;;  %v7780_v41 = vld [vmem:[%s11454_s28 + $0x4b0] sm:$0xf0] }
 0x376   : > { %v10498_v31 = vld [vmem:[%s11454_s28 + $0x19d0] sm:$0xf]  ;;  %v10019_v51 = vor.u32 %v11227_v23, %v10018_v19  ;;  %6157 = vmatpush.bf16.msrb.mxu2 %v9763_v46  ;;  %v10551_v19 = vld [vmem:[%s11454_s28 + $0x114] sm:$0xf]  ;;  %v7879_v23 = vor.u32 %v10687_v12, %v7876_v14  ;;  %v5887_v12 = vadd.f32 %v12578_v22, %v5874_v61 }
 0x377   : > { %v11347_v32 = vld [vmem:[%s11454_s28 + $0x19ec] sm:$0xf0]  ;;  %6145 = vmatmul.bf16.vlgmr.msrb.gmra.mxu1 %v11695_v25  ;;  %v7335_v44 = vor.u32 %v10551_v19, %v7332_v29  ;;  %v7236_v19 = vld [vmem:[%s11454_s28 + $0x70] sm:$0xf0] }
 0x378   : > { %v10499_v52 = vor.u32 %v11347_v32, %v10498_v31  ;;  %v10466_v56 = vld [vmem:[%s11454_s28 + $0x1990] sm:$0xf]  ;;  %6170 = vmatpush.bf16.msrb.mxu3 %v10019_v51  ;;  %6189 = vmatpush.bf16.msra.mxu1 %v7431_v53  ;;  %v10615_v31 = vld [vmem:[%s11454_s28 + $0x314] sm:$0xf] }
 0x379   : > { %v11339_v58 = vld [vmem:[%s11454_s28 + $0x19ac] sm:$0xf0]  ;;  %6158 = vmatmul.bf16.vlgmr.msrb.gmra.mxu2 %v11693_v24  ;;  %v7588_v32 = vld [vmem:[%s11454_s28 + $0x330] sm:$0xf0] }
 0x37a   : > { %6176 = vmatpush.bf16.msra.mxu0 %v10499_v52  ;;  %v10467_v3 = vor.u32 %v11339_v58, %v10466_v56  ;;  %6202 = vmatpush.bf16.msra.mxu2 %v7687_v55  ;;  %v10434_v6 = vld [vmem:[%s11454_s28 + $0x1950] sm:$0xf]  ;;  %v7591_v46 = vor.u32 %v10615_v31, %v7588_v32  ;;  %v10543_v51 = vld [vmem:[%s11454_s28 + $0xd4] sm:$0xf]  ;;  %v7847_v52 = vor.u32 %v10679_v36, %v7844_v54 }
 0x37b   : > { %v11331_v8 = vld [vmem:[%s11454_s28 + $0x196c] sm:$0xf0]  ;;  %6171 = vmatmul.bf16.vlgmr.msrb.gmra.mxu3 %v11699_v30  ;;  %v7300_v53 = vld [vmem:[%s11454_s28 + $0xf0] sm:$0xf0] }
 0x37c   : > { %6215 = vmatpush.bf16.msra.mxu3 %v7943_v60  ;;  %v10435_v15 = vor.u32 %v11331_v8, %v10434_v6  ;;  %6190 = vmatpush.bf16.msra.mxu1 %v7399_v7  ;;  %v10402_v40 = vld [vmem:[%s11454_s28 + $0x1910] sm:$0xf]  ;;  %v10607_v55 = vld [vmem:[%s11454_s28 + $0x2d4] sm:$0xf]  ;;  %v7303_v62 = vor.u32 %v10543_v51, %v7300_v53 }
 0x37d   : > { %v11323_v18 = vld [vmem:[%s11454_s28 + $0x192c] sm:$0xf0]  ;;  %v7556_v56 = vld [vmem:[%s11454_s28 + $0x2f0] sm:$0xf0] }
 0x37e   : > { %6177 = vmatpush.bf16.msra.mxu0 %v10467_v3  ;;  %6203 = vmatpush.bf16.msra.mxu2 %v7655_v5  ;;  %v10403_v37 = vor.u32 %v11323_v18, %v10402_v40  ;;  %v10370_v47 = vld [vmem:[%s11454_s28 + $0x18d0] sm:$0xf]  ;;  %v10671_v58 = vld [vmem:[%s11454_s28 + $0x4d4] sm:$0xf]  ;;  %v7559_v63 = vor.u32 %v10607_v55, %v7556_v56  ;;  %v12666_v5 = vpop.f32.mrf.mxu2  ;;  %v7783_v18 = vor.u32 %v10663_v48, %v7780_v41 }
 0x37f   : > { %v11315_v50 = vld [vmem:[%s11454_s28 + $0x18ec] sm:$0xf0]  ;;  %v10535_v3 = vld [vmem:[%s11454_s28 + $0x94] sm:$0xf]  ;;  %v7815_v7 = vor.u32 %v10671_v58, %v7812_v59 }
 0x380   : > { %6216 = vmatpush.bf16.msra.mxu3 %v7911_v26  ;;  %6191 = vmatpush.bf16.msra.mxu1 %v7367_v16  ;;  %v10371_v60 = vor.u32 %v11315_v50, %v10370_v47  ;;  %v10338_v0 = vld [vmem:[%s11454_s28 + $0x1890] sm:$0xf]  ;;  %v7268_v6 = vld [vmem:[%s11454_s28 + $0xb0] sm:$0xf0]  ;;  %v12671_v26 = vpop.f32.mrf.mxu3 }
 0x381   : > { %v11307_v2 = vld [vmem:[%s11454_s28 + $0x18ac] sm:$0xf0]  ;;  %v10599_v8 = vld [vmem:[%s11454_s28 + $0x294] sm:$0xf]  ;;  %v7271_v14 = vor.u32 %v10535_v3, %v7268_v6 }
 0x382   : > { %6178 = vmatpush.bf16.msra.mxu0 %v10435_v15  ;;  %6204 = vmatpush.bf16.msra.mxu2 %v7623_v17  ;;  %v10339_v10 = vor.u32 %v11307_v2, %v10338_v0  ;;  %v7527_v15 = vor.u32 %v10599_v8, %v7524_v9  ;;  %v10306_v16 = vld [vmem:[%s11454_s28 + $0x1850] sm:$0xf]  ;;  %v10527_v40 = vld [vmem:[%s11454_s28 + $0x54] sm:$0xf] }
 0x383   : > { %v11299_v17 = vld [vmem:[%s11454_s28 + $0x186c] sm:$0xf0]  ;;  %v7492_v29 = vld [vmem:[%s11454_s28 + $0x270] sm:$0xf0] }
 0x384   : > { %6217 = vmatpush.bf16.msra.mxu3 %v7879_v23  ;;  %6192 = vmatpush.bf16.msra.mxu1 %v7335_v44  ;;  %v10591_v23 = vld [vmem:[%s11454_s28 + $0x254] sm:$0xf]  ;;  %v10307_v32 = vor.u32 %v11299_v17, %v10306_v16  ;;  %v10274_v36 = vld [vmem:[%s11454_s28 + $0x1810] sm:$0xf]  ;;  %v7239_v44 = vor.u32 %v10527_v40, %v7236_v19 }
 0x385   : > { %v10655_v31 = vld [vmem:[%s11454_s28 + $0x454] sm:$0xf]  ;;  %v11291_v54 = vld [vmem:[%s11454_s28 + $0x182c] sm:$0xf0] }
 0x386   : > { %6179 = vmatpush.bf16.msra.mxu0 %v10403_v37  ;;  %6205 = vmatpush.bf16.msra.mxu2 %v7591_v46  ;;  %v7748_v22 = vld [vmem:[%s11454_s28 + $0x470] sm:$0xf0]  ;;  %v5900_v37 = vadd.f32 %v12588_v49, %v5887_v12  ;;  %v7495_v46 = vor.u32 %v10591_v23, %v7492_v29  ;;  %v5953_v58 = vpop.f32.mrf.mxu2 }
 0x387   : > { %v10519_v47 = vld [vmem:[%s11454_s28 + $0x14] sm:$0xf] }
 0x388   : > { %6218 = vmatpush.bf16.msra.mxu3 %v7847_v52  ;;  %6193 = vmatpush.bf16.msra.mxu1 %v7303_v62  ;;  %v7204_v50 = vld [vmem:[%s11454_s28 + $0x30] sm:$0xf0]  ;;  %v7751_v52 = vor.u32 %v10655_v31, %v7748_v22  ;;  %v5966_v61 = vpop.f32.mrf.mxu3  ;;  %v10275_v62 = vor.u32 %v11291_v54, %v10274_v36  ;;  %v5913_v3 = vadd.f32 %v12593_v4, %v5900_v37 }
 0x389   : > { %v10583_v51 = vld [vmem:[%s11454_s28 + $0x214] sm:$0xf] }
 0x38a   : > { %6180 = vmatpush.bf16.msra.mxu0 %v10371_v60  ;;  %6206 = vmatpush.bf16.msra.mxu2 %v7559_v63  ;;  %v7460_v53 = vld [vmem:[%s11454_s28 + $0x230] sm:$0xf0]  ;;  %v5926_v21 = vadd.f32 %v12647_v35, %v5913_v3  ;;  %v5990_v3 = vpop.f32.mrf.mxu1 }
 0x38b   : > { %v10647_v55 = vld [vmem:[%s11454_s28 + $0x414] sm:$0xf]  ;;  %v7463_v6 = vor.u32 %v10583_v51, %v7460_v53 }
 0x38c   : > { %6219 = vmatpush.bf16.msra.mxu3 %v7815_v7  ;;  %6194 = vmatpush.bf16.msra.mxu1 %v7271_v14  ;;  %v7716_v56 = vld [vmem:[%s11454_s28 + $0x430] sm:$0xf0]  ;;  %v7207_v7 = vor.u32 %v10519_v47, %v7204_v50  ;;  %v5939_v23 = vadd.f32 %v12651_v38, %v5926_v21 }
 0x38d   : > { %v10767_v49 = vld [vmem:[%s11454_s28 + $0x7d4] sm:$0xf]  ;;  %v7719_v48 = vor.u32 %v10647_v55, %v7716_v56 }
 0x38e   : > { %6181 = vmatpush.bf16.msra.mxu0 %v10339_v10  ;;  %6207 = vmatpush.bf16.msra.mxu2 %v7527_v15  ;;  %v8196_v59 = vld [vmem:[%s11454_s28 + $0x7f0] sm:$0xf0]  ;;  %v5952_v38 = vadd.f32 %v12666_v5, %v5939_v23  ;;  %v6003_v23 = vpop.f32.mrf.mxu2 }
 0x38f   : > { %v10831_v60 = vld [vmem:[%s11454_s28 + $0x9d4] sm:$0xf]  ;;  %v8199_v41 = vor.u32 %v10767_v49, %v8196_v59 }
 0x390   : > { %6220 = vmatpush.bf16.msra.mxu3 %v7783_v18  ;;  %v8452_v63 = vld [vmem:[%s11454_s28 + $0x9f0] sm:$0xf0]  ;;  %6195 = vmatpush.bf16.msra.mxu1 %v7239_v44  ;;  %v5965_v61 = vadd.f32 %v12671_v26, %v5952_v38 }
 0x391   : > { %v10895_v0 = vld [vmem:[%s11454_s28 + $0xbd4] sm:$0xf]  ;;  %v8455_v10 = vor.u32 %v10831_v60, %v8452_v63 }
 0x392   : > { %6182 = vmatpush.bf16.msra.mxu0 %v10307_v32  ;;  %v8708_v2 = vld [vmem:[%s11454_s28 + $0xbf0] sm:$0xf0]  ;;  %6208 = vmatpush.bf16.msra.mxu2 %v7495_v46 }
 0x393   : > { %v10959_v8 = vld [vmem:[%s11454_s28 + $0xdd4] sm:$0xf]  ;;  %v8711_v11 = vor.u32 %v10895_v0, %v8708_v2 }
 0x394   : > { %v8964_v9 = vld [vmem:[%s11454_s28 + $0xdf0] sm:$0xf0]  ;;  %6221 = vmatpush.bf16.msra.mxu3 %v7751_v52  ;;  %6196 = vmatpush.bf16.msra.mxu1 %v7207_v7 }
 0x395   : > { %v10759_v12 = vld [vmem:[%s11454_s28 + $0x794] sm:$0xf]  ;;  %v8967_v15 = vor.u32 %v10959_v8, %v8964_v9 }
 0x396   : > { %v8164_v4 = vld [vmem:[%s11454_s28 + $0x7b0] sm:$0xf0]  ;;  %6183 = vmatpush.bf16.msra.mxu0 %v10275_v62  ;;  %6209 = vmatpush.bf16.msra.mxu2 %v7463_v6  ;;  %v5977_v62 = vpop.f32.mrf.mxu0 }
 0x397   : > { %v10823_v14 = vld [vmem:[%s11454_s28 + $0x994] sm:$0xf]  ;;  %v8167_v35 = vor.u32 %v10759_v12, %v8164_v4  ;;  %6197 = vmatmul.bf16.vlgmr.msra.gmra.mxu1 %v11563_v28  ;;  %v5978_v7 = vadd.f32 %v5977_v62, %v5965_v61  ;;  %v298_v62 = vld [vmem:[#allocation2] sm:$0xff] }
 0x398   : > { %v8420_v16 = vld [vmem:[%s11454_s28 + $0x9b0] sm:$0xf0]  ;;  %6222 = vmatpush.bf16.msra.mxu3 %v7719_v48  ;;  %6241 = vmatpush.bf16.msrb.mxu1 %v8455_v10 }
 0x399   : > { %v10887_v17 = vld [vmem:[%s11454_s28 + $0xb94] sm:$0xf]  ;;  %v8423_v29 = vor.u32 %v10823_v14, %v8420_v16  ;;  %6184 = vmatmul.bf16.vlgmr.msra.gmra.mxu0 %v11764_v13  ;;  %6210 = vmatmul.bf16.vlgmr.msra.gmra.mxu2 %v11569_v34 }
 0x39a   : > { %v8676_v40 = vld [vmem:[%s11454_s28 + $0xbb0] sm:$0xf0]  ;;  %6228 = vmatpush.bf16.msrb.mxu0 %v8199_v41  ;;  %6254 = vmatpush.bf16.msrb.mxu2 %v8711_v11 }
 0x39b   : > { %v10951_v18 = vld [vmem:[%s11454_s28 + $0xd94] sm:$0xf]  ;;  %v8679_v31 = vor.u32 %v10887_v17, %v8676_v40  ;;  %6223 = vmatmul.bf16.vlgmr.msra.gmra.mxu3 %v11561_v27 }
 0x39c   : > { %v8932_v19 = vld [vmem:[%s11454_s28 + $0xdb0] sm:$0xf0]  ;;  %6267 = vmatpush.bf16.msrb.mxu3 %v8967_v15  ;;  %6242 = vmatpush.bf16.msrb.mxu1 %v8423_v29  ;;  %v5991_v15 = vadd.f32 %v5990_v3, %v5978_v7 }
 0x39d   : > { %v10751_v22 = vld [vmem:[%s11454_s28 + $0x754] sm:$0xf]  ;;  %v8935_v54 = vor.u32 %v10951_v18, %v8932_v19 }
 0x39e   : > { %v8132_v32 = vld [vmem:[%s11454_s28 + $0x770] sm:$0xf0]  ;;  %6229 = vmatpush.bf16.msrb.mxu0 %v8167_v35  ;;  %6255 = vmatpush.bf16.msrb.mxu2 %v8679_v31 }
 0x39f   : > { %v10815_v36 = vld [vmem:[%s11454_s28 + $0x954] sm:$0xf]  ;;  %v8135_v51 = vor.u32 %v10751_v22, %v8132_v32  ;;  %v6004_v32 = vadd.f32 %v6003_v23, %v5991_v15 }
 0x3a0   : > { %v8388_v37 = vld [vmem:[%s11454_s28 + $0x970] sm:$0xf0]  ;;  %6268 = vmatpush.bf16.msrb.mxu3 %v8935_v54 }
 0x3a1   : > { %v10879_v44 = vld [vmem:[%s11454_s28 + $0xb54] sm:$0xf]  ;;  %v8391_v52 = vor.u32 %v10815_v36, %v8388_v37  ;;  %v6016_v36 = vpop.f32.mrf.mxu3 }
 0x3a2   : > { %v8644_v46 = vld [vmem:[%s11454_s28 + $0xb70] sm:$0xf0]  ;;  %6230 = vmatpush.bf16.msrb.mxu0 %v8135_v51 }
 0x3a3   : > { %v10943_v47 = vld [vmem:[%s11454_s28 + $0xd54] sm:$0xf]  ;;  %v8647_v53 = vor.u32 %v10879_v44, %v8644_v46  ;;  %6243 = vmatpush.bf16.msrb.mxu1 %v8391_v52  ;;  %v5979_v44 = vpop.f32.mrf.mxu0  ;;  %v6705_v46 = vrot.slane %v12515_v57, 4 }
 0x3a4   : > { %v8900_v50 = vld [vmem:[%s11454_s28 + $0xd70] sm:$0xf0] }
 0x3a5   : > { %v10743_v5 = vld [vmem:[%s11454_s28 + $0x714] sm:$0xf]  ;;  %v8903_v58 = vor.u32 %v10943_v47, %v8900_v50  ;;  %6256 = vmatpush.bf16.msrb.mxu2 %v8647_v53  ;;  %v5992_v47 = vpop.f32.mrf.mxu1  ;;  %v6017_v50 = vadd.f32 %v6016_v36, %v6004_v32 }
 0x3a6   : > { %v8100_v55 = vld [vmem:[%s11454_s28 + $0x730] sm:$0xf0] }
 0x3a7   : > { %v10807_v56 = vld [vmem:[%s11454_s28 + $0x914] sm:$0xf]  ;;  %v8103_v2 = vor.u32 %v10743_v5, %v8100_v55  ;;  %6269 = vmatpush.bf16.msrb.mxu3 %v8903_v58 }
 0x3a8   : > { %v8356_v49 = vld [vmem:[%s11454_s28 + $0x930] sm:$0xf0] }
 0x3a9   : > { %v10871_v59 = vld [vmem:[%s11454_s28 + $0xb14] sm:$0xf]  ;;  %v8359_v6 = vor.u32 %v10807_v56, %v8356_v49  ;;  %6231 = vmatpush.bf16.msrb.mxu0 %v8103_v2 }
 0x3aa   : > { %v8612_v60 = vld [vmem:[%s11454_s28 + $0xb30] sm:$0xf0] }
 0x3ab   : > { %v10935_v63 = vld [vmem:[%s11454_s28 + $0xd14] sm:$0xf]  ;;  %v8615_v8 = vor.u32 %v10871_v59, %v8612_v60  ;;  %6244 = vmatpush.bf16.msrb.mxu1 %v8359_v6  ;;  %v6706_v59 = vrot.slane %v6017_v50, 2 }
 0x3ac   : > { %v8868_v0 = vld [vmem:[%s11454_s28 + $0xd30] sm:$0xf0] }
 0x3ad   : > { %v10735_v9 = vld [vmem:[%s11454_s28 + $0x6d4] sm:$0xf]  ;;  %v8871_v41 = vor.u32 %v10935_v63, %v8868_v0  ;;  %6257 = vmatpush.bf16.msrb.mxu2 %v8615_v8  ;;  %v6713_v3 = vsel %vm6712_vm1, %v6705_v46, %v6706_v59 }
 0x3ae   : > { %v8068_v48 = vld [vmem:[%s11454_s28 + $0x6f0] sm:$0xf0] }
 0x3af   : > { %v10799_v26 = vld [vmem:[%s11454_s28 + $0x8d4] sm:$0xf]  ;;  %v8071_v14 = vor.u32 %v10735_v9, %v8068_v48  ;;  %6270 = vmatpush.bf16.msrb.mxu3 %v8871_v41 }
 0x3b0   : > { %v8324_v21 = vld [vmem:[%s11454_s28 + $0x8f0] sm:$0xf0] }
 0x3b1   : > { %v10863_v10 = vld [vmem:[%s11454_s28 + $0xad4] sm:$0xf]  ;;  %v8327_v16 = vor.u32 %v10799_v26, %v8324_v21  ;;  %6232 = vmatpush.bf16.msrb.mxu0 %v8071_v14  ;;  %v6715_v26 = vsel %vm6714_vm2, %v12297_v1, %v6713_v3 }
 0x3b2   : > { %v8580_v11 = vld [vmem:[%s11454_s28 + $0xaf0] sm:$0xf0] }
 0x3b3   : > { %v10927_v12 = vld [vmem:[%s11454_s28 + $0xcd4] sm:$0xf]  ;;  %v8583_v17 = vor.u32 %v10863_v10, %v8580_v11  ;;  %6245 = vmatpush.bf16.msrb.mxu1 %v8327_v16 }
 0x3b4   : > { %v8836_v4 = vld [vmem:[%s11454_s28 + $0xcf0] sm:$0xf0] }
 0x3b5   : > { %v10727_v40 = vld [vmem:[%s11454_s28 + $0x694] sm:$0xf]  ;;  %v8839_v35 = vor.u32 %v10927_v12, %v8836_v4  ;;  %6258 = vmatpush.bf16.msrb.mxu2 %v8583_v17  ;;  %v6005_v12 = vpop.f32.mrf.mxu2  ;;  %v6721_v4 = vadd.f32 %v6715_v26, %v298_v62  ;;  %v6018_v17 = vpop.f32.mrf.mxu3 }
 0x3b6   : > { %v8036_v18 = vld [vmem:[%s11454_s28 + $0x6b0] sm:$0xf0] }
 0x3b7   : > { %v10791_v19 = vld [vmem:[%s11454_s28 + $0x894] sm:$0xf]  ;;  %v8039_v38 = vor.u32 %v10727_v40, %v8036_v18  ;;  %6271 = vmatpush.bf16.msrb.mxu3 %v8839_v35  ;;  %6723 = vst [vmem:[#allocation2] sm:$0xff] %v6721_v4  ;;  %v6029_v4 = vpop.f32.mrf.mxu0 }
 0x3b8   : > { %v8292_v29 = vld [vmem:[%s11454_s28 + $0x8b0] sm:$0xf0] }
 0x3b9   : > { %v10855_v31 = vld [vmem:[%s11454_s28 + $0xa94] sm:$0xf]  ;;  %v8295_v51 = vor.u32 %v10791_v19, %v8292_v29  ;;  %6233 = vmatpush.bf16.msrb.mxu0 %v8039_v38 }
 0x3ba   : > { %v8548_v22 = vld [vmem:[%s11454_s28 + $0xab0] sm:$0xf0] }
 0x3bb   : > { %v10919_v54 = vld [vmem:[%s11454_s28 + $0xc94] sm:$0xf]  ;;  %v8551_v52 = vor.u32 %v10855_v31, %v8548_v22  ;;  %6246 = vmatpush.bf16.msrb.mxu1 %v8295_v51 }
 0x3bc   : > { %v8804_v37 = vld [vmem:[%s11454_s28 + $0xcb0] sm:$0xf0] }
 0x3bd   : > { %v10719_v53 = vld [vmem:[%s11454_s28 + $0x654] sm:$0xf]  ;;  %v8807_v57 = vor.u32 %v10919_v54, %v8804_v37  ;;  %6259 = vmatpush.bf16.msrb.mxu2 %v8551_v52 }
 0x3be   : > { %v8004_v5 = vld [vmem:[%s11454_s28 + $0x670] sm:$0xf0] }
 0x3bf   : > { %v10783_v55 = vld [vmem:[%s11454_s28 + $0x854] sm:$0xf]  ;;  %v8007_v63 = vor.u32 %v10719_v53, %v8004_v5  ;;  %6272 = vmatpush.bf16.msrb.mxu3 %v8807_v57 }
 0x3c0   : > { %v8260_v56 = vld [vmem:[%s11454_s28 + $0x870] sm:$0xf0] }
 0x3c1   : > { %v10847_v58 = vld [vmem:[%s11454_s28 + $0xa54] sm:$0xf]  ;;  %v8263_v7 = vor.u32 %v10783_v55, %v8260_v56  ;;  %6234 = vmatpush.bf16.msrb.mxu0 %v8007_v63 }
 0x3c2   : > { %v8516_v49 = vld [vmem:[%s11454_s28 + $0xa70] sm:$0xf0] }
 0x3c3   : > { %v10911_v60 = vld [vmem:[%s11454_s28 + $0xc54] sm:$0xf]  ;;  %v8519_v6 = vor.u32 %v10847_v58, %v8516_v49  ;;  %6247 = vmatpush.bf16.msrb.mxu1 %v8263_v7 }
 0x3c4   : > { %v8772_v61 = vld [vmem:[%s11454_s28 + $0xc70] sm:$0xf0] }
 0x3c5   : > { %v10711_v0 = vld [vmem:[%s11454_s28 + $0x614] sm:$0xf]  ;;  %v8775_v41 = vor.u32 %v10911_v60, %v8772_v61  ;;  %6260 = vmatpush.bf16.msrb.mxu2 %v8519_v6 }
 0x3c6   : > { %v7972_v2 = vld [vmem:[%s11454_s28 + $0x630] sm:$0xf0] }
 0x3c7   : > { %v10775_v8 = vld [vmem:[%s11454_s28 + $0x814] sm:$0xf]  ;;  %v7975_v40 = vor.u32 %v10711_v0, %v7972_v2  ;;  %6273 = vmatpush.bf16.msrb.mxu3 %v8775_v41 }
 0x3c8   : > { %v8228_v9 = vld [vmem:[%s11454_s28 + $0x830] sm:$0xf0] }
 0x3c9   : > { %v10839_v48 = vld [vmem:[%s11454_s28 + $0xa14] sm:$0xf]  ;;  %v8231_v35 = vor.u32 %v10775_v8, %v8228_v9  ;;  %6235 = vmatpush.bf16.msrb.mxu0 %v7975_v40 }
 0x3ca   : > { %v8484_v21 = vld [vmem:[%s11454_s28 + $0xa30] sm:$0xf0] }
 0x3cb   : > { %v10903_v10 = vld [vmem:[%s11454_s28 + $0xc14] sm:$0xf]  ;;  %v8487_v23 = vor.u32 %v10839_v48, %v8484_v21  ;;  %6248 = vmatpush.bf16.msrb.mxu1 %v8231_v35 }
 0x3cc   : > { %v8740_v11 = vld [vmem:[%s11454_s28 + $0xc30] sm:$0xf0]  ;;  %6236 = vmatmul.bf16.vlgmr.msrb.gmra.mxu0 %v11567_v33 }
 0x3cd   : > { %v11023_v14 = vld [vmem:[%s11454_s28 + $0xfd4] sm:$0xf]  ;;  %v8743_v22 = vor.u32 %v10903_v10, %v8740_v11  ;;  %6261 = vmatpush.bf16.msrb.mxu2 %v8487_v23 }
 0x3ce   : > { %v9220_v15 = vld [vmem:[%s11454_s28 + $0xff0] sm:$0xf0]  ;;  %6249 = vmatmul.bf16.vlgmr.msrb.gmra.mxu1 %v11619_v42 }
 0x3cf   : > { %v11087_v16 = vld [vmem:[%s11454_s28 + $0x11d4] sm:$0xf]  ;;  %v9223_v32 = vor.u32 %v11023_v14, %v9220_v15  ;;  %6274 = vmatpush.bf16.msrb.mxu3 %v8743_v22 }
 0x3d0   : > { %v9476_v18 = vld [vmem:[%s11454_s28 + $0x11f0] sm:$0xf0]  ;;  %6262 = vmatmul.bf16.vlgmr.msrb.gmra.mxu2 %v11623_v45 }
 0x3d1   : > { %v11151_v1 = vld [vmem:[%s11454_s28 + $0x13d4] sm:$0xf]  ;;  %v9479_v36 = vor.u32 %v11087_v16, %v9476_v18  ;;  %6280 = vmatpush.bf16.msra.mxu0 %v9223_v32  ;;  %v6042_v18 = vpop.f32.mrf.mxu1 }
 0x3d2   : > { %v9732_v19 = vld [vmem:[%s11454_s28 + $0x13f0] sm:$0xf0]  ;;  %6275 = vmatmul.bf16.vlgmr.msrb.gmra.mxu3 %v11615_v39 }
 0x3d3   : > { %v11215_v29 = vld [vmem:[%s11454_s28 + $0x15d4] sm:$0xf]  ;;  %v9735_v54 = vor.u32 %v11151_v1, %v9732_v19  ;;  %6293 = vmatpush.bf16.msra.mxu1 %v9479_v36 }
 0x3d4   : > { %v9988_v31 = vld [vmem:[%s11454_s28 + $0x15f0] sm:$0xf0] }
 0x3d5   : > { %v11015_v37 = vld [vmem:[%s11454_s28 + $0xf94] sm:$0xf]  ;;  %v9991_v38 = vor.u32 %v11215_v29, %v9988_v31  ;;  %6306 = vmatpush.bf16.msra.mxu2 %v9735_v54  ;;  %v6043_v29 = vadd.f32 %v6042_v18, %v6029_v4 }
 0x3d6   : > { %v9188_v44 = vld [vmem:[%s11454_s28 + $0xfb0] sm:$0xf0] }
 0x3d7   : > { %v11079_v46 = vld [vmem:[%s11454_s28 + $0x1194] sm:$0xf]  ;;  %v9191_v5 = vor.u32 %v11015_v37, %v9188_v44  ;;  %6319 = vmatpush.bf16.msra.mxu3 %v9991_v38  ;;  %v6055_v38 = vpop.f32.mrf.mxu2 }
 0x3d8   : > { %v9444_v47 = vld [vmem:[%s11454_s28 + $0x11b0] sm:$0xf0] }
 0x3d9   : > { %v11143_v50 = vld [vmem:[%s11454_s28 + $0x1394] sm:$0xf]  ;;  %v9447_v55 = vor.u32 %v11079_v46, %v9444_v47  ;;  %6281 = vmatpush.bf16.msra.mxu0 %v9191_v5  ;;  %v6068_v5 = vpop.f32.mrf.mxu3 }
 0x3da   : > { %v9700_v51 = vld [vmem:[%s11454_s28 + $0x13b0] sm:$0xf0] }
 0x3db   : > { %v11207_v52 = vld [vmem:[%s11454_s28 + $0x1594] sm:$0xf]  ;;  %v9703_v57 = vor.u32 %v11143_v50, %v9700_v51  ;;  %6294 = vmatpush.bf16.msra.mxu1 %v9447_v55 }
 0x3dc   : > { %v9956_v53 = vld [vmem:[%s11454_s28 + $0x15b0] sm:$0xf0] }
 0x3dd   : > { %v11007_v56 = vld [vmem:[%s11454_s28 + $0xf54] sm:$0xf]  ;;  %v9959_v59 = vor.u32 %v11207_v52, %v9956_v53  ;;  %6307 = vmatpush.bf16.msra.mxu2 %v9703_v57  ;;  %v6056_v53 = vadd.f32 %v6055_v38, %v6043_v29 }
 0x3de   : > { %v9156_v58 = vld [vmem:[%s11454_s28 + $0xf70] sm:$0xf0] }
 0x3df   : > { %v11071_v49 = vld [vmem:[%s11454_s28 + $0x1154] sm:$0xf]  ;;  %v9159_v2 = vor.u32 %v11007_v56, %v9156_v58  ;;  %6320 = vmatpush.bf16.msra.mxu3 %v9959_v59  ;;  %v12822_v58 = vadd.f32 %v6068_v5, %v6056_v53 }
 0x3e0   : > { %v9412_v60 = vld [vmem:[%s11454_s28 + $0x1170] sm:$0xf0] }
 0x3e1   : > { %v11135_v61 = vld [vmem:[%s11454_s28 + $0x1354] sm:$0xf]  ;;  %v9415_v3 = vor.u32 %v11071_v49, %v9412_v60  ;;  %6282 = vmatpush.bf16.msra.mxu0 %v9159_v2  ;;  %v6031_v49 = vpop.f32.mrf.mxu0  ;;  %v6070_v18 = vpop.f32.mrf.mxu3 }
 0x3e2   : > { %v9668_v62 = vld [vmem:[%s11454_s28 + $0x1370] sm:$0xf0]  ;;  %v10636_v49 = vld [vmem:[%s11454_s28 + $0x3b4] sm:$0xf0] }
 0x3e3   : > { %v11199_v63 = vld [vmem:[%s11454_s28 + $0x1554] sm:$0xf]  ;;  %v9671_v7 = vor.u32 %v11135_v61, %v9668_v62  ;;  %6295 = vmatpush.bf16.msra.mxu1 %v9415_v3 }
 0x3e4   : > { %v9924_v0 = vld [vmem:[%s11454_s28 + $0x1570] sm:$0xf0] }
 0x3e5   : > { %v10999_v6 = vld [vmem:[%s11454_s28 + $0xf14] sm:$0xf]  ;;  %v9927_v48 = vor.u32 %v11199_v63, %v9924_v0  ;;  %6308 = vmatpush.bf16.msra.mxu2 %v9671_v7  ;;  %v6044_v0 = vpop.f32.mrf.mxu1 }
 0x3e6   : > { %v9124_v8 = vld [vmem:[%s11454_s28 + $0xf30] sm:$0xf0] }
 0x3e7   : > { %v11063_v9 = vld [vmem:[%s11454_s28 + $0x1114] sm:$0xf]  ;;  %v9127_v12 = vor.u32 %v10999_v6, %v9124_v8  ;;  %6321 = vmatpush.bf16.msra.mxu3 %v9927_v48 }
 0x3e8   : > { %v9380_v26 = vld [vmem:[%s11454_s28 + $0x1130] sm:$0xf0] }
 0x3e9   : > { %v11127_v41 = vld [vmem:[%s11454_s28 + $0x1314] sm:$0xf]  ;;  %v9383_v14 = vor.u32 %v11063_v9, %v9380_v26  ;;  %6283 = vmatpush.bf16.msra.mxu0 %v9127_v12  ;;  %v6081_v18 = vpop.f32.mrf.mxu0 }
 0x3ea   : > { %v9636_v21 = vld [vmem:[%s11454_s28 + $0x1330] sm:$0xf0] }
 0x3eb   : > { %v11191_v10 = vld [vmem:[%s11454_s28 + $0x1514] sm:$0xf]  ;;  %v9639_v15 = vor.u32 %v11127_v41, %v9636_v21  ;;  %6296 = vmatpush.bf16.msra.mxu1 %v9383_v14  ;;  %v6057_v14 = vpop.f32.mrf.mxu2 }
 0x3ec   : > { %v9892_v11 = vld [vmem:[%s11454_s28 + $0x1530] sm:$0xf0]  ;;  %v7338_v14 = vld [vmem:[%s11454_s28 + $0x118] sm:$0xf] }
 0x3ed   : > { %v10991_v16 = vld [vmem:[%s11454_s28 + $0xed4] sm:$0xf]  ;;  %v9895_v1 = vor.u32 %v11191_v10, %v9892_v11  ;;  %6309 = vmatpush.bf16.msra.mxu2 %v9639_v15 }
 0x3ee   : > { %v9092_v17 = vld [vmem:[%s11454_s28 + $0xef0] sm:$0xf0] }
 0x3ef   : > { %v11055_v40 = vld [vmem:[%s11454_s28 + $0x10d4] sm:$0xf]  ;;  %v9095_v32 = vor.u32 %v10991_v16, %v9092_v17  ;;  %6322 = vmatpush.bf16.msra.mxu3 %v9895_v1 }
 0x3f0   : > { %v9348_v19 = vld [vmem:[%s11454_s28 + $0x10f0] sm:$0xf0] }
 0x3f1   : > { %v11119_v35 = vld [vmem:[%s11454_s28 + $0x12d4] sm:$0xf]  ;;  %v9351_v36 = vor.u32 %v11055_v40, %v9348_v19  ;;  %6284 = vmatpush.bf16.msra.mxu0 %v9095_v32 }
 0x3f2   : > { %v9604_v23 = vld [vmem:[%s11454_s28 + $0x12f0] sm:$0xf0] }
 0x3f3   : > { %v11183_v31 = vld [vmem:[%s11454_s28 + $0x14d4] sm:$0xf]  ;;  %v9607_v54 = vor.u32 %v11119_v35, %v9604_v23  ;;  %6297 = vmatpush.bf16.msra.mxu1 %v9351_v36 }
 0x3f4   : > { %v9860_v22 = vld [vmem:[%s11454_s28 + $0x14f0] sm:$0xf0] }
 0x3f5   : > { %v10983_v37 = vld [vmem:[%s11454_s28 + $0xe94] sm:$0xf]  ;;  %v9863_v47 = vor.u32 %v11183_v31, %v9860_v22  ;;  %6310 = vmatpush.bf16.msra.mxu2 %v9607_v54  ;;  %v7434_v31 = vld [vmem:[%s11454_s28 + $0x1d8] sm:$0xf] }
 0x3f6   : > { %v9060_v44 = vld [vmem:[%s11454_s28 + $0xeb0] sm:$0xf0]  ;;  %v10580_v22 = vld [vmem:[%s11454_s28 + $0x1f4] sm:$0xf0] }
 0x3f7   : > { %v11047_v46 = vld [vmem:[%s11454_s28 + $0x1094] sm:$0xf]  ;;  %v9063_v56 = vor.u32 %v10983_v37, %v9060_v44  ;;  %6323 = vmatpush.bf16.msra.mxu3 %v9863_v47  ;;  %v7690_v54 = vld [vmem:[%s11454_s28 + $0x3d8] sm:$0xf]  ;;  %v7435_v47 = vor.u32 %v10580_v22, %v7434_v31  ;;  %v6082_v31 = vadd.f32 %v6081_v18, %v12822_v58  ;;  %v6094_v22 = vpop.f32.mrf.mxu1 }
 0x3f8   : > { %v9316_v50 = vld [vmem:[%s11454_s28 + $0x10b0] sm:$0xf0]  ;;  %v10644_v37 = vld [vmem:[%s11454_s28 + $0x3f4] sm:$0xf0] }
 0x3f9   : > { %v11111_v51 = vld [vmem:[%s11454_s28 + $0x1294] sm:$0xf]  ;;  %v9319_v59 = vor.u32 %v11047_v46, %v9316_v50  ;;  %6285 = vmatpush.bf16.msra.mxu0 %v9063_v56  ;;  %v7691_v53 = vor.u32 %v10644_v37, %v7690_v54  ;;  %v7658_v56 = vld [vmem:[%s11454_s28 + $0x398] sm:$0xf] }
 0x3fa   : > { %v9572_v52 = vld [vmem:[%s11454_s28 + $0x12b0] sm:$0xf0]  ;;  %v7306_v54 = vld [vmem:[%s11454_s28 + $0xd8] sm:$0xf] }
 0x3fb   : > { %v11175_v55 = vld [vmem:[%s11454_s28 + $0x1494] sm:$0xf]  ;;  %v9575_v60 = vor.u32 %v11111_v51, %v9572_v52  ;;  %6298 = vmatpush.bf16.msra.mxu1 %v9319_v59  ;;  %v10548_v37 = vld [vmem:[%s11454_s28 + $0xf4] sm:$0xf0] }
 0x3fc   : > { %v9828_v57 = vld [vmem:[%s11454_s28 + $0x14b0] sm:$0xf0] }
 0x3fd   : > { %v10975_v61 = vld [vmem:[%s11454_s28 + $0xe54] sm:$0xf]  ;;  %v9831_v2 = vor.u32 %v11175_v55, %v9828_v57  ;;  %6311 = vmatpush.bf16.msra.mxu2 %v9575_v60  ;;  %v7402_v55 = vld [vmem:[%s11454_s28 + $0x198] sm:$0xf] }
 0x3fe   : > { %v9028_v62 = vld [vmem:[%s11454_s28 + $0xe70] sm:$0xf0]  ;;  %v10572_v57 = vld [vmem:[%s11454_s28 + $0x1b4] sm:$0xf0] }
 0x3ff   : > { %v11039_v63 = vld [vmem:[%s11454_s28 + $0x1054] sm:$0xf]  ;;  %v9031_v48 = vor.u32 %v10975_v61, %v9028_v62  ;;  %6324 = vmatpush.bf16.msra.mxu3 %v9831_v2  ;;  %v7403_v61 = vor.u32 %v10572_v57, %v7402_v55  ;;  %v7659_v2 = vor.u32 %v10636_v49, %v7658_v56  ;;  %v7274_v56 = vld [vmem:[%s11454_s28 + $0x98] sm:$0xf] }
 0x400   : > { %v9284_v3 = vld [vmem:[%s11454_s28 + $0x1070] sm:$0xf0]  ;;  %v10540_v49 = vld [vmem:[%s11454_s28 + $0xb4] sm:$0xf0] }
 0x401   : > { %v11103_v7 = vld [vmem:[%s11454_s28 + $0x1254] sm:$0xf]  ;;  %v9287_v21 = vor.u32 %v11039_v63, %v9284_v3  ;;  %6286 = vmatpush.bf16.msra.mxu0 %v9031_v48 }
 0x402   : > { %v9540_v6 = vld [vmem:[%s11454_s28 + $0x1270] sm:$0xf0] }
 0x403   : > { %v11167_v8 = vld [vmem:[%s11454_s28 + $0x1454] sm:$0xf]  ;;  %v9543_v10 = vor.u32 %v11103_v7, %v9540_v6  ;;  %6299 = vmatpush.bf16.msra.mxu1 %v9287_v21  ;;  %v7370_v7 = vld [vmem:[%s11454_s28 + $0x158] sm:$0xf] }
 0x404   : > { %v9796_v9 = vld [vmem:[%s11454_s28 + $0x1470] sm:$0xf0]  ;;  %v10564_v6 = vld [vmem:[%s11454_s28 + $0x174] sm:$0xf0] }
 0x405   : > { %v10967_v26 = vld [vmem:[%s11454_s28 + $0xe14] sm:$0xf]  ;;  %v9799_v15 = vor.u32 %v11167_v8, %v9796_v9  ;;  %6312 = vmatpush.bf16.msra.mxu2 %v9543_v10  ;;  %v7626_v8 = vld [vmem:[%s11454_s28 + $0x358] sm:$0xf] }
 0x406   : > { %v8996_v41 = vld [vmem:[%s11454_s28 + $0xe30] sm:$0xf0]  ;;  %v10628_v9 = vld [vmem:[%s11454_s28 + $0x374] sm:$0xf0] }
 0x407   : > { %v11031_v11 = vld [vmem:[%s11454_s28 + $0x1014] sm:$0xf]  ;;  %v8999_v23 = vor.u32 %v10967_v26, %v8996_v41  ;;  %6325 = vmatpush.bf16.msra.mxu3 %v9799_v15  ;;  %v7371_v41 = vor.u32 %v10564_v6, %v7370_v7  ;;  %v10556_v15 = vld [vmem:[%s11454_s28 + $0x134] sm:$0xf0]  ;;  %v7275_v7 = vor.u32 %v10540_v49, %v7274_v56 }
 0x408   : > { %v9252_v12 = vld [vmem:[%s11454_s28 + $0x1030] sm:$0xf0]  ;;  %v10700_v56 = vld [vmem:[%s11454_s28 + $0x5b4] sm:$0xf0] }
 0x409   : > { %v11095_v4 = vld [vmem:[%s11454_s28 + $0x1214] sm:$0xf]  ;;  %v9255_v32 = vor.u32 %v11031_v11, %v9252_v12  ;;  %6287 = vmatpush.bf16.msra.mxu0 %v8999_v23  ;;  %v7627_v12 = vor.u32 %v10628_v9, %v7626_v8  ;;  %v8170_v49 = vld [vmem:[%s11454_s28 + $0x798] sm:$0xf] }
 0x40a   : > { %v9508_v16 = vld [vmem:[%s11454_s28 + $0x1230] sm:$0xf0] }
 0x40b   : > { %v11159_v17 = vld [vmem:[%s11454_s28 + $0x1414] sm:$0xf]  ;;  %v9511_v36 = vor.u32 %v11095_v4, %v9508_v16  ;;  %6300 = vmatpush.bf16.msra.mxu1 %v9255_v32  ;;  %v7594_v16 = vld [vmem:[%s11454_s28 + $0x318] sm:$0xf] }
 0x40c   : > { %v9764_v40 = vld [vmem:[%s11454_s28 + $0x1430] sm:$0xf0]  ;;  %6288 = vmatmul.bf16.vlgmr.msra.gmra.mxu0 %v11621_v43 }
 0x40d   : > { %v11279_v1 = vld [vmem:[%s11454_s28 + $0x17d4] sm:$0xf]  ;;  %v9767_v44 = vor.u32 %v11159_v17, %v9764_v40  ;;  %6313 = vmatpush.bf16.msra.mxu2 %v9511_v36  ;;  %v10620_v17 = vld [vmem:[%s11454_s28 + $0x334] sm:$0xf0] }
 0x40e   : > { %v10244_v19 = vld [vmem:[%s11454_s28 + $0x17f0] sm:$0xf0]  ;;  %6301 = vmatmul.bf16.vlgmr.msra.gmra.mxu1 %v11688_v20  ;;  %v7595_v32 = vor.u32 %v10620_v17, %v7594_v16 }
 0x40f   : > { %v11343_v35 = vld [vmem:[%s11454_s28 + $0x19d4] sm:$0xf]  ;;  %v10247_v46 = vor.u32 %v11279_v1, %v10244_v19  ;;  %6326 = vmatpush.bf16.msra.mxu3 %v9767_v44  ;;  %v7339_v19 = vor.u32 %v10556_v15, %v7338_v14  ;;  %v7562_v44 = vld [vmem:[%s11454_s28 + $0x2d8] sm:$0xf] }
 0x410   : > { %v10500_v29 = vld [vmem:[%s11454_s28 + $0x19f0] sm:$0xf0]  ;;  %6314 = vmatmul.bf16.vlgmr.msra.gmra.mxu2 %v11695_v25 }
 0x411   : > { %v10503_v38 = vor.u32 %v11343_v35, %v10500_v29  ;;  %v11271_v50 = vld [vmem:[%s11454_s28 + $0x1794] sm:$0xf]  ;;  %6332 = vmatpush.bf16.msrb.mxu0 %v10247_v46  ;;  %6358 = vmatpush.bf16.msrb.mxu2 %v7435_v47  ;;  %v10612_v46 = vld [vmem:[%s11454_s28 + $0x2f4] sm:$0xf0] }
 0x412   : > { %v10212_v51 = vld [vmem:[%s11454_s28 + $0x17b0] sm:$0xf0]  ;;  %6327 = vmatmul.bf16.vlgmr.msra.gmra.mxu3 %v11693_v24  ;;  %v7563_v55 = vor.u32 %v10612_v46, %v7562_v44  ;;  %v10772_v44 = vld [vmem:[%s11454_s28 + $0x7f4] sm:$0xf0] }
 0x413   : > { %v11335_v52 = vld [vmem:[%s11454_s28 + $0x1994] sm:$0xf]  ;;  %v10215_v59 = vor.u32 %v11271_v50, %v10212_v51  ;;  %6345 = vmatpush.bf16.msrb.mxu1 %v10503_v38  ;;  %6371 = vmatpush.bf16.msrb.mxu3 %v7691_v53  ;;  %v6095_v38 = vadd.f32 %v6094_v22, %v6082_v31  ;;  %v7307_v50 = vor.u32 %v10548_v37, %v7306_v54  ;;  %v10588_v31 = vld [vmem:[%s11454_s28 + $0x234] sm:$0xf0] }
 0x414   : > { %v10468_v5 = vld [vmem:[%s11454_s28 + $0x19b0] sm:$0xf0]  ;;  %v8202_v54 = vld [vmem:[%s11454_s28 + $0x7d8] sm:$0xf] }
 0x415   : > { %v10471_v60 = vor.u32 %v11335_v52, %v10468_v5  ;;  %v11263_v62 = vld [vmem:[%s11454_s28 + $0x1754] sm:$0xf]  ;;  %6333 = vmatpush.bf16.msrb.mxu0 %v10215_v59  ;;  %6359 = vmatpush.bf16.msrb.mxu2 %v7403_v61  ;;  %v6107_v5 = vpop.f32.mrf.mxu2  ;;  %v7530_v61 = vld [vmem:[%s11454_s28 + $0x298] sm:$0xf] }
 0x416   : > { %v10180_v63 = vld [vmem:[%s11454_s28 + $0x1770] sm:$0xf0]  ;;  %v6108_v59 = vadd.f32 %v6107_v5, %v6095_v38  ;;  %v8458_v46 = vld [vmem:[%s11454_s28 + $0x9d8] sm:$0xf]  ;;  %v8203_v5 = vor.u32 %v10772_v44, %v8202_v54 }
 0x417   : > { %v11327_v0 = vld [vmem:[%s11454_s28 + $0x1954] sm:$0xf]  ;;  %v10183_v48 = vor.u32 %v11263_v62, %v10180_v63  ;;  %6346 = vmatpush.bf16.msrb.mxu1 %v10471_v60  ;;  %6372 = vmatpush.bf16.msrb.mxu3 %v7659_v2  ;;  %v6120_v60 = vpop.f32.mrf.mxu3  ;;  %v10604_v62 = vld [vmem:[%s11454_s28 + $0x2b4] sm:$0xf0]  ;;  %v6083_v2 = vpop.f32.mrf.mxu0 }
 0x418   : > { %v10436_v3 = vld [vmem:[%s11454_s28 + $0x1970] sm:$0xf0]  ;;  %v10836_v38 = vld [vmem:[%s11454_s28 + $0x9f4] sm:$0xf0] }
 0x419   : > { %v10439_v26 = vor.u32 %v11327_v0, %v10436_v3  ;;  %v11255_v21 = vld [vmem:[%s11454_s28 + $0x1714] sm:$0xf]  ;;  %6334 = vmatpush.bf16.msrb.mxu0 %v10183_v48  ;;  %6360 = vmatpush.bf16.msrb.mxu2 %v7371_v41  ;;  %v12893_v0 = vadd.f32 %v6120_v60, %v6108_v59  ;;  %v6096_v48 = vpop.f32.mrf.mxu1  ;;  %v10764_v60 = vld [vmem:[%s11454_s28 + $0x7b4] sm:$0xf0] }
 0x41a   : > { %v10148_v10 = vld [vmem:[%s11454_s28 + $0x1730] sm:$0xf0]  ;;  %v10892_v2 = vld [vmem:[%s11454_s28 + $0xbb4] sm:$0xf0] }
 0x41b   : > { %v11319_v11 = vld [vmem:[%s11454_s28 + $0x1914] sm:$0xf]  ;;  %v10151_v40 = vor.u32 %v11255_v21, %v10148_v10  ;;  %6347 = vmatpush.bf16.msrb.mxu1 %v10439_v26  ;;  %6373 = vmatpush.bf16.msrb.mxu3 %v7627_v12  ;;  %v7531_v26 = vor.u32 %v10604_v62, %v7530_v61  ;;  %v7242_v21 = vld [vmem:[%s11454_s28 + $0x58] sm:$0xf] }
 0x41c   : > { %v10404_v4 = vld [vmem:[%s11454_s28 + $0x1930] sm:$0xf0]  ;;  %v10532_v10 = vld [vmem:[%s11454_s28 + $0x74] sm:$0xf0] }
 0x41d   : > { %v10407_v1 = vor.u32 %v11319_v11, %v10404_v4  ;;  %v11247_v35 = vld [vmem:[%s11454_s28 + $0x16d4] sm:$0xf]  ;;  %6335 = vmatpush.bf16.msrb.mxu0 %v10151_v40  ;;  %6361 = vmatpush.bf16.msrb.mxu2 %v7339_v19  ;;  %v7498_v11 = vld [vmem:[%s11454_s28 + $0x258] sm:$0xf]  ;;  %v7243_v17 = vor.u32 %v10532_v10, %v7242_v21  ;;  %v6109_v19 = vpop.f32.mrf.mxu2 }
 0x41e   : > { %v10116_v23 = vld [vmem:[%s11454_s28 + $0x16f0] sm:$0xf0]  ;;  %v10596_v12 = vld [vmem:[%s11454_s28 + $0x274] sm:$0xf0] }
 0x41f   : > { %v11311_v29 = vld [vmem:[%s11454_s28 + $0x18d4] sm:$0xf]  ;;  %v10119_v47 = vor.u32 %v11247_v35, %v10116_v23  ;;  %6348 = vmatpush.bf16.msrb.mxu1 %v10407_v1  ;;  %6374 = vmatpush.bf16.msrb.mxu3 %v7595_v32  ;;  %v7210_v1 = vld [vmem:[%s11454_s28 + $0x18] sm:$0xf]  ;;  %v7499_v35 = vor.u32 %v10596_v12, %v7498_v11  ;;  %v6122_v22 = vpop.f32.mrf.mxu3 }
 0x420   : > { %v10372_v36 = vld [vmem:[%s11454_s28 + $0x18f0] sm:$0xf0]  ;;  %v10524_v23 = vld [vmem:[%s11454_s28 + $0x34] sm:$0xf0] }
 0x421   : > { %v10375_v58 = vor.u32 %v11311_v29, %v10372_v36  ;;  %v11239_v51 = vld [vmem:[%s11454_s28 + $0x1694] sm:$0xf]  ;;  %6336 = vmatpush.bf16.msrb.mxu0 %v10119_v47  ;;  %6362 = vmatpush.bf16.msrb.mxu2 %v7307_v50  ;;  %v7466_v29 = vld [vmem:[%s11454_s28 + $0x218] sm:$0xf] }
 0x422   : > { %v10084_v52 = vld [vmem:[%s11454_s28 + $0x16b0] sm:$0xf0]  ;;  %v7946_v32 = vld [vmem:[%s11454_s28 + $0x5d8] sm:$0xf] }
 0x423   : > { %v11303_v53 = vld [vmem:[%s11454_s28 + $0x1894] sm:$0xf]  ;;  %v10087_v63 = vor.u32 %v11239_v51, %v10084_v52  ;;  %6349 = vmatpush.bf16.msrb.mxu1 %v10375_v58  ;;  %6375 = vmatpush.bf16.msrb.mxu3 %v7563_v55  ;;  %v10708_v36 = vld [vmem:[%s11454_s28 + $0x5f4] sm:$0xf0]  ;;  %v7211_v58 = vor.u32 %v10524_v23, %v7210_v1  ;;  %v7467_v52 = vor.u32 %v10588_v31, %v7466_v29  ;;  %v6133_v23 = vpop.f32.mrf.mxu0 }
 0x424   : > { %v10340_v57 = vld [vmem:[%s11454_s28 + $0x18b0] sm:$0xf0]  ;;  %v8714_v50 = vld [vmem:[%s11454_s28 + $0xbd8] sm:$0xf]  ;;  %v8459_v55 = vor.u32 %v10836_v38, %v8458_v46  ;;  %v6134_v22 = vadd.f32 %v6133_v23, %v12893_v0 }
 0x425   : > { %v10343_v3 = vor.u32 %v11303_v53, %v10340_v57  ;;  %v11231_v6 = vld [vmem:[%s11454_s28 + $0x1654] sm:$0xf]  ;;  %6337 = vmatpush.bf16.msrb.mxu0 %v10087_v63  ;;  %6363 = vmatpush.bf16.msrb.mxu2 %v7275_v7  ;;  %v10900_v51 = vld [vmem:[%s11454_s28 + $0xbf4] sm:$0xf0]  ;;  %v7947_v53 = vor.u32 %v10708_v36, %v7946_v32  ;;  %v8171_v7 = vor.u32 %v10764_v60, %v8170_v49  ;;  %v6146_v36 = vpop.f32.mrf.mxu1 }
 0x426   : > { %v10052_v8 = vld [vmem:[%s11454_s28 + $0x1670] sm:$0xf0]  ;;  %v7914_v57 = vld [vmem:[%s11454_s28 + $0x598] sm:$0xf]  ;;  %v8715_v59 = vor.u32 %v10900_v51, %v8714_v50 }
 0x427   : > { %v11295_v9 = vld [vmem:[%s11454_s28 + $0x1854] sm:$0xf]  ;;  %v10055_v4 = vor.u32 %v11231_v6, %v10052_v8  ;;  %6350 = vmatpush.bf16.msrb.mxu1 %v10343_v3  ;;  %6376 = vmatpush.bf16.msrb.mxu3 %v7531_v26  ;;  %v8426_v61 = vld [vmem:[%s11454_s28 + $0x998] sm:$0xf]  ;;  %v7915_v3 = vor.u32 %v10700_v56, %v7914_v57 }
 0x428   : > { %v10308_v41 = vld [vmem:[%s11454_s28 + $0x1870] sm:$0xf0]  ;;  %v10828_v62 = vld [vmem:[%s11454_s28 + $0x9b4] sm:$0xf0] }
 0x429   : > { %v11223_v14 = vld [vmem:[%s11454_s28 + $0x1614] sm:$0xf]  ;;  %v10311_v16 = vor.u32 %v11295_v9, %v10308_v41  ;;  %6338 = vmatpush.bf16.msrb.mxu0 %v10055_v4  ;;  %6364 = vmatpush.bf16.msrb.mxu2 %v7243_v17  ;;  %v8682_v63 = vld [vmem:[%s11454_s28 + $0xb98] sm:$0xf]  ;;  %v8427_v6 = vor.u32 %v10828_v62, %v8426_v61  ;;  %v6159_v61 = vpop.f32.mrf.mxu2 }
 0x42a   : > { %v10020_v15 = vld [vmem:[%s11454_s28 + $0x1630] sm:$0xf0]  ;;  %v7882_v8 = vld [vmem:[%s11454_s28 + $0x558] sm:$0xf]  ;;  %v8683_v26 = vor.u32 %v10892_v2, %v8682_v63 }
 0x42b   : > { %v11287_v40 = vld [vmem:[%s11454_s28 + $0x1814] sm:$0xf]  ;;  %v10023_v37 = vor.u32 %v11223_v14, %v10020_v15  ;;  %6351 = vmatpush.bf16.msrb.mxu1 %v10311_v16  ;;  %6377 = vmatpush.bf16.msrb.mxu3 %v7499_v35  ;;  %v10692_v9 = vld [vmem:[%s11454_s28 + $0x574] sm:$0xf0] }
 0x42c   : > { %v10276_v18 = vld [vmem:[%s11454_s28 + $0x1830] sm:$0xf0]  ;;  %v8138_v48 = vld [vmem:[%s11454_s28 + $0x758] sm:$0xf]  ;;  %v7883_v4 = vor.u32 %v10692_v9, %v7882_v8  ;;  %v6135_v9 = vpop.f32.mrf.mxu0 }
 0x42d   : > { %v10279_v47 = vor.u32 %v11287_v40, %v10276_v18  ;;  %6339 = vmatpush.bf16.msrb.mxu0 %v10023_v37  ;;  %6365 = vmatpush.bf16.msrb.mxu2 %v7211_v58  ;;  %v10756_v41 = vld [vmem:[%s11454_s28 + $0x774] sm:$0xf0]  ;;  %v6147_v58 = vadd.f32 %v6146_v36, %v6134_v22 }
 0x42e   : > { %v8394_v21 = vld [vmem:[%s11454_s28 + $0x958] sm:$0xf]  ;;  %v8139_v14 = vor.u32 %v10756_v41, %v8138_v48 }
 0x42f   : > { %6352 = vmatpush.bf16.msrb.mxu1 %v10279_v47  ;;  %6378 = vmatpush.bf16.msrb.mxu3 %v7467_v52  ;;  %v10820_v10 = vld [vmem:[%s11454_s28 + $0x974] sm:$0xf0] }
 0x430   : > { %6340 = vmatmul.bf16.vlgmr.msrb.gmra.mxu0 %v11699_v30  ;;  %v8650_v11 = vld [vmem:[%s11454_s28 + $0xb58] sm:$0xf]  ;;  %6366 = vmatmul.bf16.vlgmr.msrb.gmra.mxu2 %v11563_v28  ;;  %v8395_v15 = vor.u32 %v10820_v10, %v8394_v21 }
 0x431   : > { %6384 = vmatpush.bf16.msra.mxu0 %v7947_v53  ;;  %6410 = vmatpush.bf16.msra.mxu2 %v8459_v55  ;;  %v10884_v12 = vld [vmem:[%s11454_s28 + $0xb74] sm:$0xf0] }
 0x432   : > { %6353 = vmatmul.bf16.vlgmr.msrb.gmra.mxu1 %v11764_v13  ;;  %6379 = vmatmul.bf16.vlgmr.msrb.gmra.mxu3 %v11569_v34  ;;  %v7850_v16 = vld [vmem:[%s11454_s28 + $0x518] sm:$0xf]  ;;  %v8651_v18 = vor.u32 %v10884_v12, %v8650_v11 }
 0x433   : > { %6397 = vmatpush.bf16.msra.mxu1 %v8203_v5  ;;  %6423 = vmatpush.bf16.msra.mxu3 %v8715_v59  ;;  %v10684_v17 = vld [vmem:[%s11454_s28 + $0x534] sm:$0xf0] }
 0x434   : > { %v8106_v40 = vld [vmem:[%s11454_s28 + $0x718] sm:$0xf]  ;;  %v7851_v32 = vor.u32 %v10684_v17, %v7850_v16 }
 0x435   : > { %6385 = vmatpush.bf16.msra.mxu0 %v7915_v3  ;;  %6411 = vmatpush.bf16.msra.mxu2 %v8427_v6  ;;  %v10748_v1 = vld [vmem:[%s11454_s28 + $0x734] sm:$0xf0]  ;;  %v6160_v3 = vadd.f32 %v6159_v61, %v6147_v58 }
 0x436   : > { %v8362_v19 = vld [vmem:[%s11454_s28 + $0x918] sm:$0xf]  ;;  %v8107_v54 = vor.u32 %v10748_v1, %v8106_v40 }
 0x437   : > { %6398 = vmatpush.bf16.msra.mxu1 %v8171_v7  ;;  %6424 = vmatpush.bf16.msra.mxu3 %v8683_v26  ;;  %v10812_v35 = vld [vmem:[%s11454_s28 + $0x934] sm:$0xf0]  ;;  %v6172_v7 = vpop.f32.mrf.mxu3  ;;  %v6148_v26 = vpop.f32.mrf.mxu1 }
 0x438   : > { %v8618_v29 = vld [vmem:[%s11454_s28 + $0xb18] sm:$0xf]  ;;  %v8363_v37 = vor.u32 %v10812_v35, %v8362_v19  ;;  %v12964_v41 = vadd.f32 %v6172_v7, %v6160_v3 }
 0x439   : > { %v10876_v31 = vld [vmem:[%s11454_s28 + $0xb34] sm:$0xf0]  ;;  %6386 = vmatpush.bf16.msra.mxu0 %v7883_v4  ;;  %6412 = vmatpush.bf16.msra.mxu2 %v8395_v15 }
 0x43a   : > { %v7818_v44 = vld [vmem:[%s11454_s28 + $0x4d8] sm:$0xf]  ;;  %v8619_v47 = vor.u32 %v10876_v31, %v8618_v29 }
 0x43b   : > { %6399 = vmatpush.bf16.msra.mxu1 %v8139_v14  ;;  %v10676_v46 = vld [vmem:[%s11454_s28 + $0x4f4] sm:$0xf0]  ;;  %6425 = vmatpush.bf16.msra.mxu3 %v8651_v18 }
 0x43c   : > { %v8074_v38 = vld [vmem:[%s11454_s28 + $0x6d8] sm:$0xf]  ;;  %v7819_v5 = vor.u32 %v10676_v46, %v7818_v44  ;;  %v6161_v46 = vpop.f32.mrf.mxu2 }
 0x43d   : > { %v10740_v50 = vld [vmem:[%s11454_s28 + $0x6f4] sm:$0xf0]  ;;  %6387 = vmatpush.bf16.msra.mxu0 %v7851_v32  ;;  %6413 = vmatpush.bf16.msra.mxu2 %v8363_v37 }
 0x43e   : > { %v8330_v51 = vld [vmem:[%s11454_s28 + $0x8d8] sm:$0xf]  ;;  %v8075_v55 = vor.u32 %v10740_v50, %v8074_v38 }
 0x43f   : > { %v10804_v0 = vld [vmem:[%s11454_s28 + $0x8f4] sm:$0xf0]  ;;  %6400 = vmatpush.bf16.msra.mxu1 %v8107_v54  ;;  %6426 = vmatpush.bf16.msra.mxu3 %v8619_v47  ;;  %v6174_v50 = vpop.f32.mrf.mxu3 }
 0x440   : > { %v8586_v52 = vld [vmem:[%s11454_s28 + $0xad8] sm:$0xf]  ;;  %v8331_v57 = vor.u32 %v10804_v0, %v8330_v51 }
 0x441   : > { %v10868_v53 = vld [vmem:[%s11454_s28 + $0xaf4] sm:$0xf0]  ;;  %6388 = vmatpush.bf16.msra.mxu0 %v7819_v5 }
 0x442   : > { %v7786_v56 = vld [vmem:[%s11454_s28 + $0x498] sm:$0xf]  ;;  %v8587_v60 = vor.u32 %v10868_v53, %v8586_v52  ;;  %6414 = vmatpush.bf16.msra.mxu2 %v8331_v57 }
 0x443   : > { %v10668_v49 = vld [vmem:[%s11454_s28 + $0x4b4] sm:$0xf0]  ;;  %6401 = vmatpush.bf16.msra.mxu1 %v8075_v55 }
 0x444   : > { %v8042_v59 = vld [vmem:[%s11454_s28 + $0x698] sm:$0xf]  ;;  %v7787_v48 = vor.u32 %v10668_v49, %v7786_v56  ;;  %6427 = vmatpush.bf16.msra.mxu3 %v8587_v60 }
 0x445   : > { %v10732_v62 = vld [vmem:[%s11454_s28 + $0x6b4] sm:$0xf0] }
 0x446   : > { %v8298_v63 = vld [vmem:[%s11454_s28 + $0x898] sm:$0xf]  ;;  %v8043_v21 = vor.u32 %v10732_v62, %v8042_v59  ;;  %6389 = vmatpush.bf16.msra.mxu0 %v7787_v48 }
 0x447   : > { %v10796_v2 = vld [vmem:[%s11454_s28 + $0x8b4] sm:$0xf0] }
 0x448   : > { %v8554_v6 = vld [vmem:[%s11454_s28 + $0xa98] sm:$0xf]  ;;  %v8299_v10 = vor.u32 %v10796_v2, %v8298_v63  ;;  %6402 = vmatpush.bf16.msra.mxu1 %v8043_v21 }
 0x449   : > { %v10860_v8 = vld [vmem:[%s11454_s28 + $0xab4] sm:$0xf0] }
 0x44a   : > { %v7754_v11 = vld [vmem:[%s11454_s28 + $0x458] sm:$0xf]  ;;  %v8555_v14 = vor.u32 %v10860_v8, %v8554_v6  ;;  %6415 = vmatpush.bf16.msra.mxu2 %v8299_v10 }
 0x44b   : > { %v10660_v12 = vld [vmem:[%s11454_s28 + $0x474] sm:$0xf0] }
 0x44c   : > { %v8010_v4 = vld [vmem:[%s11454_s28 + $0x658] sm:$0xf]  ;;  %v7755_v1 = vor.u32 %v10660_v12, %v7754_v11  ;;  %6428 = vmatpush.bf16.msra.mxu3 %v8555_v14 }
 0x44d   : > { %v10724_v15 = vld [vmem:[%s11454_s28 + $0x674] sm:$0xf0] }
 0x44e   : > { %v8266_v16 = vld [vmem:[%s11454_s28 + $0x858] sm:$0xf]  ;;  %v8011_v23 = vor.u32 %v10724_v15, %v8010_v4  ;;  %6390 = vmatpush.bf16.msra.mxu0 %v7755_v1 }
 0x44f   : > { %v10788_v17 = vld [vmem:[%s11454_s28 + $0x874] sm:$0xf0] }
 0x450   : > { %v8522_v40 = vld [vmem:[%s11454_s28 + $0xa58] sm:$0xf]  ;;  %v8267_v29 = vor.u32 %v10788_v17, %v8266_v16  ;;  %6403 = vmatpush.bf16.msra.mxu1 %v8011_v23 }
 0x451   : > { %v10852_v18 = vld [vmem:[%s11454_s28 + $0xa74] sm:$0xf0] }
 0x452   : > { %v7722_v19 = vld [vmem:[%s11454_s28 + $0x418] sm:$0xf]  ;;  %v8523_v36 = vor.u32 %v10852_v18, %v8522_v40  ;;  %6416 = vmatpush.bf16.msra.mxu2 %v8267_v29 }
 0x453   : > { %v10652_v35 = vld [vmem:[%s11454_s28 + $0x434] sm:$0xf0] }
 0x454   : > { %v7978_v31 = vld [vmem:[%s11454_s28 + $0x618] sm:$0xf]  ;;  %v7723_v51 = vor.u32 %v10652_v35, %v7722_v19  ;;  %6429 = vmatpush.bf16.msra.mxu3 %v8523_v36 }
 0x455   : > { %v10716_v22 = vld [vmem:[%s11454_s28 + $0x634] sm:$0xf0] }
 0x456   : > { %v8234_v32 = vld [vmem:[%s11454_s28 + $0x818] sm:$0xf]  ;;  %v7979_v5 = vor.u32 %v10716_v22, %v7978_v31  ;;  %6391 = vmatpush.bf16.msra.mxu0 %v7723_v51 }
 0x457   : > { %v10780_v54 = vld [vmem:[%s11454_s28 + $0x834] sm:$0xf0] }
 0x458   : > { %v8490_v37 = vld [vmem:[%s11454_s28 + $0xa18] sm:$0xf]  ;;  %v8235_v55 = vor.u32 %v10780_v54, %v8234_v32  ;;  %6404 = vmatpush.bf16.msra.mxu1 %v7979_v5 }
 0x459   : > { %v10844_v44 = vld [vmem:[%s11454_s28 + $0xa34] sm:$0xf0]  ;;  %6392 = vmatmul.bf16.vlgmr.msra.gmra.mxu0 %v11561_v27 }
 0x45a   : > { %v8970_v38 = vld [vmem:[%s11454_s28 + $0xdd8] sm:$0xf]  ;;  %v8491_v49 = vor.u32 %v10844_v44, %v8490_v37  ;;  %6417 = vmatpush.bf16.msra.mxu2 %v8235_v55  ;;  %v6185_v37 = vpop.f32.mrf.mxu0 }
 0x45b   : > { %v10964_v47 = vld [vmem:[%s11454_s28 + $0xdf4] sm:$0xf0]  ;;  %6405 = vmatmul.bf16.vlgmr.msra.gmra.mxu1 %v11567_v33 }
 0x45c   : > { %v9226_v58 = vld [vmem:[%s11454_s28 + $0xfd8] sm:$0xf]  ;;  %v8971_v59 = vor.u32 %v10964_v47, %v8970_v38  ;;  %6430 = vmatpush.bf16.msra.mxu3 %v8491_v49  ;;  %v13019_v38 = vadd.f32 %v6185_v37, %v12964_v41 }
 0x45d   : > { %v11028_v0 = vld [vmem:[%s11454_s28 + $0xff4] sm:$0xf0]  ;;  %6418 = vmatmul.bf16.vlgmr.msra.gmra.mxu2 %v11619_v42 }
 0x45e   : > { %v9482_v52 = vld [vmem:[%s11454_s28 + $0x11d8] sm:$0xf]  ;;  %v9227_v60 = vor.u32 %v11028_v0, %v9226_v58  ;;  %6436 = vmatpush.bf16.msrb.mxu0 %v8971_v59 }
 0x45f   : > { %v11092_v53 = vld [vmem:[%s11454_s28 + $0x11f4] sm:$0xf0]  ;;  %6431 = vmatmul.bf16.vlgmr.msra.gmra.mxu3 %v11623_v45 }
 0x460   : > { %v9738_v57 = vld [vmem:[%s11454_s28 + $0x13d8] sm:$0xf]  ;;  %v9483_v61 = vor.u32 %v11092_v53, %v9482_v52  ;;  %6449 = vmatpush.bf16.msrb.mxu1 %v9227_v60  ;;  %v6198_v53 = vpop.f32.mrf.mxu1 }
 0x461   : > { %v11156_v56 = vld [vmem:[%s11454_s28 + $0x13f4] sm:$0xf0] }
 0x462   : > { %v8938_v62 = vld [vmem:[%s11454_s28 + $0xd98] sm:$0xf]  ;;  %v9739_v3 = vor.u32 %v11156_v56, %v9738_v57  ;;  %6462 = vmatpush.bf16.msrb.mxu2 %v9483_v61 }
 0x463   : > { %v10956_v63 = vld [vmem:[%s11454_s28 + $0xdb4] sm:$0xf0] }
 0x464   : > { %v9194_v2 = vld [vmem:[%s11454_s28 + $0xf98] sm:$0xf]  ;;  %v8939_v26 = vor.u32 %v10956_v63, %v8938_v62  ;;  %6475 = vmatpush.bf16.msrb.mxu3 %v9739_v3 }
 0x465   : > { %v11020_v7 = vld [vmem:[%s11454_s28 + $0xfb4] sm:$0xf0] }
 0x466   : > { %v9450_v6 = vld [vmem:[%s11454_s28 + $0x1198] sm:$0xf]  ;;  %v9195_v21 = vor.u32 %v11020_v7, %v9194_v2  ;;  %6437 = vmatpush.bf16.msrb.mxu0 %v8939_v26 }
 0x467   : > { %v11084_v8 = vld [vmem:[%s11454_s28 + $0x11b4] sm:$0xf0] }
 0x468   : > { %v9706_v9 = vld [vmem:[%s11454_s28 + $0x1398] sm:$0xf]  ;;  %v9451_v10 = vor.u32 %v11084_v8, %v9450_v6  ;;  %6450 = vmatpush.bf16.msrb.mxu1 %v9195_v21 }
 0x469   : > { %v11148_v48 = vld [vmem:[%s11454_s28 + $0x13b4] sm:$0xf0] }
 0x46a   : > { %v8906_v11 = vld [vmem:[%s11454_s28 + $0xd58] sm:$0xf]  ;;  %v9707_v14 = vor.u32 %v11148_v48, %v9706_v9  ;;  %6463 = vmatpush.bf16.msrb.mxu2 %v9451_v10  ;;  %v6211_v9 = vpop.f32.mrf.mxu2  ;;  %v6224_v48 = vpop.f32.mrf.mxu3 }
 0x46b   : > { %v10948_v12 = vld [vmem:[%s11454_s28 + $0xd74] sm:$0xf0]  ;;  %v6212_v10 = vadd.f32 %v6211_v9, %v6198_v53 }
 0x46c   : > { %v9162_v4 = vld [vmem:[%s11454_s28 + $0xf58] sm:$0xf]  ;;  %v8907_v1 = vor.u32 %v10948_v12, %v8906_v11  ;;  %6476 = vmatpush.bf16.msrb.mxu3 %v9707_v14  ;;  %v6187_v11 = vpop.f32.mrf.mxu0 }
 0x46d   : > { %v11012_v15 = vld [vmem:[%s11454_s28 + $0xf74] sm:$0xf0] }
 0x46e   : > { %v9418_v16 = vld [vmem:[%s11454_s28 + $0x1158] sm:$0xf]  ;;  %v9163_v19 = vor.u32 %v11012_v15, %v9162_v4  ;;  %6438 = vmatpush.bf16.msrb.mxu0 %v8907_v1 }
 0x46f   : > { %v11076_v17 = vld [vmem:[%s11454_s28 + $0x1174] sm:$0xf0] }
 0x470   : > { %v9674_v40 = vld [vmem:[%s11454_s28 + $0x1358] sm:$0xf]  ;;  %v9419_v35 = vor.u32 %v11076_v17, %v9418_v16  ;;  %6451 = vmatpush.bf16.msrb.mxu1 %v9163_v19 }
 0x471   : > { %v11140_v18 = vld [vmem:[%s11454_s28 + $0x1374] sm:$0xf0] }
 0x472   : > { %v8874_v23 = vld [vmem:[%s11454_s28 + $0xd18] sm:$0xf]  ;;  %v9675_v22 = vor.u32 %v11140_v18, %v9674_v40  ;;  %6464 = vmatpush.bf16.msrb.mxu2 %v9419_v35  ;;  %v13040_v40 = vadd.f32 %v6224_v48, %v6212_v10  ;;  %v6200_v18 = vpop.f32.mrf.mxu1  ;;  %v6226_v53 = vpop.f32.mrf.mxu3 }
 0x473   : > { %v10940_v29 = vld [vmem:[%s11454_s28 + $0xd34] sm:$0xf0] }
 0x474   : > { %v9130_v31 = vld [vmem:[%s11454_s28 + $0xf18] sm:$0xf]  ;;  %v8875_v47 = vor.u32 %v10940_v29, %v8874_v23  ;;  %6477 = vmatpush.bf16.msrb.mxu3 %v9675_v22 }
 0x475   : > { %v11004_v32 = vld [vmem:[%s11454_s28 + $0xf34] sm:$0xf0] }
 0x476   : > { %v9386_v36 = vld [vmem:[%s11454_s28 + $0x1118] sm:$0xf]  ;;  %v9131_v58 = vor.u32 %v11004_v32, %v9130_v31  ;;  %6439 = vmatpush.bf16.msrb.mxu0 %v8875_v47 }
 0x477   : > { %v11068_v54 = vld [vmem:[%s11454_s28 + $0x1134] sm:$0xf0] }
 0x478   : > { %v9642_v44 = vld [vmem:[%s11454_s28 + $0x1318] sm:$0xf]  ;;  %v9387_v50 = vor.u32 %v11068_v54, %v9386_v36  ;;  %6452 = vmatpush.bf16.msrb.mxu1 %v9131_v58 }
 0x479   : > { %v11132_v46 = vld [vmem:[%s11454_s28 + $0x1334] sm:$0xf0] }
 0x47a   : > { %v8842_v51 = vld [vmem:[%s11454_s28 + $0xcd8] sm:$0xf]  ;;  %v9643_v5 = vor.u32 %v11132_v46, %v9642_v44  ;;  %6465 = vmatpush.bf16.msrb.mxu2 %v9387_v50 }
 0x47b   : > { %v10932_v0 = vld [vmem:[%s11454_s28 + $0xcf4] sm:$0xf0] }
 0x47c   : > { %v9098_v52 = vld [vmem:[%s11454_s28 + $0xed8] sm:$0xf]  ;;  %v8843_v59 = vor.u32 %v10932_v0, %v8842_v51  ;;  %6478 = vmatpush.bf16.msrb.mxu3 %v9643_v5 }
 0x47d   : > { %v10996_v55 = vld [vmem:[%s11454_s28 + $0xef4] sm:$0xf0] }
 0x47e   : > { %v9354_v57 = vld [vmem:[%s11454_s28 + $0x10d8] sm:$0xf]  ;;  %v9099_v60 = vor.u32 %v10996_v55, %v9098_v52  ;;  %6440 = vmatpush.bf16.msrb.mxu0 %v8843_v59  ;;  %v6213_v52 = vpop.f32.mrf.mxu2 }
 0x47f   : > { %v11060_v41 = vld [vmem:[%s11454_s28 + $0x10f4] sm:$0xf0]  ;;  %v7340_v52 = vld [vmem:[%s11454_s28 + $0x138] sm:$0xf0] }
 0x480   : > { %v9610_v56 = vld [vmem:[%s11454_s28 + $0x12d8] sm:$0xf]  ;;  %v9355_v61 = vor.u32 %v11060_v41, %v9354_v57  ;;  %6453 = vmatpush.bf16.msrb.mxu1 %v9099_v60 }
 0x481   : > { %v11124_v49 = vld [vmem:[%s11454_s28 + $0x12f4] sm:$0xf0] }
 0x482   : > { %v8810_v62 = vld [vmem:[%s11454_s28 + $0xc98] sm:$0xf]  ;;  %v9611_v3 = vor.u32 %v11124_v49, %v9610_v56  ;;  %6466 = vmatpush.bf16.msrb.mxu2 %v9355_v61 }
 0x483   : > { %v10924_v63 = vld [vmem:[%s11454_s28 + $0xcb4] sm:$0xf0] }
 0x484   : > { %v9066_v2 = vld [vmem:[%s11454_s28 + $0xe98] sm:$0xf]  ;;  %v8811_v12 = vor.u32 %v10924_v63, %v8810_v62  ;;  %6479 = vmatpush.bf16.msrb.mxu3 %v9611_v3  ;;  %v10576_v62 = vld [vmem:[%s11454_s28 + $0x1dc] sm:$0xf] }
 0x485   : > { %v10988_v7 = vld [vmem:[%s11454_s28 + $0xeb4] sm:$0xf0]  ;;  %v7436_v63 = vld [vmem:[%s11454_s28 + $0x1f8] sm:$0xf0] }
 0x486   : > { %v9322_v6 = vld [vmem:[%s11454_s28 + $0x1098] sm:$0xf]  ;;  %v9067_v4 = vor.u32 %v10988_v7, %v9066_v2  ;;  %6441 = vmatpush.bf16.msrb.mxu0 %v8811_v12  ;;  %v10568_v12 = vld [vmem:[%s11454_s28 + $0x19c] sm:$0xf] }
 0x487   : > { %v11052_v8 = vld [vmem:[%s11454_s28 + $0x10b4] sm:$0xf0] }
 0x488   : > { %v9578_v26 = vld [vmem:[%s11454_s28 + $0x1298] sm:$0xf]  ;;  %v9323_v14 = vor.u32 %v11052_v8, %v9322_v6  ;;  %6454 = vmatpush.bf16.msrb.mxu1 %v9067_v4  ;;  %v7404_v4 = vld [vmem:[%s11454_s28 + $0x1b8] sm:$0xf0] }
 0x489   : > { %v11116_v21 = vld [vmem:[%s11454_s28 + $0x12b4] sm:$0xf0] }
 0x48a   : > { %v8778_v15 = vld [vmem:[%s11454_s28 + $0xc58] sm:$0xf]  ;;  %v9579_v1 = vor.u32 %v11116_v21, %v9578_v26  ;;  %6467 = vmatpush.bf16.msrb.mxu2 %v9323_v14  ;;  %v7439_v26 = vor.u32 %v10576_v62, %v7436_v63 }
 0x48b   : > { %v10916_v16 = vld [vmem:[%s11454_s28 + $0xc74] sm:$0xf0] }
 0x48c   : > { %v9034_v17 = vld [vmem:[%s11454_s28 + $0xe58] sm:$0xf]  ;;  %v8779_v22 = vor.u32 %v10916_v16, %v8778_v15  ;;  %6480 = vmatpush.bf16.msrb.mxu3 %v9579_v1 }
 0x48d   : > { %v10980_v19 = vld [vmem:[%s11454_s28 + $0xe74] sm:$0xf0] }
 0x48e   : > { %v9290_v35 = vld [vmem:[%s11454_s28 + $0x1058] sm:$0xf]  ;;  %v9035_v54 = vor.u32 %v10980_v19, %v9034_v17  ;;  %6442 = vmatpush.bf16.msrb.mxu0 %v8779_v22  ;;  %v7407_v19 = vor.u32 %v10568_v12, %v7404_v4  ;;  %v7372_v22 = vld [vmem:[%s11454_s28 + $0x178] sm:$0xf0] }
 0x48f   : > { %v11044_v23 = vld [vmem:[%s11454_s28 + $0x1074] sm:$0xf0] }
 0x490   : > { %v9546_v29 = vld [vmem:[%s11454_s28 + $0x1258] sm:$0xf]  ;;  %v9291_v37 = vor.u32 %v11044_v23, %v9290_v35  ;;  %6455 = vmatpush.bf16.msrb.mxu1 %v9035_v54 }
 0x491   : > { %v11108_v31 = vld [vmem:[%s11454_s28 + $0x1274] sm:$0xf0] }
 0x492   : > { %v8746_v32 = vld [vmem:[%s11454_s28 + $0xc18] sm:$0xf]  ;;  %v9547_v58 = vor.u32 %v11108_v31, %v9546_v29  ;;  %6468 = vmatpush.bf16.msrb.mxu2 %v9291_v37  ;;  %v10560_v31 = vld [vmem:[%s11454_s28 + $0x15c] sm:$0xf] }
 0x493   : > { %v10908_v36 = vld [vmem:[%s11454_s28 + $0xc34] sm:$0xf0] }
 0x494   : > { %v9002_v44 = vld [vmem:[%s11454_s28 + $0xe18] sm:$0xf]  ;;  %v8747_v41 = vor.u32 %v10908_v36, %v8746_v32  ;;  %6481 = vmatpush.bf16.msrb.mxu3 %v9547_v58 }
 0x495   : > { %v10972_v46 = vld [vmem:[%s11454_s28 + $0xe34] sm:$0xf0] }
 0x496   : > { %v9258_v47 = vld [vmem:[%s11454_s28 + $0x1018] sm:$0xf]  ;;  %v9003_v60 = vor.u32 %v10972_v46, %v9002_v44  ;;  %6443 = vmatpush.bf16.msrb.mxu0 %v8747_v41 }
 0x497   : > { %v11036_v50 = vld [vmem:[%s11454_s28 + $0x1034] sm:$0xf0] }
 0x498   : > { %v9514_v51 = vld [vmem:[%s11454_s28 + $0x1218] sm:$0xf]  ;;  %v9259_v61 = vor.u32 %v11036_v50, %v9258_v47  ;;  %6456 = vmatpush.bf16.msrb.mxu1 %v9003_v60  ;;  %v7375_v47 = vor.u32 %v10560_v31, %v7372_v22  ;;  %v6250_v60 = vpop.f32.mrf.mxu1 }
 0x499   : > { %v11100_v0 = vld [vmem:[%s11454_s28 + $0x1234] sm:$0xf0]  ;;  %6444 = vmatmul.bf16.vlgmr.msrb.gmra.mxu0 %v11615_v39 }
 0x49a   : > { %v9994_v5 = vld [vmem:[%s11454_s28 + $0x15d8] sm:$0xf]  ;;  %v9515_v2 = vor.u32 %v11100_v0, %v9514_v51  ;;  %6469 = vmatpush.bf16.msrb.mxu2 %v9259_v61  ;;  %v10552_v0 = vld [vmem:[%s11454_s28 + $0x11c] sm:$0xf] }
 0x49b   : > { %v11220_v55 = vld [vmem:[%s11454_s28 + $0x15f4] sm:$0xf0]  ;;  %6457 = vmatmul.bf16.vlgmr.msrb.gmra.mxu1 %v11621_v43  ;;  %v7343_v61 = vor.u32 %v10552_v0, %v7340_v52 }
 0x49c   : > { %v10250_v57 = vld [vmem:[%s11454_s28 + $0x17d8] sm:$0xf]  ;;  %v9995_v3 = vor.u32 %v11220_v55, %v9994_v5  ;;  %6482 = vmatpush.bf16.msrb.mxu3 %v9515_v2  ;;  %v6237_v5 = vpop.f32.mrf.mxu0 }
 0x49d   : > { %v11284_v56 = vld [vmem:[%s11454_s28 + $0x17f4] sm:$0xf0]  ;;  %6470 = vmatmul.bf16.vlgmr.msrb.gmra.mxu2 %v11688_v20 }
 0x49e   : > { %v10506_v49 = vld [vmem:[%s11454_s28 + $0x19d8] sm:$0xf]  ;;  %v10251_v7 = vor.u32 %v11284_v56, %v10250_v57  ;;  %6488 = vmatpush.bf16.msra.mxu0 %v9995_v3  ;;  %v10544_v3 = vld [vmem:[%s11454_s28 + $0xdc] sm:$0xf] }
 0x49f   : > { %v11348_v59 = vld [vmem:[%s11454_s28 + $0x19f4] sm:$0xf0]  ;;  %6483 = vmatmul.bf16.vlgmr.msrb.gmra.mxu3 %v11695_v25 }
 0x4a0   : > { %v10507_v6 = vor.u32 %v11348_v59, %v10506_v49  ;;  %v9962_v8 = vld [vmem:[%s11454_s28 + $0x1598] sm:$0xf]  ;;  %6501 = vmatpush.bf16.msra.mxu1 %v10251_v7  ;;  %6527 = vmatpush.bf16.msra.mxu3 %v7439_v26  ;;  %v6238_v59 = vadd.f32 %v6237_v5, %v13040_v40  ;;  %v7308_v7 = vld [vmem:[%s11454_s28 + $0xf8] sm:$0xf0] }
 0x4a1   : > { %v11212_v9 = vld [vmem:[%s11454_s28 + $0x15b4] sm:$0xf0] }
 0x4a2   : > { %v10218_v48 = vld [vmem:[%s11454_s28 + $0x1798] sm:$0xf]  ;;  %v9963_v14 = vor.u32 %v11212_v9, %v9962_v8  ;;  %6514 = vmatpush.bf16.msra.mxu2 %v10507_v6  ;;  %v6251_v6 = vadd.f32 %v6250_v60, %v6238_v59  ;;  %v10520_v59 = vld [vmem:[%s11454_s28 + $0x1c] sm:$0xf] }
 0x4a3   : > { %v11276_v21 = vld [vmem:[%s11454_s28 + $0x17b4] sm:$0xf0]  ;;  %v7212_v60 = vld [vmem:[%s11454_s28 + $0x38] sm:$0xf0] }
 0x4a4   : > { %v10474_v10 = vld [vmem:[%s11454_s28 + $0x1998] sm:$0xf]  ;;  %v10219_v15 = vor.u32 %v11276_v21, %v10218_v48  ;;  %6489 = vmatpush.bf16.msra.mxu0 %v9963_v14  ;;  %6528 = vmatpush.bf16.msra.mxu3 %v7407_v19 }
 0x4a5   : > { %v11340_v11 = vld [vmem:[%s11454_s28 + $0x19b4] sm:$0xf0] }
 0x4a6   : > { %v10475_v16 = vor.u32 %v11340_v11, %v10474_v10  ;;  %v9930_v17 = vld [vmem:[%s11454_s28 + $0x1558] sm:$0xf]  ;;  %6502 = vmatpush.bf16.msra.mxu1 %v10219_v15  ;;  %v6263_v10 = vpop.f32.mrf.mxu2  ;;  %v7311_v11 = vor.u32 %v10544_v3, %v7308_v7  ;;  %v7948_v7 = vld [vmem:[%s11454_s28 + $0x5f8] sm:$0xf0] }
 0x4a7   : > { %v11204_v18 = vld [vmem:[%s11454_s28 + $0x1574] sm:$0xf0]  ;;  %v6264_v15 = vadd.f32 %v6263_v10, %v6251_v6  ;;  %v10768_v6 = vld [vmem:[%s11454_s28 + $0x7dc] sm:$0xf] }
 0x4a8   : > { %v10186_v1 = vld [vmem:[%s11454_s28 + $0x1758] sm:$0xf]  ;;  %v9931_v32 = vor.u32 %v11204_v18, %v9930_v17  ;;  %6515 = vmatpush.bf16.msra.mxu2 %v10475_v16  ;;  %6529 = vmatpush.bf16.msra.mxu3 %v7375_v47  ;;  %v6276_v16 = vpop.f32.mrf.mxu3  ;;  %v10536_v17 = vld [vmem:[%s11454_s28 + $0x9c] sm:$0xf] }
 0x4a9   : > { %v11268_v35 = vld [vmem:[%s11454_s28 + $0x1774] sm:$0xf0]  ;;  %v7276_v18 = vld [vmem:[%s11454_s28 + $0xb8] sm:$0xf0]  ;;  %v13108_v19 = vadd.f32 %v6276_v16, %v6264_v15 }
 0x4aa   : > { %v10442_v23 = vld [vmem:[%s11454_s28 + $0x1958] sm:$0xf]  ;;  %v10187_v36 = vor.u32 %v11268_v35, %v10186_v1  ;;  %6490 = vmatpush.bf16.msra.mxu0 %v9931_v32  ;;  %v6239_v35 = vpop.f32.mrf.mxu0  ;;  %v10528_v47 = vld [vmem:[%s11454_s28 + $0x5c] sm:$0xf] }
 0x4ab   : > { %v11332_v29 = vld [vmem:[%s11454_s28 + $0x1974] sm:$0xf0]  ;;  %v10696_v15 = vld [vmem:[%s11454_s28 + $0x59c] sm:$0xf] }
 0x4ac   : > { %v10443_v54 = vor.u32 %v11332_v29, %v10442_v23  ;;  %v9898_v37 = vld [vmem:[%s11454_s28 + $0x1518] sm:$0xf]  ;;  %6503 = vmatpush.bf16.msra.mxu1 %v10187_v36  ;;  %6530 = vmatpush.bf16.msra.mxu3 %v7343_v61  ;;  %v6252_v36 = vpop.f32.mrf.mxu1  ;;  %v10824_v35 = vld [vmem:[%s11454_s28 + $0x99c] sm:$0xf] }
 0x4ad   : > { %v11196_v44 = vld [vmem:[%s11454_s28 + $0x1534] sm:$0xf0]  ;;  %v7628_v36 = vld [vmem:[%s11454_s28 + $0x378] sm:$0xf0] }
 0x4ae   : > { %v10154_v46 = vld [vmem:[%s11454_s28 + $0x1718] sm:$0xf]  ;;  %v9899_v53 = vor.u32 %v11196_v44, %v9898_v37  ;;  %6516 = vmatpush.bf16.msra.mxu2 %v10443_v54  ;;  %v7279_v54 = vor.u32 %v10536_v17, %v7276_v18  ;;  %v7916_v17 = vld [vmem:[%s11454_s28 + $0x5b8] sm:$0xf0] }
 0x4af   : > { %v11260_v58 = vld [vmem:[%s11454_s28 + $0x1734] sm:$0xf0]  ;;  %v10760_v18 = vld [vmem:[%s11454_s28 + $0x79c] sm:$0xf] }
 0x4b0   : > { %v10410_v50 = vld [vmem:[%s11454_s28 + $0x1918] sm:$0xf]  ;;  %v10155_v55 = vor.u32 %v11260_v58, %v10154_v46  ;;  %6491 = vmatpush.bf16.msra.mxu0 %v9899_v53  ;;  %6531 = vmatpush.bf16.msra.mxu3 %v7311_v11  ;;  %v7244_v58 = vld [vmem:[%s11454_s28 + $0x78] sm:$0xf0]  ;;  %v6278_v61 = vpop.f32.mrf.mxu3 }
 0x4b1   : > { %v11324_v51 = vld [vmem:[%s11454_s28 + $0x1934] sm:$0xf0]  ;;  %v8364_v61 = vld [vmem:[%s11454_s28 + $0x938] sm:$0xf0] }
 0x4b2   : > { %v10411_v57 = vor.u32 %v11324_v51, %v10410_v50  ;;  %v9866_v41 = vld [vmem:[%s11454_s28 + $0x14d8] sm:$0xf]  ;;  %6504 = vmatpush.bf16.msra.mxu1 %v10155_v55 }
 0x4b3   : > { %v11188_v56 = vld [vmem:[%s11454_s28 + $0x14f4] sm:$0xf0] }
 0x4b4   : > { %v10122_v49 = vld [vmem:[%s11454_s28 + $0x16d8] sm:$0xf]  ;;  %v9867_v8 = vor.u32 %v11188_v56, %v9866_v41  ;;  %6517 = vmatpush.bf16.msra.mxu2 %v10411_v57  ;;  %v6265_v41 = vpop.f32.mrf.mxu2  ;;  %6532 = vmatpush.bf16.msra.mxu3 %v7279_v54  ;;  %v7247_v56 = vor.u32 %v10528_v47, %v7244_v58  ;;  %v10688_v54 = vld [vmem:[%s11454_s28 + $0x55c] sm:$0xf] }
 0x4b5   : > { %v11252_v62 = vld [vmem:[%s11454_s28 + $0x16f4] sm:$0xf0]  ;;  %v8140_v47 = vld [vmem:[%s11454_s28 + $0x778] sm:$0xf0] }
 0x4b6   : > { %v10378_v63 = vld [vmem:[%s11454_s28 + $0x18d8] sm:$0xf]  ;;  %v10123_v40 = vor.u32 %v11252_v62, %v10122_v49  ;;  %6492 = vmatpush.bf16.msra.mxu0 %v9867_v8  ;;  %v10640_v62 = vld [vmem:[%s11454_s28 + $0x3dc] sm:$0xf] }
 0x4b7   : > { %v11316_v2 = vld [vmem:[%s11454_s28 + $0x18f4] sm:$0xf0]  ;;  %v8204_v8 = vld [vmem:[%s11454_s28 + $0x7f8] sm:$0xf0] }
 0x4b8   : > { %v10379_v9 = vor.u32 %v11316_v2, %v10378_v63  ;;  %v9834_v48 = vld [vmem:[%s11454_s28 + $0x1498] sm:$0xf]  ;;  %6505 = vmatpush.bf16.msra.mxu1 %v10123_v40  ;;  %v7692_v63 = vld [vmem:[%s11454_s28 + $0x3f8] sm:$0xf0]  ;;  %6533 = vmatpush.bf16.msra.mxu3 %v7247_v56 }
 0x4b9   : > { %v11180_v26 = vld [vmem:[%s11454_s28 + $0x14b4] sm:$0xf0]  ;;  %v10704_v2 = vld [vmem:[%s11454_s28 + $0x5dc] sm:$0xf]  ;;  %v7695_v10 = vor.u32 %v10640_v62, %v7692_v63  ;;  %v6302_v63 = vpop.f32.mrf.mxu1 }
 0x4ba   : > { %v10090_v21 = vld [vmem:[%s11454_s28 + $0x1698] sm:$0xf]  ;;  %v9835_v1 = vor.u32 %v11180_v26, %v9834_v48  ;;  %6518 = vmatpush.bf16.msra.mxu2 %v10379_v9  ;;  %v10832_v48 = vld [vmem:[%s11454_s28 + $0x9dc] sm:$0xf]  ;;  %v7951_v11 = vor.u32 %v10704_v2, %v7948_v7 }
 0x4bb   : > { %v11244_v12 = vld [vmem:[%s11454_s28 + $0x16b4] sm:$0xf0]  ;;  %v8460_v26 = vld [vmem:[%s11454_s28 + $0x9f8] sm:$0xf0] }
 0x4bc   : > { %v10346_v4 = vld [vmem:[%s11454_s28 + $0x1898] sm:$0xf]  ;;  %v10091_v23 = vor.u32 %v11244_v12, %v10090_v21  ;;  %6493 = vmatpush.bf16.msra.mxu0 %v9835_v1  ;;  %v7215_v21 = vor.u32 %v10520_v59, %v7212_v60  ;;  %v8207_v12 = vor.u32 %v10768_v6, %v8204_v8  ;;  %v8463_v16 = vor.u32 %v10832_v48, %v8460_v26  ;;  %v8172_v1 = vld [vmem:[%s11454_s28 + $0x7b8] sm:$0xf0]  ;;  %v6289_v59 = vpop.f32.mrf.mxu0 }
 0x4bd   : > { %v11308_v14 = vld [vmem:[%s11454_s28 + $0x18b4] sm:$0xf0]  ;;  %v10816_v58 = vld [vmem:[%s11454_s28 + $0x95c] sm:$0xf] }
 0x4be   : > { %v10347_v29 = vor.u32 %v11308_v14, %v10346_v4  ;;  %v9802_v31 = vld [vmem:[%s11454_s28 + $0x1458] sm:$0xf]  ;;  %6506 = vmatpush.bf16.msra.mxu1 %v10091_v23  ;;  %v10632_v4 = vld [vmem:[%s11454_s28 + $0x39c] sm:$0xf]  ;;  %6534 = vmatpush.bf16.msra.mxu3 %v7215_v21 }
 0x4bf   : > { %v11172_v22 = vld [vmem:[%s11454_s28 + $0x1474] sm:$0xf0]  ;;  %v7660_v14 = vld [vmem:[%s11454_s28 + $0x3b8] sm:$0xf0] }
 0x4c0   : > { %v10058_v32 = vld [vmem:[%s11454_s28 + $0x1658] sm:$0xf]  ;;  %v9803_v50 = vor.u32 %v11172_v22, %v9802_v31  ;;  %6519 = vmatpush.bf16.msra.mxu2 %v10347_v29  ;;  %v8428_v23 = vld [vmem:[%s11454_s28 + $0x9b8] sm:$0xf0]  ;;  %v7663_v29 = vor.u32 %v10632_v4, %v7660_v14  ;;  %v7919_v31 = vor.u32 %v10696_v15, %v7916_v17  ;;  %v8175_v22 = vor.u32 %v10760_v18, %v8172_v1  ;;  %v6315_v18 = vpop.f32.mrf.mxu2 }
 0x4c1   : > { %v11236_v37 = vld [vmem:[%s11454_s28 + $0x1674] sm:$0xf0]  ;;  %6535 = vmatmul.bf16.vlgmr.msra.gmra.mxu3 %v11563_v28  ;;  %v7852_v41 = vld [vmem:[%s11454_s28 + $0x538] sm:$0xf0]  ;;  %v6290_v28 = vadd.f32 %v6289_v59, %v13108_v19 }
 0x4c2   : > { %v10314_v44 = vld [vmem:[%s11454_s28 + $0x1858] sm:$0xf]  ;;  %v10059_v52 = vor.u32 %v11236_v37, %v10058_v32  ;;  %6494 = vmatpush.bf16.msra.mxu0 %v9803_v50  ;;  %v10624_v32 = vld [vmem:[%s11454_s28 + $0x35c] sm:$0xf]  ;;  %6579 = vmatpush.bf16.msrb.mxu3 %v8463_v16  ;;  %v8431_v37 = vor.u32 %v10824_v35, %v8428_v23 }
 0x4c3   : > { %v11300_v46 = vld [vmem:[%s11454_s28 + $0x1874] sm:$0xf0]  ;;  %v8396_v50 = vld [vmem:[%s11454_s28 + $0x978] sm:$0xf0] }
 0x4c4   : > { %v9770_v51 = vld [vmem:[%s11454_s28 + $0x1418] sm:$0xf]  ;;  %v10315_v53 = vor.u32 %v11300_v46, %v10314_v44  ;;  %6507 = vmatpush.bf16.msra.mxu1 %v10059_v52  ;;  %v7884_v44 = vld [vmem:[%s11454_s28 + $0x578] sm:$0xf0] }
 0x4c5   : > { %v11164_v0 = vld [vmem:[%s11454_s28 + $0x1434] sm:$0xf0]  ;;  %v10752_v46 = vld [vmem:[%s11454_s28 + $0x75c] sm:$0xf] }
 0x4c6   : > { %v10026_v5 = vld [vmem:[%s11454_s28 + $0x1618] sm:$0xf]  ;;  %v9771_v3 = vor.u32 %v11164_v0, %v9770_v51  ;;  %6520 = vmatpush.bf16.msra.mxu2 %v10315_v53  ;;  %v7631_v51 = vor.u32 %v10624_v32, %v7628_v36  ;;  %v7887_v0 = vor.u32 %v10688_v54, %v7884_v44  ;;  %v8143_v52 = vor.u32 %v10752_v46, %v8140_v47  ;;  %v10616_v53 = vld [vmem:[%s11454_s28 + $0x31c] sm:$0xf]  ;;  %v6291_v36 = vpop.f32.mrf.mxu0 }
 0x4c7   : > { %v11228_v55 = vld [vmem:[%s11454_s28 + $0x1634] sm:$0xf0]  ;;  %6580 = vmatpush.bf16.msrb.mxu3 %v8431_v37  ;;  %v10744_v56 = vld [vmem:[%s11454_s28 + $0x71c] sm:$0xf]  ;;  %v6304_v37 = vpop.f32.mrf.mxu1 }
 0x4c8   : > { %v10282_v57 = vld [vmem:[%s11454_s28 + $0x1818] sm:$0xf]  ;;  %v10027_v40 = vor.u32 %v11228_v55, %v10026_v5  ;;  %6495 = vmatpush.bf16.msra.mxu0 %v9771_v3  ;;  %v7596_v5 = vld [vmem:[%s11454_s28 + $0x338] sm:$0xf0] }
 0x4c9   : > { %v11292_v49 = vld [vmem:[%s11454_s28 + $0x1834] sm:$0xf0]  ;;  %v10680_v55 = vld [vmem:[%s11454_s28 + $0x51c] sm:$0xf]  ;;  %v7599_v62 = vor.u32 %v10616_v53, %v7596_v5 }
 0x4ca   : > { %v10283_v9 = vor.u32 %v11292_v49, %v10282_v57  ;;  %6508 = vmatpush.bf16.msra.mxu1 %v10027_v40  ;;  %v8399_v57 = vor.u32 %v10816_v58, %v8396_v50  ;;  %v8108_v49 = vld [vmem:[%s11454_s28 + $0x738] sm:$0xf0]  ;;  %v7855_v2 = vor.u32 %v10680_v55, %v7852_v41 }
 0x4cb   : > { %6496 = vmatmul.bf16.vlgmr.msra.gmra.mxu0 %v11693_v24  ;;  %v10808_v60 = vld [vmem:[%s11454_s28 + $0x91c] sm:$0xf]  ;;  %v8111_v3 = vor.u32 %v10744_v56, %v8108_v49 }
 0x4cc   : > { %6521 = vmatpush.bf16.msra.mxu2 %v10283_v9  ;;  %6540 = vmatpush.bf16.msrb.mxu0 %v7695_v10  ;;  %v10608_v7 = vld [vmem:[%s11454_s28 + $0x2dc] sm:$0xf]  ;;  %v8367_v40 = vor.u32 %v10808_v60, %v8364_v61  ;;  %v6303_v9 = vadd.f32 %v6302_v63, %v6290_v28 }
 0x4cd   : > { %6509 = vmatmul.bf16.vlgmr.msra.gmra.mxu1 %v11699_v30  ;;  %v7564_v6 = vld [vmem:[%s11454_s28 + $0x2f8] sm:$0xf0]  ;;  %6581 = vmatpush.bf16.msrb.mxu3 %v8399_v57 }
 0x4ce   : > { %6553 = vmatpush.bf16.msrb.mxu1 %v7951_v11  ;;  %v10672_v8 = vld [vmem:[%s11454_s28 + $0x4dc] sm:$0xf]  ;;  %v7567_v11 = vor.u32 %v10608_v7, %v7564_v6  ;;  %v6317_v6 = vpop.f32.mrf.mxu2 }
 0x4cf   : > { %6522 = vmatmul.bf16.vlgmr.msra.gmra.mxu2 %v11764_v13  ;;  %v7820_v48 = vld [vmem:[%s11454_s28 + $0x4f8] sm:$0xf0] }
 0x4d0   : > { %6566 = vmatpush.bf16.msrb.mxu2 %v8207_v12  ;;  %6541 = vmatpush.bf16.msrb.mxu0 %v7663_v29  ;;  %v10736_v26 = vld [vmem:[%s11454_s28 + $0x6dc] sm:$0xf]  ;;  %v7823_v12 = vor.u32 %v10672_v8, %v7820_v48  ;;  %v6316_v29 = vadd.f32 %v6315_v18, %v6303_v9 }
 0x4d1   : > { %v8076_v19 = vld [vmem:[%s11454_s28 + $0x6f8] sm:$0xf0]  ;;  %6582 = vmatpush.bf16.msrb.mxu3 %v8367_v40 }
 0x4d2   : > { %6554 = vmatpush.bf16.msrb.mxu1 %v7919_v31  ;;  %v10800_v21 = vld [vmem:[%s11454_s28 + $0x8dc] sm:$0xf]  ;;  %v8079_v4 = vor.u32 %v10736_v26, %v8076_v19  ;;  %v6328_v31 = vpop.f32.mrf.mxu3 }
 0x4d3   : > { %v8332_v10 = vld [vmem:[%s11454_s28 + $0x8f8] sm:$0xf0]  ;;  %v13179_v44 = vadd.f32 %v6328_v31, %v6316_v29 }
 0x4d4   : > { %6567 = vmatpush.bf16.msrb.mxu2 %v8175_v22  ;;  %6542 = vmatpush.bf16.msrb.mxu0 %v7631_v51  ;;  %v10600_v14 = vld [vmem:[%s11454_s28 + $0x29c] sm:$0xf]  ;;  %v8335_v17 = vor.u32 %v10800_v21, %v8332_v10 }
 0x4d5   : > { %v7532_v15 = vld [vmem:[%s11454_s28 + $0x2b8] sm:$0xf0] }
 0x4d6   : > { %6555 = vmatpush.bf16.msrb.mxu1 %v7887_v0  ;;  %v10664_v16 = vld [vmem:[%s11454_s28 + $0x49c] sm:$0xf]  ;;  %v7535_v54 = vor.u32 %v10600_v14, %v7532_v15  ;;  %6583 = vmatpush.bf16.msrb.mxu3 %v8335_v17 }
 0x4d7   : > { %v7788_v1 = vld [vmem:[%s11454_s28 + $0x4b8] sm:$0xf0] }
 0x4d8   : > { %6568 = vmatpush.bf16.msrb.mxu2 %v8143_v52  ;;  %6543 = vmatpush.bf16.msrb.mxu0 %v7599_v62  ;;  %v10728_v35 = vld [vmem:[%s11454_s28 + $0x69c] sm:$0xf]  ;;  %v7791_v46 = vor.u32 %v10664_v16, %v7788_v1 }
 0x4d9   : > { %v8044_v23 = vld [vmem:[%s11454_s28 + $0x6b8] sm:$0xf0] }
 0x4da   : > { %6556 = vmatpush.bf16.msrb.mxu1 %v7855_v2  ;;  %v10792_v22 = vld [vmem:[%s11454_s28 + $0x89c] sm:$0xf]  ;;  %v8047_v47 = vor.u32 %v10728_v35, %v8044_v23  ;;  %v6330_v48 = vpop.f32.mrf.mxu3 }
 0x4db   : > { %v8300_v32 = vld [vmem:[%s11454_s28 + $0x8b8] sm:$0xf0] }
 0x4dc   : > { %6569 = vmatpush.bf16.msrb.mxu2 %v8111_v3  ;;  %6544 = vmatpush.bf16.msrb.mxu0 %v7567_v11  ;;  %v10592_v58 = vld [vmem:[%s11454_s28 + $0x25c] sm:$0xf]  ;;  %v8303_v0 = vor.u32 %v10792_v22, %v8300_v32 }
 0x4dd   : > { %v7500_v50 = vld [vmem:[%s11454_s28 + $0x278] sm:$0xf0] }
 0x4de   : > { %6557 = vmatpush.bf16.msrb.mxu1 %v7823_v12  ;;  %v10656_v51 = vld [vmem:[%s11454_s28 + $0x45c] sm:$0xf]  ;;  %v7503_v41 = vor.u32 %v10592_v58, %v7500_v50  ;;  %6584 = vmatpush.bf16.msrb.mxu3 %v8303_v0 }
 0x4df   : > { %v7756_v52 = vld [vmem:[%s11454_s28 + $0x478] sm:$0xf0] }
 0x4e0   : > { %6570 = vmatpush.bf16.msrb.mxu2 %v8079_v4  ;;  %v10720_v53 = vld [vmem:[%s11454_s28 + $0x65c] sm:$0xf]  ;;  %6545 = vmatpush.bf16.msrb.mxu0 %v7535_v54  ;;  %v7759_v59 = vor.u32 %v10656_v51, %v7756_v52 }
 0x4e1   : > { %v8012_v5 = vld [vmem:[%s11454_s28 + $0x678] sm:$0xf0] }
 0x4e2   : > { %v10784_v55 = vld [vmem:[%s11454_s28 + $0x85c] sm:$0xf]  ;;  %6558 = vmatpush.bf16.msrb.mxu1 %v7791_v46  ;;  %v8015_v60 = vor.u32 %v10720_v53, %v8012_v5 }
 0x4e3   : > { %v8268_v57 = vld [vmem:[%s11454_s28 + $0x878] sm:$0xf0] }
 0x4e4   : > { %v10584_v56 = vld [vmem:[%s11454_s28 + $0x21c] sm:$0xf]  ;;  %6571 = vmatpush.bf16.msrb.mxu2 %v8047_v47  ;;  %v8271_v63 = vor.u32 %v10784_v55, %v8268_v57  ;;  %6546 = vmatpush.bf16.msrb.mxu0 %v7503_v41 }
 0x4e5   : > { %v7468_v49 = vld [vmem:[%s11454_s28 + $0x238] sm:$0xf0] }
 0x4e6   : > { %v10648_v61 = vld [vmem:[%s11454_s28 + $0x41c] sm:$0xf]  ;;  %v7471_v26 = vor.u32 %v10584_v56, %v7468_v49  ;;  %6559 = vmatpush.bf16.msrb.mxu1 %v7759_v59  ;;  %6585 = vmatpush.bf16.msrb.mxu3 %v8271_v63 }
 0x4e7   : > { %v7724_v28 = vld [vmem:[%s11454_s28 + $0x438] sm:$0xf0] }
 0x4e8   : > { %v10712_v62 = vld [vmem:[%s11454_s28 + $0x61c] sm:$0xf]  ;;  %6572 = vmatpush.bf16.msrb.mxu2 %v8015_v60  ;;  %v7727_v11 = vor.u32 %v10648_v61, %v7724_v28  ;;  %6547 = vmatpush.bf16.msrb.mxu0 %v7471_v26 }
 0x4e9   : > { %v7980_v2 = vld [vmem:[%s11454_s28 + $0x638] sm:$0xf0] }
 0x4ea   : > { %v10776_v3 = vld [vmem:[%s11454_s28 + $0x81c] sm:$0xf]  ;;  %v7983_v12 = vor.u32 %v10712_v62, %v7980_v2  ;;  %6560 = vmatpush.bf16.msrb.mxu1 %v7727_v11  ;;  %v6341_v62 = vpop.f32.mrf.mxu0 }
 0x4eb   : > { %v8236_v7 = vld [vmem:[%s11454_s28 + $0x838] sm:$0xf0]  ;;  %6548 = vmatmul.bf16.vlgmr.msrb.gmra.mxu0 %v11569_v34 }
 0x4ec   : > { %v10896_v8 = vld [vmem:[%s11454_s28 + $0xbdc] sm:$0xf]  ;;  %v8239_v15 = vor.u32 %v10776_v3, %v8236_v7  ;;  %6573 = vmatpush.bf16.msrb.mxu2 %v7983_v12  ;;  %v6354_v7 = vpop.f32.mrf.mxu1 }
 0x4ed   : > { %v8716_v40 = vld [vmem:[%s11454_s28 + $0xbf8] sm:$0xf0]  ;;  %6561 = vmatmul.bf16.vlgmr.msrb.gmra.mxu1 %v11561_v27  ;;  %v6342_v27 = vadd.f32 %v6341_v62, %v13179_v44 }
 0x4ee   : > { %v10960_v9 = vld [vmem:[%s11454_s28 + $0xddc] sm:$0xf]  ;;  %v8719_v16 = vor.u32 %v10896_v8, %v8716_v40  ;;  %6586 = vmatpush.bf16.msrb.mxu3 %v8239_v15 }
 0x4ef   : > { %v8972_v19 = vld [vmem:[%s11454_s28 + $0xdf8] sm:$0xf0]  ;;  %6574 = vmatmul.bf16.vlgmr.msrb.gmra.mxu2 %v11567_v33 }
 0x4f0   : > { %v11024_v21 = vld [vmem:[%s11454_s28 + $0xfdc] sm:$0xf]  ;;  %v8975_v17 = vor.u32 %v10960_v9, %v8972_v19  ;;  %6592 = vmatpush.bf16.msra.mxu0 %v8719_v16  ;;  %v6355_v19 = vadd.f32 %v6354_v7, %v6342_v27 }
 0x4f1   : > { %v9228_v10 = vld [vmem:[%s11454_s28 + $0xff8] sm:$0xf0]  ;;  %6587 = vmatmul.bf16.vlgmr.msrb.gmra.mxu3 %v11619_v42 }
 0x4f2   : > { %v11088_v4 = vld [vmem:[%s11454_s28 + $0x11dc] sm:$0xf]  ;;  %v9231_v18 = vor.u32 %v11024_v21, %v9228_v10  ;;  %6605 = vmatpush.bf16.msra.mxu1 %v8975_v17 }
 0x4f3   : > { %v9484_v14 = vld [vmem:[%s11454_s28 + $0x11f8] sm:$0xf0] }
 0x4f4   : > { %v10888_v1 = vld [vmem:[%s11454_s28 + $0xb9c] sm:$0xf]  ;;  %v9487_v29 = vor.u32 %v11088_v4, %v9484_v14  ;;  %6618 = vmatpush.bf16.msra.mxu2 %v9231_v18  ;;  %v6707_v4 = vrot.slane %v6355_v19, 6 }
 0x4f5   : > { %v8684_v35 = vld [vmem:[%s11454_s28 + $0xbb8] sm:$0xf0] }
 0x4f6   : > { %v10952_v23 = vld [vmem:[%s11454_s28 + $0xd9c] sm:$0xf]  ;;  %v8687_v37 = vor.u32 %v10888_v1, %v8684_v35  ;;  %6631 = vmatpush.bf16.msra.mxu3 %v9487_v29  ;;  %v13247_v35 = vsel %vm6710_vm0, %v13019_v38, %v6707_v4 }
 0x4f7   : > { %v8940_v31 = vld [vmem:[%s11454_s28 + $0xdb8] sm:$0xf0] }
 0x4f8   : > { %v11016_v22 = vld [vmem:[%s11454_s28 + $0xf9c] sm:$0xf]  ;;  %v8943_v46 = vor.u32 %v10952_v23, %v8940_v31  ;;  %6593 = vmatpush.bf16.msra.mxu0 %v8687_v37  ;;  %v6380_v37 = vpop.f32.mrf.mxu3 }
 0x4f9   : > { %v9196_v32 = vld [vmem:[%s11454_s28 + $0xfb8] sm:$0xf0] }
 0x4fa   : > { %v11080_v36 = vld [vmem:[%s11454_s28 + $0x119c] sm:$0xf]  ;;  %v9199_v47 = vor.u32 %v11016_v22, %v9196_v32  ;;  %6606 = vmatpush.bf16.msra.mxu1 %v8943_v46  ;;  %v6367_v32 = vpop.f32.mrf.mxu2  ;;  %v6343_v46 = vpop.f32.mrf.mxu0 }
 0x4fb   : > { %v9452_v54 = vld [vmem:[%s11454_s28 + $0x11b8] sm:$0xf0]  ;;  %v13254_v38 = vadd.f32 %v6380_v37, %v6367_v32 }
 0x4fc   : > { %v10880_v58 = vld [vmem:[%s11454_s28 + $0xb5c] sm:$0xf]  ;;  %v9455_v0 = vor.u32 %v11080_v36, %v9452_v54  ;;  %6619 = vmatpush.bf16.msra.mxu2 %v9199_v47 }
 0x4fd   : > { %v8652_v50 = vld [vmem:[%s11454_s28 + $0xb78] sm:$0xf0] }
 0x4fe   : > { %v10944_v51 = vld [vmem:[%s11454_s28 + $0xd5c] sm:$0xf]  ;;  %v8655_v41 = vor.u32 %v10880_v58, %v8652_v50  ;;  %6632 = vmatpush.bf16.msra.mxu3 %v9455_v0  ;;  %v6356_v58 = vpop.f32.mrf.mxu1 }
 0x4ff   : > { %v8908_v52 = vld [vmem:[%s11454_s28 + $0xd78] sm:$0xf0] }
 0x500   : > { %v11008_v53 = vld [vmem:[%s11454_s28 + $0xf5c] sm:$0xf]  ;;  %v8911_v33 = vor.u32 %v10944_v51, %v8908_v52  ;;  %6594 = vmatpush.bf16.msra.mxu0 %v8655_v41 }
 0x501   : > { %v9164_v5 = vld [vmem:[%s11454_s28 + $0xf78] sm:$0xf0] }
 0x502   : > { %v11072_v55 = vld [vmem:[%s11454_s28 + $0x115c] sm:$0xf]  ;;  %v9167_v56 = vor.u32 %v11008_v53, %v9164_v5  ;;  %6607 = vmatpush.bf16.msra.mxu1 %v8911_v33  ;;  %v6369_v7 = vpop.f32.mrf.mxu2 }
 0x503   : > { %v9420_v57 = vld [vmem:[%s11454_s28 + $0x1178] sm:$0xf0] }
 0x504   : > { %v10872_v49 = vld [vmem:[%s11454_s28 + $0xb1c] sm:$0xf]  ;;  %v9423_v42 = vor.u32 %v11072_v55, %v9420_v57  ;;  %6620 = vmatpush.bf16.msra.mxu2 %v9167_v56 }
 0x505   : > { %v8620_v59 = vld [vmem:[%s11454_s28 + $0xb38] sm:$0xf0] }
 0x506   : > { %v10936_v34 = vld [vmem:[%s11454_s28 + $0xd1c] sm:$0xf]  ;;  %v8623_v3 = vor.u32 %v10872_v49, %v8620_v59  ;;  %6633 = vmatpush.bf16.msra.mxu3 %v9423_v42  ;;  %v6406_v7 = vpop.f32.mrf.mxu1 }
 0x507   : > { %v8876_v60 = vld [vmem:[%s11454_s28 + $0xd38] sm:$0xf0] }
 0x508   : > { %v11000_v61 = vld [vmem:[%s11454_s28 + $0xf1c] sm:$0xf]  ;;  %v8879_v6 = vor.u32 %v10936_v34, %v8876_v60  ;;  %6595 = vmatpush.bf16.msra.mxu0 %v8623_v3 }
 0x509   : > { %v9132_v28 = vld [vmem:[%s11454_s28 + $0xf38] sm:$0xf0] }
 0x50a   : > { %v11064_v63 = vld [vmem:[%s11454_s28 + $0x111c] sm:$0xf]  ;;  %v9135_v8 = vor.u32 %v11000_v61, %v9132_v28  ;;  %6608 = vmatpush.bf16.msra.mxu1 %v8879_v6 }
 0x50b   : > { %v9388_v2 = vld [vmem:[%s11454_s28 + $0x1138] sm:$0xf0] }
 0x50c   : > { %v10864_v40 = vld [vmem:[%s11454_s28 + $0xadc] sm:$0xf]  ;;  %v9391_v26 = vor.u32 %v11064_v63, %v9388_v2  ;;  %6621 = vmatpush.bf16.msra.mxu2 %v9135_v8 }
 0x50d   : > { %v8588_v9 = vld [vmem:[%s11454_s28 + $0xaf8] sm:$0xf0] }
 0x50e   : > { %v10928_v48 = vld [vmem:[%s11454_s28 + $0xcdc] sm:$0xf]  ;;  %v8591_v14 = vor.u32 %v10864_v40, %v8588_v9  ;;  %6634 = vmatpush.bf16.msra.mxu3 %v9391_v26  ;;  %v6382_v9 = vpop.f32.mrf.mxu3 }
 0x50f   : > { %v8844_v21 = vld [vmem:[%s11454_s28 + $0xcf8] sm:$0xf0] }
 0x510   : > { %v10992_v10 = vld [vmem:[%s11454_s28 + $0xedc] sm:$0xf]  ;;  %v8847_v15 = vor.u32 %v10928_v48, %v8844_v21  ;;  %6596 = vmatpush.bf16.msra.mxu0 %v8591_v14 }
 0x511   : > { %v9100_v44 = vld [vmem:[%s11454_s28 + $0xef8] sm:$0xf0] }
 0x512   : > { %v11056_v11 = vld [vmem:[%s11454_s28 + $0x10dc] sm:$0xf]  ;;  %v9103_v16 = vor.u32 %v10992_v10, %v9100_v44  ;;  %6609 = vmatpush.bf16.msra.mxu1 %v8847_v15 }
 0x513   : > { %v9356_v12 = vld [vmem:[%s11454_s28 + $0x10f8] sm:$0xf0] }
 0x514   : > { %v10856_v17 = vld [vmem:[%s11454_s28 + $0xa9c] sm:$0xf]  ;;  %v9359_v23 = vor.u32 %v11056_v11, %v9356_v12  ;;  %6622 = vmatpush.bf16.msra.mxu2 %v9103_v16 }
 0x515   : > { %v8556_v18 = vld [vmem:[%s11454_s28 + $0xab8] sm:$0xf0] }
 0x516   : > { %v10920_v1 = vld [vmem:[%s11454_s28 + $0xc9c] sm:$0xf]  ;;  %v8559_v47 = vor.u32 %v10856_v17, %v8556_v18  ;;  %6635 = vmatpush.bf16.msra.mxu3 %v9359_v23 }
 0x517   : > { %v8812_v29 = vld [vmem:[%s11454_s28 + $0xcb8] sm:$0xf0] }
 0x518   : > { %v10984_v31 = vld [vmem:[%s11454_s28 + $0xe9c] sm:$0xf]  ;;  %v8815_v50 = vor.u32 %v10920_v1, %v8812_v29  ;;  %6597 = vmatpush.bf16.msra.mxu0 %v8559_v47 }
 0x519   : > { %v9068_v22 = vld [vmem:[%s11454_s28 + $0xeb8] sm:$0xf0] }
 0x51a   : > { %v11048_v36 = vld [vmem:[%s11454_s28 + $0x109c] sm:$0xf]  ;;  %v9071_v51 = vor.u32 %v10984_v31, %v9068_v22  ;;  %6610 = vmatpush.bf16.msra.mxu1 %v8815_v50 }
 0x51b   : > { %v9324_v54 = vld [vmem:[%s11454_s28 + $0x10b8] sm:$0xf0] }
 0x51c   : > { %v10848_v0 = vld [vmem:[%s11454_s28 + $0xa5c] sm:$0xf]  ;;  %v9327_v5 = vor.u32 %v11048_v36, %v9324_v54  ;;  %6623 = vmatpush.bf16.msra.mxu2 %v9071_v51 }
 0x51d   : > { %v8524_v52 = vld [vmem:[%s11454_s28 + $0xa78] sm:$0xf0] }
 0x51e   : > { %v10912_v53 = vld [vmem:[%s11454_s28 + $0xc5c] sm:$0xf]  ;;  %v8527_v49 = vor.u32 %v10848_v0, %v8524_v52  ;;  %6636 = vmatpush.bf16.msra.mxu3 %v9327_v5 }
 0x51f   : > { %v8780_v55 = vld [vmem:[%s11454_s28 + $0xc78] sm:$0xf0] }
 0x520   : > { %v10976_v57 = vld [vmem:[%s11454_s28 + $0xe5c] sm:$0xf]  ;;  %v8783_v42 = vor.u32 %v10912_v53, %v8780_v55  ;;  %6598 = vmatpush.bf16.msra.mxu0 %v8527_v49 }
 0x521   : > { %v9036_v41 = vld [vmem:[%s11454_s28 + $0xe78] sm:$0xf0] }
 0x522   : > { %v11040_v33 = vld [vmem:[%s11454_s28 + $0x105c] sm:$0xf]  ;;  %v9039_v60 = vor.u32 %v10976_v57, %v9036_v41  ;;  %6611 = vmatpush.bf16.msra.mxu1 %v8783_v42 }
 0x523   : > { %v9292_v56 = vld [vmem:[%s11454_s28 + $0x1078] sm:$0xf0] }
 0x524   : > { %v10840_v59 = vld [vmem:[%s11454_s28 + $0xa1c] sm:$0xf]  ;;  %v9295_v63 = vor.u32 %v11040_v33, %v9292_v56  ;;  %6624 = vmatpush.bf16.msra.mxu2 %v9039_v60 }
 0x525   : > { %v8492_v34 = vld [vmem:[%s11454_s28 + $0xa38] sm:$0xf0] }
 0x526   : > { %v10904_v61 = vld [vmem:[%s11454_s28 + $0xc1c] sm:$0xf]  ;;  %v8495_v48 = vor.u32 %v10840_v59, %v8492_v34  ;;  %6637 = vmatpush.bf16.msra.mxu3 %v9295_v63 }
 0x527   : > { %v8748_v28 = vld [vmem:[%s11454_s28 + $0xc38] sm:$0xf0] }
 0x528   : > { %v10968_v62 = vld [vmem:[%s11454_s28 + $0xe1c] sm:$0xf]  ;;  %v8751_v10 = vor.u32 %v10904_v61, %v8748_v28  ;;  %6599 = vmatpush.bf16.msra.mxu0 %v8495_v48  ;;  %v6393_v61 = vpop.f32.mrf.mxu0 }
 0x529   : > { %v9004_v2 = vld [vmem:[%s11454_s28 + $0xe38] sm:$0xf0] }
 0x52a   : > { %v11032_v27 = vld [vmem:[%s11454_s28 + $0x101c] sm:$0xf]  ;;  %v9007_v44 = vor.u32 %v10968_v62, %v9004_v2  ;;  %6612 = vmatpush.bf16.msra.mxu1 %v8751_v10 }
 0x52b   : > { %v9260_v3 = vld [vmem:[%s11454_s28 + $0x1038] sm:$0xf0]  ;;  %6600 = vmatmul.bf16.vlgmr.msra.gmra.mxu0 %v11623_v45 }
 0x52c   : > { %v11152_v6 = vld [vmem:[%s11454_s28 + $0x13dc] sm:$0xf]  ;;  %v9263_v4 = vor.u32 %v11032_v27, %v9260_v3  ;;  %6625 = vmatpush.bf16.msra.mxu2 %v9007_v44  ;;  %v6394_v3 = vadd.f32 %v6393_v61, %v13254_v38 }
 0x52d   : > { %v9740_v8 = vld [vmem:[%s11454_s28 + $0x13f8] sm:$0xf0]  ;;  %6613 = vmatmul.bf16.vlgmr.msra.gmra.mxu1 %v11615_v39 }
 0x52e   : > { %v11216_v40 = vld [vmem:[%s11454_s28 + $0x15dc] sm:$0xf]  ;;  %v9743_v14 = vor.u32 %v11152_v6, %v9740_v8  ;;  %6638 = vmatpush.bf16.msra.mxu3 %v9263_v4  ;;  %v6419_v4 = vpop.f32.mrf.mxu2 }
 0x52f   : > { %v9996_v26 = vld [vmem:[%s11454_s28 + $0x15f8] sm:$0xf0]  ;;  %6626 = vmatmul.bf16.vlgmr.msra.gmra.mxu2 %v11621_v43 }
 0x530   : > { %v11280_v19 = vld [vmem:[%s11454_s28 + $0x17dc] sm:$0xf]  ;;  %v9999_v15 = vor.u32 %v11216_v40, %v9996_v26  ;;  %6644 = vmatpush.bf16.msrb.mxu0 %v9743_v14 }
 0x531   : > { %v10252_v21 = vld [vmem:[%s11454_s28 + $0x17f8] sm:$0xf0]  ;;  %6639 = vmatmul.bf16.vlgmr.msra.gmra.mxu3 %v11688_v20 }
 0x532   : > { %v11344_v11 = vld [vmem:[%s11454_s28 + $0x19dc] sm:$0xf]  ;;  %v10255_v16 = vor.u32 %v11280_v19, %v10252_v21  ;;  %6657 = vmatpush.bf16.msrb.mxu1 %v9999_v15  ;;  %v6407_v19 = vadd.f32 %v6406_v7, %v6394_v3 }
 0x533   : > { %v10508_v12 = vld [vmem:[%s11454_s28 + $0x19f8] sm:$0xf0] }
 0x534   : > { %v11144_v17 = vld [vmem:[%s11454_s28 + $0x139c] sm:$0xf]  ;;  %v10511_v23 = vor.u32 %v11344_v11, %v10508_v12  ;;  %6670 = vmatpush.bf16.msrb.mxu2 %v10255_v16 }
 0x535   : > { %v9708_v18 = vld [vmem:[%s11454_s28 + $0x13b8] sm:$0xf0] }
 0x536   : > { %v11208_v1 = vld [vmem:[%s11454_s28 + $0x159c] sm:$0xf]  ;;  %v9711_v54 = vor.u32 %v11144_v17, %v9708_v18  ;;  %6683 = vmatpush.bf16.msrb.mxu3 %v10511_v23  ;;  %v6420_v18 = vadd.f32 %v6419_v4, %v6407_v19 }
 0x537   : > { %v9964_v29 = vld [vmem:[%s11454_s28 + $0x15b8] sm:$0xf0] }
 0x538   : > { %v11272_v31 = vld [vmem:[%s11454_s28 + $0x179c] sm:$0xf]  ;;  %v9967_v37 = vor.u32 %v11208_v1, %v9964_v29  ;;  %6645 = vmatpush.bf16.msrb.mxu0 %v9711_v54  ;;  %v6432_v1 = vpop.f32.mrf.mxu3 }
 0x539   : > { %v10220_v22 = vld [vmem:[%s11454_s28 + $0x17b8] sm:$0xf0] }
 0x53a   : > { %v11336_v32 = vld [vmem:[%s11454_s28 + $0x199c] sm:$0xf]  ;;  %v10223_v46 = vor.u32 %v11272_v31, %v10220_v22  ;;  %6658 = vmatpush.bf16.msrb.mxu1 %v9967_v37  ;;  %v6433_v22 = vadd.f32 %v6432_v1, %v6420_v18 }
 0x53b   : > { %v10476_v36 = vld [vmem:[%s11454_s28 + $0x19b8] sm:$0xf0] }
 0x53c   : > { %v11136_v47 = vld [vmem:[%s11454_s28 + $0x135c] sm:$0xf]  ;;  %v10479_v51 = vor.u32 %v11336_v32, %v10476_v36  ;;  %6671 = vmatpush.bf16.msrb.mxu2 %v10223_v46  ;;  %v6395_v32 = vpop.f32.mrf.mxu0 }
 0x53d   : > { %v9676_v58 = vld [vmem:[%s11454_s28 + $0x1378] sm:$0xf0] }
 0x53e   : > { %v11200_v50 = vld [vmem:[%s11454_s28 + $0x155c] sm:$0xf]  ;;  %v9679_v45 = vor.u32 %v11136_v47, %v9676_v58  ;;  %6684 = vmatpush.bf16.msrb.mxu3 %v10479_v51  ;;  %v6408_v58 = vpop.f32.mrf.mxu1 }
 0x53f   : > { %v9932_v0 = vld [vmem:[%s11454_s28 + $0x1578] sm:$0xf0] }
 0x540   : > { %v11264_v52 = vld [vmem:[%s11454_s28 + $0x175c] sm:$0xf]  ;;  %v9935_v57 = vor.u32 %v11200_v50, %v9932_v0  ;;  %6646 = vmatpush.bf16.msrb.mxu0 %v9679_v45 }
 0x541   : > { %v10188_v53 = vld [vmem:[%s11454_s28 + $0x1778] sm:$0xf0] }
 0x542   : > { %v11328_v5 = vld [vmem:[%s11454_s28 + $0x195c] sm:$0xf]  ;;  %v10191_v41 = vor.u32 %v11264_v52, %v10188_v53  ;;  %6659 = vmatpush.bf16.msrb.mxu1 %v9935_v57 }
 0x543   : > { %v10444_v55 = vld [vmem:[%s11454_s28 + $0x1978] sm:$0xf0] }
 0x544   : > { %v11128_v33 = vld [vmem:[%s11454_s28 + $0x131c] sm:$0xf]  ;;  %v10447_v39 = vor.u32 %v11328_v5, %v10444_v55  ;;  %6672 = vmatpush.bf16.msrb.mxu2 %v10191_v41 }
 0x545   : > { %v9644_v56 = vld [vmem:[%s11454_s28 + $0x1338] sm:$0xf0] }
 0x546   : > { %v11192_v43 = vld [vmem:[%s11454_s28 + $0x151c] sm:$0xf]  ;;  %v9647_v60 = vor.u32 %v11128_v33, %v9644_v56  ;;  %6685 = vmatpush.bf16.msrb.mxu3 %v10447_v39  ;;  %v6458_v3 = vpop.f32.mrf.mxu1 }
 0x547   : > { %v9900_v49 = vld [vmem:[%s11454_s28 + $0x1538] sm:$0xf0] }
 0x548   : > { %v11256_v59 = vld [vmem:[%s11454_s28 + $0x171c] sm:$0xf]  ;;  %v9903_v28 = vor.u32 %v11192_v43, %v9900_v49  ;;  %6647 = vmatpush.bf16.msrb.mxu0 %v9647_v60  ;;  %v6421_v43 = vpop.f32.mrf.mxu2 }
 0x549   : > { %v10156_v34 = vld [vmem:[%s11454_s28 + $0x1738] sm:$0xf0] }
 0x54a   : > { %v11320_v42 = vld [vmem:[%s11454_s28 + $0x191c] sm:$0xf]  ;;  %v10159_v62 = vor.u32 %v11256_v59, %v10156_v34  ;;  %6660 = vmatpush.bf16.msrb.mxu1 %v9903_v28 }
 0x54b   : > { %v10412_v20 = vld [vmem:[%s11454_s28 + $0x1938] sm:$0xf0] }
 0x54c   : > { %v11120_v63 = vld [vmem:[%s11454_s28 + $0x12dc] sm:$0xf]  ;;  %v10415_v6 = vor.u32 %v11320_v42, %v10412_v20  ;;  %6673 = vmatpush.bf16.msrb.mxu2 %v10159_v62  ;;  %v6434_v42 = vpop.f32.mrf.mxu3 }
 0x54d   : > { %v9612_v2 = vld [vmem:[%s11454_s28 + $0x12f8] sm:$0xf0] }
 0x54e   : > { %v11184_v27 = vld [vmem:[%s11454_s28 + $0x14dc] sm:$0xf]  ;;  %v9615_v21 = vor.u32 %v11120_v63, %v9612_v2  ;;  %6686 = vmatpush.bf16.msrb.mxu3 %v10415_v6  ;;  %v6445_v2 = vpop.f32.mrf.mxu0 }
 0x54f   : > { %v9868_v8 = vld [vmem:[%s11454_s28 + $0x14f8] sm:$0xf0] }
 0x550   : > { %v11248_v40 = vld [vmem:[%s11454_s28 + $0x16dc] sm:$0xf]  ;;  %v9871_v38 = vor.u32 %v11184_v27, %v9868_v8  ;;  %6648 = vmatpush.bf16.msrb.mxu0 %v9615_v21  ;;  %v6446_v27 = vadd.f32 %v6445_v2, %v6433_v22  ;;  %v6471_v6 = vpop.f32.mrf.mxu2 }
 0x551   : > { %v10124_v9 = vld [vmem:[%s11454_s28 + $0x16f8] sm:$0xf0] }
 0x552   : > { %v11312_v48 = vld [vmem:[%s11454_s28 + $0x18dc] sm:$0xf]  ;;  %v10127_v10 = vor.u32 %v11248_v40, %v10124_v9  ;;  %6661 = vmatpush.bf16.msrb.mxu1 %v9871_v38  ;;  %v6459_v7 = vadd.f32 %v6458_v3, %v6446_v27 }
 0x553   : > { %v10380_v26 = vld [vmem:[%s11454_s28 + $0x18f8] sm:$0xf0] }
 0x554   : > { %v11112_v44 = vld [vmem:[%s11454_s28 + $0x129c] sm:$0xf]  ;;  %v10383_v14 = vor.u32 %v11312_v48, %v10380_v26  ;;  %6674 = vmatpush.bf16.msrb.mxu2 %v10127_v10  ;;  %v6472_v8 = vadd.f32 %v6471_v6, %v6459_v7  ;;  %v6484_v40 = vpop.f32.mrf.mxu3  ;;  %v6460_v48 = vpop.f32.mrf.mxu1 }
 0x555   : > { %v9580_v11 = vld [vmem:[%s11454_s28 + $0x12b8] sm:$0xf0] }
 0x556   : > { %v11176_v12 = vld [vmem:[%s11454_s28 + $0x149c] sm:$0xf]  ;;  %v9583_v31 = vor.u32 %v11112_v44, %v9580_v11  ;;  %6687 = vmatpush.bf16.msrb.mxu3 %v10383_v14  ;;  %v6447_v9 = vpop.f32.mrf.mxu0  ;;  %v6485_v26 = vadd.f32 %v6484_v40, %v6472_v8 }
 0x557   : > { %v9836_v15 = vld [vmem:[%s11454_s28 + $0x14b8] sm:$0xf0] }
 0x558   : > { %v11240_v16 = vld [vmem:[%s11454_s28 + $0x169c] sm:$0xf]  ;;  %v9839_v36 = vor.u32 %v11176_v12, %v9836_v15  ;;  %6649 = vmatpush.bf16.msrb.mxu0 %v9583_v31  ;;  %v6473_v19 = vpop.f32.mrf.mxu2 }
 0x559   : > { %v10092_v17 = vld [vmem:[%s11454_s28 + $0x16b8] sm:$0xf0] }
 0x55a   : > { %v11304_v23 = vld [vmem:[%s11454_s28 + $0x189c] sm:$0xf]  ;;  %v10095_v54 = vor.u32 %v11240_v16, %v10092_v17  ;;  %6662 = vmatpush.bf16.msrb.mxu1 %v9839_v36 }
 0x55b   : > { %v10348_v29 = vld [vmem:[%s11454_s28 + $0x18b8] sm:$0xf0] }
 0x55c   : > { %v11104_v37 = vld [vmem:[%s11454_s28 + $0x125c] sm:$0xf]  ;;  %v10351_v50 = vor.u32 %v11304_v23, %v10348_v29  ;;  %6675 = vmatpush.bf16.msrb.mxu2 %v10095_v54  ;;  %v6486_v21 = vpop.f32.mrf.mxu3  ;;  %v6510_v10 = vpop.f32.mrf.mxu1 }
 0x55d   : > { %v9548_v46 = vld [vmem:[%s11454_s28 + $0x1278] sm:$0xf0] }
 0x55e   : > { %v11168_v47 = vld [vmem:[%s11454_s28 + $0x145c] sm:$0xf]  ;;  %v9551_v55 = vor.u32 %v11104_v37, %v9548_v46  ;;  %6688 = vmatpush.bf16.msrb.mxu3 %v10351_v50  ;;  %v6497_v38 = vpop.f32.mrf.mxu0 }
 0x55f   : > { %v9804_v51 = vld [vmem:[%s11454_s28 + $0x1478] sm:$0xf0] }
 0x560   : > { %v11232_v0 = vld [vmem:[%s11454_s28 + $0x165c] sm:$0xf]  ;;  %v9807_v45 = vor.u32 %v11168_v47, %v9804_v51  ;;  %6650 = vmatpush.bf16.msrb.mxu0 %v9551_v55  ;;  %v6523_v44 = vpop.f32.mrf.mxu2 }
 0x561   : > { %v10060_v52 = vld [vmem:[%s11454_s28 + $0x1678] sm:$0xf0] }
 0x562   : > { %v11296_v53 = vld [vmem:[%s11454_s28 + $0x185c] sm:$0xf]  ;;  %v10063_v57 = vor.u32 %v11232_v0, %v10060_v52  ;;  %6663 = vmatpush.bf16.msrb.mxu1 %v9807_v45 }
 0x563   : > { %v10316_v5 = vld [vmem:[%s11454_s28 + $0x1878] sm:$0xf0] }
 0x564   : > { %v11096_v41 = vld [vmem:[%s11454_s28 + $0x121c] sm:$0xf]  ;;  %v10319_v39 = vor.u32 %v11296_v53, %v10316_v5  ;;  %6676 = vmatpush.bf16.msrb.mxu2 %v10063_v57  ;;  %v6536_v11 = vpop.f32.mrf.mxu3  ;;  %v6512_v12 = vpop.f32.mrf.mxu1 }
 0x565   : > { %v9516_v33 = vld [vmem:[%s11454_s28 + $0x1238] sm:$0xf0] }
 0x566   : > { %v11160_v56 = vld [vmem:[%s11454_s28 + $0x141c] sm:$0xf]  ;;  %v9519_v61 = vor.u32 %v11096_v41, %v9516_v33  ;;  %6689 = vmatpush.bf16.msrb.mxu3 %v10319_v39 }
 0x567   : > { %v9772_v49 = vld [vmem:[%s11454_s28 + $0x1438] sm:$0xf0] }
 0x568   : > { %v11224_v59 = vld [vmem:[%s11454_s28 + $0x161c] sm:$0xf]  ;;  %v9775_v28 = vor.u32 %v11160_v56, %v9772_v49  ;;  %6651 = vmatpush.bf16.msrb.mxu0 %v9519_v61  ;;  %v6525_v4 = vpop.f32.mrf.mxu2  ;;  %v299_v61 = vld [vmem:[#allocation2 + $0x8] sm:$0xff] }
 0x569   : > { %v10028_v34 = vld [vmem:[%s11454_s28 + $0x1638] sm:$0xf0] }
 0x56a   : > { %v11288_v20 = vld [vmem:[%s11454_s28 + $0x181c] sm:$0xf]  ;;  %v10031_v62 = vor.u32 %v11224_v59, %v10028_v34  ;;  %6664 = vmatpush.bf16.msrb.mxu1 %v9775_v28 }
 0x56b   : > { %v10284_v60 = vld [vmem:[%s11454_s28 + $0x1838] sm:$0xf0]  ;;  %6652 = vmatmul.bf16.vlgmr.msrb.gmra.mxu0 %v11695_v25  ;;  %v6498_v25 = vadd.f32 %v6497_v38, %v6485_v26 }
 0x56c   : > { %v10287_v63 = vor.u32 %v11288_v20, %v10284_v60  ;;  %6677 = vmatpush.bf16.msrb.mxu2 %v10031_v62  ;;  %v6538_v14 = vpop.f32.mrf.mxu3  ;;  %v6562_v16 = vpop.f32.mrf.mxu1 }
 0x56d   : > { %6665 = vmatmul.bf16.vlgmr.msrb.gmra.mxu1 %v11693_v24  ;;  %v6511_v24 = vadd.f32 %v6510_v10, %v6498_v25 }
 0x56e   : > { %6690 = vmatpush.bf16.msrb.mxu3 %v10287_v63 }
 0x56f   : > { %6678 = vmatmul.bf16.vlgmr.msrb.gmra.mxu2 %v11699_v30  ;;  %v6524_v30 = vadd.f32 %v6523_v44, %v6511_v24 }
 0x571   : > { %6691 = vmatmul.bf16.vlgmr.msrb.gmra.mxu3 %v11764_v13  ;;  %v6499_v13 = vpop.f32.mrf.mxu0  ;;  %v6708_v20 = vrot.slane %v6524_v30, 4 }
 0x572   : > { %v6575_v17 = vpop.f32.mrf.mxu2 }
 0x574   : > { %v6588_v18 = vpop.f32.mrf.mxu3  ;;  %v6564_v23 = vpop.f32.mrf.mxu1 }
 0x579   : > { %v6549_v15 = vpop.f32.mrf.mxu0 }
 0x57a   : > { %v6577_v29 = vpop.f32.mrf.mxu2  ;;  %v6550_v36 = vadd.f32 %v6549_v15, %v6536_v11 }
 0x57c   : > { %v6590_v31 = vpop.f32.mrf.mxu3  ;;  %v6563_v47 = vadd.f32 %v6562_v16, %v6550_v36 }
 0x57e   : > { %v6576_v50 = vadd.f32 %v6575_v17, %v6563_v47 }
 0x580   : > { %v6589_v52 = vadd.f32 %v6588_v18, %v6576_v50 }
 0x581   : > { %v6551_v1 = vpop.f32.mrf.mxu0 }
 0x5a8   : > { %v6601_v22 = vpop.f32.mrf.mxu0 }
 0x5a9   : > { %v6602_v53 = vadd.f32 %v6601_v22, %v6589_v52 }
 0x5aa   : > { %v6614_v32 = vpop.f32.mrf.mxu1 }
 0x5ab   : > { %v6615_v5 = vadd.f32 %v6614_v32, %v6602_v53 }
 0x5b0   : > { %v6603_v46 = vpop.f32.mrf.mxu0 }
 0x5b2   : > { %v6627_v54 = vpop.f32.mrf.mxu2  ;;  %v6616_v58 = vpop.f32.mrf.mxu1 }
 0x5b3   : > { %v6628_v55 = vadd.f32 %v6627_v54, %v6615_v5 }
 0x5b4   : > { %v6640_v37 = vpop.f32.mrf.mxu3 }
 0x5b5   : > { %v6641_v45 = vadd.f32 %v6640_v37, %v6628_v55 }
 0x5ba   : > { %v6629_v51 = vpop.f32.mrf.mxu2 }
 0x5bc   : > { %v6642_v0 = vpop.f32.mrf.mxu3 }
 0x5e8   : > { %v6653_v57 = vpop.f32.mrf.mxu0 }
 0x5e9   : > { %v6654_v33 = vadd.f32 %v6653_v57, %v6641_v45 }
 0x5ea   : > { %v6666_v41 = vpop.f32.mrf.mxu1 }
 0x5eb   : > { %v6667_v56 = vadd.f32 %v6666_v41, %v6654_v33 }
 0x5f0   : > { %v6655_v59 = vpop.f32.mrf.mxu0 }
 0x5f2   : > { %v6679_v43 = vpop.f32.mrf.mxu2  ;;  %v6668_v34 = vpop.f32.mrf.mxu1 }
 0x5f3   : > { %v6680_v39 = vadd.f32 %v6679_v43, %v6667_v56 }
 0x5f4   : > { %v6692_v49 = vpop.f32.mrf.mxu3 }
 0x5f5   : > { %v6693_v42 = vadd.f32 %v6692_v49, %v6680_v39 }
 0x5f7   : > { %v6709_v60 = vrot.slane %v6693_v42, 2 }
 0x5f9   : > { %v6717_v28 = vsel %vm6712_vm1, %v6708_v20, %v6709_v60  ;;  %6728 = sbr.rel (%p10512_p7) target bundleno = 1738 (0x6ca), region = 44 }
 0x5fa   : > { %v6718_v62 = vsel %vm6714_vm2, %v13247_v35, %v6717_v28  ;;  %v6681_v63 = vpop.f32.mrf.mxu2 }
 0x5fb   : > { %v6722_v2 = vadd.f32 %v6718_v62, %v299_v61 }
 0x5fc   : > { %v6694_v27 = vpop.f32.mrf.mxu3 }
 0x5fd   : > { %6724 = vst [vmem:[#allocation2 + $0x8] sm:$0xff] %v6722_v2 }
 0x5fe   : > { %v6774_v3 = vld [vmem:[%s13757_s3 + $0x78] sm:$0xff]  ;;  %v6773_v6 = vld [vmem:[%s13757_s3 + $0x70] sm:$0xff]  ;;  %v6772_v9 = vld [vmem:[%s13757_s3 + $0x68] sm:$0xff]  ;;  %vm7068_vm3 = vcmask 50176  }
 0x5ff   : > { %v6806_v7 = vld [vmem:[%s13757_s3 + $0x178] sm:$0xff]  ;;  %6908 = vmatpush.msra.mxu0 %v6774_v3  ;;  %v6805_v8 = vld [vmem:[%s13757_s3 + $0x170] sm:$0xff]  ;;  %v6804_v26 = vld [vmem:[%s13757_s3 + $0x168] sm:$0xff] }
 0x600   : > { %6948 = vmatpush.msra.mxu2 %v6806_v7  ;;  %v6790_v35 = vld [vmem:[%s13757_s3 + $0xf8] sm:$0xff]  ;;  %v6789_v48 = vld [vmem:[%s13757_s3 + $0xf0] sm:$0xff]  ;;  %v6788_v21 = vld [vmem:[%s13757_s3 + $0xe8] sm:$0xff] }
 0x601   : > { %v6822_v40 = vld [vmem:[%s13757_s3 + $0x1f8] sm:$0xff]  ;;  %6928 = vmatpush.msra.mxu1 %v6790_v35  ;;  %6909 = vmatpush.msra.mxu0 %v6773_v6  ;;  %v6821_v19 = vld [vmem:[%s13757_s3 + $0x1f0] sm:$0xff]  ;;  %v6771_v38 = vld [vmem:[%s13757_s3 + $0x60] sm:$0xff] }
 0x602   : > { %6968 = vmatpush.msra.mxu3 %v6822_v40  ;;  %6949 = vmatpush.msra.mxu2 %v6805_v8  ;;  %v6803_v25 = vld [vmem:[%s13757_s3 + $0x160] sm:$0xff]  ;;  %v6820_v10 = vld [vmem:[%s13757_s3 + $0x1e8] sm:$0xff]  ;;  %v6770_v30 = vld [vmem:[%s13757_s3 + $0x58] sm:$0xff] }
 0x603   : > { %6929 = vmatpush.msra.mxu1 %v6789_v48  ;;  %6910 = vmatpush.msra.mxu0 %v6772_v9  ;;  %v6787_v24 = vld [vmem:[%s13757_s3 + $0xe0] sm:$0xff]  ;;  %v6802_v11 = vld [vmem:[%s13757_s3 + $0x158] sm:$0xff]  ;;  %v6769_v4 = vld [vmem:[%s13757_s3 + $0x50] sm:$0xff] }
 0x604   : > { %6969 = vmatpush.msra.mxu3 %v6821_v19  ;;  %6950 = vmatpush.msra.mxu2 %v6804_v26  ;;  %v6819_v44 = vld [vmem:[%s13757_s3 + $0x1e0] sm:$0xff]  ;;  %v6786_v13 = vld [vmem:[%s13757_s3 + $0xd8] sm:$0xff]  ;;  %v6801_v14 = vld [vmem:[%s13757_s3 + $0x150] sm:$0xff] }
 0x605   : > { %6930 = vmatpush.msra.mxu1 %v6788_v21  ;;  %6911 = vmatpush.msra.mxu0 %v6771_v38  ;;  %v6818_v12 = vld [vmem:[%s13757_s3 + $0x1d8] sm:$0xff]  ;;  %v6785_v15 = vld [vmem:[%s13757_s3 + $0xd0] sm:$0xff]  ;;  %v6768_v17 = vld [vmem:[%s13757_s3 + $0x48] sm:$0xff] }
 0x606   : > { %6970 = vmatpush.msra.mxu3 %v6820_v10  ;;  %6951 = vmatpush.msra.mxu2 %v6803_v25  ;;  %v6817_v16 = vld [vmem:[%s13757_s3 + $0x1d0] sm:$0xff]  ;;  %v6800_v18 = vld [vmem:[%s13757_s3 + $0x148] sm:$0xff]  ;;  %v6767_v29 = vld [vmem:[%s13757_s3 + $0x40] sm:$0xff] }
 0x607   : > { %6931 = vmatpush.msra.mxu1 %v6787_v24  ;;  %6912 = vmatpush.msra.mxu0 %v6770_v30  ;;  %v6784_v1 = vld [vmem:[%s13757_s3 + $0xc8] sm:$0xff]  ;;  %v6799_v31 = vld [vmem:[%s13757_s3 + $0x140] sm:$0xff]  ;;  %v6766_v36 = vld [vmem:[%s13757_s3 + $0x38] sm:$0xff] }
 0x608   : > { %6971 = vmatpush.msra.mxu3 %v6819_v44  ;;  %6952 = vmatpush.msra.mxu2 %v6802_v11  ;;  %v6816_v23 = vld [vmem:[%s13757_s3 + $0x1c8] sm:$0xff]  ;;  %v6783_v22 = vld [vmem:[%s13757_s3 + $0xc0] sm:$0xff]  ;;  %v6798_v54 = vld [vmem:[%s13757_s3 + $0x138] sm:$0xff] }
 0x609   : > { %6932 = vmatpush.msra.mxu1 %v6786_v13  ;;  %6913 = vmatpush.msra.mxu0 %v6769_v4  ;;  %v6815_v32 = vld [vmem:[%s13757_s3 + $0x1c0] sm:$0xff]  ;;  %v6782_v37 = vld [vmem:[%s13757_s3 + $0xb8] sm:$0xff]  ;;  %v6765_v47 = vld [vmem:[%s13757_s3 + $0x30] sm:$0xff] }
 0x60a   : > { %6972 = vmatpush.msra.mxu3 %v6818_v12  ;;  %6953 = vmatpush.msra.mxu2 %v6801_v14  ;;  %v6814_v46 = vld [vmem:[%s13757_s3 + $0x1b8] sm:$0xff]  ;;  %v6797_v58 = vld [vmem:[%s13757_s3 + $0x130] sm:$0xff]  ;;  %v6764_v0 = vld [vmem:[%s13757_s3 + $0x28] sm:$0xff] }
 0x60b   : > { %6933 = vmatpush.msra.mxu1 %v6785_v15  ;;  %6914 = vmatpush.msra.mxu0 %v6768_v17  ;;  %v6781_v50 = vld [vmem:[%s13757_s3 + $0xb0] sm:$0xff]  ;;  %v6796_v52 = vld [vmem:[%s13757_s3 + $0x128] sm:$0xff]  ;;  %v6763_v55 = vld [vmem:[%s13757_s3 + $0x20] sm:$0xff] }
 0x60c   : > { %6973 = vmatpush.msra.mxu3 %v6817_v16  ;;  %6954 = vmatpush.msra.mxu2 %v6800_v18  ;;  %v6813_v51 = vld [vmem:[%s13757_s3 + $0x1b0] sm:$0xff]  ;;  %v6780_v53 = vld [vmem:[%s13757_s3 + $0xa8] sm:$0xff]  ;;  %v6795_v45 = vld [vmem:[%s13757_s3 + $0x120] sm:$0xff] }
 0x60d   : > { %6934 = vmatpush.msra.mxu1 %v6784_v1  ;;  %6915 = vmatpush.msra.mxu0 %v6767_v29  ;;  %v6812_v5 = vld [vmem:[%s13757_s3 + $0x1a8] sm:$0xff]  ;;  %v6779_v57 = vld [vmem:[%s13757_s3 + $0xa0] sm:$0xff]  ;;  %v6762_v33 = vld [vmem:[%s13757_s3 + $0x18] sm:$0xff] }
 0x60e   : > { %6974 = vmatpush.msra.mxu3 %v6816_v23  ;;  %6955 = vmatpush.msra.mxu2 %v6799_v31  ;;  %v6811_v41 = vld [vmem:[%s13757_s3 + $0x1a0] sm:$0xff]  ;;  %v6794_v56 = vld [vmem:[%s13757_s3 + $0x118] sm:$0xff]  ;;  %v6761_v49 = vld [vmem:[%s13757_s3 + $0x10] sm:$0xff] }
 0x60f   : > { %6935 = vmatpush.msra.mxu1 %v6783_v22  ;;  %6916 = vmatpush.msra.mxu0 %v6766_v36  ;;  %v6778_v43 = vld [vmem:[%s13757_s3 + $0x98] sm:$0xff]  ;;  %v6793_v59 = vld [vmem:[%s13757_s3 + $0x110] sm:$0xff]  ;;  %v6760_v20 = vld [vmem:[%s13757_s3 + $0x8] sm:$0xff] }
 0x610   : > { %6975 = vmatpush.msra.mxu3 %v6815_v32  ;;  %6956 = vmatpush.msra.mxu2 %v6798_v54  ;;  %v6810_v39 = vld [vmem:[%s13757_s3 + $0x198] sm:$0xff]  ;;  %v6777_v34 = vld [vmem:[%s13757_s3 + $0x90] sm:$0xff]  ;;  %v6792_v60 = vld [vmem:[%s13757_s3 + $0x108] sm:$0xff] }
 0x611   : > { %6936 = vmatpush.msra.mxu1 %v6782_v37  ;;  %6917 = vmatpush.msra.mxu0 %v6765_v47  ;;  %v6809_v42 = vld [vmem:[%s13757_s3 + $0x190] sm:$0xff]  ;;  %v6776_v61 = vld [vmem:[%s13757_s3 + $0x88] sm:$0xff]  ;;  %v6759_v62 = vld [vmem:[%s13757_s3] sm:$0xff] }
 0x612   : > { %6976 = vmatpush.msra.mxu3 %v6814_v46  ;;  %6957 = vmatpush.msra.mxu2 %v6797_v58  ;;  %v6808_v28 = vld [vmem:[%s13757_s3 + $0x188] sm:$0xff]  ;;  %v6791_v63 = vld [vmem:[%s13757_s3 + $0x100] sm:$0xff]  ;;  %v6838_v2 = vld [vmem:[%s13757_s3 + $0x278] sm:$0xff] }
 0x613   : > { %6937 = vmatpush.msra.mxu1 %v6781_v50  ;;  %6918 = vmatpush.msra.mxu0 %v6764_v0  ;;  %v6870_v27 = vld [vmem:[%s13757_s3 + $0x378] sm:$0xff]  ;;  %v6775_v3 = vld [vmem:[%s13757_s3 + $0x80] sm:$0xff]  ;;  %v6837_v6 = vld [vmem:[%s13757_s3 + $0x270] sm:$0xff] }
 0x614   : > { %6977 = vmatpush.msra.mxu3 %v6813_v51  ;;  %6958 = vmatpush.msra.mxu2 %v6796_v52  ;;  %v6807_v7 = vld [vmem:[%s13757_s3 + $0x180] sm:$0xff]  ;;  %v6854_v35 = vld [vmem:[%s13757_s3 + $0x2f8] sm:$0xff]  ;;  %v6869_v8 = vld [vmem:[%s13757_s3 + $0x370] sm:$0xff] }
 0x615   : > { %6938 = vmatpush.msra.mxu1 %v6780_v53  ;;  %6919 = vmatpush.msra.mxu0 %v6763_v55  ;;  %v6886_v40 = vld [vmem:[%s13757_s3 + $0x3f8] sm:$0xff]  ;;  %v6836_v9 = vld [vmem:[%s13757_s3 + $0x268] sm:$0xff]  ;;  %v6853_v48 = vld [vmem:[%s13757_s3 + $0x2f0] sm:$0xff] }
 0x616   : > { %6978 = vmatpush.msra.mxu3 %v6812_v5  ;;  %6959 = vmatpush.msra.mxu2 %v6795_v45  ;;  %v6868_v26 = vld [vmem:[%s13757_s3 + $0x368] sm:$0xff]  ;;  %v6885_v19 = vld [vmem:[%s13757_s3 + $0x3f0] sm:$0xff]  ;;  %v6835_v21 = vld [vmem:[%s13757_s3 + $0x260] sm:$0xff] }
 0x617   : > { %6939 = vmatpush.msra.mxu1 %v6779_v57  ;;  %6920 = vmatpush.msra.mxu0 %v6762_v33  ;;  %v6852_v38 = vld [vmem:[%s13757_s3 + $0x2e8] sm:$0xff]  ;;  %v6731_v25 = vld [vmem:[%s13756_s2] sm:$0xff]  ;;  %v6834_v12 = vld [vmem:[%s13757_s3 + $0x258] sm:$0xff] }
 0x618   : > { %6979 = vmatpush.msra.mxu3 %v6811_v41  ;;  %6960 = vmatpush.msra.mxu2 %v6794_v56  ;;  %v6867_v10 = vld [vmem:[%s13757_s3 + $0x360] sm:$0xff]  ;;  %v6884_v24 = vld [vmem:[%s13757_s3 + $0x3e8] sm:$0xff]  ;;  %v6733_v44 = vperm.slane %v6731_v25, 0  ;;  %v6734_v30 = vperm.slane %v6731_v25, 1  ;;  %v6735_v11 = vperm.slane %v6731_v25, 2  ;;  %v6736_v13 = vperm.slane %v6731_v25, 3 }
 0x619   : > { %6940 = vmatpush.msra.mxu1 %v6778_v43  ;;  %6921 = vmatpush.msra.mxu0 %v6761_v49  ;;  %v6851_v4 = vld [vmem:[%s13757_s3 + $0x2e0] sm:$0xff]  ;;  %v6737_v14 = vperm.slane %v6731_v25, 4  ;;  %v6738_v15 = vperm.slane %v6731_v25, 5  ;;  %v6739_v16 = vperm.slane %v6731_v25, 6  ;;  %v6866_v17 = vld [vmem:[%s13757_s3 + $0x358] sm:$0xff]  ;;  %v6833_v31 = vld [vmem:[%s13757_s3 + $0x250] sm:$0xff] }
 0x61a   : > { %6980 = vmatpush.msra.mxu3 %v6810_v39  ;;  %6961 = vmatpush.msra.mxu2 %v6793_v59  ;;  %v6883_v18 = vld [vmem:[%s13757_s3 + $0x3e0] sm:$0xff]  ;;  %v6741_v1 = vrot.slane %v6734_v30, 6  ;;  %v6742_v23 = vrot.slane %v6735_v11, 4  ;;  %v6743_v29 = vrot.slane %v6736_v13, 2  ;;  %v6850_v22 = vld [vmem:[%s13757_s3 + $0x2d8] sm:$0xff]  ;;  %v6729_v32 = vld [vmem:[#allocation2] sm:$0xff] }
 0x61b   : > { %6941 = vmatpush.msra.mxu1 %v6777_v34  ;;  %6922 = vmatpush.msra.mxu0 %v6760_v20  ;;  %v6740_v36 = vperm.slane %v6731_v25, 7  ;;  %v6744_v54 = vrot.slane %v6738_v15, 6  ;;  %v6745_v37 = vrot.slane %v6739_v16, 4  ;;  %v6865_v46 = vld [vmem:[%s13757_s3 + $0x350] sm:$0xff]  ;;  %v6882_v47 = vld [vmem:[%s13757_s3 + $0x3d8] sm:$0xff]  ;;  %v6832_v51 = vld [vmem:[%s13757_s3 + $0x248] sm:$0xff] }
 0x61c   : > { %6981 = vmatpush.msra.mxu3 %v6809_v42  ;;  %6962 = vmatpush.msra.mxu2 %v6792_v60  ;;  %v6747_v58 = vsel %vm6710_vm0, %v6733_v44, %v6741_v1  ;;  %v6748_v50 = vsel %vm6712_vm1, %v6742_v23, %v6743_v29  ;;  %v6849_v0 = vld [vmem:[%s13757_s3 + $0x2d0] sm:$0xff]  ;;  %v6864_v55 = vld [vmem:[%s13757_s3 + $0x348] sm:$0xff]  ;;  %v6831_v41 = vld [vmem:[%s13757_s3 + $0x240] sm:$0xff] }
 0x61d   : > { %6942 = vmatpush.msra.mxu1 %v6776_v61  ;;  %6923 = vmatpush.msra.mxu0 %v6759_v62  ;;  %v6749_v52 = vsel %vm6714_vm2, %v6747_v58, %v6748_v50  ;;  %v6746_v53 = vrot.slane %v6740_v36, 2  ;;  %v6750_v5 = vsel %vm6710_vm0, %v6737_v14, %v6744_v54  ;;  %v6881_v45 = vld [vmem:[%s13757_s3 + $0x3d0] sm:$0xff]  ;;  %v6848_v33 = vld [vmem:[%s13757_s3 + $0x2c8] sm:$0xff]  ;;  %v6863_v39 = vld [vmem:[%s13757_s3 + $0x340] sm:$0xff] }
 0x61e   : > { %6982 = vmatpush.msra.mxu3 %v6808_v28  ;;  %6963 = vmatpush.msra.mxu2 %v6791_v63  ;;  %v6755_v57 = vadd.f32 %v6749_v52, %v6729_v32  ;;  %v6730_v56 = vld [vmem:[#allocation2 + $0x8] sm:$0xff]  ;;  %v6880_v49 = vld [vmem:[%s13757_s3 + $0x3c8] sm:$0xff]  ;;  %v6830_v42 = vld [vmem:[%s13757_s3 + $0x238] sm:$0xff] }
 0x61f   : > { %6988 = vmatpush.msrb.mxu0 %v6838_v2  ;;  %6943 = vmatpush.msra.mxu1 %v6775_v3  ;;  %v6751_v43 = vsel %vm6712_vm1, %v6745_v37, %v6746_v53  ;;  %v6847_v20 = vld [vmem:[%s13757_s3 + $0x2c0] sm:$0xff]  ;;  %v6862_v61 = vld [vmem:[%s13757_s3 + $0x338] sm:$0xff]  ;;  %v6829_v62 = vld [vmem:[%s13757_s3 + $0x230] sm:$0xff] }
 0x620   : > { %7028 = vmatpush.msrb.mxu2 %v6870_v27  ;;  %6983 = vmatpush.msra.mxu3 %v6807_v7  ;;  %v6757_v59 = vmax.f32 %v6755_v57, 0.0  ;;  %v6752_v34 = vsel %vm6714_vm2, %v6750_v5, %v6751_v43  ;;  %v6879_v28 = vld [vmem:[%s13757_s3 + $0x3c0] sm:$0xff]  ;;  %v6846_v63 = vld [vmem:[%s13757_s3 + $0x2b8] sm:$0xff]  ;;  %v6861_v27 = vld [vmem:[%s13757_s3 + $0x330] sm:$0xff] }
 0x621   : > { %6989 = vmatpush.msrb.mxu0 %v6837_v6  ;;  %7008 = vmatpush.msrb.mxu1 %v6854_v35  ;;  %v6756_v60 = vadd.f32 %v6752_v34, %v6730_v56  ;;  %v6878_v3 = vld [vmem:[%s13757_s3 + $0x3b8] sm:$0xff]  ;;  %v6828_v7 = vld [vmem:[%s13757_s3 + $0x228] sm:$0xff]  ;;  %v6845_v6 = vld [vmem:[%s13757_s3 + $0x2b0] sm:$0xff] }
 0x622   : > { %7029 = vmatpush.msrb.mxu2 %v6869_v8  ;;  %7048 = vmatpush.msrb.mxu3 %v6886_v40  ;;  %6889 = vst [vmem:[#allocation1] ss:$4 sm:$0xff] %v6757_v59  ;;  %v6860_v35 = vld [vmem:[%s13757_s3 + $0x328] sm:$0xff]  ;;  %v6877_v8 = vld [vmem:[%s13757_s3 + $0x3b0] sm:$0xff]  ;;  %v6827_v40 = vld [vmem:[%s13757_s3 + $0x220] sm:$0xff] }
 0x623   : > { %6990 = vmatpush.msrb.mxu0 %v6836_v9  ;;  %7009 = vmatpush.msrb.mxu1 %v6853_v48  ;;  %v6758_v2 = vmax.f32 %v6756_v60, 0.0  ;;  %v6844_v9 = vld [vmem:[%s13757_s3 + $0x2a8] sm:$0xff]  ;;  %v6859_v48 = vld [vmem:[%s13757_s3 + $0x320] sm:$0xff]  ;;  %v6826_v25 = vld [vmem:[%s13757_s3 + $0x218] sm:$0xff] }
 0x624   : > { %7030 = vmatpush.msrb.mxu2 %v6868_v26  ;;  %7049 = vmatpush.msrb.mxu3 %v6885_v19  ;;  %v6876_v26 = vld [vmem:[%s13757_s3 + $0x3a8] sm:$0xff]  ;;  %v6875_v44 = vld [vmem:[%s13757_s3 + $0x3a0] sm:$0xff]  ;;  %v6825_v11 = vld [vmem:[%s13757_s3 + $0x210] sm:$0xff] }
 0x625   : > { %6991 = vmatpush.msrb.mxu0 %v6835_v21  ;;  %7010 = vmatpush.msrb.mxu1 %v6852_v38  ;;  %6891 = vst [vmem:[#allocation1 + $0x20] ss:$4 sm:$0xff] %v6758_v2  ;;  %v6842_v13 = vld [vmem:[%s13757_s3 + $0x298] sm:$0xff]  ;;  %v6824_v14 = vld [vmem:[%s13757_s3 + $0x208] sm:$0xff]  ;;  %v6841_v15 = vld [vmem:[%s13757_s3 + $0x290] sm:$0xff] }
 0x626   : > { %7031 = vmatpush.msrb.mxu2 %v6867_v10  ;;  %7050 = vmatpush.msrb.mxu3 %v6884_v24  ;;  %v6843_v10 = vld [vmem:[%s13757_s3 + $0x2a0] sm:$0xff]  ;;  %v6858_v24 = vld [vmem:[%s13757_s3 + $0x318] sm:$0xff]  ;;  %v6856_v16 = vld [vmem:[%s13757_s3 + $0x308] sm:$0xff] }
 0x627   : > { %6992 = vmatpush.msrb.mxu0 %v6834_v12  ;;  %7011 = vmatpush.msrb.mxu1 %v6851_v4  ;;  %v6857_v12 = vld [vmem:[%s13757_s3 + $0x310] sm:$0xff]  ;;  %v6874_v4 = vld [vmem:[%s13757_s3 + $0x398] sm:$0xff]  ;;  %v6840_v1 = vld [vmem:[%s13757_s3 + $0x288] sm:$0xff] }
 0x628   : > { %7032 = vmatpush.msrb.mxu2 %v6866_v17  ;;  %7051 = vmatpush.msrb.mxu3 %v6883_v18  ;;  %v6873_v17 = vld [vmem:[%s13757_s3 + $0x390] sm:$0xff]  ;;  %v6823_v18 = vld [vmem:[%s13757_s3 + $0x200] sm:$0xff]  ;;  %v6872_v29 = vld [vmem:[%s13757_s3 + $0x388] sm:$0xff] }
 0x629   : > { %6993 = vmatpush.msrb.mxu0 %v6833_v31  ;;  %7012 = vmatpush.msrb.mxu1 %v6850_v22  ;;  %v6894_v19 = vld.sshfl [vmem:[#allocation1 + $0x10] sm:$0xff pattern:$0x73625140]  ;;  %v6892_v21 = vld.sshfl [vmem:[#allocation1] sm:$0xff pattern:$0x73625140] }
 0x62a   : > { %7033 = vmatpush.msrb.mxu2 %v6865_v46  ;;  %7052 = vmatpush.msrb.mxu3 %v6882_v47  ;;  %v6895_v38 = vld.sshfl [vmem:[#allocation1 + $0x18] sm:$0xff pattern:$0x73625140]  ;;  %v6893_v30 = vld.sshfl [vmem:[#allocation1 + $0x8] sm:$0xff pattern:$0x73625140] }
 0x62b   : > { %6994 = vmatpush.msrb.mxu0 %v6832_v51  ;;  %7013 = vmatpush.msrb.mxu1 %v6849_v0  ;;  %v6855_v23 = vld [vmem:[%s13757_s3 + $0x300] sm:$0xff] }
 0x62c   : > { %7034 = vmatpush.msrb.mxu2 %v6864_v55  ;;  %7053 = vmatpush.msrb.mxu3 %v6881_v45  ;;  %v6896_v31 = vld.sshfl [vmem:[#allocation1 + $0x20] sm:$0xff pattern:$0x73625140]  ;;  %v6898_v22 = vld.sshfl [vmem:[#allocation1 + $0x30] sm:$0xff pattern:$0x73625140] }
 0x62d   : > { %6995 = vmatpush.msrb.mxu0 %v6831_v41  ;;  %7014 = vmatpush.msrb.mxu1 %v6848_v33  ;;  %v6839_v32 = vld [vmem:[%s13757_s3 + $0x280] sm:$0xff]  ;;  %v6897_v54 = vld.sshfl [vmem:[#allocation1 + $0x28] sm:$0xff pattern:$0x73625140] }
 0x62e   : > { %7035 = vmatpush.msrb.mxu2 %v6863_v39  ;;  %7054 = vmatpush.msrb.mxu3 %v6880_v49  ;;  %v6871_v36 = vld [vmem:[%s13757_s3 + $0x380] sm:$0xff]  ;;  %v6899_v37 = vld.sshfl [vmem:[#allocation1 + $0x38] sm:$0xff pattern:$0x73625140] }
 0x62f   : > { %6996 = vmatpush.msrb.mxu0 %v6830_v42  ;;  %7015 = vmatpush.msrb.mxu1 %v6847_v20 }
 0x630   : > { %7036 = vmatpush.msrb.mxu2 %v6862_v61  ;;  %7055 = vmatpush.msrb.mxu3 %v6879_v28 }
 0x631   : > { %6997 = vmatpush.msrb.mxu0 %v6829_v62  ;;  %7016 = vmatpush.msrb.mxu1 %v6846_v63 }
 0x632   : > { %7037 = vmatpush.msrb.mxu2 %v6861_v27  ;;  %7056 = vmatpush.msrb.mxu3 %v6878_v3 }
 0x633   : > { %6998 = vmatpush.msrb.mxu0 %v6828_v7  ;;  %7017 = vmatpush.msrb.mxu1 %v6845_v6 }
 0x634   : > { %7038 = vmatpush.msrb.mxu2 %v6860_v35  ;;  %7057 = vmatpush.msrb.mxu3 %v6877_v8 }
 0x635   : > { %6964 = vmatmul.f32.vlgmr.msra.gmra.mxu2 %v6894_v19  ;;  %6999 = vmatpush.msrb.mxu0 %v6827_v40 }
 0x636   : > { %7018 = vmatpush.msrb.mxu1 %v6844_v9  ;;  %7039 = vmatpush.msrb.mxu2 %v6859_v48 }
 0x637   : > { %7058 = vmatpush.msrb.mxu3 %v6876_v26  ;;  %6924 = vmatmul.f32.vlgmr.msra.gmra.mxu0 %v6892_v21 }
 0x638   : > { %6984 = vmatmul.f32.vlgmr.msra.gmra.mxu3 %v6895_v38  ;;  %7000 = vmatpush.msrb.mxu0 %v6826_v25 }
 0x639   : > { %7019 = vmatpush.msrb.mxu1 %v6843_v10  ;;  %7040 = vmatpush.msrb.mxu2 %v6858_v24 }
 0x63a   : > { %7059 = vmatpush.msrb.mxu3 %v6875_v44  ;;  %6944 = vmatmul.f32.vlgmr.msra.gmra.mxu1 %v6893_v30 }
 0x63b   : > { %7001 = vmatpush.msrb.mxu0 %v6825_v11  ;;  %7020 = vmatpush.msrb.mxu1 %v6842_v13 }
 0x63c   : > { %7041 = vmatpush.msrb.mxu2 %v6857_v12  ;;  %7060 = vmatpush.msrb.mxu3 %v6874_v4 }
 0x63d   : > { %7002 = vmatpush.msrb.mxu0 %v6824_v14  ;;  %7021 = vmatpush.msrb.mxu1 %v6841_v15 }
 0x63e   : > { %7042 = vmatpush.msrb.mxu2 %v6856_v16  ;;  %7061 = vmatpush.msrb.mxu3 %v6873_v17 }
 0x63f   : > { %7003 = vmatpush.msrb.mxu0 %v6823_v18  ;;  %7022 = vmatpush.msrb.mxu1 %v6840_v1 }
 0x640   : > { %7043 = vmatpush.msrb.mxu2 %v6855_v23  ;;  %7062 = vmatpush.msrb.mxu3 %v6872_v29 }
 0x641   : > { %7004 = vmatmul.f32.vlgmr.msrb.gmra.mxu0 %v6896_v31  ;;  %7044 = vmatmul.f32.vlgmr.msrb.gmra.mxu2 %v6898_v22 }
 0x642   : > { %7023 = vmatpush.msrb.mxu1 %v6839_v32  ;;  %7063 = vmatpush.msrb.mxu3 %v6871_v36 }
 0x643   : > { %7024 = vmatmul.f32.vlgmr.msrb.gmra.mxu1 %v6897_v54  ;;  %7064 = vmatmul.f32.vlgmr.msrb.gmra.mxu3 %v6899_v37 }
 0x6b4   : > { %v6925_v46 = vpop.f32.mrf.mxu0 }
 0x6b7   : > { %v6945_v47 = vpop.f32.mrf.mxu1 }
 0x6b8   : > { %v6946_v58 = vadd.f32 %v6945_v47, %v6925_v46  ;;  %v6965_v50 = vpop.f32.mrf.mxu2 }
 0x6ba   : > { %v6966_v51 = vadd.f32 %v6965_v50, %v6946_v58 }
 0x6bb   : > { %v6985_v0 = vpop.f32.mrf.mxu3 }
 0x6bc   : > { %v6986_v52 = vadd.f32 %v6985_v0, %v6966_v51 }
 0x6be   : > { %v7005_v53 = vpop.f32.mrf.mxu0 }
 0x6bf   : > { %v7006_v5 = vadd.f32 %v7005_v53, %v6986_v52 }
 0x6c0   : > { %v7025_v55 = vpop.f32.mrf.mxu1 }
 0x6c1   : > { %v7026_v45 = vadd.f32 %v7025_v55, %v7006_v5 }
 0x6c4   : > { %v7045_v57 = vpop.f32.mrf.mxu2 }
 0x6c5   : > { %v7046_v41 = vadd.f32 %v7045_v57, %v7026_v45 }
 0x6c6   : > { %v7065_v33 = vpop.f32.mrf.mxu3 }
 0x6c7   : > { %v7066_v56 = vadd.f32 %v7065_v33, %v7046_v41 }
 0x6c9   : > { %7069 = vst.msk [vmem:[%s13758_s4] sm:$0x3] %vm7068_vm3, %v7066_v56 }
 0x6ca PF: > { %s14_s17 = sadd.s32 1, %s11396_s17   ;;  %s13759_s15 = smov %s11392_s16 }
 0x6cb   : > { %p11_p8 = scmp.ge.s32.totalorder %s14_s17, 4   ;;  %s13760_s16 = smov %s13762_s18 }
 0x6cd   :  { %13 = sbr.rel (!%p11_p8) target bundleno = 2 (0x2), region = 85 }

</bundles_post_ra>
